<compile_context>
chip_gen: v6e
topology: v6e:2x2x1
jax: 0.10.0
libtpu: 0.0.40
codegen_flags: <defaults>
</compile_context>

<pallas_src>
import jax
import jax.numpy as jnp
from jax.experimental import pallas as pl
from jax.experimental.pallas import tpu as pltpu

EPS = 1e-5                      # PyTorch BatchNorm1d default eps
HIDDEN = (832, 512, 256, 64)    # hidden layer widths of the Sequential model
OUT_DIM = 1                     # real output width
W5_ROWS = 8                     # sublane-padded rows of the final weight (row 0 is real)


def _round_up(x, m):
    return ((x + m - 1) // m) * m


# --------------------------------------------------------------------------
# Kernel: fully fused 5-layer MLP for one batch tile. All weights resident in
# VMEM (full-array blocks, ~1.4 MB bf16 total).
# --------------------------------------------------------------------------
def _mlp_kernel(x_ref,
                w1, b1, w2, b2, w3, b3, w4, b4, w5t, b5,
                o_ref):
    def lin_relu_bf16(h, w_ref, b_ref):
        # bf16 x bf16 matmul, f32 accumulation; bias add + ReLU in f32,
        # then cast back to bf16 for the next MXU pass.
        z = jnp.dot(h, w_ref[...], preferred_element_type=jnp.float32) + b_ref[...]
        return jnp.maximum(z, 0.0).astype(jnp.bfloat16)

    h = x_ref[...]                      # (tile, Dp) bf16
    h = lin_relu_bf16(h, w1, b1)        # (tile, 832)  — BN folded into w/b
    h = lin_relu_bf16(h, w2, b2)        # (tile, 512)
    h = lin_relu_bf16(h, w3, b3)        # (tile, 256)
    h = lin_relu_bf16(h, w4, b4)        # (tile, 64)

    # Final Linear(64,1)+ReLU computed with the contraction on the 64-dim of
    # BOTH operands ("NT" matmul, same dimension_numbers flash-attention uses
    # for q @ k^T). Result has batch on lanes -> lane-dense (1, tile) store.
    z = jax.lax.dot_general(
        w5t[...], h,                                   # (8,64) x (tile,64)^T
        dimension_numbers=(((1,), (1,)), ((), ())),
        preferred_element_type=jnp.float32)            # (8, tile) f32
    out = jnp.maximum(z[0:1, :] + b5[...], 0.0)        # (1, tile); row 0 is real
    o_ref[...] = out.reshape(o_ref.shape)


# --------------------------------------------------------------------------
# Wrapper
# --------------------------------------------------------------------------
def mlp_forward(x, folded_params, *, batch_tile=256):
    """x: (B, D) float32; folded_params: flat list from fold_params()."""
    B, D = x.shape
    Dp = folded_params[0].shape[0]          # padded input width (w1 rows)

    n_steps = pl.cdiv(B, batch_tile)
    if n_steps == 1:
        # Small batch: one grid step so the ~1.4 MB weight set is DMA'd once
        # (no per-TensorCore weight duplication on v7x).
        batch_tile = _round_up(max(B, 1), 128)
    Bp = n_steps * batch_tile

    xp = x.astype(jnp.bfloat16)
    xp = jnp.pad(xp, ((0, Bp - B), (0, Dp - D)))        # zero-pad batch + features

    in_specs = [pl.BlockSpec((batch_tile, Dp), lambda i: (i, 0))]
    # Parameters: whole-array blocks, same block every grid step (stay in VMEM).
    in_specs += [pl.BlockSpec(p.shape, lambda i: (0, 0)) for p in folded_params]
    # Output: (n_steps, 1, batch_tile) f32 — one lane-dense row per grid step.
    out_spec = pl.BlockSpec((1, 1, batch_tile), lambda i: (i, 0, 0))

    # Advisory cost estimate for the XLA scheduler.
    dims = (Dp,) + HIDDEN + (W5_ROWS,)
    flops = 2 * Bp * sum(a * b for a, b in zip(dims[:-1], dims[1:]))
    param_bytes = sum(int(p.size) * p.dtype.itemsize for p in folded_params)
    bytes_accessed = int(xp.size) * xp.dtype.itemsize + param_bytes + Bp * 4
    cost = pl.CostEstimate(flops=int(flops), transcendentals=0,
                           bytes_accessed=int(bytes_accessed))

    # Explicit VMEM budget sized from the live tiles (double-buffered I/O tiles,
    # resident params, f32 activation intermediates) with generous headroom.
    tile_io_bytes = batch_tile * Dp * 2 + batch_tile * 4
    act_bytes = batch_tile * max(HIDDEN) * 4
    vmem_limit = min(64 * 1024 * 1024,
                     max(16 * 1024 * 1024,
                         2 * param_bytes + 2 * tile_io_bytes + 6 * act_bytes
                         + (4 << 20)))

    out = pl.pallas_call(
        _mlp_kernel,
        out_shape=jax.ShapeDtypeStruct((n_steps, 1, batch_tile), jnp.float32),
        grid_spec=pltpu.PrefetchScalarGridSpec(
            num_scalar_prefetch=0,
            grid=(n_steps,),
            in_specs=in_specs,
            out_specs=out_spec,
        ),
        compiler_params=pltpu.CompilerParams(
            dimension_semantics=("parallel",),   # batch tiles are independent
            vmem_limit_bytes=int(vmem_limit),
        ),
        cost_estimate=cost,
    )(xp, *folded_params)

    # Row i of step s holds predictions for batch rows [s*tile, (s+1)*tile).
    return out.reshape(Bp)[:B].reshape(B, OUT_DIM)


# --------------------------------------------------------------------------
# Parameters (PyTorch-default init) + eval-mode BN folding
# --------------------------------------------------------------------------
def init_raw_params(input_dim, key):
    """Raw params matching the PyTorch module's layer shapes.

    Linear weights stored transposed as (in, out); bias/BN vectors as (out,).
    BN params follow PyTorch defaults (gamma=1, beta=0, mean=0, var=1).
    """
    dims = (input_dim,) + HIDDEN + (OUT_DIM,)
    layers = []
    for li in range(len(dims) - 1):
        fan_in, fan_out = dims[li], dims[li + 1]
        key, kw, kb = jax.random.split(key, 3)
        bound = 1.0 / (fan_in ** 0.5)
        layer = {
            "w": jax.random.uniform(kw, (fan_in, fan_out), jnp.float32, -bound, bound),
            "b": jax.random.uniform(kb, (fan_out,), jnp.float32, -bound, bound),
        }
        if li < len(dims) - 2:  # BatchNorm1d after every hidden Linear
            layer.update(
                gamma=jnp.ones((fan_out,), jnp.float32),
                beta=jnp.zeros((fan_out,), jnp.float32),
                mean=jnp.zeros((fan_out,), jnp.float32),
                var=jnp.ones((fan_out,), jnp.float32),
            )
        layers.append(layer)
    return layers


def fold_params(raw_layers, *, pad_in_to=128):
    """Fold eval-mode BN into Linear; cast weights to bf16, biases stay f32.

    * Layer-1 weight rows are zero-padded so the input feature dim is a
      multiple of 128 (lane-dense layer-1 LHS / input DMA).
    * The final Linear(64,1) weight is stored transposed and sublane-padded to
      (8, 64); only row 0 is meaningful (the kernel slices it out).
    """
    folded = []
    for li, layer in enumerate(raw_layers[:-1]):
        scale = layer["gamma"] * jax.lax.rsqrt(layer["var"] + EPS)
        w = layer["w"] * scale[None, :]
        b = (layer["b"] - layer["mean"]) * scale + layer["beta"]
        if li == 0:
            Dp = _round_up(w.shape[0], pad_in_to)
            w = jnp.pad(w, ((0, Dp - w.shape[0]), (0, 0)))
        folded += [w.astype(jnp.bfloat16), b.astype(jnp.float32).reshape(1, -1)]

    last = raw_layers[-1]
    w5t = jnp.zeros((W5_ROWS, last["w"].shape[0]), jnp.float32)
    w5t = w5t.at[0, :].set(last["w"][:, 0]).astype(jnp.bfloat16)
    b5 = last["b"].reshape(1, 1).astype(jnp.float32)
    folded += [w5t, b5]
    return folded


def reference_forward(x, raw_layers):
    """Plain-JAX f32 reference of the eval-mode forward pass (unfolded BN)."""
    h = x
    for layer in raw_layers[:-1]:
        z = h @ layer["w"] + layer["b"][None, :]
        z = (z - layer["mean"]) / jnp.sqrt(layer["var"] + EPS) * layer["gamma"] + layer["beta"]
        h = jnp.maximum(z, 0.0)           # Dropout = identity in eval mode
    last = raw_layers[-1]
    return jnp.maximum(h @ last["w"] + last["b"][None, :], 0.0)


if __name__ == "__main__":
    key = jax.random.PRNGKey(0)
    key, kx, kp = jax.random.split(key, 3)

    D = 32
    raw = init_raw_params(D, kp)
    params = fold_params(raw)

    # Case 1: ragged batch, multi-step grid (2 steps of 256 at batch_tile=256).
    B1 = 300
    x1 = jax.random.normal(kx, (B1, D), jnp.float32)
    out1 = jax.block_until_ready(mlp_forward(x1, params, batch_tile=256))
    ref1 = reference_forward(x1, raw)
    assert out1.shape == (B1, OUT_DIM)
    assert jnp.allclose(out1, ref1, atol=5e-2, rtol=5e-2), "mismatch (multi-step)"

    # Case 2: small batch -> single grid step (weights DMA'd exactly once).
    B2 = 64
    x2 = x1[:B2]
    out2 = jax.block_until_ready(mlp_forward(x2, params, batch_tile=256))
    assert out2.shape == (B2, OUT_DIM)
    assert jnp.allclose(out2, ref1[:B2], atol=5e-2, rtol=5e-2), "mismatch (single-step)"

    print("KERNEL_OK")
</pallas_src>

<mosaic_0001>
module attributes {stable_mosaic.version = 11 : i64} {
  func.func @_mlp_kernel(%arg0: i32, %arg1: memref<256x128xbf16, #tpu.memory_space<vmem>>, %arg2: memref<128x832xbf16, #tpu.memory_space<vmem>>, %arg3: memref<1x832xf32, #tpu.memory_space<vmem>>, %arg4: memref<832x512xbf16, #tpu.memory_space<vmem>>, %arg5: memref<1x512xf32, #tpu.memory_space<vmem>>, %arg6: memref<512x256xbf16, #tpu.memory_space<vmem>>, %arg7: memref<1x256xf32, #tpu.memory_space<vmem>>, %arg8: memref<256x64xbf16, #tpu.memory_space<vmem>>, %arg9: memref<1x64xf32, #tpu.memory_space<vmem>>, %arg10: memref<8x64xbf16, #tpu.memory_space<vmem>>, %arg11: memref<1x1xf32, #tpu.memory_space<vmem>>, %arg12: memref<1x1x256xf32, #tpu.memory_space<vmem>>) attributes {dimension_semantics = [#tpu.dimension_semantics<parallel>], iteration_bounds = array<i64: 2>, scalar_prefetch = 0 : i64, scratch_operands = 0 : i64, tpu.core_type = #tpu.core_type<tc>, window_params = [{transform_indices = @transform_0, window_bounds = array<i64: 256, 128>}, {pipeline_mode = #tpu.pipeline_mode<synchronous>, transform_indices = @transform_1, window_bounds = array<i64: 128, 832>}, {pipeline_mode = #tpu.pipeline_mode<synchronous>, transform_indices = @transform_2, window_bounds = array<i64: 1, 832>}, {pipeline_mode = #tpu.pipeline_mode<synchronous>, transform_indices = @transform_3, window_bounds = array<i64: 832, 512>}, {pipeline_mode = #tpu.pipeline_mode<synchronous>, transform_indices = @transform_4, window_bounds = array<i64: 1, 512>}, {pipeline_mode = #tpu.pipeline_mode<synchronous>, transform_indices = @transform_5, window_bounds = array<i64: 512, 256>}, {pipeline_mode = #tpu.pipeline_mode<synchronous>, transform_indices = @transform_6, window_bounds = array<i64: 1, 256>}, {pipeline_mode = #tpu.pipeline_mode<synchronous>, transform_indices = @transform_7, window_bounds = array<i64: 256, 64>}, {pipeline_mode = #tpu.pipeline_mode<synchronous>, transform_indices = @transform_8, window_bounds = array<i64: 1, 64>}, {pipeline_mode = #tpu.pipeline_mode<synchronous>, transform_indices = @transform_9, window_bounds = array<i64: 8, 64>}, {pipeline_mode = #tpu.pipeline_mode<synchronous>, transform_indices = @transform_10, window_bounds = array<i64: 1, 1>}, {transform_indices = @transform_11, window_bounds = array<i64: 1, 1, 256>}]} {
    %c0 = arith.constant 0 : index
    %c0_0 = arith.constant 0 : index
    %0 = vector.load %arg1[%c0, %c0_0] : memref<256x128xbf16, #tpu.memory_space<vmem>>, vector<256x128xbf16>
    %c0_1 = arith.constant 0 : index
    %c0_2 = arith.constant 0 : index
    %1 = vector.load %arg2[%c0_1, %c0_2] : memref<128x832xbf16, #tpu.memory_space<vmem>>, vector<128x832xbf16>
    %cst = arith.constant dense<0.000000e+00> : vector<256x832xf32>
    %2 = tpu.matmul %0, %1, %cst {dimension_numbers = #tpu.dot_dimension_numbers<[1], [0], [0], [1], [0, 0, 1, 1], [], []>} : vector<256x128xbf16>, vector<128x832xbf16>, vector<256x832xf32> -> vector<256x832xf32>
    %c0_3 = arith.constant 0 : index
    %c0_4 = arith.constant 0 : index
    %3 = vector.load %arg3[%c0_3, %c0_4] : memref<1x832xf32, #tpu.memory_space<vmem>>, vector<1x832xf32>
    %4 = vector.broadcast %3 : vector<1x832xf32> to vector<256x832xf32>
    %5 = arith.addf %2, %4 : vector<256x832xf32>
    %cst_5 = arith.constant 0.000000e+00 : f32
    %6 = vector.broadcast %cst_5 : f32 to vector<256x832xf32>
    %7 = arith.maximumf %5, %6 : vector<256x832xf32>
    %8 = arith.truncf %7 : vector<256x832xf32> to vector<256x832xbf16>
    %c0_6 = arith.constant 0 : index
    %c0_7 = arith.constant 0 : index
    %9 = vector.load %arg4[%c0_6, %c0_7] : memref<832x512xbf16, #tpu.memory_space<vmem>>, vector<832x512xbf16>
    %cst_8 = arith.constant dense<0.000000e+00> : vector<256x512xf32>
    %10 = tpu.matmul %8, %9, %cst_8 {dimension_numbers = #tpu.dot_dimension_numbers<[1], [0], [0], [1], [0, 0, 1, 1], [], []>} : vector<256x832xbf16>, vector<832x512xbf16>, vector<256x512xf32> -> vector<256x512xf32>
    %c0_9 = arith.constant 0 : index
    %c0_10 = arith.constant 0 : index
    %11 = vector.load %arg5[%c0_9, %c0_10] : memref<1x512xf32, #tpu.memory_space<vmem>>, vector<1x512xf32>
    %12 = vector.broadcast %11 : vector<1x512xf32> to vector<256x512xf32>
    %13 = arith.addf %10, %12 : vector<256x512xf32>
    %cst_11 = arith.constant 0.000000e+00 : f32
    %14 = vector.broadcast %cst_11 : f32 to vector<256x512xf32>
    %15 = arith.maximumf %13, %14 : vector<256x512xf32>
    %16 = arith.truncf %15 : vector<256x512xf32> to vector<256x512xbf16>
    %c0_12 = arith.constant 0 : index
    %c0_13 = arith.constant 0 : index
    %17 = vector.load %arg6[%c0_12, %c0_13] : memref<512x256xbf16, #tpu.memory_space<vmem>>, vector<512x256xbf16>
    %cst_14 = arith.constant dense<0.000000e+00> : vector<256x256xf32>
    %18 = tpu.matmul %16, %17, %cst_14 {dimension_numbers = #tpu.dot_dimension_numbers<[1], [0], [0], [1], [0, 0, 1, 1], [], []>} : vector<256x512xbf16>, vector<512x256xbf16>, vector<256x256xf32> -> vector<256x256xf32>
    %c0_15 = arith.constant 0 : index
    %c0_16 = arith.constant 0 : index
    %19 = vector.load %arg7[%c0_15, %c0_16] : memref<1x256xf32, #tpu.memory_space<vmem>>, vector<1x256xf32>
    %20 = vector.broadcast %19 : vector<1x256xf32> to vector<256x256xf32>
    %21 = arith.addf %18, %20 : vector<256x256xf32>
    %cst_17 = arith.constant 0.000000e+00 : f32
    %22 = vector.broadcast %cst_17 : f32 to vector<256x256xf32>
    %23 = arith.maximumf %21, %22 : vector<256x256xf32>
    %24 = arith.truncf %23 : vector<256x256xf32> to vector<256x256xbf16>
    %c0_18 = arith.constant 0 : index
    %c0_19 = arith.constant 0 : index
    %25 = vector.load %arg8[%c0_18, %c0_19] : memref<256x64xbf16, #tpu.memory_space<vmem>>, vector<256x64xbf16>
    %cst_20 = arith.constant dense<0.000000e+00> : vector<256x64xf32>
    %26 = tpu.matmul %24, %25, %cst_20 {dimension_numbers = #tpu.dot_dimension_numbers<[1], [0], [0], [1], [0, 0, 1, 1], [], []>} : vector<256x256xbf16>, vector<256x64xbf16>, vector<256x64xf32> -> vector<256x64xf32>
    %c0_21 = arith.constant 0 : index
    %c0_22 = arith.constant 0 : index
    %27 = vector.load %arg9[%c0_21, %c0_22] : memref<1x64xf32, #tpu.memory_space<vmem>>, vector<1x64xf32>
    %28 = vector.broadcast %27 : vector<1x64xf32> to vector<256x64xf32>
    %29 = arith.addf %26, %28 : vector<256x64xf32>
    %cst_23 = arith.constant 0.000000e+00 : f32
    %30 = vector.broadcast %cst_23 : f32 to vector<256x64xf32>
    %31 = arith.maximumf %29, %30 : vector<256x64xf32>
    %32 = arith.truncf %31 : vector<256x64xf32> to vector<256x64xbf16>
    %c0_24 = arith.constant 0 : index
    %c0_25 = arith.constant 0 : index
    %33 = vector.load %arg10[%c0_24, %c0_25] : memref<8x64xbf16, #tpu.memory_space<vmem>>, vector<8x64xbf16>
    %cst_26 = arith.constant dense<0.000000e+00> : vector<8x256xf32>
    %34 = tpu.matmul %33, %32, %cst_26 {dimension_numbers = #tpu.dot_dimension_numbers<[1], [1], [0], [0], [0, 0, 1, 0], [], []>} : vector<8x64xbf16>, vector<256x64xbf16>, vector<8x256xf32> -> vector<8x256xf32>
    %35 = vector.extract_strided_slice %34 {offsets = [0, 0], sizes = [1, 256], strides = [1, 1]} : vector<8x256xf32> to vector<1x256xf32>
    %c0_27 = arith.constant 0 : index
    %c0_28 = arith.constant 0 : index
    %36 = vector.load %arg11[%c0_27, %c0_28] : memref<1x1xf32, #tpu.memory_space<vmem>>, vector<1x1xf32>
    %37 = vector.broadcast %36 : vector<1x1xf32> to vector<1x256xf32>
    %38 = arith.addf %35, %37 : vector<1x256xf32>
    %cst_29 = arith.constant 0.000000e+00 : f32
    %39 = vector.broadcast %cst_29 : f32 to vector<1x256xf32>
    %40 = arith.maximumf %38, %39 : vector<1x256xf32>
    %41 = vector.shape_cast %40 : vector<1x256xf32> to vector<1x1x256xf32>
    %c0_30 = arith.constant 0 : index
    %c0_31 = arith.constant 0 : index
    %c0_32 = arith.constant 0 : index
    %42 = vector.load %arg12[%c0_30, %c0_31, %c0_32] : memref<1x1x256xf32, #tpu.memory_space<vmem>>, vector<1x1x256xf32>
    tpu.vector_store %arg12[%c0_30, %c0_31, %c0_32], %41 {strides = array<i32>} : memref<1x1x256xf32, #tpu.memory_space<vmem>>, vector<1x1x256xf32>,
    return
  }
  func.func @transform_0(%arg0: i32) -> (i32, i32) {
    %c0_i32 = arith.constant 0 : i32
    %c0_i32_0 = arith.constant 0 : i32
    return %arg0, %c0_i32 : i32, i32
  }
  func.func @transform_1(%arg0: i32) -> (i32, i32) {
    %c0_i32 = arith.constant 0 : i32
    %c0_i32_0 = arith.constant 0 : i32
    %c0_i32_1 = arith.constant 0 : i32
    return %c0_i32, %c0_i32_0 : i32, i32
  }
  func.func @transform_2(%arg0: i32) -> (i32, i32) {
    %c0_i32 = arith.constant 0 : i32
    %c0_i32_0 = arith.constant 0 : i32
    %c0_i32_1 = arith.constant 0 : i32
    return %c0_i32, %c0_i32_0 : i32, i32
  }
  func.func @transform_3(%arg0: i32) -> (i32, i32) {
    %c0_i32 = arith.constant 0 : i32
    %c0_i32_0 = arith.constant 0 : i32
    %c0_i32_1 = arith.constant 0 : i32
    return %c0_i32, %c0_i32_0 : i32, i32
  }
  func.func @transform_4(%arg0: i32) -> (i32, i32) {
    %c0_i32 = arith.constant 0 : i32
    %c0_i32_0 = arith.constant 0 : i32
    %c0_i32_1 = arith.constant 0 : i32
    return %c0_i32, %c0_i32_0 : i32, i32
  }
  func.func @transform_5(%arg0: i32) -> (i32, i32) {
    %c0_i32 = arith.constant 0 : i32
    %c0_i32_0 = arith.constant 0 : i32
    %c0_i32_1 = arith.constant 0 : i32
    return %c0_i32, %c0_i32_0 : i32, i32
  }
  func.func @transform_6(%arg0: i32) -> (i32, i32) {
    %c0_i32 = arith.constant 0 : i32
    %c0_i32_0 = arith.constant 0 : i32
    %c0_i32_1 = arith.constant 0 : i32
    return %c0_i32, %c0_i32_0 : i32, i32
  }
  func.func @transform_7(%arg0: i32) -> (i32, i32) {
    %c0_i32 = arith.constant 0 : i32
    %c0_i32_0 = arith.constant 0 : i32
    %c0_i32_1 = arith.constant 0 : i32
    return %c0_i32, %c0_i32_0 : i32, i32
  }
  func.func @transform_8(%arg0: i32) -> (i32, i32) {
    %c0_i32 = arith.constant 0 : i32
    %c0_i32_0 = arith.constant 0 : i32
    %c0_i32_1 = arith.constant 0 : i32
    return %c0_i32, %c0_i32_0 : i32, i32
  }
  func.func @transform_9(%arg0: i32) -> (i32, i32) {
    %c0_i32 = arith.constant 0 : i32
    %c0_i32_0 = arith.constant 0 : i32
    %c0_i32_1 = arith.constant 0 : i32
    return %c0_i32, %c0_i32_0 : i32, i32
  }
  func.func @transform_10(%arg0: i32) -> (i32, i32) {
    %c0_i32 = arith.constant 0 : i32
    %c0_i32_0 = arith.constant 0 : i32
    %c0_i32_1 = arith.constant 0 : i32
    return %c0_i32, %c0_i32_0 : i32, i32
  }
  func.func @transform_11(%arg0: i32) -> (i32, i32, i32) {
    %c0_i32 = arith.constant 0 : i32
    %c0_i32_0 = arith.constant 0 : i32
    %c0_i32_1 = arith.constant 0 : i32
    return %arg0, %c0_i32, %c0_i32_0 : i32, i32, i32
  }
}

</mosaic_0001>

<bundles_post_ra>
// kernel: tpu_custom_call.1
= control target key start
LH: loop header
LB: loop body
LE: loop exit
PB: predicated region body
PF: predicated region fallthrough
CT: control target
= control target key end

     0   :  { %s11499_s0 = inlined_call_operand.vmem [shape: bf16[512,128], index: 0, kind: input, shape index: {}]   ;;  %s11500_s1 = inlined_call_operand.vmem [shape: bf16[128,832], index: 1, kind: input, shape index: {}]   ;;  %s11501_s2 = inlined_call_operand.vmem [shape: f32[1,832], index: 2, kind: input, shape index: {}]   ;;  %s11502_s3 = inlined_call_operand.hbm [shape: bf16[832,512], index: 3, kind: input, shape index: {}]   ;;  %s11503_s4 = inlined_call_operand.vmem [shape: f32[1,512], index: 4, kind: input, shape index: {}]   ;;  %s11504_s5 = inlined_call_operand.vmem [shape: bf16[512,256], index: 5, kind: input, shape index: {}]   ;;  %s11505_s6 = inlined_call_operand.vmem [shape: f32[1,256], index: 6, kind: input, shape index: {}]   ;;  %s11506_s7 = inlined_call_operand.vmem [shape: bf16[256,64], index: 7, kind: input, shape index: {}]   ;;  %s11507_s8 = inlined_call_operand.vmem [shape: f32[1,64], index: 8, kind: input, shape index: {}]   ;;  %s11508_s9 = inlined_call_operand.vmem [shape: bf16[8,64], index: 9, kind: input, shape index: {}]   ;;  %s11509_s10 = inlined_call_operand.<no memory space> [shape: f32[1,1], index: 10, kind: input, shape index: {}]   ;;  %s11510_s11 = inlined_call_operand.hbm [shape: f32[2,1,256], index: 11, kind: output, shape index: {}]  }
   0x1   :  { %11642 = sst [smem:[#allocation125_spill]] %s11502_s3  ;;  %v16_v0 = vstv %s11509_s10 }
   0x2   :  { %17 = vst [vmem:[#allocation2] sm:$0x1] %v16_v0 }
   0x3   :  { %18 = vsyncpa [#allocation4], 0 }
   0x4   :  { %19 = vsyncpa [#allocation5], 0 }
   0x5   :  { %21 = vsyncpa [#allocation5 + $0x1], 0  ;;  %s7880_s19 = smov 0   ;;  %s7882_s20 = smov 0  }
   0x6   :  { %s7884_s21 = smov 0   ;;  %s7886_s22 = smov 0  }
   0x7 LB: > { %s7901_s10 = sadd.s32 4294967295, %s7809_s22   ;;  %s6491_s23 = sadd.s32 4294967294, %s7809_s22   ;;  %s7809_s22 = sphi %s7886_s22, %s12124_s22   ;;  %s7805_s21 = sphi %s7884_s21, %s12123_s21   ;;  %s7801_s20 = sphi %s7882_s20, %s12122_s20   ;;  %s7797_s19 = sphi %s7880_s19, %s12121_s19  }
   0x8   : > { %s7905_s24 = sadd.s32 1, %s7809_s22   ;;  %s270_s25 = sadd.s32 1, %s7805_s21 }
   0x9   : > { %s267_s26 = ssub.s32 %s7809_s22, %s7905_s24  ;;  %p280_p0 = scmp.ne.s32.totalorder %s7805_s21, %s7801_s20 }
   0xa   : > { %p268_p1 = scmp.eq.s32.totalorder %s267_s26, 0  ;;  %p281_p2 = scmp.eq.s32.totalorder %s7901_s10, 1 }
   0xb   : > { %p286_p3 = scmp.ne.s32.totalorder %s7801_s20, %s7797_s19  ;;  %p287_p4 = scmp.eq.s32.totalorder %s6491_s23, 1 }
   0xc   : > { %s7916_s27 = scalar_select %p268_p1, %s7805_s21, %s270_s25  }
   0xd   : > { %p7918_p5 = por %p281_p2, %p280_p0  ;;  %p7922_p6 = por %p287_p4, %p286_p3 }
   0xe   : > { %p6492_p7 = scmp.ge.s32.totalorder %s7809_s22, 1  ;;  %p294_p8 = scmp.lt.s32.totalorder %s7809_s22, 3 }
   0xf   : > { %s11644_s29 = scalar_select %p7922_p6, 1, 0 }
  0x10   : > { %p7156_p9 = scmp.eq.s32.totalorder %s7901_s10, 0  ;;  %p7929_p10 = pnand %p6492_p7, %p294_p8 }
  0x11   : > { %s7811_s12 = smov [#allocation3]  }
  0x12   : > { %s312_s13 = sshll.u32 %s7811_s12, 4  ;;  %p7148_p11 = pneg %p7929_p10  ;;  %s313_s13 = int_to_ptr.vmem [resolvable:$true] %s312_s13 }
  0x13   : > { %s7730_s14 = scalar_lea.vmem %s313_s13, 26624  ;;  %p7738_p3 = scmp.lt.s32.totalorder %s313_s13, %s313_s13 }
  0x14   : > { %p7149_p12 = pnand %p7156_p9, %p7148_p11  ;;  %p7731_p0 = scmp.ne.s32.totalorder %s313_s13, %s7730_s14 }
  0x15   : > { %p7739_p4 = scmp.lt.s32.totalorder %s7730_s14, %s7730_s14 }
  0x16   : > { %p7721_p13 = pneg %p7149_p12 }
  0x17   : > { %p7740_p6 = por %p7739_p4, %p7738_p3 }
  0x18   : > { %p7733_p1 = pnand %p7731_p0, %p7721_p13 }
  0x1a   : > { %p7734_p2 = pneg %p7733_p1 }
  0x1c   : > { %p7741_p7 = pnand %p7740_p6, %p7734_p2 }
  0x1e   : > { %7744 = shalt.err (!%p7741_p7)
}
  0x1f   : > { %s7812_s15 = smov 256   ;;  %s7813_s16 = smov 16  }
  0x20   : > { %s11646_s3 = sld [smem:[#allocation125_spill]] }
  0x22   : > { %358 = sbr.rel (%p7929_p10) target bundleno = 1759 (0x6df), region = 64 }
  0x26   : > { %7151 = dma.hbm_to_vmem [thread:$0]  (!%p7149_p12), %s11646_s3, 26624, %s313_s13, [#allocation4], %s7812_s15, %s7812_s15, %s7813_s16  }
  0x27   : > { %7788 = dma.done.wait (%p7156_p9), [#allocation4], 26624  }
  0x28   : > { %7790 = vsyncadd (%p7156_p9), [#allocation4], 4294940672  ;;  %v11517_v1 = vmov 0   ;;  %v7197_v2 = vld [vmem:[%s11500_s1 + $0x18c] ss:$28 sps:$4 sm:$0xff]   ;;  %s7959_s14 = sshll.u32 %s7901_s10, 5 }
  0x29   : > { %954 = vmatprep.mubr.bf16.mxu0 %v11517_v1  ;;  %1147 = vmatprep.mubr.bf16.mxu1 %v11517_v1  ;;  %v7199_v3 = vld [vmem:[%s11500_s1 + $0x188] ss:$28 sps:$4 sm:$0xff]   ;;  %v7200_v4 = vld [vmem:[%s11500_s1 + $0x154] ss:$28 sps:$4 sm:$0xff]   ;;  %v7203_v6 = vld [vmem:[%s11500_s1 + $0x11c] ss:$28 sps:$4 sm:$0xff]  }
  0x2a   : > { %7196 = vset.pattern.permute.xlu0 %v11517_v1  ;;  %922 = vmatprep.subr.bf16.mxu0 %v7197_v2  ;;  %v7202_v5 = vld [vmem:[%s11500_s1 + $0x150] ss:$28 sps:$4 sm:$0xff]   ;;  %p399_p6 = scmp.lt.s32.totalorder %s7959_s14, 63  ;;  %v7205_v9 = vld [vmem:[%s11500_s1 + $0x118] ss:$28 sps:$4 sm:$0xff]   ;;  %vm3268_vm0 = vcmask 523264  }
  0x2b   : > { %923 = vmatpush1.bf16.msra.mxu0 %v7199_v3  ;;  %v7209_v7 = vld [vmem:[%s11500_s1 + $0x194] ss:$28 sps:$4 sm:$0xff]   ;;  %v7206_v10 = vld [vmem:[%s11500_s1 + $0xe4] ss:$28 sps:$4 sm:$0xff]   ;;  %v7215_v11 = vld [vmem:[%s11500_s1 + $0x15c] ss:$28 sps:$4 sm:$0xff]  }
  0x2c   : > { %924 = vmatprep.subr.bf16.mxu0 %v7200_v4  ;;  %v7211_v8 = vld [vmem:[%s11500_s1 + $0x190] ss:$28 sps:$4 sm:$0xff]   ;;  %1115 = vmatprep.subr.bf16.mxu1 %v7209_v7  ;;  %v7217_v12 = vld [vmem:[%s11500_s1 + $0x158] ss:$28 sps:$4 sm:$0xff]   ;;  %s400_s25 = scalar_select %p399_p6, %s7959_s14, 63 }
  0x2d   : > { %1116 = vmatpush1.bf16.msra.mxu1 %v7211_v8  ;;  %v7208_v13 = vld [vmem:[%s11500_s1 + $0xe0] ss:$28 sps:$4 sm:$0xff]   ;;  %v7212_v15 = vld [vmem:[%s11500_s1 + $0xac] ss:$28 sps:$4 sm:$0xff]   ;;  %v7218_v19 = vld [vmem:[%s11500_s1 + $0x74] ss:$28 sps:$4 sm:$0xff]  }
  0x2e   : > { %1117 = vmatprep.subr.bf16.mxu1 %v7215_v11  ;;  %v7221_v14 = vld [vmem:[%s11500_s1 + $0x124] ss:$28 sps:$4 sm:$0xff]   ;;  %s6499_s18 = sshll.u32 %s400_s25, 2  ;;  %v7227_v17 = vld [vmem:[%s11500_s1 + $0xec] ss:$28 sps:$4 sm:$0xff]   ;;  %s395_s26 = sand.u32 1, %s7801_s20  }
  0x2f   : > { %925 = vmatpush1.bf16.msra.mxu0 %v7202_v5  ;;  %v7223_v16 = vld [vmem:[%s11500_s1 + $0x120] ss:$28 sps:$4 sm:$0xff]   ;;  %v7214_v18 = vld [vmem:[%s11500_s1 + $0xa8] ss:$28 sps:$4 sm:$0xff]   ;;  %s8011_s16 = scalar_lea.vmem %s11499_s0, %s6499_s18  ;;  %v7233_v21 = vld [vmem:[%s11500_s1 + $0xb4] ss:$28 sps:$4 sm:$0xff]  }
  0x30   : > { %926 = vmatprep.subr.bf16.mxu0 %v7203_v6  ;;  %v7229_v20 = vld [vmem:[%s11500_s1 + $0xe8] ss:$28 sps:$4 sm:$0xff]   ;;  %v7220_v22 = vld [vmem:[%s11500_s1 + $0x70] ss:$28 sps:$4 sm:$0xff]   ;;  %v7224_v23 = vld [vmem:[%s11500_s1 + $0x3c] ss:$28 sps:$4 sm:$0xff]  }
  0x31   : > { %1118 = vmatpush1.bf16.msra.mxu1 %v7217_v12  ;;  %v7235_v24 = vld [vmem:[%s11500_s1 + $0xb0] ss:$28 sps:$4 sm:$0xff]   ;;  %v7237_v25 = vld [vmem:[%s11500_s1 + $0x7c] ss:$28 sps:$4 sm:$0xff]   ;;  %v7230_v27 = vld [vmem:[%s11500_s1 + $0x4] ss:$28 sps:$4 sm:$0xff]  }
  0x32   : > { %1119 = vmatprep.subr.bf16.mxu1 %v7221_v14  ;;  %v7226_v26 = vld [vmem:[%s11500_s1 + $0x38] ss:$28 sps:$4 sm:$0xff]   ;;  %v7240_v29 = vld [vmem:[%s11500_s1 + $0x44] ss:$28 sps:$4 sm:$0xff]   ;;  %v7244_v33 = vld [vmem:[%s11500_s1 + $0xc] ss:$28 sps:$4 sm:$0xff]  }
  0x33   : > { %927 = vmatpush1.bf16.msra.mxu0 %v7205_v9  ;;  %v7239_v28 = vld [vmem:[%s11500_s1 + $0x78] ss:$28 sps:$4 sm:$0xff]   ;;  %v7232_v30 = vld [vmem:[%s11500_s1] ss:$28 sps:$4 sm:$0xff]   ;;  %v7246_v36 = vld [vmem:[%s11500_s1 + $0x8] ss:$28 sps:$4 sm:$0xff]  }
  0x34   : > { %928 = vmatprep.subr.bf16.mxu0 %v7206_v10  ;;  %v8047_v31 = vld [vmem:[%s8011_s16] sm:$0xff]   ;;  %v7254_v34 = vld [vmem:[%s11500_s1 + $0x198] ss:$28 sps:$4 sm:$0xff]   ;;  %v8073_v39 = vld [vmem:[%s8011_s16 + $0x8] sm:$0xff]   ;;  %s6497_s10 = sshll.u32 %s395_s26, 1  ;;  %s6406_s15 = scalar_lea.sflag [#allocation5], %s395_s26 }
  0x35   : > { %1120 = vmatpush1.bf16.msra.mxu1 %v7223_v16  ;;  %v7242_v32 = vld [vmem:[%s11500_s1 + $0x40] ss:$28 sps:$4 sm:$0xff]   ;;  %v7266_v40 = vld [vmem:[%s11500_s1 + $0x12c] ss:$28 sps:$4 sm:$0xff]   ;;  %v7270_v42 = vld [vmem:[%s11500_s1 + $0xf4] ss:$28 sps:$4 sm:$0xff]  }
  0x36   : > { %1121 = vmatprep.subr.bf16.mxu1 %v7227_v17  ;;  %v7256_v35 = vld [vmem:[%s11500_s1 + $0x19c] ss:$28 sps:$4 sm:$0xff]   ;;  %v7261_v37 = vld [vmem:[%s11500_s1 + $0x164] ss:$28 sps:$4 sm:$0xff]   ;;  %v7268_v44 = vld [vmem:[%s11500_s1 + $0xf0] ss:$28 sps:$4 sm:$0xff]  }
  0x37   : > { %929 = vmatpush1.bf16.msra.mxu0 %v7208_v13  ;;  %v7259_v38 = vld [vmem:[%s11500_s1 + $0x160] ss:$28 sps:$4 sm:$0xff]   ;;  %v7264_v41 = vld [vmem:[%s11500_s1 + $0x128] ss:$28 sps:$4 sm:$0xff]   ;;  %v8101_v47 = vld [vmem:[%s8011_s16 + $0x10] sm:$0xff]   ;;  %s397_s30 = scalar_lea.vmem [#allocation6], %s6497_s10 }
  0x38   : > { %930 = vmatprep.subr.bf16.mxu0 %v7212_v15  ;;  %v7271_v43 = vld [vmem:[%s11500_s1 + $0x1a0] ss:$28 sps:$4 sm:$0xff]   ;;  %v7276_v46 = vld [vmem:[%s11500_s1 + $0x168] ss:$28 sps:$4 sm:$0xff]   ;;  %v7273_v48 = vld [vmem:[%s11500_s1 + $0xb8] ss:$28 sps:$4 sm:$0xff]  }
  0x39   : > { %1122 = vmatpush1.bf16.msra.mxu1 %v7229_v20  ;;  %v7275_v45 = vld [vmem:[%s11500_s1 + $0xbc] ss:$28 sps:$4 sm:$0xff]   ;;  %v7280_v49 = vld [vmem:[%s11500_s1 + $0x130] ss:$28 sps:$4 sm:$0xff]   ;;  %v7279_v50 = vld [vmem:[%s11500_s1 + $0x84] ss:$28 sps:$4 sm:$0xff]  }
  0x3a   : > { %1123 = vmatprep.subr.bf16.mxu1 %v7233_v21  ;;  %v7285_v51 = vld [vmem:[%s11500_s1 + $0xf8] ss:$28 sps:$4 sm:$0xff]   ;;  %v7277_v52 = vld [vmem:[%s11500_s1 + $0x80] ss:$28 sps:$4 sm:$0xff]   ;;  %v7284_v53 = vld [vmem:[%s11500_s1 + $0x4c] ss:$28 sps:$4 sm:$0xff]  }
  0x3b   : > { %931 = vmatpush1.bf16.msra.mxu0 %v7214_v18  ;;  %v8126_v54 = vld [vmem:[%s8011_s16 + $0x18] sm:$0xff]   ;;  %v7282_v56 = vld [vmem:[%s11500_s1 + $0x48] ss:$28 sps:$4 sm:$0xff]   ;;  %v7288_v57 = vld [vmem:[%s11500_s1 + $0x14] ss:$28 sps:$4 sm:$0xff]   ;;  %s6420_s12 = sshll.u32 %s397_s30, 4  ;;  %s6421_s12 = int_to_ptr.vmem [resolvable:$true] %s6420_s12 }
  0x3c   : > { %932 = vmatprep.subr.bf16.mxu0 %v7218_v19  ;;  %v7289_v55 = vld [vmem:[%s11500_s1 + $0xc0] ss:$28 sps:$4 sm:$0xff]   ;;  %v7290_v58 = vld [vmem:[%s11500_s1 + $0x88] ss:$28 sps:$4 sm:$0xff]   ;;  %v7286_v59 = vld [vmem:[%s11500_s1 + $0x10] ss:$28 sps:$4 sm:$0xff]  }
  0x3d   : > { %1124 = vmatpush1.bf16.msra.mxu1 %v7235_v24  ;;  %v8148_v60 = vld [vmem:[%s8011_s16 + $0x20] sm:$0xff]   ;;  %v7291_v61 = vld [vmem:[%s11500_s1 + $0x50] ss:$28 sps:$4 sm:$0xff]   ;;  %v7292_v62 = vld [vmem:[%s11500_s1 + $0x18] ss:$28 sps:$4 sm:$0xff]   ;;  %s7745_s25 = scalar_lea.vmem %s6421_s12, 32 }
  0x3e   : > { %1125 = vmatprep.subr.bf16.mxu1 %v7237_v25  ;;  %v8161_v63 = vld [vmem:[%s8011_s16 + $0x28] sm:$0xff]   ;;  %v8168_v2 = vld [vmem:[%s8011_s16 + $0x30] sm:$0xff]   ;;  %v8175_v3 = vld [vmem:[%s8011_s16 + $0x38] sm:$0xff]   ;;  %p7746_p8 = scmp.ne.s32.totalorder %s6421_s12, %s7745_s25  ;;  %s7816_s17 = smov [#allocation6]  }
  0x3f   : > { %933 = vmatpush1.bf16.msra.mxu0 %v7220_v22  ;;  %v7295_v0 = vld [vmem:[#allocation3 + $0xe4] ss:$16 sps:$4 sm:$0xff]   ;;  %v7332_v13 = vld [vmem:[#allocation3 + $0x2e0] ss:$16 sps:$4 sm:$0xff]   ;;  %s7749_s3 = sshll.u32 %s7816_s17, 4  ;;  %s7750_s3 = int_to_ptr.vmem [resolvable:$false] %s7749_s3 }
  0x40   : > { %934 = vmatprep.subr.bf16.mxu0 %v7224_v23  ;;  %v8182_v4 = vld [vmem:[%s8011_s16 + $0x40] sm:$0xff]   ;;  %v8189_v6 = vld [vmem:[%s8011_s16 + $0x48] sm:$0xff]   ;;  %v8196_v7 = vld [vmem:[%s8011_s16 + $0x50] sm:$0xff]   ;;  %p7747_p9 = pnand %p7746_p8, %p7918_p5  ;;  %s7751_s23 = scalar_lea.vmem %s7750_s3, 64 }
  0x41   : > { %1126 = vmatpush1.bf16.msra.mxu1 %v7239_v28  ;;  %v7334_v5 = vld [vmem:[#allocation3 + $0x2e4] ss:$16 sps:$4 sm:$0xff]   ;;  %v7338_v15 = vld [vmem:[#allocation3 + $0x2c0] ss:$16 sps:$4 sm:$0xff]   ;;  %p7752_p11 = scmp.lt.s32.totalorder %s6421_s12, %s7750_s3  ;;  %p7753_p12 = scmp.lt.s32.totalorder %s7751_s23, %s7745_s25 }
  0x42   : > { %1127 = vmatprep.subr.bf16.mxu1 %v7240_v29  ;;  %v8203_v8 = vld [vmem:[%s8011_s16 + $0x58] sm:$0xff]   ;;  %v8210_v9 = vld [vmem:[%s8011_s16 + $0x60] sm:$0xff]   ;;  %v8217_v10 = vld [vmem:[%s8011_s16 + $0x68] sm:$0xff]   ;;  %p7748_p10 = pneg %p7747_p9 }
  0x43   : > { %935 = vmatpush1.bf16.msra.mxu0 %v7226_v26  ;;  %v8224_v11 = vld [vmem:[%s8011_s16 + $0x70] sm:$0xff]   ;;  %v8231_v12 = vld [vmem:[%s8011_s16 + $0x78] sm:$0xff]   ;;  %s6418_s16 = scalar_lea.hbm %s11510_s11, %s7959_s14  ;;  %p7754_p13 = por %p7753_p12, %p7752_p11 }
  0x44   : > { %936 = vmatprep.subr.bf16.mxu0 %v7230_v27  ;;  %v7340_v14 = vld [vmem:[#allocation3 + $0x2c4] ss:$16 sps:$4 sm:$0xff]   ;;  %v7293_v17 = vld [vmem:[#allocation3 + $0xe0] ss:$16 sps:$4 sm:$0xff]  }
  0x45   : > { %1128 = vmatpush1.bf16.msra.mxu1 %v7242_v32  ;;  %v7346_v16 = vld [vmem:[#allocation3 + $0x2a4] ss:$16 sps:$4 sm:$0xff]   ;;  %v7344_v19 = vld [vmem:[#allocation3 + $0x2a0] ss:$16 sps:$4 sm:$0xff]   ;;  %p7755_p0 = pnand %p7754_p13, %p7748_p10 }
  0x46   : > { %1129 = vmatprep.subr.bf16.mxu1 %v7244_v33  ;;  %v7298_v18 = vld [vmem:[#allocation3 + $0xc4] ss:$16 sps:$4 sm:$0xff]   ;;  %v7296_v21 = vld [vmem:[#allocation3 + $0xc0] ss:$16 sps:$4 sm:$0xff]  }
  0x47   : > { %937 = vmatpush1.bf16.msra.mxu0 %v7232_v30  ;;  %v7352_v20 = vld [vmem:[#allocation3 + $0x284] ss:$16 sps:$4 sm:$0xff]   ;;  %v7350_v23 = vld [vmem:[#allocation3 + $0x280] ss:$16 sps:$4 sm:$0xff]  }
  0x48   : > { %1308 = vmatprep.subr.bf16.mxu0 %v7256_v35  ;;  %v7301_v22 = vld [vmem:[#allocation3 + $0xa4] ss:$16 sps:$4 sm:$0xff]   ;;  %v7299_v25 = vld [vmem:[#allocation3 + $0xa0] ss:$16 sps:$4 sm:$0xff]  }
  0x49   : > { %1130 = vmatpush1.bf16.msra.mxu1 %v7246_v36  ;;  %v7355_v24 = vld [vmem:[#allocation3 + $0x264] ss:$16 sps:$4 sm:$0xff]   ;;  %v7353_v27 = vld [vmem:[#allocation3 + $0x260] ss:$16 sps:$4 sm:$0xff]  }
  0x4a   : > { %955 = vmatmul.mubr.bf16.vlgmr.msra.gmra.mxu0 %v8047_v31  ;;  %7054 = vmatprep.subr.bf16.mxu1 %v7271_v43  ;;  %v7304_v26 = vld [vmem:[#allocation3 + $0x84] ss:$16 sps:$4 sm:$0xff]   ;;  %v7302_v29 = vld [vmem:[#allocation3 + $0x80] ss:$16 sps:$4 sm:$0xff]  }
  0x4b   : > { %964 = vmatprep.mubr.bf16.mxu0 %v11517_v1  ;;  %1309 = vmatpush1.bf16.msra.mxu0 %v7254_v34  ;;  %v7358_v28 = vld [vmem:[#allocation3 + $0x244] ss:$16 sps:$4 sm:$0xff]   ;;  %v7305_v33 = vld [vmem:[#allocation3 + $0x60] ss:$16 sps:$4 sm:$0xff]  }
  0x4c   : > { %1310 = vmatprep.subr.bf16.mxu0 %v7261_v37  ;;  %1148 = vmatmul.mubr.bf16.vlgmr.msra.gmra.mxu1 %v8047_v31  ;;  %v7307_v30 = vld [vmem:[#allocation3 + $0x64] ss:$16 sps:$4 sm:$0xff]   ;;  %v7359_v35 = vld [vmem:[#allocation3 + $0x220] ss:$16 sps:$4 sm:$0xff]  }
  0x4d   : > { %1157 = vmatprep.mubr.bf16.mxu1 %v11517_v1  ;;  %7055 = vmatpush3.bf16.msra.mxu1 %v7271_v43  ;;  %v7361_v32 = vld [vmem:[#allocation3 + $0x224] ss:$16 sps:$4 sm:$0xff]   ;;  %v7308_v37 = vld [vmem:[#allocation3 + $0x40] ss:$16 sps:$4 sm:$0xff]  }
  0x4e   : > { %7056 = vmatprep.subr.bf16.mxu1 %v7276_v46  ;;  %v7310_v34 = vld [vmem:[#allocation3 + $0x44] ss:$16 sps:$4 sm:$0xff]   ;;  %v7365_v43 = vld [vmem:[#allocation3 + $0x3e0] ss:$16 sps:$4 sm:$0xff]  }
  0x4f   : > { %1311 = vmatpush1.bf16.msra.mxu0 %v7259_v38  ;;  %v7364_v36 = vld [vmem:[#allocation3 + $0x204] ss:$16 sps:$4 sm:$0xff]  }
  0x50   : > { %1312 = vmatprep.subr.bf16.mxu0 %v7266_v40  ;;  %v7313_v38 = vld [vmem:[#allocation3 + $0x24] ss:$16 sps:$4 sm:$0xff]  }
  0x51   : > { %7057 = vmatpush3.bf16.msra.mxu1 %v7276_v46  ;;  %v7367_v40 = vld [vmem:[#allocation3 + $0x3e4] ss:$16 sps:$4 sm:$0xff]  }
  0x52   : > { %965 = vmatmul.mubr.bf16.gmra.mxu0 %v8073_v39  ;;  %7058 = vmatprep.subr.bf16.mxu1 %v7280_v49  ;;  %v7319_v46 = vld [vmem:[#allocation3 + $0x1e4] ss:$16 sps:$4 sm:$0xff]  }
  0x53   : > { %974 = vmatprep.mubr.bf16.mxu0 %v11517_v1  ;;  %1313 = vmatpush1.bf16.msra.mxu0 %v7264_v41  ;;  %v7311_v41 = vld [vmem:[#allocation3 + $0x20] ss:$16 sps:$4 sm:$0xff]  }
  0x54   : > { %1314 = vmatprep.subr.bf16.mxu0 %v7270_v42  ;;  %1158 = vmatmul.mubr.bf16.gmra.mxu1 %v8073_v39  ;;  %v7316_v42 = vld [vmem:[#allocation3 + $0x4] ss:$16 sps:$4 sm:$0xff]  }
  0x55   : > { %1167 = vmatprep.mubr.bf16.mxu1 %v11517_v1  ;;  %7059 = vmatpush3.bf16.msra.mxu1 %v7280_v49  ;;  %v7317_v49 = vld [vmem:[#allocation3 + $0x1e0] ss:$16 sps:$4 sm:$0xff]  }
  0x56   : > { %7060 = vmatprep.subr.bf16.mxu1 %v7285_v51 }
  0x57   : > { %1315 = vmatpush1.bf16.msra.mxu0 %v7268_v44  ;;  %v7370_v44 = vld [vmem:[#allocation3 + $0x3c4] ss:$16 sps:$4 sm:$0xff]  }
  0x58   : > { %1316 = vmatprep.subr.bf16.mxu0 %v7275_v45  ;;  %v7314_v45 = vld [vmem:[#allocation3] ss:$16 sps:$4 sm:$0xff]  }
  0x59   : > { %7061 = vmatpush3.bf16.msra.mxu1 %v7285_v51  ;;  %v7371_v51 = vld [vmem:[#allocation3 + $0x3a0] ss:$16 sps:$4 sm:$0xff]  }
  0x5a   : > { %975 = vmatmul.mubr.bf16.gmra.mxu0 %v8101_v47  ;;  %7062 = vmatprep.subr.bf16.mxu1 %v7289_v55 }
  0x5b   : > { %984 = vmatprep.mubr.bf16.mxu0 %v11517_v1  ;;  %1317 = vmatpush1.bf16.msra.mxu0 %v7273_v48  ;;  %v7373_v48 = vld [vmem:[#allocation3 + $0x3a4] ss:$16 sps:$4 sm:$0xff]  }
  0x5c   : > { %1318 = vmatprep.subr.bf16.mxu0 %v7279_v50  ;;  %1168 = vmatmul.mubr.bf16.gmra.mxu1 %v8101_v47  ;;  %v7322_v50 = vld [vmem:[#allocation3 + $0x1c4] ss:$16 sps:$4 sm:$0xff]  }
  0x5d   : > { %1177 = vmatprep.mubr.bf16.mxu1 %v11517_v1  ;;  %7063 = vmatpush3.bf16.msra.mxu1 %v7289_v55  ;;  %v7374_v55 = vld [vmem:[#allocation3 + $0x380] ss:$16 sps:$4 sm:$0xff]  }
  0x5e   : > { %7064 = vmatprep.subr.bf16.mxu1 %v7290_v58 }
  0x5f   : > { %1319 = vmatpush1.bf16.msra.mxu0 %v7277_v52  ;;  %v7376_v52 = vld [vmem:[#allocation3 + $0x384] ss:$16 sps:$4 sm:$0xff]  }
  0x60   : > { %1320 = vmatprep.subr.bf16.mxu0 %v7284_v53  ;;  %v7320_v53 = vld [vmem:[#allocation3 + $0x1c0] ss:$16 sps:$4 sm:$0xff]  }
  0x61   : > { %7065 = vmatpush3.bf16.msra.mxu1 %v7290_v58  ;;  %v7328_v58 = vld [vmem:[#allocation3 + $0x184] ss:$16 sps:$4 sm:$0xff]  }
  0x62   : > { %985 = vmatmul.mubr.bf16.gmra.mxu0 %v8126_v54  ;;  %7066 = vmatprep.subr.bf16.mxu1 %v7291_v61 }
  0x63   : > { %994 = vmatprep.mubr.bf16.mxu0 %v11517_v1  ;;  %1321 = vmatpush1.bf16.msra.mxu0 %v7282_v56  ;;  %v7379_v56 = vld [vmem:[#allocation3 + $0x364] ss:$16 sps:$4 sm:$0xff]  }
  0x64   : > { %1322 = vmatprep.subr.bf16.mxu0 %v7288_v57  ;;  %1178 = vmatmul.mubr.bf16.gmra.mxu1 %v8126_v54  ;;  %v7323_v57 = vld [vmem:[#allocation3 + $0x1a0] ss:$16 sps:$4 sm:$0xff]  }
  0x65   : > { %1187 = vmatprep.mubr.bf16.mxu1 %v11517_v1  ;;  %7067 = vmatpush3.bf16.msra.mxu1 %v7291_v61  ;;  %v7326_v61 = vld [vmem:[#allocation3 + $0x180] ss:$16 sps:$4 sm:$0xff]  }
  0x66   : > { %7068 = vmatprep.subr.bf16.mxu1 %v7292_v62 }
  0x67   : > { %1323 = vmatpush1.bf16.msra.mxu0 %v7286_v59  ;;  %v7377_v59 = vld [vmem:[#allocation3 + $0x360] ss:$16 sps:$4 sm:$0xff]  }
  0x68   : > { %3510 = vmatprep.subr.bf16.mxu0 %v7334_v5  ;;  %v7329_v5 = vld [vmem:[#allocation3 + $0x160] ss:$16 sps:$4 sm:$0xff]  }
  0x69   : > { %7069 = vmatpush3.bf16.msra.mxu1 %v7292_v62  ;;  %v7331_v62 = vld [vmem:[#allocation3 + $0x164] ss:$16 sps:$4 sm:$0xff]  }
  0x6a   : > { %995 = vmatmul.mubr.bf16.gmra.mxu0 %v8148_v60  ;;  %3317 = vmatprep.subr.bf16.mxu1 %v7295_v0  ;;  %v7385_v0 = vld [vmem:[#allocation3 + $0x324] ss:$16 sps:$4 sm:$0xff]  }
  0x6b   : > { %1004 = vmatprep.mubr.bf16.mxu0 %v11517_v1 }
  0x6c   : > { %1188 = vmatmul.mubr.bf16.gmra.mxu1 %v8148_v60 }
  0x6d   : > { %1197 = vmatprep.mubr.bf16.mxu1 %v11517_v1 }
  0x72   : > { %1005 = vmatmul.mubr.bf16.gmra.mxu0 %v8161_v63 }
  0x73   : > { %1014 = vmatprep.mubr.bf16.mxu0 %v11517_v1 }
  0x74   : > { %1198 = vmatmul.mubr.bf16.gmra.mxu1 %v8161_v63 }
  0x75   : > { %1207 = vmatprep.mubr.bf16.mxu1 %v11517_v1 }
  0x7a   : > { %1015 = vmatmul.mubr.bf16.gmra.mxu0 %v8168_v2 }
  0x7b   : > { %1024 = vmatprep.mubr.bf16.mxu0 %v11517_v1 }
  0x7c   : > { %1208 = vmatmul.mubr.bf16.gmra.mxu1 %v8168_v2 }
  0x7d   : > { %1217 = vmatprep.mubr.bf16.mxu1 %v11517_v1 }
  0x82   : > { %1025 = vmatmul.mubr.bf16.gmra.mxu0 %v8175_v3 }
  0x83   : > { %1034 = vmatprep.mubr.bf16.mxu0 %v11517_v1 }
  0x84   : > { %1218 = vmatmul.mubr.bf16.gmra.mxu1 %v8175_v3 }
  0x85   : > { %1227 = vmatprep.mubr.bf16.mxu1 %v11517_v1 }
  0x8a   : > { %1035 = vmatmul.mubr.bf16.gmra.mxu0 %v8182_v4 }
  0x8b   : > { %1044 = vmatprep.mubr.bf16.mxu0 %v11517_v1 }
  0x8c   : > { %1228 = vmatmul.mubr.bf16.gmra.mxu1 %v8182_v4 }
  0x8d   : > { %1237 = vmatprep.mubr.bf16.mxu1 %v11517_v1 }
  0x92   : > { %1045 = vmatmul.mubr.bf16.gmra.mxu0 %v8189_v6 }
  0x93   : > { %1054 = vmatprep.mubr.bf16.mxu0 %v11517_v1 }
  0x94   : > { %1238 = vmatmul.mubr.bf16.gmra.mxu1 %v8189_v6 }
  0x95   : > { %1247 = vmatprep.mubr.bf16.mxu1 %v11517_v1 }
  0x9a   : > { %1055 = vmatmul.mubr.bf16.gmra.mxu0 %v8196_v7 }
  0x9b   : > { %1064 = vmatprep.mubr.bf16.mxu0 %v11517_v1 }
  0x9c   : > { %1248 = vmatmul.mubr.bf16.gmra.mxu1 %v8196_v7 }
  0x9d   : > { %1257 = vmatprep.mubr.bf16.mxu1 %v11517_v1 }
  0xa2   : > { %1065 = vmatmul.mubr.bf16.gmra.mxu0 %v8203_v8 }
  0xa3   : > { %1074 = vmatprep.mubr.bf16.mxu0 %v11517_v1 }
  0xa4   : > { %1258 = vmatmul.mubr.bf16.gmra.mxu1 %v8203_v8 }
  0xa5   : > { %1267 = vmatprep.mubr.bf16.mxu1 %v11517_v1 }
  0xaa   : > { %1075 = vmatmul.mubr.bf16.gmra.mxu0 %v8210_v9 }
  0xab   : > { %1084 = vmatprep.mubr.bf16.mxu0 %v11517_v1 }
  0xac   : > { %1268 = vmatmul.mubr.bf16.gmra.mxu1 %v8210_v9 }
  0xad   : > { %1277 = vmatprep.mubr.bf16.mxu1 %v11517_v1 }
  0xb2   : > { %1085 = vmatmul.mubr.bf16.gmra.mxu0 %v8217_v10 }
  0xb3   : > { %1094 = vmatprep.mubr.bf16.mxu0 %v11517_v1 }
  0xb4   : > { %1278 = vmatmul.mubr.bf16.gmra.mxu1 %v8217_v10 }
  0xb5   : > { %1287 = vmatprep.mubr.bf16.mxu1 %v11517_v1 }
  0xba   : > { %1095 = vmatmul.mubr.bf16.gmra.mxu0 %v8224_v11 }
  0xbb   : > { %1104 = vmatprep.mubr.bf16.mxu0 %v11517_v1 }
  0xbc   : > { %1288 = vmatmul.mubr.bf16.gmra.mxu1 %v8224_v11 }
  0xbd   : > { %1297 = vmatprep.mubr.bf16.mxu1 %v11517_v1 }
  0xc2   : > { %1105 = vmatmul.mubr.bf16.gmra.mxu0 %v8231_v12 }
  0xc3   : > { %1340 = vmatprep.mubr.bf16.mxu0 %v11517_v1 }
  0xc4   : > { %1298 = vmatmul.mubr.bf16.gmra.mxu1 %v8231_v12 }
  0xc5   : > { %7070 = vmatprep.mubr.bf16.mxu1 %v8047_v31 }
  0xca   : > { %1341 = vmatmul.mubr.bf16.vlgmr.msra.gmra.mxu0 %v8047_v31  ;;  %v7356_v31 = vld [vmem:[#allocation3 + $0x240] ss:$16 sps:$4 sm:$0xff]  }
  0xcb   : > { %1350 = vmatprep.mubr.bf16.mxu0 %v11517_v1  ;;  %3511 = vmatpush1.bf16.msra.mxu0 %v7332_v13  ;;  %v7337_v13 = vld [vmem:[#allocation3 + $0x144] ss:$16 sps:$4 sm:$0xff]  }
  0xcc   : > { %3512 = vmatprep.subr.bf16.mxu0 %v7340_v14  ;;  %7071 = vmatmul.mubr.bf16.vlgmr.msra.gmra.mxu1 %v8073_v39  ;;  %v7383_v14 = vld [vmem:[#allocation3 + $0x320] ss:$16 sps:$4 sm:$0xff]  }
  0xcd   : > { %3318 = vmatpush1.bf16.msra.mxu1 %v7293_v17  ;;  %7074 = vmatprep.mubr.bf16.mxu1 %v8101_v47  ;;  %v7343_v17 = vld [vmem:[#allocation3 + $0x124] ss:$16 sps:$4 sm:$0xff]  }
  0xce   : > { %3319 = vmatprep.subr.bf16.mxu1 %v7298_v18  ;;  %v7386_v18 = vld [vmem:[#allocation3 + $0x300] ss:$16 sps:$4 sm:$0xff]  }
  0xcf   : > { %3513 = vmatpush1.bf16.msra.mxu0 %v7338_v15  ;;  %v11511_v15 = vlaneseq }
  0xd0   : > { %3514 = vmatprep.subr.bf16.mxu0 %v7346_v16  ;;  %v7388_v16 = vld [vmem:[#allocation3 + $0x304] ss:$16 sps:$4 sm:$0xff]  }
  0xd1   : > { %3320 = vmatpush1.bf16.msra.mxu1 %v7296_v21  ;;  %v7349_v21 = vld [vmem:[#allocation3 + $0x104] ss:$16 sps:$4 sm:$0xff]  }
  0xd2   : > { %1351 = vmatmul.mubr.bf16.gmra.mxu0 %v8073_v39  ;;  %3321 = vmatprep.subr.bf16.mxu1 %v7301_v22  ;;  %v7362_v39 = vld [vmem:[#allocation3 + $0x200] ss:$16 sps:$4 sm:$0xff]   ;;  %v7391_v22 = vld [vmem:[#allocation3 + $0x4e4] ss:$16 sps:$4 sm:$0xff]  }
  0xd3   : > { %1360 = vmatprep.mubr.bf16.mxu0 %v11517_v1  ;;  %3515 = vmatpush1.bf16.msra.mxu0 %v7344_v19  ;;  %v8270_v19 = vshrl.u32 %v11511_v15, 7 }
  0xd4   : > { %3516 = vmatprep.subr.bf16.mxu0 %v7352_v20  ;;  %7075 = vmatmul.mubr.bf16.gmra.mxu1 %v8126_v54  ;;  %v7341_v20 = vld [vmem:[#allocation3 + $0x120] ss:$16 sps:$4 sm:$0xff]  }
  0xd5   : > { %3322 = vmatpush1.bf16.msra.mxu1 %v7299_v25  ;;  %7078 = vmatprep.mubr.bf16.mxu1 %v8148_v60  ;;  %11647 = vst [vmem:[#allocation9_spill] sm:$0xff] %v8270_v19  ;;  %v7347_v25 = vld [vmem:[#allocation3 + $0x100] ss:$16 sps:$4 sm:$0xff]  }
  0xd6   : > { %3323 = vmatprep.subr.bf16.mxu1 %v7304_v26 }
  0xd7   : > { %3517 = vmatpush1.bf16.msra.mxu0 %v7350_v23  ;;  %v8273_v23 = vsub.s32 1, %v8270_v19 }
  0xd8   : > { %3518 = vmatprep.subr.bf16.mxu0 %v7355_v24  ;;  %v8282_v24 = vld [vmem:[%s11501_s2] sm:$0x7f] }
  0xd9   : > { %3324 = vmatpush1.bf16.msra.mxu1 %v7302_v29  ;;  %11648 = vst [vmem:[#allocation10_spill] sm:$0xff] %v8273_v23 }
  0xda   : > { %1361 = vmatmul.mubr.bf16.gmra.mxu0 %v8101_v47  ;;  %3325 = vmatprep.subr.bf16.mxu1 %v7307_v30  ;;  %v7368_v47 = vld [vmem:[#allocation3 + $0x3c0] ss:$16 sps:$4 sm:$0xff]  }
  0xdb   : > { %1370 = vmatprep.mubr.bf16.mxu0 %v11517_v1  ;;  %3519 = vmatpush1.bf16.msra.mxu0 %v7353_v27  ;;  %v8287_v27 = vrot.slane %v8282_v24, %v8273_v23 }
  0xdc   : > { %3520 = vmatprep.subr.bf16.mxu0 %v7358_v28  ;;  %7079 = vmatmul.mubr.bf16.gmra.mxu1 %v8161_v63 }
  0xdd   : > { %3326 = vmatpush1.bf16.msra.mxu1 %v7305_v33  ;;  %7082 = vmatprep.mubr.bf16.mxu1 %v8168_v2 }
  0xde   : > { %3327 = vmatprep.subr.bf16.mxu1 %v7310_v34 }
  0xdf   : > { %3521 = vmatpush1.bf16.msra.mxu0 %v7356_v31 }
  0xe0   : > { %3522 = vmatprep.subr.bf16.mxu0 %v7361_v32 }
  0xe1   : > { %3328 = vmatpush1.bf16.msra.mxu1 %v7308_v37 }
  0xe2   : > { %1371 = vmatmul.mubr.bf16.gmra.mxu0 %v8126_v54  ;;  %3329 = vmatprep.subr.bf16.mxu1 %v7313_v38  ;;  %v7325_v54 = vld [vmem:[#allocation3 + $0x1a4] ss:$16 sps:$4 sm:$0xff]  }
  0xe3   : > { %1380 = vmatprep.mubr.bf16.mxu0 %v11517_v1  ;;  %3523 = vmatpush1.bf16.msra.mxu0 %v7359_v35 }
  0xe4   : > { %3524 = vmatprep.subr.bf16.mxu0 %v7364_v36  ;;  %7083 = vmatmul.mubr.bf16.gmra.mxu1 %v8175_v3 }
  0xe5   : > { %3330 = vmatpush1.bf16.msra.mxu1 %v7311_v41  ;;  %7086 = vmatprep.mubr.bf16.mxu1 %v8182_v4 }
  0xe6   : > { %3331 = vmatprep.subr.bf16.mxu1 %v7316_v42 }
  0xe7   : > { %3525 = vmatpush1.bf16.msra.mxu0 %v7362_v39 }
  0xe8   : > { %3526 = vmatprep.subr.bf16.mxu0 %v7367_v40 }
  0xe9   : > { %3332 = vmatpush1.bf16.msra.mxu1 %v7314_v45  ;;  %v8308_v45 = vld [vmem:[#allocation3 + $0x4e0] ss:$16 sps:$4 sm:$0xff]  }
  0xea   : > { %1381 = vmatmul.mubr.bf16.gmra.mxu0 %v8148_v60  ;;  %3333 = vmatprep.subr.bf16.mxu1 %v7319_v46  ;;  %v7382_v60 = vld [vmem:[#allocation3 + $0x344] ss:$16 sps:$4 sm:$0xff]  }
  0xeb   : > { %1390 = vmatprep.mubr.bf16.mxu0 %v11517_v1  ;;  %3527 = vmatpush2.bf16.msra.mxu0 %v7365_v43 }
  0xec   : > { %3528 = vmatprep.subr.bf16.mxu0 %v7370_v44  ;;  %7087 = vmatmul.mubr.bf16.gmra.mxu1 %v8189_v6 }
  0xed   : > { %3334 = vmatpush2.bf16.msra.mxu1 %v7317_v49  ;;  %7090 = vmatprep.mubr.bf16.mxu1 %v8196_v7 }
  0xee   : > { %3335 = vmatprep.subr.bf16.mxu1 %v7322_v50 }
  0xef   : > { %3529 = vmatpush2.bf16.msra.mxu0 %v7368_v47 }
  0xf0   : > { %3530 = vmatprep.subr.bf16.mxu0 %v7373_v48 }
  0xf1   : > { %3336 = vmatpush2.bf16.msra.mxu1 %v7320_v53 }
  0xf2   : > { %1391 = vmatmul.mubr.bf16.gmra.mxu0 %v8161_v63  ;;  %3337 = vmatprep.subr.bf16.mxu1 %v7325_v54  ;;  %v7380_v63 = vld [vmem:[#allocation3 + $0x340] ss:$16 sps:$4 sm:$0xff]  }
  0xf3   : > { %1400 = vmatprep.mubr.bf16.mxu0 %v11517_v1  ;;  %3531 = vmatpush2.bf16.msra.mxu0 %v7371_v51 }
  0xf4   : > { %3532 = vmatprep.subr.bf16.mxu0 %v7376_v52  ;;  %7091 = vmatmul.mubr.bf16.gmra.mxu1 %v8203_v8 }
  0xf5   : > { %3338 = vmatpush2.bf16.msra.mxu1 %v7323_v57  ;;  %7094 = vmatprep.mubr.bf16.mxu1 %v8210_v9 }
  0xf6   : > { %3339 = vmatprep.subr.bf16.mxu1 %v7328_v58 }
  0xf7   : > { %3533 = vmatpush2.bf16.msra.mxu0 %v7374_v55  ;;  %v8325_v55 = vld [vmem:[#allocation3 + $0x4c0] ss:$16 sps:$4 sm:$0xff]  }
  0xf8   : > { %3534 = vmatprep.subr.bf16.mxu0 %v7379_v56 }
  0xf9   : > { %3340 = vmatpush2.bf16.msra.mxu1 %v7326_v61 }
  0xfa   : > { %1401 = vmatmul.mubr.bf16.gmra.mxu0 %v8168_v2  ;;  %3341 = vmatprep.subr.bf16.mxu1 %v7331_v62  ;;  %v7335_v2 = vld [vmem:[#allocation3 + $0x140] ss:$16 sps:$4 sm:$0xff]  }
  0xfb   : > { %1410 = vmatprep.mubr.bf16.mxu0 %v11517_v1  ;;  %3535 = vmatpush2.bf16.msra.mxu0 %v7377_v59  ;;  %v8331_v59 = vld [vmem:[#allocation3 + $0x4a4] ss:$16 sps:$4 sm:$0xff]  }
  0xfc   : > { %3536 = vmatprep.subr.bf16.mxu0 %v7382_v60  ;;  %7095 = vmatmul.mubr.bf16.gmra.mxu1 %v8217_v10 }
  0xfd   : > { %3342 = vmatpush2.bf16.msra.mxu1 %v7329_v5  ;;  %7098 = vmatprep.mubr.bf16.mxu1 %v8224_v11 }
  0xfe   : > { %3343 = vmatprep.subr.bf16.mxu1 %v7337_v13  ;;  %v8339_v13 = vld [vmem:[#allocation3 + $0x4a0] ss:$16 sps:$4 sm:$0xff]  }
  0xff   : > { %3537 = vmatpush2.bf16.msra.mxu0 %v7380_v63 }
 0x100   : > { %3538 = vmatprep.subr.bf16.mxu0 %v7385_v0 }
 0x101   : > { %3344 = vmatpush2.bf16.msra.mxu1 %v7335_v2  ;;  %v8346_v2 = vld [vmem:[#allocation3 + $0x484] ss:$16 sps:$4 sm:$0xff]  }
 0x102   : > { %1411 = vmatmul.mubr.bf16.gmra.mxu0 %v8175_v3  ;;  %3345 = vmatprep.subr.bf16.mxu1 %v7343_v17  ;;  %v8276_v3 = vsub.s32 0, %v8270_v19 }
 0x103   : > { %1420 = vmatprep.mubr.bf16.mxu0 %v11517_v1  ;;  %3539 = vmatpush2.bf16.msra.mxu0 %v7383_v14 }
 0x104   : > { %3540 = vmatprep.subr.bf16.mxu0 %v7388_v16  ;;  %11649 = vst [vmem:[#allocation11_spill] sm:$0xff] %v8276_v3  ;;  %7099 = vmatmul.mubr.bf16.gmra.mxu1 %v8231_v12  ;;  %v8292_v28 = vrot.slane %v8282_v24, %v8276_v3 }
 0x105   : > { %3346 = vmatpush2.bf16.msra.mxu1 %v7341_v20 }
 0x106   : > { %3347 = vmatprep.subr.bf16.mxu1 %v7349_v21 }
 0x107   : > { %3541 = vmatpush2.bf16.msra.mxu0 %v7386_v18 }
 0x108   : > { %3703 = vmatprep.subr.bf16.mxu0 %v7391_v22 }
 0x109   : > { %3348 = vmatpush2.bf16.msra.mxu1 %v7347_v25 }
 0x10a   : > { %v956_v26 = vpop.f32.mrf.mxu0  ;;  %1421 = vmatmul.mubr.bf16.gmra.mxu0 %v8182_v4  ;;  %7102 = vmatprep.subr.bf16.mxu1 %v7391_v22 }
 0x10b   : > { %1430 = vmatprep.mubr.bf16.mxu0 %v11517_v1  ;;  %v957_v4 = vadd.f32 %v956_v26, %v8292_v28  ;;  %v8357_v26 = vld [vmem:[#allocation3 + $0x480] ss:$16 sps:$4 sm:$0xff]  }
 0x10c   : > { %v958_v29 = vpop.f32.mrf.mxu0  ;;  %v8297_v34 = vpop.f32.mrf.mxu1 }
 0x10d   : > { %v959_v31 = vadd.f32 %v958_v29, %v8287_v27  ;;  %v1662_v41 = vmax.f32 %v957_v4, 0.0 }
 0x10e   : > { %v960_v30 = vpop.f32.mrf.mxu0  ;;  %v8301_v38 = vpop.f32.mrf.mxu1 }
 0x10f   : > { %v961_v32 = vadd.f32 %v960_v30, %v8292_v28  ;;  %v1663_v39 = vmax.f32 %v959_v31, 0.0 }
 0x110   : > { %v962_v33 = vpop.f32.mrf.mxu0  ;;  %v8304_v43 = vpop.f32.mrf.mxu1 }
 0x111   : > { %v963_v35 = vadd.f32 %v962_v33, %v8287_v27  ;;  %v1669_v36 = vmax.f32 %v961_v32, 0.0  ;;  %v8363_v32 = vld [vmem:[#allocation3 + $0x464] ss:$16 sps:$4 sm:$0xff]  }
 0x112   : > { %v966_v37 = vpop.f32.mrf.mxu0  ;;  %1431 = vmatmul.mubr.bf16.gmra.mxu0 %v8189_v6  ;;  %v8312_v48 = vpop.f32.mrf.mxu1  ;;  %v8314_v6 = vld [vmem:[#allocation3 + $0x4c4] ss:$16 sps:$4 sm:$0xff]  }
 0x113   : > { %v1670_v40 = vmax.f32 %v963_v35, 0.0  ;;  %1440 = vmatprep.mubr.bf16.mxu0 %v11517_v1  ;;  %v8310_v46 = vpack.c.bf16 %v1669_v36, %v1662_v41  ;;  %v967_v51 = vadd.f32 %v966_v37, %v8292_v28 }
 0x114   : > { %v968_v42 = vpop.f32.mrf.mxu0  ;;  %v8321_v53 = vpop.f32.mrf.mxu1 }
 0x115   : > { %v8306_v44 = vpack.c.bf16 %v1670_v40, %v1663_v39  ;;  %11651 = vst [vmem:[#allocation13_spill] sm:$0xff] %v8310_v46  ;;  %v969_v49 = vadd.f32 %v968_v42, %v8287_v27  ;;  %v1676_v62 = vmax.f32 %v967_v51, 0.0  ;;  %v8371_v40 = vld [vmem:[#allocation3 + $0x460] ss:$16 sps:$4 sm:$0xff]  }
 0x116   : > { %v970_v47 = vpop.f32.mrf.mxu0  ;;  %v8328_v58 = vpop.f32.mrf.mxu1 }
 0x117   : > { %11650 = vst [vmem:[#allocation12_spill] sm:$0xff] %v8306_v44  ;;  %v971_v50 = vadd.f32 %v970_v47, %v8292_v28  ;;  %3349 = vmatprep.mubr.bf16.mxu1 %v8306_v44  ;;  %v1677_v60 = vmax.f32 %v969_v49, 0.0  ;;  %v8378_v47 = vld [vmem:[#allocation3 + $0x444] ss:$16 sps:$4 sm:$0xff]  }
 0x118   : > { %v972_v52 = vpop.f32.mrf.mxu0  ;;  %3350 = vmatmul.mubr.bf16.vlgmr.msra.gmra.mxu1 %v8310_v46  ;;  %v8334_v0 = vpop.f32.mrf.mxu1  ;;  %v11663_v46 = vmov 0  }
 0x119   : > { %v973_v54 = vadd.f32 %v972_v52, %v8287_v27  ;;  %7118 = vmatpush1.bf16.msra.mxu1 %v8308_v45  ;;  %v1683_v56 = vmax.f32 %v971_v50, 0.0 }
 0x11a   : > { %v976_v57 = vpop.f32.mrf.mxu0  ;;  %1441 = vmatmul.mubr.bf16.gmra.mxu0 %v8196_v7  ;;  %7103 = vmatprep.subr.bf16.mxu1 %v8314_v6  ;;  %v8343_v16 = vpop.f32.mrf.mxu1 }
 0x11b   : > { %v1684_v61 = vmax.f32 %v973_v54, 0.0  ;;  %1450 = vmatprep.mubr.bf16.mxu0 %v11517_v1  ;;  %v8341_v7 = vpack.c.bf16 %v1683_v56, %v1676_v62  ;;  %v977_v20 = vadd.f32 %v976_v57, %v8292_v28  ;;  %v8389_v57 = vld [vmem:[#allocation3 + $0x440] ss:$16 sps:$4 sm:$0xff]  }
 0x11c   : > { %v978_v63 = vpop.f32.mrf.mxu0  ;;  %v8353_v22 = vpop.f32.mrf.mxu1 }
 0x11d   : > { %v8336_v5 = vpack.c.bf16 %v1684_v61, %v1677_v60  ;;  %7119 = vmatpush1.bf16.msra.mxu1 %v8325_v55  ;;  %11653 = vst [vmem:[#allocation15_spill] sm:$0xff] %v8341_v7  ;;  %v979_v17 = vadd.f32 %v978_v63, %v8287_v27  ;;  %v1690_v35 = vmax.f32 %v977_v20, 0.0  ;;  %v8395_v63 = vld [vmem:[#allocation3 + $0x424] ss:$16 sps:$4 sm:$0xff]  }
 0x11e   : > { %v980_v14 = vpop.f32.mrf.mxu0  ;;  %7104 = vmatprep.subr.bf16.mxu1 %v8331_v59  ;;  %v8360_v31 = vpop.f32.mrf.mxu1 }
 0x11f   : > { %11652 = vst [vmem:[#allocation14_spill] sm:$0xff] %v8336_v5  ;;  %v981_v18 = vadd.f32 %v980_v14, %v8292_v28  ;;  %3359 = vmatprep.mubr.bf16.mxu1 %v8336_v5  ;;  %v1691_v4 = vmax.f32 %v979_v17, 0.0 }
 0x120   : > { %v982_v21 = vpop.f32.mrf.mxu0  ;;  %3360 = vmatmul.mubr.bf16.gmra.mxu1 %v8341_v7  ;;  %v8366_v37 = vpop.f32.mrf.mxu1 }
 0x121   : > { %v983_v25 = vadd.f32 %v982_v21, %v8287_v27  ;;  %7120 = vmatpush1.bf16.msra.mxu1 %v8339_v13  ;;  %v1697_v29 = vmax.f32 %v981_v18, 0.0 }
 0x122   : > { %v986_v30 = vpop.f32.mrf.mxu0  ;;  %1451 = vmatmul.mubr.bf16.gmra.mxu0 %v8203_v8  ;;  %7105 = vmatprep.subr.bf16.mxu1 %v8346_v2  ;;  %v8375_v42 = vpop.f32.mrf.mxu1 }
 0x123   : > { %v1698_v33 = vmax.f32 %v983_v25, 0.0  ;;  %1460 = vmatprep.mubr.bf16.mxu0 %v11517_v1  ;;  %v8373_v8 = vpack.c.bf16 %v1697_v29, %v1690_v35  ;;  %v987_v51 = vadd.f32 %v986_v30, %v8292_v28  ;;  %v8403_v29 = vld [vmem:[#allocation3 + $0x420] ss:$16 sps:$4 sm:$0xff]   ;;  %v11516_v35 = vsub.s32 3, %v8270_v19 }
 0x124   : > { %v988_v36 = vpop.f32.mrf.mxu0  ;;  %v8385_v54 = vpop.f32.mrf.mxu1 }
 0x125   : > { %v8368_v39 = vpack.c.bf16 %v1698_v33, %v1691_v4  ;;  %7121 = vmatpush1.bf16.msra.mxu1 %v8357_v26  ;;  %11655 = vst [vmem:[#allocation17_spill] sm:$0xff] %v8373_v8  ;;  %v989_v49 = vadd.f32 %v988_v36, %v8287_v27  ;;  %v1704_v18 = vmax.f32 %v987_v51, 0.0  ;;  %v8410_v33 = vld [vmem:[#allocation3 + $0x404] ss:$16 sps:$4 sm:$0xff]  }
 0x126   : > { %v990_v41 = vpop.f32.mrf.mxu0  ;;  %7106 = vmatprep.subr.bf16.mxu1 %v8363_v32  ;;  %v8392_v62 = vpop.f32.mrf.mxu1 }
 0x127   : > { %11654 = vst [vmem:[#allocation16_spill] sm:$0xff] %v8368_v39  ;;  %v991_v50 = vadd.f32 %v990_v41, %v8292_v28  ;;  %3369 = vmatprep.mubr.bf16.mxu1 %v8368_v39  ;;  %v1705_v14 = vmax.f32 %v989_v49, 0.0 }
 0x128   : > { %v992_v52 = vpop.f32.mrf.mxu0  ;;  %3370 = vmatmul.mubr.bf16.gmra.mxu1 %v8373_v8  ;;  %v8398_v21 = vpop.f32.mrf.mxu1 }
 0x129   : > { %v993_v56 = vadd.f32 %v992_v52, %v8287_v27  ;;  %7122 = vmatpush1.bf16.msra.mxu1 %v8371_v40  ;;  %v1711_v60 = vmax.f32 %v991_v50, 0.0 }
 0x12a   : > { %v996_v61 = vpop.f32.mrf.mxu0  ;;  %1461 = vmatmul.mubr.bf16.gmra.mxu0 %v8210_v9  ;;  %7107 = vmatprep.subr.bf16.mxu1 %v8378_v47  ;;  %v8407_v4 = vpop.f32.mrf.mxu1 }
 0x12b   : > { %v1712_v17 = vmax.f32 %v993_v56, 0.0  ;;  %1470 = vmatprep.mubr.bf16.mxu0 %v11517_v1  ;;  %v8405_v9 = vpack.c.bf16 %v1711_v60, %v1704_v18  ;;  %v997_v49 = vadd.f32 %v996_v61, %v8292_v28  ;;  %v8422_v56 = vld [vmem:[#allocation3 + $0x400] ss:$16 sps:$4 sm:$0xff]   ;;  %v8428_v61 = vld [vmem:[#allocation3 + $0x5e4] ss:$16 sps:$4 sm:$0xff]   ;;  %v8433_v18 = vrot.slane %v8282_v24, %v11516_v35 }
 0x12c   : > { %v998_v20 = vpop.f32.mrf.mxu0  ;;  %v8418_v51 = vpop.f32.mrf.mxu1 }
 0x12d   : > { %v8400_v25 = vpack.c.bf16 %v1712_v17, %v1705_v14  ;;  %7123 = vmatpush1.bf16.msra.mxu1 %v8389_v57  ;;  %11657 = vst [vmem:[#allocation19_spill] sm:$0xff] %v8405_v9  ;;  %v999_v36 = vadd.f32 %v998_v20, %v8287_v27 }
 0x12e   : > { %v1000_v30 = vpop.f32.mrf.mxu0  ;;  %7108 = vmatprep.subr.bf16.mxu1 %v8395_v63  ;;  %v8425_v17 = vpop.f32.mrf.mxu1 }
 0x12f   : > { %11656 = vst [vmem:[#allocation18_spill] sm:$0xff] %v8400_v25  ;;  %v1001_v41 = vadd.f32 %v1000_v30, %v8292_v28  ;;  %3379 = vmatprep.mubr.bf16.mxu1 %v8400_v25  ;;  %v1719_v20 = vmax.f32 %v999_v36, 0.0  ;;  %v8448_v36 = vld [vmem:[#allocation3 + $0x5c4] ss:$16 sps:$4 sm:$0xff]  }
 0x130   : > { %v1002_v50 = vpop.f32.mrf.mxu0  ;;  %3380 = vmatmul.mubr.bf16.gmra.mxu1 %v8405_v9  ;;  %v8436_v15 = vpop.f32.mrf.mxu1  ;;  %v8441_v9 = vld [vmem:[#allocation3 + $0x5e0] ss:$16 sps:$4 sm:$0xff]   ;;  %11660 = vst [vmem:[#allocation22_spill] sm:$0xff] %v8448_v36 }
 0x131   : > { %v1003_v52 = vadd.f32 %v1002_v50, %v8287_v27  ;;  %7124 = vmatpush1.bf16.msra.mxu1 %v8403_v29  ;;  %v1725_v60 = vmax.f32 %v1001_v41, 0.0  ;;  %v1718_v50 = vmax.f32 %v997_v49, 0.0  ;;  %v1152_v49 = vadd.f32 %v8301_v38, %v8433_v18 }
 0x132   : > { %v1006_v14 = vpop.f32.mrf.mxu0  ;;  %1471 = vmatmul.mubr.bf16.gmra.mxu0 %v8217_v10  ;;  %7109 = vmatprep.subr.bf16.mxu1 %v8410_v33  ;;  %v8445_v39 = vpop.f32.mrf.mxu1 }
 0x133   : > { %v1726_v30 = vmax.f32 %v1003_v52, 0.0  ;;  %1480 = vmatprep.mubr.bf16.mxu0 %v11517_v1  ;;  %v8443_v25 = vpack.c.bf16 %v1725_v60, %v1718_v50  ;;  %v1156_v52 = vadd.f32 %v8312_v48, %v8433_v18  ;;  %v1007_v50 = vadd.f32 %v1006_v14, %v8292_v28  ;;  %v8464_v48 = vld [vmem:[#allocation3 + $0x5c0] ss:$16 sps:$4 sm:$0xff]   ;;  %v8470_v14 = vld [vmem:[#allocation3 + $0x5a4] ss:$16 sps:$4 sm:$0xff]  }
 0x134   : > { %v1008_v41 = vpop.f32.mrf.mxu0  ;;  %v8460_v1 = vpop.f32.mrf.mxu1  ;;  %11661 = vst [vmem:[#allocation23_spill] sm:$0xff] %v8464_v48  ;;  %11662 = vst [vmem:[#allocation24_spill] sm:$0xff] %v8470_v14  ;;  %v1665_v60 = vmax.f32 %v1152_v49, 0.0  ;;  %v1162_v49 = vadd.f32 %v8328_v58, %v8433_v18 }
 0x135   : > { %v8438_v10 = vpack.c.bf16 %v1726_v30, %v1719_v20  ;;  %7125 = vmatpush1.bf16.msra.mxu1 %v8422_v56  ;;  %11659 = vst [vmem:[#allocation21_spill] sm:$0xff] %v8443_v25  ;;  %v1009_v20 = vadd.f32 %v1008_v41, %v8287_v27 }
 0x136   : > { %v1010_v8 = vpop.f32.mrf.mxu0  ;;  %7110 = vmatprep.subr.bf16.mxu1 %v8428_v61 }
 0x137   : > { %11658 = vst [vmem:[#allocation20_spill] sm:$0xff] %v8438_v10  ;;  %v1011_v30 = vadd.f32 %v1010_v8, %v8292_v28  ;;  %3389 = vmatprep.mubr.bf16.mxu1 %v8438_v10  ;;  %v8467_v8 = vpop.f32.mrf.mxu1  ;;  %v1733_v10 = vmax.f32 %v1009_v20, 0.0 }
 0x138   : > { %v1012_v35 = vpop.f32.mrf.mxu0  ;;  %3390 = vmatmul.mubr.bf16.gmra.mxu1 %v8443_v25  ;;  %v1672_v25 = vmax.f32 %v1156_v52, 0.0 }
 0x139   : > { %v1013_v38 = vadd.f32 %v1012_v35, %v8287_v27  ;;  %7126 = vmatpush2.bf16.msra.mxu1 %v8441_v9  ;;  %v1739_v41 = vmax.f32 %v1011_v30, 0.0  ;;  %v11664_v35 = vsub.s32 2, %v8270_v19  ;;  %v1732_v30 = vmax.f32 %v1007_v50, 0.0 }
 0x13a   : > { %v1016_v7 = vpop.f32.mrf.mxu0  ;;  %1481 = vmatmul.mubr.bf16.gmra.mxu0 %v8224_v11  ;;  %7111 = vmatprep.subr.bf16.mxu1 %v8448_v36  ;;  %v8478_v11 = vpop.f32.mrf.mxu1  ;;  %v8483_v36 = vld [vmem:[#allocation3 + $0x5a0] ss:$16 sps:$4 sm:$0xff]  }
 0x13b   : > { %v1740_v5 = vmax.f32 %v1013_v38, 0.0  ;;  %1490 = vmatprep.mubr.bf16.mxu0 %v11663_v46  ;;  %v8476_v44 = vrot.slane %v8282_v24, %v11664_v35  ;;  %11666 = vst [vmem:[#allocation26_spill] sm:$0xff] %v8483_v36  ;;  %v8487_v52 = vpack.c.bf16 %v1739_v41, %v1732_v30  ;;  %v8492_v24 = vld [vmem:[#allocation3 + $0x584] ss:$16 sps:$4 sm:$0xff]   ;;  %v8499_v35 = vpack.c.bf16 %v1672_v25, %v1665_v60 }
 0x13c   : > { %v1018_v23 = vpop.f32.mrf.mxu0  ;;  %v8489_v38 = vpop.f32.mrf.mxu1  ;;  %v1017_v30 = vadd.f32 %v1016_v7, %v8292_v28  ;;  %v1679_v7 = vmax.f32 %v1162_v49, 0.0  ;;  %v1172_v49 = vadd.f32 %v8360_v31, %v8433_v18 }
 0x13d   : > { %v8480_v3 = vpack.c.bf16 %v1740_v5, %v1733_v10  ;;  %7127 = vmatpush2.bf16.msra.mxu1 %v8464_v48  ;;  %11667 = vst [vmem:[#allocation27_spill] sm:$0xff] %v8487_v52  ;;  %v1166_v5 = vadd.f32 %v8343_v16, %v8433_v18  ;;  %v1019_v10 = vadd.f32 %v1018_v23, %v8287_v27  ;;  %11668 = vst [vmem:[#allocation28_spill] sm:$0xff] %v8499_v35 }
 0x13e   : > { %v1020_v20 = vpop.f32.mrf.mxu0  ;;  %7112 = vmatprep.subr.bf16.mxu1 %v8470_v14  ;;  %v1150_v58 = vadd.f32 %v8297_v34, %v8476_v44  ;;  %v1154_v41 = vadd.f32 %v8304_v43, %v8476_v44  ;;  %v8507_v16 = vpop.f32.mrf.mxu1  ;;  %v8517_v43 = vld [vmem:[#allocation3 + $0x564] ss:$16 sps:$4 sm:$0xff]   ;;  %v1746_v14 = vmax.f32 %v1017_v30, 0.0 }
 0x13f   : > { %11665 = vst [vmem:[#allocation25_spill] sm:$0xff] %v8480_v3  ;;  %v1021_v50 = vadd.f32 %v1020_v20, %v8292_v28  ;;  %3399 = vmatprep.mubr.bf16.mxu1 %v8480_v3  ;;  %11669 = vst [vmem:[#allocation29_spill] sm:$0xff] %v8507_v16  ;;  %v8511_v20 = vld [vmem:[#allocation3 + $0x580] ss:$16 sps:$4 sm:$0xff]   ;;  %v1747_v3 = vmax.f32 %v1019_v10, 0.0 }
 0x140   : > { %v1022_v46 = vpop.f32.mrf.mxu0  ;;  %3400 = vmatmul.mubr.bf16.gmra.mxu1 %v8487_v52  ;;  %v8514_v34 = vpop.f32.mrf.mxu1  ;;  %11670 = vst [vmem:[#allocation30_spill] sm:$0xff] %v8517_v43  ;;  %v1686_v52 = vmax.f32 %v1166_v5, 0.0 }
 0x141   : > { %v1023_v23 = vadd.f32 %v1022_v46, %v8287_v27  ;;  %7128 = vmatpush2.bf16.msra.mxu1 %v8483_v36  ;;  %v1753_v25 = vmax.f32 %v1021_v50, 0.0  ;;  %v1664_v46 = vmax.f32 %v1150_v58, 0.0  ;;  %v1671_v36 = vmax.f32 %v1154_v41, 0.0  ;;  %v8534_v58 = vld [vmem:[#allocation3 + $0x544] ss:$16 sps:$4 sm:$0xff]  }
 0x142   : > { %v1026_v60 = vpop.f32.mrf.mxu0  ;;  %1491 = vmatmul.mubr.bf16.gmra.mxu0 %v8231_v12  ;;  %7113 = vmatprep.subr.bf16.mxu1 %v8492_v24  ;;  %v8520_v50 = vpop.f32.mrf.mxu1  ;;  %v8525_v12 = vld [vmem:[#allocation3 + $0x560] ss:$16 sps:$4 sm:$0xff]   ;;  %11674 = vst [vmem:[#allocation34_spill] sm:$0xff] %v8534_v58  ;;  %v8541_v30 = vpack.c.bf16 %v1686_v52, %v1679_v7 }
 0x143   : > { %v1754_v19 = vmax.f32 %v1023_v23, 0.0  ;;  %3542 = vmatprep.mubr.bf16.mxu0 %v8499_v35  ;;  %11672 = vst [vmem:[#allocation32_spill] sm:$0xff] %v8525_v12  ;;  %v8529_v5 = vpack.c.bf16 %v1753_v25, %v1746_v14  ;;  %v8543_v31 = vpack.c.bf16 %v1671_v36, %v1664_v46  ;;  %v1160_v14 = vadd.f32 %v8321_v53, %v8476_v44  ;;  %v8555_v52 = vld [vmem:[#allocation3 + $0x540] ss:$16 sps:$4 sm:$0xff]  }
 0x144   : > { %v1028_v48 = vpop.f32.mrf.mxu0  ;;  %v8531_v23 = vpop.f32.mrf.mxu1  ;;  %11675 = vst [vmem:[#allocation35_spill] sm:$0xff] %v8541_v30  ;;  %v1164_v25 = vadd.f32 %v8334_v0, %v8476_v44  ;;  %v1027_v35 = vadd.f32 %v1026_v60, %v8292_v28  ;;  %v8561_v0 = vld [vmem:[#allocation3 + $0x524] ss:$16 sps:$4 sm:$0xff]   ;;  %v1693_v60 = vmax.f32 %v1172_v49, 0.0  ;;  %v8573_v49 = vld [vmem:[#allocation3 + $0x520] ss:$16 sps:$4 sm:$0xff]  }
 0x145   : > { %v8522_v16 = vpack.c.bf16 %v1754_v19, %v1747_v3  ;;  %7129 = vmatpush2.bf16.msra.mxu1 %v8511_v20  ;;  %11673 = vst [vmem:[#allocation33_spill] sm:$0xff] %v8529_v5  ;;  %v1176_v19 = vadd.f32 %v8375_v42, %v8433_v18  ;;  %v1029_v3 = vadd.f32 %v1028_v48, %v8287_v27  ;;  %11676 = vst [vmem:[#allocation36_spill] sm:$0xff] %v8543_v31 }
 0x146   : > { %v1030_v10 = vpop.f32.mrf.mxu0  ;;  %7114 = vmatprep.subr.bf16.mxu1 %v8517_v43  ;;  %v8551_v42 = vpop.f32.mrf.mxu1 }
 0x147   : > { %11671 = vst [vmem:[#allocation31_spill] sm:$0xff] %v8522_v16  ;;  %v1031_v41 = vadd.f32 %v1030_v10, %v8292_v28  ;;  %3409 = vmatprep.mubr.bf16.mxu1 %v8522_v16  ;;  %11677 = vst [vmem:[#allocation37_spill] sm:$0xff] %v8551_v42  ;;  %v1700_v46 = vmax.f32 %v1176_v19, 0.0  ;;  %v1761_v10 = vmax.f32 %v1029_v3, 0.0  ;;  %v1685_v16 = vmax.f32 %v1164_v25, 0.0 }
 0x148   : > { %v1032_v43 = vpop.f32.mrf.mxu0  ;;  %3410 = vmatmul.mubr.bf16.gmra.mxu1 %v8529_v5  ;;  %v8558_v53 = vpop.f32.mrf.mxu1  ;;  %v1186_v19 = vadd.f32 %v8407_v4, %v8433_v18 }
 0x149   : > { %v1033_v48 = vadd.f32 %v1032_v43, %v8287_v27  ;;  %7130 = vmatpush2.bf16.msra.mxu1 %v8525_v12  ;;  %v1767_v36 = vmax.f32 %v1031_v41, 0.0  ;;  %v1678_v43 = vmax.f32 %v1160_v14, 0.0  ;;  %v1760_v41 = vmax.f32 %v1027_v35, 0.0 }
 0x14a   : > { %v1036_v7 = vpop.f32.mrf.mxu0  ;;  %3543 = vmatmul.mubr.bf16.vlgmr.msra.gmra.mxu0 %v8543_v31  ;;  %7115 = vmatprep.subr.bf16.mxu1 %v8534_v58  ;;  %v8565_v42 = vpop.f32.mrf.mxu1  ;;  %v1170_v31 = vadd.f32 %v8353_v22, %v8476_v44  ;;  %v1182_v35 = vadd.f32 %v8392_v62, %v8433_v18  ;;  %v8586_v22 = vld [vmem:[#allocation3 + $0x504] ss:$16 sps:$4 sm:$0xff]  }
 0x14b   : > { %v1768_v5 = vmax.f32 %v1033_v48, 0.0  ;;  %3552 = vmatprep.mubr.bf16.mxu0 %v8541_v30  ;;  %3704 = vmatpush1.bf16.msra.mxu0 %v8308_v45  ;;  %v1174_v45 = vadd.f32 %v8366_v37, %v8476_v44  ;;  %v8581_v3 = vpack.c.bf16 %v1767_v36, %v1760_v41  ;;  %v8591_v37 = vpack.c.bf16 %v1700_v46, %v1693_v60  ;;  %v8603_v60 = vld [vmem:[#allocation3 + $0x500] ss:$16 sps:$4 sm:$0xff]  }
 0x14c   : > { %v1038_v12 = vpop.f32.mrf.mxu0  ;;  %3705 = vmatprep.subr.bf16.mxu0 %v8314_v6  ;;  %v8583_v14 = vpop.f32.mrf.mxu1  ;;  %v8594_v62 = vpack.c.bf16 %v1685_v16, %v1678_v43  ;;  %v1037_v4 = vadd.f32 %v1036_v7, %v8292_v28  ;;  %v1714_v16 = vmax.f32 %v1186_v19, 0.0  ;;  %v1192_v19 = vadd.f32 %v8425_v17, %v8433_v18 }
 0x14d   : > { %v8570_v58 = vpack.c.bf16 %v1768_v5, %v1761_v10  ;;  %7131 = vmatpush2.bf16.msra.mxu1 %v8555_v52  ;;  %11678 = vst [vmem:[#allocation38_spill] sm:$0xff] %v8581_v3  ;;  %v1039_v5 = vadd.f32 %v1038_v12, %v8287_v27  ;;  %11679 = vst [vmem:[#allocation39_spill] sm:$0xff] %v8591_v37  ;;  %v1692_v12 = vmax.f32 %v1170_v31, 0.0  ;;  %v1699_v46 = vmax.f32 %v1174_v45, 0.0 }
 0x14e   : > { %v1040_v6 = vpop.f32.mrf.mxu0  ;;  %7116 = vmatprep.subr.bf16.mxu1 %v8561_v0  ;;  %11680 = vst [vmem:[#allocation40_spill] sm:$0xff] %v8594_v62  ;;  %v8598_v36 = vpop.f32.mrf.mxu1  ;;  %v1774_v31 = vmax.f32 %v1037_v4, 0.0  ;;  %v7445_v4 = vld [vmem:[#allocation3 + $0xec] ss:$16 sps:$4 sm:$0xff]   ;;  %v1180_v17 = vadd.f32 %v8385_v54, %v8476_v44 }
 0x14f   : > { %v1041_v25 = vadd.f32 %v1040_v6, %v8292_v28  ;;  %3419 = vmatprep.mubr.bf16.mxu1 %v8570_v58  ;;  %3706 = vmatpush1.bf16.msra.mxu0 %v8325_v55  ;;  %v1707_v55 = vmax.f32 %v1182_v35, 0.0  ;;  %v1775_v6 = vmax.f32 %v1039_v5, 0.0  ;;  %v8617_v35 = vpack.c.bf16 %v1699_v46, %v1692_v12 }
 0x150   : > { %v1042_v48 = vpop.f32.mrf.mxu0  ;;  %3420 = vmatmul.mubr.bf16.gmra.mxu1 %v8581_v3  ;;  %3707 = vmatprep.subr.bf16.mxu0 %v8331_v59  ;;  %v8606_v7 = vpop.f32.mrf.mxu1  ;;  %v1184_v12 = vadd.f32 %v8398_v21, %v8476_v44 }
 0x151   : > { %v1043_v10 = vadd.f32 %v1042_v48, %v8287_v27  ;;  %7132 = vmatpush2.bf16.msra.mxu1 %v8573_v49  ;;  %v1781_v43 = vmax.f32 %v1041_v25, 0.0  ;;  %11682 = vst [vmem:[#allocation42_spill] sm:$0xff] %v8617_v35 }
 0x152   : > { %v1046_v41 = vpop.f32.mrf.mxu0  ;;  %3553 = vmatmul.mubr.bf16.gmra.mxu0 %v8594_v62  ;;  %7117 = vmatprep.subr.bf16.mxu1 %v8586_v22  ;;  %v8611_v30 = vpop.f32.mrf.mxu1 }
 0x153   : > { %v1782_v59 = vmax.f32 %v1043_v10, 0.0  ;;  %3562 = vmatprep.mubr.bf16.mxu0 %v8591_v37  ;;  %3708 = vmatpush1.bf16.msra.mxu0 %v8339_v13  ;;  %v8621_v5 = vpack.c.bf16 %v1781_v43, %v1774_v31  ;;  %v8623_v10 = vpack.c.bf16 %v1714_v16, %v1707_v55  ;;  %v1047_v46 = vadd.f32 %v1046_v41, %v8292_v28 }
 0x154   : > { %v1048_v48 = vpop.f32.mrf.mxu0  ;;  %3709 = vmatprep.subr.bf16.mxu0 %v8346_v2  ;;  %v8625_v13 = vpop.f32.mrf.mxu1  ;;  %v1196_v2 = vadd.f32 %v8445_v39, %v8433_v18  ;;  %v1721_v31 = vmax.f32 %v1192_v19, 0.0  ;;  %v1713_v37 = vmax.f32 %v1184_v12, 0.0  ;;  %v1194_v19 = vadd.f32 %v8436_v15, %v8476_v44 }
 0x155   : > { %v8614_v45 = vpack.c.bf16 %v1782_v59, %v1775_v6  ;;  %7133 = vmatpush2.bf16.msra.mxu1 %v8603_v60  ;;  %11683 = vst [vmem:[#allocation43_spill] sm:$0xff] %v8621_v5  ;;  %11684 = vst [vmem:[#allocation44_spill] sm:$0xff] %v8623_v10  ;;  %v1049_v6 = vadd.f32 %v1048_v48, %v8287_v27 }
 0x156   : > { %v1050_v25 = vpop.f32.mrf.mxu0  ;;  %v8639_v39 = vpop.f32.mrf.mxu1  ;;  %4089 = vmatprep.subr.bf16.mxu1 %v7445_v4  ;;  %v1728_v21 = vmax.f32 %v1196_v2, 0.0  ;;  %v1190_v4 = vadd.f32 %v8418_v51, %v8476_v44  ;;  %v1202_v2 = vadd.f32 %v8467_v8, %v8433_v18 }
 0x157   : > { %11681 = vst [vmem:[#allocation41_spill] sm:$0xff] %v8614_v45  ;;  %v1051_v59 = vadd.f32 %v1050_v25, %v8292_v28  ;;  %3429 = vmatprep.mubr.bf16.mxu1 %v8614_v45  ;;  %3710 = vmatpush1.bf16.msra.mxu0 %v8357_v26  ;;  %v1789_v48 = vmax.f32 %v1049_v6, 0.0  ;;  %v1706_v25 = vmax.f32 %v1180_v17, 0.0 }
 0x158   : > { %v1052_v55 = vpop.f32.mrf.mxu0  ;;  %3430 = vmatmul.mubr.bf16.gmra.mxu1 %v8621_v5  ;;  %3711 = vmatprep.subr.bf16.mxu0 %v8363_v32  ;;  %v8644_v54 = vpop.f32.mrf.mxu1  ;;  %v1788_v32 = vmax.f32 %v1047_v46, 0.0  ;;  %v8668_v46 = vpack.c.bf16 %v1728_v21, %v1721_v31 }
 0x159   : > { %v1053_v16 = vadd.f32 %v1052_v55, %v8287_v27  ;;  %v1795_v43 = vmax.f32 %v1051_v59, 0.0  ;;  %v8671_v15 = vpack.c.bf16 %v1713_v37, %v1706_v25 }
 0x15a   : > { %v1056_v26 = vpop.f32.mrf.mxu0  ;;  %3563 = vmatmul.mubr.bf16.gmra.mxu0 %v8617_v35  ;;  %v8648_v55 = vpop.f32.mrf.mxu1  ;;  %11687 = vst [vmem:[#allocation47_spill] sm:$0xff] %v8668_v46 }
 0x15b   : > { %v1796_v41 = vmax.f32 %v1053_v16, 0.0  ;;  %3572 = vmatprep.mubr.bf16.mxu0 %v8623_v10  ;;  %3712 = vmatpush1.bf16.msra.mxu0 %v8371_v40  ;;  %v1206_v40 = vadd.f32 %v8489_v38, %v8433_v18  ;;  %v8661_v6 = vpack.c.bf16 %v1795_v43, %v1788_v32  ;;  %11688 = vst [vmem:[#allocation48_spill] sm:$0xff] %v8671_v15 }
 0x15c   : > { %v1058_v62 = vpop.f32.mrf.mxu0  ;;  %3713 = vmatprep.subr.bf16.mxu0 %v8378_v47  ;;  %v8663_v12 = vpop.f32.mrf.mxu1  ;;  %v1057_v8 = vadd.f32 %v1056_v26, %v8292_v28 }
 0x15d   : > { %v8653_v59 = vpack.c.bf16 %v1796_v41, %v1789_v48  ;;  %11686 = vst [vmem:[#allocation46_spill] sm:$0xff] %v8661_v6  ;;  %v1059_v47 = vadd.f32 %v1058_v62, %v8287_v27  ;;  %v1720_v62 = vmax.f32 %v1190_v4, 0.0  ;;  %v1727_v48 = vmax.f32 %v1194_v19, 0.0 }
 0x15e   : > { %v1060_v17 = vpop.f32.mrf.mxu0  ;;  %v8675_v16 = vpop.f32.mrf.mxu1  ;;  %v1735_v41 = vmax.f32 %v1202_v2, 0.0  ;;  %v1742_v31 = vmax.f32 %v1206_v40, 0.0  ;;  %v1802_v25 = vmax.f32 %v1057_v8, 0.0  ;;  %v1212_v40 = vadd.f32 %v8514_v34, %v8433_v18 }
 0x15f   : > { %11685 = vst [vmem:[#allocation45_spill] sm:$0xff] %v8653_v59  ;;  %v1061_v51 = vadd.f32 %v1060_v17, %v8292_v28  ;;  %3439 = vmatprep.mubr.bf16.mxu1 %v8653_v59  ;;  %3714 = vmatpush1.bf16.msra.mxu0 %v8389_v57  ;;  %v1803_v37 = vmax.f32 %v1059_v47, 0.0  ;;  %v8689_v2 = vpack.c.bf16 %v1727_v48, %v1720_v62 }
 0x160   : > { %v1062_v38 = vpop.f32.mrf.mxu0  ;;  %3440 = vmatmul.mubr.bf16.gmra.mxu1 %v8661_v6  ;;  %3715 = vmatprep.subr.bf16.mxu0 %v8395_v63  ;;  %v8680_v57 = vpop.f32.mrf.mxu1  ;;  %v1200_v34 = vadd.f32 %v8460_v1, %v8476_v44  ;;  %v1204_v62 = vadd.f32 %v8478_v11, %v8476_v44  ;;  %v1749_v1 = vmax.f32 %v1212_v40, 0.0  ;;  %v1214_v40 = vadd.f32 %v8520_v50, %v8476_v44  ;;  %v11698_v50 = vld [vmem:[#allocation23_spill] sm:$0xff] }
 0x161   : > { %v1063_v43 = vadd.f32 %v1062_v38, %v8287_v27  ;;  %v1809_v21 = vmax.f32 %v1061_v51, 0.0  ;;  %11690 = vst [vmem:[#allocation50_spill] sm:$0xff] %v8689_v2  ;;  %v8695_v51 = vpack.c.bf16 %v1742_v31, %v1735_v41 }
 0x162   : > { %v1066_v32 = vpop.f32.mrf.mxu0  ;;  %3573 = vmatmul.mubr.bf16.gmra.mxu0 %v8671_v15  ;;  %v8684_v4 = vpop.f32.mrf.mxu1 }
 0x163   : > { %v1810_v26 = vmax.f32 %v1063_v43, 0.0  ;;  %3582 = vmatprep.mubr.bf16.mxu0 %v8668_v46  ;;  %3716 = vmatpush1.bf16.msra.mxu0 %v8403_v29  ;;  %v8693_v17 = vpack.c.bf16 %v1809_v21, %v1802_v25  ;;  %11692 = vst [vmem:[#allocation52_spill] sm:$0xff] %v8695_v51  ;;  %v1216_v29 = vadd.f32 %v8531_v23, %v8433_v18  ;;  %v1741_v25 = vmax.f32 %v1204_v62, 0.0 }
 0x164   : > { %v1068_v63 = vpop.f32.mrf.mxu0  ;;  %3717 = vmatprep.subr.bf16.mxu0 %v8410_v33  ;;  %v8697_v38 = vpop.f32.mrf.mxu1  ;;  %v1067_v43 = vadd.f32 %v1066_v32, %v8292_v28  ;;  %v1734_v32 = vmax.f32 %v1200_v34, 0.0 }
 0x165   : > { %v8687_v19 = vpack.c.bf16 %v1810_v26, %v1803_v37  ;;  %11691 = vst [vmem:[#allocation51_spill] sm:$0xff] %v8693_v17  ;;  %v1069_v8 = vadd.f32 %v1068_v63, %v8287_v27  ;;  %v1756_v37 = vmax.f32 %v1216_v29, 0.0  ;;  %v1222_v29 = vadd.f32 %v8558_v53, %v8433_v18 }
 0x166   : > { %v1070_v47 = vpop.f32.mrf.mxu0  ;;  %v8711_v23 = vpop.f32.mrf.mxu1  ;;  %v1816_v63 = vmax.f32 %v1067_v43, 0.0 }
 0x167   : > { %11689 = vst [vmem:[#allocation49_spill] sm:$0xff] %v8687_v19  ;;  %v1071_v33 = vadd.f32 %v1070_v47, %v8292_v28  ;;  %3449 = vmatprep.mubr.bf16.mxu1 %v8687_v19  ;;  %3718 = vmatpush1.bf16.msra.mxu0 %v8422_v56  ;;  %v1817_v11 = vmax.f32 %v1069_v8, 0.0 }
 0x168   : > { %v1072_v48 = vpop.f32.mrf.mxu0  ;;  %3450 = vmatmul.mubr.bf16.gmra.mxu1 %v8693_v17  ;;  %3719 = vmatprep.subr.bf16.mxu0 %v8428_v61  ;;  %v8716_v56 = vpop.f32.mrf.mxu1 }
 0x169   : > { %v1073_v41 = vadd.f32 %v1072_v48, %v8287_v27  ;;  %v1823_v31 = vmax.f32 %v1071_v33, 0.0  ;;  %v11693_v33 = vld [vmem:[#allocation22_spill] sm:$0xff]  ;;  %v11694_v48 = vld [vmem:[#allocation29_spill] sm:$0xff] }
 0x16a   : > { %v1076_v21 = vpop.f32.mrf.mxu0  ;;  %3583 = vmatmul.mubr.bf16.gmra.mxu0 %v8689_v2  ;;  %v8720_v47 = vpop.f32.mrf.mxu1  ;;  %v1210_v2 = vadd.f32 %v11694_v48, %v8476_v44  ;;  %v1755_v48 = vmax.f32 %v1214_v40, 0.0 }
 0x16b   : > { %v1824_v26 = vmax.f32 %v1073_v41, 0.0  ;;  %3592 = vmatprep.mubr.bf16.mxu0 %v8695_v51  ;;  %3720 = vmatpush2.bf16.msra.mxu0 %v8441_v9  ;;  %v1226_v9 = vadd.f32 %v8583_v14, %v8433_v18  ;;  %v8733_v8 = vpack.c.bf16 %v1823_v31, %v1816_v63  ;;  %v1077_v53 = vadd.f32 %v1076_v21, %v8292_v28  ;;  %v11700_v63 = vld [vmem:[#allocation24_spill] sm:$0xff] }
 0x16c   : > { %v1078_v61 = vpop.f32.mrf.mxu0  ;;  %3721 = vmatprep.subr.bf16.mxu0 %v11693_v33  ;;  %v8735_v62 = vpop.f32.mrf.mxu1 }
 0x16d   : > { %v8725_v46 = vpack.c.bf16 %v1824_v26, %v1817_v11  ;;  %11696 = vst [vmem:[#allocation29_spill] sm:$0xff] %v8733_v8  ;;  %v1079_v43 = vadd.f32 %v1078_v61, %v8287_v27  ;;  %v8740_v11 = vpack.c.bf16 %v1756_v37, %v1749_v1  ;;  %v8743_v26 = vpack.c.bf16 %v1741_v25, %v1734_v32 }
 0x16e   : > { %v1080_v34 = vpop.f32.mrf.mxu0  ;;  %v8747_v31 = vpop.f32.mrf.mxu1  ;;  %v1748_v61 = vmax.f32 %v1210_v2, 0.0  ;;  %v1770_v1 = vmax.f32 %v1226_v9, 0.0  ;;  %v1830_v15 = vmax.f32 %v1077_v53, 0.0  ;;  %v1232_v9 = vadd.f32 %v8606_v7, %v8433_v18  ;;  %v11706_v7 = vld [vmem:[#allocation37_spill] sm:$0xff] }
 0x16f   : > { %11695 = vst [vmem:[#allocation22_spill] sm:$0xff] %v8725_v46  ;;  %v1081_v41 = vadd.f32 %v1080_v34, %v8292_v28  ;;  %3459 = vmatprep.mubr.bf16.mxu1 %v8725_v46  ;;  %11697 = vst [vmem:[#allocation53_spill] sm:$0xff] %v8740_v11  ;;  %3722 = vmatpush2.bf16.msra.mxu0 %v11698_v50  ;;  %v1763_v34 = vmax.f32 %v1222_v29, 0.0  ;;  %v1831_v21 = vmax.f32 %v1079_v43, 0.0  ;;  %v11701_v50 = vld [vmem:[#allocation26_spill] sm:$0xff] }
 0x170   : > { %11699 = vst [vmem:[#allocation23_spill] sm:$0xff] %v8743_v26  ;;  %v1082_v14 = vpop.f32.mrf.mxu0  ;;  %3460 = vmatmul.mubr.bf16.gmra.mxu1 %v8733_v8  ;;  %3723 = vmatprep.subr.bf16.mxu0 %v11700_v63  ;;  %v8752_v32 = vpop.f32.mrf.mxu1  ;;  %v8761_v29 = vpack.c.bf16 %v1755_v48, %v1748_v61  ;;  %v1236_v53 = vadd.f32 %v8625_v13, %v8433_v18 }
 0x171   : > { %v1083_v33 = vadd.f32 %v1082_v14, %v8287_v27  ;;  %v1837_v37 = vmax.f32 %v1081_v41, 0.0  ;;  %v8767_v14 = vpack.c.bf16 %v1770_v1, %v1763_v34  ;;  %v1224_v61 = vadd.f32 %v8565_v42, %v8476_v44  ;;  %v11707_v1 = vld [vmem:[#allocation30_spill] sm:$0xff] }
 0x172   : > { %v1086_v51 = vpop.f32.mrf.mxu0  ;;  %3593 = vmatmul.mubr.bf16.gmra.mxu0 %v8743_v26  ;;  %v8756_v2 = vpop.f32.mrf.mxu1  ;;  %11703 = vst [vmem:[#allocation26_spill] sm:$0xff] %v8761_v29 }
 0x173   : > { %v1838_v25 = vmax.f32 %v1083_v33, 0.0  ;;  %3602 = vmatprep.mubr.bf16.mxu0 %v8740_v11  ;;  %3724 = vmatpush2.bf16.msra.mxu0 %v11701_v50  ;;  %v8765_v41 = vpack.c.bf16 %v1837_v37, %v1830_v15  ;;  %11705 = vst [vmem:[#allocation55_spill] sm:$0xff] %v8767_v14  ;;  %v1220_v15 = vadd.f32 %v11706_v7, %v8476_v44  ;;  %v1769_v26 = vmax.f32 %v1224_v61, 0.0 }
 0x174   : > { %v1088_v63 = vpop.f32.mrf.mxu0  ;;  %3725 = vmatprep.subr.bf16.mxu0 %v8492_v24  ;;  %v8769_v33 = vpop.f32.mrf.mxu1  ;;  %v1087_v48 = vadd.f32 %v1086_v51, %v8292_v28  ;;  %v11708_v51 = vld [vmem:[#allocation32_spill] sm:$0xff] }
 0x175   : > { %v8759_v40 = vpack.c.bf16 %v1838_v25, %v1831_v21  ;;  %11704 = vst [vmem:[#allocation54_spill] sm:$0xff] %v8765_v41  ;;  %v1089_v50 = vadd.f32 %v1088_v63, %v8287_v27  ;;  %v1777_v63 = vmax.f32 %v1232_v9, 0.0  ;;  %v1762_v11 = vmax.f32 %v1220_v15, 0.0 }
 0x176   : > { %v1090_v43 = vpop.f32.mrf.mxu0  ;;  %v8783_v13 = vpop.f32.mrf.mxu1  ;;  %v1234_v9 = vadd.f32 %v8611_v30, %v8476_v44 }
 0x177   : > { %11702 = vst [vmem:[#allocation24_spill] sm:$0xff] %v8759_v40  ;;  %v1091_v24 = vadd.f32 %v1090_v43, %v8292_v28  ;;  %3469 = vmatprep.mubr.bf16.mxu1 %v8759_v40  ;;  %3726 = vmatpush2.bf16.msra.mxu0 %v8511_v20  ;;  %v1784_v43 = vmax.f32 %v1236_v53, 0.0  ;;  %v1845_v42 = vmax.f32 %v1089_v50, 0.0  ;;  %v1242_v53 = vadd.f32 %v8644_v54, %v8433_v18 }
 0x178   : > { %v1092_v34 = vpop.f32.mrf.mxu0  ;;  %3470 = vmatmul.mubr.bf16.gmra.mxu1 %v8765_v41  ;;  %3727 = vmatprep.subr.bf16.mxu0 %v11707_v1  ;;  %v8788_v20 = vpop.f32.mrf.mxu1  ;;  %v1844_v41 = vmax.f32 %v1087_v48, 0.0  ;;  %v1246_v50 = vadd.f32 %v8663_v12, %v8433_v18  ;;  %v8815_v30 = vpack.c.bf16 %v1769_v26, %v1762_v11 }
 0x179   : > { %v1093_v37 = vadd.f32 %v1092_v34, %v8287_v27  ;;  %v1851_v21 = vmax.f32 %v1091_v24, 0.0  ;;  %v11709_v24 = vld [vmem:[#allocation34_spill] sm:$0xff]  ;;  %v1230_v34 = vadd.f32 %v8598_v36, %v8476_v44 }
 0x17a   : > { %v1096_v25 = vpop.f32.mrf.mxu0  ;;  %3603 = vmatmul.mubr.bf16.gmra.mxu0 %v8761_v29  ;;  %v8792_v10 = vpop.f32.mrf.mxu1  ;;  %11713 = vst [vmem:[#allocation34_spill] sm:$0xff] %v8815_v30 }
 0x17b   : > { %v1852_v7 = vmax.f32 %v1093_v37, 0.0  ;;  %3612 = vmatprep.mubr.bf16.mxu0 %v8767_v14  ;;  %3728 = vmatpush2.bf16.msra.mxu0 %v11708_v51  ;;  %v8805_v15 = vpack.c.bf16 %v1851_v21, %v1844_v41  ;;  %v1097_v54 = vadd.f32 %v1096_v25, %v8292_v28  ;;  %v1776_v21 = vmax.f32 %v1230_v34, 0.0 }
 0x17c   : > { %v1098_v1 = vpop.f32.mrf.mxu0  ;;  %3729 = vmatprep.subr.bf16.mxu0 %v11709_v24  ;;  %v8807_v48 = vpop.f32.mrf.mxu1  ;;  %v1783_v51 = vmax.f32 %v1234_v9, 0.0  ;;  %v7439_v9 = vld [vmem:[#allocation3 + $0x664] ss:$16 sps:$4 sm:$0xff]   ;;  %v1282_v14 = vadd.f32 %v8788_v20, %v8433_v18 }
 0x17d   : > { %v8797_v29 = vpack.c.bf16 %v1852_v7, %v1845_v42  ;;  %11711 = vst [vmem:[#allocation30_spill] sm:$0xff] %v8805_v15  ;;  %v1099_v37 = vadd.f32 %v1098_v1, %v8287_v27  ;;  %v8812_v42 = vpack.c.bf16 %v1784_v43, %v1777_v63  ;;  %v1791_v1 = vmax.f32 %v1242_v53, 0.0 }
 0x17e   : > { %v1100_v61 = vpop.f32.mrf.mxu0  ;;  %v8819_v41 = vpop.f32.mrf.mxu1  ;;  %v1798_v63 = vmax.f32 %v1246_v50, 0.0  ;;  %v1858_v25 = vmax.f32 %v1097_v54, 0.0  ;;  %v8833_v50 = vpack.c.bf16 %v1783_v51, %v1776_v21  ;;  %v1256_v54 = vadd.f32 %v8697_v38, %v8433_v18 }
 0x17f   : > { %11710 = vst [vmem:[#allocation37_spill] sm:$0xff] %v8797_v29  ;;  %v1101_v36 = vadd.f32 %v1100_v61, %v8292_v28  ;;  %3479 = vmatprep.mubr.bf16.mxu1 %v8797_v29  ;;  %11712 = vst [vmem:[#allocation32_spill] sm:$0xff] %v8812_v42  ;;  %3730 = vmatpush2.bf16.msra.mxu0 %v8555_v52  ;;  %v1859_v11 = vmax.f32 %v1099_v37, 0.0  ;;  %v1252_v61 = vadd.f32 %v8680_v57, %v8433_v18 }
 0x180   : > { %v1102_v12 = vpop.f32.mrf.mxu0  ;;  %3480 = vmatmul.mubr.bf16.gmra.mxu1 %v8805_v15  ;;  %3731 = vmatprep.subr.bf16.mxu0 %v8561_v0  ;;  %v8824_v52 = vpop.f32.mrf.mxu1  ;;  %11715 = vst [vmem:[#allocation57_spill] sm:$0xff] %v8833_v50  ;;  %v1240_v57 = vadd.f32 %v8639_v39, %v8476_v44  ;;  %v1244_v21 = vadd.f32 %v8648_v55, %v8476_v44  ;;  %v8965_v15 = vld [vmem:[%s11501_s2] sm:$0x7f] }
 0x181   : > { %v1103_v7 = vadd.f32 %v1102_v12, %v8287_v27  ;;  %v1865_v43 = vmax.f32 %v1101_v36, 0.0  ;;  %v8839_v12 = vpack.c.bf16 %v1798_v63, %v1791_v1  ;;  %v1805_v39 = vmax.f32 %v1252_v61, 0.0 }
 0x182   : > { %v1106_v24 = vpop.f32.mrf.mxu0  ;;  %3613 = vmatmul.mubr.bf16.gmra.mxu0 %v8815_v30  ;;  %v8828_v34 = vpop.f32.mrf.mxu1  ;;  %v1262_v61 = vadd.f32 %v8716_v56, %v8433_v18 }
 0x183   : > { %v1866_v26 = vmax.f32 %v1103_v7, 0.0  ;;  %3622 = vmatprep.mubr.bf16.mxu0 %v8812_v42  ;;  %3732 = vmatpush2.bf16.msra.mxu0 %v8573_v49  ;;  %v8837_v37 = vpack.c.bf16 %v1865_v43, %v1858_v25  ;;  %11717 = vst [vmem:[#allocation59_spill] sm:$0xff] %v8839_v12  ;;  %v1107_v51 = vadd.f32 %v1106_v24, %v8292_v28  ;;  %v1797_v24 = vmax.f32 %v1244_v21, 0.0 }
 0x184   : > { %v1108_v0 = vpop.f32.mrf.mxu0  ;;  %3733 = vmatprep.subr.bf16.mxu0 %v8586_v22  ;;  %v8841_v49 = vpop.f32.mrf.mxu1  ;;  %v1250_v21 = vadd.f32 %v8675_v16, %v8476_v44 }
 0x185   : > { %v8831_v53 = vpack.c.bf16 %v1866_v26, %v1859_v11  ;;  %11716 = vst [vmem:[#allocation58_spill] sm:$0xff] %v8837_v37  ;;  %v1109_v22 = vadd.f32 %v1108_v0, %v8287_v27  ;;  %v1812_v26 = vmax.f32 %v1256_v54, 0.0  ;;  %v1872_v0 = vmax.f32 %v1107_v51, 0.0 }
 0x186   : > { %v1110_v36 = vpop.f32.mrf.mxu0  ;;  %v8855_v38 = vpop.f32.mrf.mxu1  ;;  %v1266_v54 = vadd.f32 %v8735_v62, %v8433_v18  ;;  %v1254_v51 = vadd.f32 %v8684_v4, %v8476_v44  ;;  %v1804_v16 = vmax.f32 %v1250_v21, 0.0  ;;  %v1260_v21 = vadd.f32 %v8711_v23, %v8476_v44 }
 0x187   : > { %11714 = vst [vmem:[#allocation56_spill] sm:$0xff] %v8831_v53  ;;  %v1111_v7 = vadd.f32 %v1110_v36, %v8292_v28  ;;  %3489 = vmatprep.mubr.bf16.mxu1 %v8831_v53  ;;  %3734 = vmatpush2.bf16.msra.mxu0 %v8603_v60  ;;  %v1873_v55 = vmax.f32 %v1109_v22, 0.0  ;;  %v1790_v28 = vmax.f32 %v1240_v57, 0.0  ;;  %v8881_v22 = vpack.c.bf16 %v1812_v26, %v1805_v39 }
 0x188   : > { %v1112_v1 = vpop.f32.mrf.mxu0  ;;  %3490 = vmatmul.mubr.bf16.gmra.mxu1 %v8837_v37  ;;  %3904 = vmatprep.subr.bf16.mxu0 %v7439_v9  ;;  %v8861_v60 = vpop.f32.mrf.mxu1  ;;  %v1819_v39 = vmax.f32 %v1262_v61, 0.0  ;;  %v1826_v26 = vmax.f32 %v1266_v54, 0.0 }
 0x189   : > { %v1113_v63 = vadd.f32 %v1112_v1, %v8287_v27  ;;  %v1879_v43 = vmax.f32 %v1111_v7, 0.0  ;;  %11720 = vst [vmem:[#allocation62_spill] sm:$0xff] %v8881_v22  ;;  %v8883_v57 = vpack.c.bf16 %v1797_v24, %v1790_v28 }
 0x18a   : > { %v8858_v11 = vpop.f32.mrf.mxu0  ;;  %3623 = vmatmul.mubr.bf16.gmra.mxu0 %v8833_v50  ;;  %v8866_v9 = vpop.f32.mrf.mxu1  ;;  %v8912_v61 = vpack.c.bf16 %v1826_v26, %v1819_v39  ;;  %v1818_v26 = vmax.f32 %v1260_v21, 0.0  ;;  %v1270_v21 = vadd.f32 %v8747_v31, %v8476_v44 }
 0x18b   : > { %v1880_v25 = vmax.f32 %v1113_v63, 0.0  ;;  %3632 = vmatprep.mubr.bf16.mxu0 %v8839_v12  ;;  %v8870_v7 = vpack.c.bf16 %v1879_v43, %v1872_v0  ;;  %11721 = vst [vmem:[#allocation63_spill] sm:$0xff] %v8883_v57  ;;  %v1272_v0 = vadd.f32 %v8752_v32, %v8433_v18 }
 0x18c   : > { %v8864_v36 = vpop.f32.mrf.mxu0  ;;  %v8874_v50 = vpop.f32.mrf.mxu1  ;;  %11722 = vst [vmem:[#allocation64_spill] sm:$0xff] %v8912_v61  ;;  %v1832_v31 = vmax.f32 %v1270_v21, 0.0 }
 0x18d   : > { %v8868_v27 = vpack.c.bf16 %v1880_v25, %v1873_v55  ;;  %11719 = vst [vmem:[#allocation61_spill] sm:$0xff] %v8870_v7  ;;  %v1811_v55 = vmax.f32 %v1254_v51, 0.0  ;;  %v1264_v51 = vadd.f32 %v8720_v47, %v8476_v44 }
 0x18e   : > { %v8872_v1 = vpop.f32.mrf.mxu0  ;;  %v8892_v56 = vpop.f32.mrf.mxu1 }
 0x18f   : > { %11718 = vst [vmem:[#allocation60_spill] sm:$0xff] %v8868_v27  ;;  %3499 = vmatprep.mubr.bf16.mxu1 %v8868_v27  ;;  %v8914_v54 = vpack.c.bf16 %v1811_v55, %v1804_v16  ;;  %v1825_v16 = vmax.f32 %v1264_v51, 0.0  ;;  %v1274_v51 = vadd.f32 %v8756_v2, %v8476_v44  ;;  %v11726_v27 = vld [vmem:[#allocation9_spill] sm:$0xff] }
 0x190   : > { %v8889_v63 = vpop.f32.mrf.mxu0  ;;  %3500 = vmatmul.mubr.bf16.gmra.mxu1 %v8870_v7  ;;  %v8897_v62 = vpop.f32.mrf.mxu1  ;;  %v521_v37 = vsub.s32 4, %v11726_v27  ;;  %v525_v20 = vsub.s32 5, %v11726_v27 }
 0x191   : > { %11723 = vst [vmem:[#allocation65_spill] sm:$0xff] %v8914_v54 }
 0x192   : > { %v8894_v43 = vpop.f32.mrf.mxu0  ;;  %3633 = vmatmul.mubr.bf16.gmra.mxu0 %v8883_v57  ;;  %v8902_v4 = vpop.f32.mrf.mxu1  ;;  %v1276_v57 = vadd.f32 %v8769_v33, %v8433_v18  ;;  %v1833_v33 = vmax.f32 %v1272_v0, 0.0  ;;  %v8968_v29 = vrot.slane %v8965_v15, %v521_v37 }
 0x193   : > { %3642 = vmatprep.mubr.bf16.mxu0 %v8881_v22 }
 0x194   : > { %v8900_v25 = vpop.f32.mrf.mxu0  ;;  %v8906_v24 = vpop.f32.mrf.mxu1  ;;  %v1840_v39 = vmax.f32 %v1276_v57, 0.0  ;;  %v8944_v57 = vpack.c.bf16 %v1825_v16, %v1818_v26  ;;  %v1839_v26 = vmax.f32 %v1274_v51, 0.0  ;;  %v1296_v51 = vadd.f32 %v8841_v49, %v8433_v18 }
 0x196   : > { %v8904_v28 = vpop.f32.mrf.mxu0  ;;  %v8922_v12 = vpop.f32.mrf.mxu1  ;;  %v8942_v0 = vpack.c.bf16 %v1840_v39, %v1833_v33  ;;  %11725 = vst [vmem:[#allocation67_spill] sm:$0xff] %v8944_v57  ;;  %v1847_v33 = vmax.f32 %v1282_v14, 0.0  ;;  %v1292_v14 = vadd.f32 %v8824_v52, %v8433_v18  ;;  %v8983_v37 = vpack.c.bf16 %v1839_v26, %v1832_v31 }
 0x197   : > { %v1284_v52 = vadd.f32 %v8792_v10, %v8476_v44  ;;  %v1868_v31 = vmax.f32 %v1296_v51, 0.0 }
 0x198   : > { %v8920_v22 = vpop.f32.mrf.mxu0  ;;  %v8927_v32 = vpop.f32.mrf.mxu1  ;;  %11724 = vst [vmem:[#allocation66_spill] sm:$0xff] %v8942_v0  ;;  %11728 = vst [vmem:[#allocation69_spill] sm:$0xff] %v8983_v37 }
 0x19a   : > { %v8924_v42 = vpop.f32.mrf.mxu0  ;;  %3643 = vmatmul.mubr.bf16.gmra.mxu0 %v8914_v54  ;;  %v8932_v55 = vpop.f32.mrf.mxu1  ;;  %v1286_v54 = vadd.f32 %v8807_v48, %v8433_v18 }
 0x19b   : > { %3652 = vmatprep.mubr.bf16.mxu0 %v8912_v61 }
 0x19c   : > { %v8930_v23 = vpop.f32.mrf.mxu0  ;;  %v8936_v30 = vpop.f32.mrf.mxu1  ;;  %v1854_v39 = vmax.f32 %v1286_v54, 0.0 }
 0x19e   : > { %v8934_v47 = vpop.f32.mrf.mxu0  ;;  %v8952_v7 = vpop.f32.mrf.mxu1  ;;  %v8981_v40 = vpack.c.bf16 %v1854_v39, %v1847_v33  ;;  %v1861_v39 = vmax.f32 %v1292_v14, 0.0 }
 0x1a0   : > { %v8950_v61 = vpop.f32.mrf.mxu0  ;;  %v8957_v48 = vpop.f32.mrf.mxu1  ;;  %11727 = vst [vmem:[#allocation68_spill] sm:$0xff] %v8981_v40 }
 0x1a2   : > { %v1372_v53 = vpop.f32.mrf.mxu0  ;;  %3653 = vmatmul.mubr.bf16.gmra.mxu0 %v8944_v57  ;;  %v8960_v16 = vpop.f32.mrf.mxu1  ;;  %v8971_v57 = vrot.slane %v8965_v15, %v525_v20  ;;  %v1280_v20 = vadd.f32 %v8783_v13, %v8476_v44 }
 0x1a3   : > { %3662 = vmatprep.mubr.bf16.mxu0 %v8942_v0  ;;  %v1373_v8 = vadd.f32 %v1372_v53, %v8968_v29 }
 0x1a4   : > { %v1374_v2 = vpop.f32.mrf.mxu0  ;;  %v8975_v21 = vpop.f32.mrf.mxu1  ;;  %v1846_v10 = vmax.f32 %v1280_v20, 0.0  ;;  %v1306_v20 = vadd.f32 %v8874_v50, %v8433_v18  ;;  %v7449_v50 = vld [vmem:[#allocation3 + $0xc8] ss:$16 sps:$4 sm:$0xff]  }
 0x1a5   : > { %v1375_v0 = vadd.f32 %v1374_v2, %v8971_v57  ;;  %v1708_v53 = vmax.f32 %v1373_v8, 0.0 }
 0x1a6   : > { %v1376_v54 = vpop.f32.mrf.mxu0  ;;  %v8990_v17 = vpop.f32.mrf.mxu1 }
 0x1a7   : > { %v1377_v35 = vadd.f32 %v1376_v54, %v8968_v29  ;;  %v1709_v26 = vmax.f32 %v1375_v0, 0.0  ;;  %v1853_v54 = vmax.f32 %v1284_v52, 0.0  ;;  %v7451_v0 = vld [vmem:[#allocation3 + $0xcc] ss:$16 sps:$4 sm:$0xff]  }
 0x1a8   : > { %v1378_v46 = vpop.f32.mrf.mxu0  ;;  %v8994_v33 = vpop.f32.mrf.mxu1 }
 0x1a9   : > { %v1379_v49 = vadd.f32 %v1378_v46, %v8971_v57  ;;  %v1715_v2 = vmax.f32 %v1377_v35, 0.0  ;;  %v7443_v35 = vld [vmem:[#allocation3 + $0xe8] ss:$16 sps:$4 sm:$0xff]   ;;  %v1302_v46 = vadd.f32 %v8861_v60, %v8433_v18  ;;  %v1290_v60 = vadd.f32 %v8819_v41, %v8476_v44 }
 0x1aa   : > { %v1382_v19 = vpop.f32.mrf.mxu0  ;;  %3663 = vmatmul.mubr.bf16.gmra.mxu0 %v8983_v37  ;;  %v8997_v59 = vpop.f32.mrf.mxu1 }
 0x1ab   : > { %v1716_v13 = vmax.f32 %v1379_v49, 0.0  ;;  %3672 = vmatprep.mubr.bf16.mxu0 %v8981_v40  ;;  %v9003_v37 = vpack.c.bf16 %v1715_v2, %v1708_v53  ;;  %v9012_v49 = vpack.c.bf16 %v1868_v31, %v1861_v39  ;;  %v1294_v2 = vadd.f32 %v8828_v34, %v8476_v44  ;;  %v7457_v34 = vld [vmem:[#allocation3 + $0xac] ss:$16 sps:$4 sm:$0xff]  }
 0x1ac   : > { %v1384_v6 = vpop.f32.mrf.mxu0  ;;  %v9005_v51 = vpop.f32.mrf.mxu1  ;;  %v529_v39 = vsub.s32 6, %v11726_v27  ;;  %v7455_v27 = vld [vmem:[#allocation3 + $0xa8] ss:$16 sps:$4 sm:$0xff]  }
 0x1ad   : > { %v8999_v5 = vpack.c.bf16 %v1716_v13, %v1709_v26  ;;  %11730 = vst [vmem:[#allocation71_spill] sm:$0xff] %v9003_v37  ;;  %v1385_v8 = vadd.f32 %v1384_v6, %v8971_v57  ;;  %11731 = vst [vmem:[#allocation72_spill] sm:$0xff] %v9012_v49  ;;  %v9014_v26 = vpack.c.bf16 %v1853_v54, %v1846_v10  ;;  %v1882_v54 = vmax.f32 %v1306_v20, 0.0 }
 0x1ae   : > { %v1386_v14 = vpop.f32.mrf.mxu0  ;;  %v1383_v13 = vadd.f32 %v1382_v19, %v8968_v29  ;;  %v9022_v18 = vpop.f32.mrf.mxu1  ;;  %v1875_v19 = vmax.f32 %v1302_v46, 0.0  ;;  %v7460_v46 = vld [vmem:[#allocation3 + $0x8c] ss:$16 sps:$4 sm:$0xff]   ;;  %v9039_v20 = vrot.slane %v8965_v15, %v529_v39  ;;  %v1349_v39 = vadd.f32 %v8889_v63, %v8971_v57 }
 0x1af   : > { %11729 = vst [vmem:[#allocation70_spill] sm:$0xff] %v8999_v5  ;;  %v1387_v52 = vadd.f32 %v1386_v14, %v8968_v29  ;;  %3765 = vmatprep.mubr.bf16.mxu1 %v8999_v5  ;;  %11732 = vst [vmem:[#allocation73_spill] sm:$0xff] %v9014_v26  ;;  %v1723_v14 = vmax.f32 %v1385_v8, 0.0 }
 0x1b0   : > { %v1388_v53 = vpop.f32.mrf.mxu0  ;;  %3766 = vmatmul.mubr.bf16.vlgmr.msra.gmra.mxu1 %v9003_v37  ;;  %v9027_v41 = vpop.f32.mrf.mxu1  ;;  %v1860_v37 = vmax.f32 %v1290_v60, 0.0 }
 0x1b1   : > { %v1389_v6 = vadd.f32 %v1388_v53, %v8971_v57  ;;  %4090 = vmatpush1.bf16.msra.mxu1 %v7443_v35  ;;  %v1729_v31 = vmax.f32 %v1387_v52, 0.0  ;;  %v1867_v53 = vmax.f32 %v1294_v2, 0.0  ;;  %v1722_v35 = vmax.f32 %v1383_v13, 0.0 }
 0x1b2   : > { %v1392_v10 = vpop.f32.mrf.mxu0  ;;  %3673 = vmatmul.mubr.bf16.gmra.mxu0 %v9014_v26  ;;  %4091 = vmatprep.subr.bf16.mxu1 %v7451_v0  ;;  %v9030_v45 = vpop.f32.mrf.mxu1  ;;  %v1300_v13 = vadd.f32 %v8855_v38, %v8476_v44 }
 0x1b3   : > { %v1730_v40 = vmax.f32 %v1389_v6, 0.0  ;;  %3682 = vmatprep.mubr.bf16.mxu0 %v9012_v49  ;;  %v9034_v26 = vpack.c.bf16 %v1729_v31, %v1722_v35  ;;  %v9046_v2 = vpack.c.bf16 %v1867_v53, %v1860_v37  ;;  %v1304_v6 = vadd.f32 %v8866_v9, %v8476_v44  ;;  %v7458_v37 = vld [vmem:[#allocation3 + $0x88] ss:$16 sps:$4 sm:$0xff]   ;;  %v7463_v9 = vld [vmem:[#allocation3 + $0x6c] ss:$16 sps:$4 sm:$0xff]  }
 0x1b4   : > { %v1394_v5 = vpop.f32.mrf.mxu0  ;;  %v9036_v3 = vpop.f32.mrf.mxu1  ;;  %v1874_v63 = vmax.f32 %v1300_v13, 0.0 }
 0x1b5   : > { %v9032_v52 = vpack.c.bf16 %v1730_v40, %v1723_v14  ;;  %4092 = vmatpush1.bf16.msra.mxu1 %v7449_v50  ;;  %11734 = vst [vmem:[#allocation75_spill] sm:$0xff] %v9034_v26  ;;  %v1395_v8 = vadd.f32 %v1394_v5, %v8971_v57  ;;  %v9044_v40 = vpack.c.bf16 %v1882_v54, %v1875_v19  ;;  %11736 = vst [vmem:[#allocation77_spill] sm:$0xff] %v9046_v2 }
 0x1b6   : > { %v1396_v0 = vpop.f32.mrf.mxu0  ;;  %4093 = vmatprep.subr.bf16.mxu1 %v7457_v34  ;;  %v1393_v50 = vadd.f32 %v1392_v10, %v8968_v29  ;;  %v7092_v5 = vpop.f32.mrf.mxu1  ;;  %v1345_v10 = vadd.f32 %v8864_v36, %v8971_v57 }
 0x1b7   : > { %11733 = vst [vmem:[#allocation74_spill] sm:$0xff] %v9032_v52  ;;  %v1397_v60 = vadd.f32 %v1396_v0, %v8968_v29  ;;  %3775 = vmatprep.mubr.bf16.mxu1 %v9032_v52  ;;  %11735 = vst [vmem:[#allocation76_spill] sm:$0xff] %v9044_v40  ;;  %v1624_v38 = vadd.f32 %v7092_v5, %v9039_v20  ;;  %v1737_v54 = vmax.f32 %v1395_v8, 0.0 }
 0x1b8   : > { %v1398_v15 = vpop.f32.mrf.mxu0  ;;  %3776 = vmatmul.mubr.bf16.gmra.mxu1 %v9034_v26  ;;  %v9059_v44 = vpop.f32.mrf.mxu1  ;;  %v1736_v53 = vmax.f32 %v1393_v50, 0.0  ;;  %v1667_v13 = vmax.f32 %v1345_v10, 0.0  ;;  %v1359_v10 = vadd.f32 %v8920_v22, %v8971_v57  ;;  %v7469_v22 = vld [vmem:[#allocation3 + $0x2c] ss:$16 sps:$4 sm:$0xff]  }
 0x1b9   : > { %v1399_v31 = vadd.f32 %v1398_v15, %v8971_v57  ;;  %4094 = vmatpush1.bf16.msra.mxu1 %v7455_v27  ;;  %v1743_v34 = vmax.f32 %v1397_v60, 0.0  ;;  %v1881_v27 = vmax.f32 %v1304_v6, 0.0  ;;  %v1674_v60 = vmax.f32 %v1349_v39, 0.0 }
 0x1ba   : > { %v1402_v19 = vpop.f32.mrf.mxu0  ;;  %3683 = vmatmul.mubr.bf16.gmra.mxu0 %v9046_v2  ;;  %4095 = vmatprep.subr.bf16.mxu1 %v7460_v46  ;;  %v7093_v0 = vpop.f32.mrf.mxu1  ;;  %v1822_v5 = vmax.f32 %v1624_v38, 0.0  ;;  %v7461_v46 = vld [vmem:[#allocation3 + $0x68] ss:$16 sps:$4 sm:$0xff]   ;;  %v1347_v38 = vadd.f32 %v8872_v1, %v8968_v29  ;;  %v1343_v1 = vadd.f32 %v8858_v11, %v8968_v29 }
 0x1bb   : > { %v1744_v14 = vmax.f32 %v1399_v31, 0.0  ;;  %3692 = vmatprep.mubr.bf16.mxu0 %v9044_v40  ;;  %v1627_v2 = vadd.f32 %v7093_v0, %v9039_v20  ;;  %v9067_v49 = vpack.c.bf16 %v1743_v34, %v1736_v53  ;;  %v7466_v31 = vld [vmem:[#allocation3 + $0x4c] ss:$16 sps:$4 sm:$0xff]   ;;  %v1403_v34 = vadd.f32 %v1402_v19, %v8968_v29 }
 0x1bc   : > { %v1404_v35 = vpop.f32.mrf.mxu0  ;;  %v9069_v8 = vpop.f32.mrf.mxu1  ;;  %v9083_v53 = vpack.c.bf16 %v1674_v60, %v1667_v13  ;;  %v1355_v60 = vadd.f32 %v8900_v25, %v8971_v57  ;;  %v1666_v40 = vmax.f32 %v1343_v1, 0.0 }
 0x1bd   : > { %v9064_v15 = vpack.c.bf16 %v1744_v14, %v1737_v54  ;;  %4096 = vmatpush1.bf16.msra.mxu1 %v7458_v37  ;;  %11738 = vst [vmem:[#allocation79_spill] sm:$0xff] %v9067_v49  ;;  %v1405_v6 = vadd.f32 %v1404_v35, %v8971_v57  ;;  %v1829_v39 = vmax.f32 %v1627_v2, 0.0  ;;  %v9076_v37 = vpack.c.bf16 %v1881_v27, %v1874_v63  ;;  %v7464_v2 = vld [vmem:[#allocation3 + $0x48] ss:$16 sps:$4 sm:$0xff]  }
 0x1be   : > { %v1406_v36 = vpop.f32.mrf.mxu0  ;;  %4097 = vmatprep.subr.bf16.mxu1 %v7463_v9  ;;  %v7096_v9 = vpop.f32.mrf.mxu1  ;;  %11740 = vst [vmem:[#allocation81_spill] sm:$0xff] %v9083_v53  ;;  %v1750_v13 = vmax.f32 %v1403_v34, 0.0 }
 0x1bf   : > { %11737 = vst [vmem:[#allocation78_spill] sm:$0xff] %v9064_v15  ;;  %v1407_v50 = vadd.f32 %v1406_v36, %v8968_v29  ;;  %3785 = vmatprep.mubr.bf16.mxu1 %v9064_v15  ;;  %11739 = vst [vmem:[#allocation80_spill] sm:$0xff] %v9076_v37  ;;  %v9085_v35 = vpack.c.bf16 %v1829_v39, %v1822_v5  ;;  %v1640_v27 = vadd.f32 %v7096_v9, %v9039_v20 }
 0x1c0   : > { %v1408_v54 = vpop.f32.mrf.mxu0  ;;  %3786 = vmatmul.mubr.bf16.gmra.mxu1 %v9067_v49  ;;  %v9091_v0 = vpop.f32.mrf.mxu1  ;;  %v1751_v5 = vmax.f32 %v1405_v6, 0.0  ;;  %v1688_v39 = vmax.f32 %v1359_v10, 0.0 }
 0x1c1   : > { %v1409_v14 = vadd.f32 %v1408_v54, %v8971_v57  ;;  %11741 = vst [vmem:[#allocation82_spill] sm:$0xff] %v9085_v35  ;;  %4098 = vmatpush1.bf16.msra.mxu1 %v7461_v46  ;;  %v1757_v63 = vmax.f32 %v1407_v50, 0.0  ;;  %v1673_v46 = vmax.f32 %v1347_v38, 0.0  ;;  %v1681_v38 = vmax.f32 %v1355_v60, 0.0  ;;  %v7442_v60 = vld [vmem:[#allocation3 + $0x644] ss:$16 sps:$4 sm:$0xff]  }
 0x1c2   : > { %v1412_v19 = vpop.f32.mrf.mxu0  ;;  %3693 = vmatmul.mubr.bf16.gmra.mxu0 %v9076_v37  ;;  %4099 = vmatprep.subr.bf16.mxu1 %v7466_v31  ;;  %v7097_v50 = vpop.f32.mrf.mxu1  ;;  %v1850_v37 = vmax.f32 %v1640_v27, 0.0  ;;  %v7467_v31 = vld [vmem:[#allocation3 + $0x28] ss:$16 sps:$4 sm:$0xff]  }
 0x1c3   : > { %v1758_v36 = vmax.f32 %v1409_v14, 0.0  ;;  %3735 = vmatprep.mubr.bf16.mxu0 %v9083_v53  ;;  %v1643_v9 = vadd.f32 %v7097_v50, %v9039_v20  ;;  %v9099_v49 = vpack.c.bf16 %v1757_v63, %v1750_v13  ;;  %v7472_v14 = vld [vmem:[#allocation3 + $0xc] ss:$16 sps:$4 sm:$0xff]   ;;  %v1413_v1 = vadd.f32 %v1412_v19, %v8968_v29  ;;  %v11772_v53 = vld [vmem:[#allocation11_spill] sm:$0xff] }
 0x1c4   : > { %v1414_v11 = vpop.f32.mrf.mxu0  ;;  %v9101_v6 = vpop.f32.mrf.mxu1  ;;  %v1369_v13 = vadd.f32 %v8950_v61, %v8971_v57  ;;  %v9115_v50 = vpack.c.bf16 %v1688_v39, %v1681_v38  ;;  %v1365_v19 = vadd.f32 %v8930_v23, %v8971_v57  ;;  %v7475_v39 = vld [vmem:[#allocation3 + $0x1ec] ss:$16 sps:$4 sm:$0xff]  }
 0x1c5   : > { %v9096_v54 = vpack.c.bf16 %v1758_v36, %v1751_v5  ;;  %4100 = vmatpush1.bf16.msra.mxu1 %v7464_v2  ;;  %11743 = vst [vmem:[#allocation84_spill] sm:$0xff] %v9099_v49  ;;  %v1415_v34 = vadd.f32 %v1414_v11, %v8971_v57  ;;  %v1857_v27 = vmax.f32 %v1643_v9, 0.0  ;;  %v7437_v5 = vld [vmem:[#allocation3 + $0x660] ss:$16 sps:$4 sm:$0xff]   ;;  %v9106_v36 = vpack.c.bf16 %v1673_v46, %v1666_v40  ;;  %v7470_v40 = vld [vmem:[#allocation3 + $0x8] ss:$16 sps:$4 sm:$0xff]  }
 0x1c6   : > { %v1416_v25 = vpop.f32.mrf.mxu0  ;;  %4101 = vmatprep.subr.bf16.mxu1 %v7469_v22  ;;  %v1357_v2 = vadd.f32 %v8904_v28, %v8968_v29  ;;  %v7100_v22 = vpop.f32.mrf.mxu1  ;;  %11745 = vst [vmem:[#allocation86_spill] sm:$0xff] %v9115_v50  ;;  %v1353_v28 = vadd.f32 %v8894_v43, %v8968_v29  ;;  %v1764_v43 = vmax.f32 %v1413_v1, 0.0  ;;  %v1702_v15 = vmax.f32 %v1369_v13, 0.0 }
 0x1c7   : > { %11742 = vst [vmem:[#allocation83_spill] sm:$0xff] %v9096_v54  ;;  %v1417_v10 = vadd.f32 %v1416_v25, %v8968_v29  ;;  %3795 = vmatprep.mubr.bf16.mxu1 %v9096_v54  ;;  %11744 = vst [vmem:[#allocation85_spill] sm:$0xff] %v9106_v36  ;;  %v9117_v9 = vpack.c.bf16 %v1857_v27, %v1850_v37  ;;  %v1656_v61 = vadd.f32 %v7100_v22, %v9039_v20  ;;  %v7448_v54 = vld [vmem:[#allocation3 + $0x624] ss:$16 sps:$4 sm:$0xff]  }
 0x1c8   : > { %v1418_v63 = vpop.f32.mrf.mxu0  ;;  %3796 = vmatmul.mubr.bf16.gmra.mxu1 %v9099_v49  ;;  %v1647_v49 = vpop.f32.mrf.mxu1  ;;  %v1765_v38 = vmax.f32 %v1415_v34, 0.0  ;;  %v1687_v27 = vmax.f32 %v1357_v2, 0.0  ;;  %v7473_v34 = vld [vmem:[#allocation3 + $0x1e8] ss:$16 sps:$4 sm:$0xff]   ;;  %v1695_v52 = vmax.f32 %v1365_v19, 0.0  ;;  %v1367_v19 = vadd.f32 %v8934_v47, %v8968_v29 }
 0x1c9   : > { %v1419_v11 = vadd.f32 %v1418_v63, %v8971_v57  ;;  %11746 = vst [vmem:[#allocation87_spill] sm:$0xff] %v9117_v9  ;;  %4102 = vmatpush1.bf16.msra.mxu1 %v7467_v31  ;;  %v1771_v46 = vmax.f32 %v1417_v10, 0.0  ;;  %v7440_v31 = vld [vmem:[#allocation3 + $0x640] ss:$16 sps:$4 sm:$0xff]   ;;  %v1648_v23 = vadd.f32 %v1647_v49, %v9039_v20  ;;  %v1878_v22 = vmax.f32 %v1656_v61, 0.0 }
 0x1ca   : > { %v1422_v25 = vpop.f32.mrf.mxu0  ;;  %3736 = vmatmul.mubr.bf16.vlgmr.msra.gmra.mxu0 %v9106_v36  ;;  %4103 = vmatprep.subr.bf16.mxu1 %v7472_v14  ;;  %v7101_v10 = vpop.f32.mrf.mxu1  ;;  %v7478_v49 = vld [vmem:[#allocation3 + $0x1cc] ss:$16 sps:$4 sm:$0xff]  }
 0x1cb   : > { %v1772_v37 = vmax.f32 %v1419_v11, 0.0  ;;  %3745 = vmatprep.mubr.bf16.mxu0 %v9115_v50  ;;  %3905 = vmatpush1.bf16.msra.mxu0 %v7437_v5  ;;  %v1659_v14 = vadd.f32 %v7101_v10, %v9039_v20  ;;  %v1680_v11 = vmax.f32 %v1353_v28, 0.0  ;;  %v9130_v5 = vpack.c.bf16 %v1771_v46, %v1764_v43 }
 0x1cc   : > { %v1424_v63 = vpop.f32.mrf.mxu0  ;;  %3906 = vmatprep.subr.bf16.mxu0 %v7442_v60  ;;  %v1650_v50 = vpop.f32.mrf.mxu1  ;;  %v1864_v13 = vmax.f32 %v1648_v23, 0.0  ;;  %v1423_v46 = vadd.f32 %v1422_v25, %v8968_v29  ;;  %v7481_v25 = vld [vmem:[#allocation3 + $0x1ac] ss:$16 sps:$4 sm:$0xff]  }
 0x1cd   : > { %v9127_v26 = vpack.c.bf16 %v1772_v37, %v1765_v38  ;;  %4104 = vmatpush1.bf16.msra.mxu1 %v7470_v40  ;;  %11748 = vst [vmem:[#allocation89_spill] sm:$0xff] %v9130_v5  ;;  %v1425_v2 = vadd.f32 %v1424_v63, %v8971_v57  ;;  %v1885_v61 = vmax.f32 %v1659_v14, 0.0  ;;  %v1651_v38 = vadd.f32 %v1650_v50, %v9039_v20  ;;  %v7446_v40 = vld [vmem:[#allocation3 + $0x620] ss:$16 sps:$4 sm:$0xff]  }
 0x1ce   : > { %v1426_v1 = vpop.f32.mrf.mxu0  ;;  %4105 = vmatprep.subr.bf16.mxu1 %v7475_v39  ;;  %v9136_v28 = vpack.c.bf16 %v1687_v27, %v1680_v11  ;;  %v7454_v39 = vld [vmem:[#allocation3 + $0x604] ss:$16 sps:$4 sm:$0xff]   ;;  %v9143_v63 = vpack.c.bf16 %v1702_v15, %v1695_v52  ;;  %v1363_v27 = vadd.f32 %v8924_v42, %v8968_v29  ;;  %v7452_v15 = vld [vmem:[#allocation3 + $0x600] ss:$16 sps:$4 sm:$0xff]  }
 0x1cf   : > { %11747 = vst [vmem:[#allocation88_spill] sm:$0xff] %v9127_v26  ;;  %v1427_v60 = vadd.f32 %v1426_v1, %v8968_v29  ;;  %3805 = vmatprep.mubr.bf16.mxu1 %v9127_v26  ;;  %3907 = vmatpush1.bf16.msra.mxu0 %v7440_v31  ;;  %v9145_v23 = vpack.c.bf16 %v1885_v61, %v1878_v22  ;;  %v1871_v50 = vmax.f32 %v1651_v38, 0.0  ;;  %v7476_v31 = vld [vmem:[#allocation3 + $0x1c8] ss:$16 sps:$4 sm:$0xff]   ;;  %v1701_v22 = vmax.f32 %v1367_v19, 0.0 }
 0x1d0   : > { %11749 = vst [vmem:[#allocation90_spill] sm:$0xff] %v9136_v28  ;;  %v1428_v37 = vpop.f32.mrf.mxu0  ;;  %3806 = vmatmul.mubr.bf16.gmra.mxu1 %v9130_v5  ;;  %3908 = vmatprep.subr.bf16.mxu0 %v7448_v54  ;;  %11750 = vst [vmem:[#allocation91_spill] sm:$0xff] %v9143_v63  ;;  %v1779_v54 = vmax.f32 %v1425_v2, 0.0  ;;  %v7499_v1 = vld [vmem:[#allocation3 + $0x2ec] ss:$16 sps:$4 sm:$0xff]   ;;  %v1694_v61 = vmax.f32 %v1363_v27, 0.0 }
 0x1d1   : > { %v1429_v43 = vadd.f32 %v1428_v37, %v8971_v57  ;;  %11751 = vst [vmem:[#allocation92_spill] sm:$0xff] %v9145_v23  ;;  %4106 = vmatpush2.bf16.msra.mxu1 %v7473_v34  ;;  %v1785_v47 = vmax.f32 %v1427_v60, 0.0  ;;  %v9151_v52 = vpack.c.bf16 %v1871_v50, %v1864_v13  ;;  %v1778_v34 = vmax.f32 %v1423_v46, 0.0  ;;  %v7479_v60 = vld [vmem:[#allocation3 + $0x1a8] ss:$16 sps:$4 sm:$0xff]  }
 0x1d2   : > { %v1432_v10 = vpop.f32.mrf.mxu0  ;;  %3746 = vmatmul.mubr.bf16.gmra.mxu0 %v9136_v28  ;;  %4107 = vmatprep.subr.bf16.mxu1 %v7478_v49  ;;  %v7484_v38 = vld [vmem:[#allocation3 + $0x18c] ss:$16 sps:$4 sm:$0xff]   ;;  %v1536_v13 = vadd.f32 %v8897_v62, %v9039_v20  ;;  %v9162_v46 = vpack.c.bf16 %v1701_v22, %v1694_v61  ;;  %v1539_v37 = vadd.f32 %v8906_v24, %v9039_v20  ;;  %v7485_v61 = vld [vmem:[#allocation3 + $0x168] ss:$16 sps:$4 sm:$0xff]  }
 0x1d3   : > { %v1786_v14 = vmax.f32 %v1429_v43, 0.0  ;;  %3755 = vmatprep.mubr.bf16.mxu0 %v9143_v63  ;;  %11752 = vst [vmem:[#allocation93_spill] sm:$0xff] %v9151_v52  ;;  %3909 = vmatpush1.bf16.msra.mxu0 %v7446_v40  ;;  %v9155_v49 = vpack.c.bf16 %v1785_v47, %v1778_v34  ;;  %v7487_v24 = vld [vmem:[#allocation3 + $0x16c] ss:$16 sps:$4 sm:$0xff]   ;;  %v1576_v28 = vadd.f32 %v8952_v7, %v9039_v20 }
 0x1d4   : > { %v1434_v11 = vpop.f32.mrf.mxu0  ;;  %3910 = vmatprep.subr.bf16.mxu0 %v7454_v39  ;;  %11755 = vst [vmem:[#allocation96_spill] sm:$0xff] %v9162_v46  ;;  %v1433_v39 = vadd.f32 %v1432_v10, %v8968_v29  ;;  %v1675_v22 = vmax.f32 %v1539_v37, 0.0 }
 0x1d5   : > { %v9153_v42 = vpack.c.bf16 %v1786_v14, %v1779_v54  ;;  %4108 = vmatpush2.bf16.msra.mxu1 %v7476_v31  ;;  %11754 = vst [vmem:[#allocation95_spill] sm:$0xff] %v9155_v49  ;;  %v1435_v40 = vadd.f32 %v1434_v11, %v8971_v57  ;;  %v7482_v31 = vld [vmem:[#allocation3 + $0x188] ss:$16 sps:$4 sm:$0xff]   ;;  %v11756_v14 = vmov 0  }
 0x1d6   : > { %v1436_v2 = vpop.f32.mrf.mxu0  ;;  %4109 = vmatprep.subr.bf16.mxu1 %v7481_v25  ;;  %v1792_v34 = vmax.f32 %v1433_v39, 0.0 }
 0x1d7   : > { %11753 = vst [vmem:[#allocation94_spill] sm:$0xff] %v9153_v42  ;;  %v1437_v19 = vadd.f32 %v1436_v2, %v8968_v29  ;;  %3815 = vmatprep.mubr.bf16.mxu1 %v9153_v42  ;;  %3911 = vmatpush1.bf16.msra.mxu0 %v7452_v15  ;;  %v1793_v54 = vmax.f32 %v1435_v40, 0.0  ;;  %v1668_v15 = vmax.f32 %v1536_v13, 0.0  ;;  %v1544_v13 = vadd.f32 %v8892_v56, %v9039_v20  ;;  %v7502_v56 = vld [vmem:[#allocation3 + $0x2cc] ss:$16 sps:$4 sm:$0xff]  }
 0x1d8   : > { %v1438_v43 = vpop.f32.mrf.mxu0  ;;  %v9167_v50 = vpop.f32.mrf.mxu1  ;;  %3816 = vmatmul.mubr.bf16.gmra.mxu1 %v9155_v49  ;;  %4282 = vmatprep.subr.bf16.mxu0 %v7499_v1  ;;  %v1547_v40 = vadd.f32 %v8902_v4, %v9039_v20  ;;  %v7488_v4 = vld [vmem:[#allocation3 + $0x148] ss:$16 sps:$4 sm:$0xff]  }
 0x1d9   : > { %v1439_v62 = vadd.f32 %v1438_v43, %v8971_v57  ;;  %4110 = vmatpush2.bf16.msra.mxu1 %v7479_v60  ;;  %v1799_v27 = vmax.f32 %v1437_v19, 0.0 }
 0x1da   : > { %v1442_v47 = vpop.f32.mrf.mxu0  ;;  %v9171_v25 = vpop.f32.mrf.mxu1  ;;  %3756 = vmatmul.mubr.bf16.gmra.mxu0 %v9162_v46  ;;  %4111 = vmatprep.subr.bf16.mxu1 %v7484_v38  ;;  %v7490_v38 = vld [vmem:[#allocation3 + $0x14c] ss:$16 sps:$4 sm:$0xff]  }
 0x1db   : > { %v1800_v10 = vmax.f32 %v1439_v62, 0.0  ;;  %3928 = vmatprep.mubr.bf16.mxu0 %v11756_v14  ;;  %v9179_v2 = vpack.c.bf16 %v1799_v27, %v1792_v34  ;;  %v7497_v62 = vld [vmem:[#allocation3 + $0x2e8] ss:$16 sps:$4 sm:$0xff]   ;;  %v1443_v27 = vadd.f32 %v1442_v47, %v8968_v29  ;;  %v1682_v47 = vmax.f32 %v1544_v13, 0.0 }
 0x1dc   : > { %v1444_v11 = vpop.f32.mrf.mxu0  ;;  %v9175_v1 = vpop.f32.mrf.mxu1 }
 0x1dd   : > { %v9177_v60 = vpack.c.bf16 %v1800_v10, %v1793_v54  ;;  %4112 = vmatpush2.bf16.msra.mxu1 %v7482_v31  ;;  %11758 = vst [vmem:[#allocation98_spill] sm:$0xff] %v9179_v2  ;;  %v1445_v37 = vadd.f32 %v1444_v11, %v8971_v57  ;;  %v9190_v31 = vpack.c.bf16 %v1675_v22, %v1668_v15  ;;  %v7493_v15 = vld [vmem:[#allocation3 + $0x12c] ss:$16 sps:$4 sm:$0xff]   ;;  %v1689_v22 = vmax.f32 %v1547_v40, 0.0 }
 0x1de   : > { %v1446_v19 = vpop.f32.mrf.mxu0  ;;  %v9181_v43 = vpop.f32.mrf.mxu1  ;;  %4113 = vmatprep.subr.bf16.mxu1 %v7487_v24 }
 0x1df   : > { %11757 = vst [vmem:[#allocation97_spill] sm:$0xff] %v9177_v60  ;;  %v1447_v39 = vadd.f32 %v1446_v19, %v8968_v29  ;;  %3825 = vmatprep.mubr.bf16.mxu1 %v9177_v60  ;;  %11759 = vst [vmem:[#allocation99_spill] sm:$0xff] %v9190_v31  ;;  %v1807_v60 = vmax.f32 %v1445_v37, 0.0  ;;  %v7496_v37 = vld [vmem:[#allocation3 + $0x10c] ss:$16 sps:$4 sm:$0xff]  }
 0x1e0   : > { %v1448_v54 = vpop.f32.mrf.mxu0  ;;  %v9193_v24 = vpop.f32.mrf.mxu1  ;;  %3826 = vmatmul.mubr.bf16.gmra.mxu1 %v9179_v2  ;;  %v7500_v2 = vld [vmem:[#allocation3 + $0x2c8] ss:$16 sps:$4 sm:$0xff]  }
 0x1e1   : > { %v1449_v10 = vadd.f32 %v1448_v54, %v8971_v57  ;;  %4114 = vmatpush2.bf16.msra.mxu1 %v7485_v61  ;;  %v1813_v34 = vmax.f32 %v1447_v39, 0.0  ;;  %v1806_v54 = vmax.f32 %v1443_v27, 0.0  ;;  %v7505_v39 = vld [vmem:[#allocation3 + $0x2ac] ss:$16 sps:$4 sm:$0xff]  }
 0x1e2   : > { %v1452_v11 = vpop.f32.mrf.mxu0  ;;  %v9197_v19 = vpop.f32.mrf.mxu1  ;;  %6780 = vmatmul.mubr.msk.bf16.vlgmr.msra.gmra.mxu0 %vm3268_vm0, %v9190_v31  ;;  %4115 = vmatprep.subr.bf16.mxu1 %v7490_v38  ;;  %v7491_v31 = vld [vmem:[#allocation3 + $0x128] ss:$16 sps:$4 sm:$0xff]  }
 0x1e3   : > { %v1814_v49 = vmax.f32 %v1449_v10, 0.0  ;;  %3938 = vmatprep.mubr.bf16.mxu0 %v11756_v14  ;;  %4283 = vmatpush1.bf16.msra.mxu0 %v7497_v62  ;;  %v9206_v38 = vpack.c.bf16 %v1813_v34, %v1806_v54  ;;  %v9210_v10 = vpack.c.bf16 %v1689_v22, %v1682_v47  ;;  %v7508_v47 = vld [vmem:[#allocation3 + $0x28c] ss:$16 sps:$4 sm:$0xff]  }
 0x1e4   : > { %v1454_v61 = vpop.f32.mrf.mxu0  ;;  %v9202_v42 = vpop.f32.mrf.mxu1  ;;  %4284 = vmatprep.subr.bf16.mxu0 %v7502_v56  ;;  %v1555_v56 = vadd.f32 %v8936_v30, %v9039_v20  ;;  %v7541_v30 = vld [vmem:[#allocation3 + $0x4ec] ss:$16 sps:$4 sm:$0xff]  }
 0x1e5   : > { %v9204_v5 = vpack.c.bf16 %v1814_v49, %v1807_v60  ;;  %4116 = vmatpush2.bf16.msra.mxu1 %v7488_v4  ;;  %11761 = vst [vmem:[#allocation101_spill] sm:$0xff] %v9206_v38  ;;  %11762 = vst [vmem:[#allocation102_spill] sm:$0xff] %v9210_v10  ;;  %v1455_v62 = vadd.f32 %v1454_v61, %v8971_v57  ;;  %v7503_v49 = vld [vmem:[#allocation3 + $0x2a8] ss:$16 sps:$4 sm:$0xff]   ;;  %v1552_v60 = vadd.f32 %v8927_v32, %v9039_v20 }
 0x1e6   : > { %v1456_v13 = vpop.f32.mrf.mxu0  ;;  %v9208_v40 = vpop.f32.mrf.mxu1  ;;  %4117 = vmatprep.subr.bf16.mxu1 %v7493_v15  ;;  %v1453_v4 = vadd.f32 %v1452_v11, %v8968_v29 }
 0x1e7   : > { %11760 = vst [vmem:[#allocation100_spill] sm:$0xff] %v9204_v5  ;;  %v1457_v27 = vadd.f32 %v1456_v13, %v8968_v29  ;;  %3835 = vmatprep.mubr.bf16.mxu1 %v9204_v5  ;;  %4285 = vmatpush1.bf16.msra.mxu0 %v7500_v2  ;;  %v7494_v2 = vld [vmem:[#allocation3 + $0x108] ss:$16 sps:$4 sm:$0xff]   ;;  %v1821_v32 = vmax.f32 %v1455_v62, 0.0  ;;  %v1703_v5 = vmax.f32 %v1555_v56, 0.0 }
 0x1e8   : > { %v1458_v34 = vpop.f32.mrf.mxu0  ;;  %v9220_v15 = vpop.f32.mrf.mxu1  ;;  %3836 = vmatmul.mubr.bf16.gmra.mxu1 %v9206_v38  ;;  %4286 = vmatprep.subr.bf16.mxu0 %v7505_v39  ;;  %v7506_v39 = vld [vmem:[#allocation3 + $0x288] ss:$16 sps:$4 sm:$0xff]   ;;  %v1696_v38 = vmax.f32 %v1552_v60, 0.0 }
 0x1e9   : > { %v1459_v22 = vadd.f32 %v1458_v34, %v8971_v57  ;;  %4118 = vmatpush2.bf16.msra.mxu1 %v7491_v31  ;;  %v1827_v54 = vmax.f32 %v1457_v27, 0.0  ;;  %v1820_v34 = vmax.f32 %v1453_v4, 0.0  ;;  %v7511_v27 = vld [vmem:[#allocation3 + $0x26c] ss:$16 sps:$4 sm:$0xff]   ;;  %v7509_v4 = vld [vmem:[#allocation3 + $0x268] ss:$16 sps:$4 sm:$0xff]  }
 0x1ea   : > { %v1462_v61 = vpop.f32.mrf.mxu0  ;;  %v9224_v13 = vpop.f32.mrf.mxu1  ;;  %6781 = vmatmul.mubr.msk.bf16.gmra.mxu0 %vm3268_vm0, %v9210_v10  ;;  %4119 = vmatprep.subr.bf16.mxu1 %v7496_v37  ;;  %v1560_v37 = vadd.f32 %v8922_v12, %v9039_v20 }
 0x1eb   : > { %v1828_v11 = vmax.f32 %v1459_v22, 0.0  ;;  %3948 = vmatprep.mubr.bf16.mxu0 %v11756_v14  ;;  %4287 = vmatpush1.bf16.msra.mxu0 %v7503_v49  ;;  %v9235_v62 = vpack.c.bf16 %v1827_v54, %v1820_v34  ;;  %v1563_v49 = vadd.f32 %v8932_v55, %v9039_v20  ;;  %v1463_v12 = vadd.f32 %v1462_v61, %v8968_v29 }
 0x1ec   : > { %v1464_v31 = vpop.f32.mrf.mxu0  ;;  %v9229_v26 = vpop.f32.mrf.mxu1  ;;  %4288 = vmatprep.subr.bf16.mxu0 %v7508_v47  ;;  %v9244_v47 = vpack.c.bf16 %v1703_v5, %v1696_v38  ;;  %v1710_v5 = vmax.f32 %v1560_v37, 0.0 }
 0x1ed   : > { %v9231_v46 = vpack.c.bf16 %v1828_v11, %v1821_v32  ;;  %4120 = vmatpush2.bf16.msra.mxu1 %v7494_v2  ;;  %11764 = vst [vmem:[#allocation104_spill] sm:$0xff] %v9235_v62  ;;  %v1465_v60 = vadd.f32 %v1464_v31, %v8971_v57  ;;  %v1717_v38 = vmax.f32 %v1563_v49, 0.0  ;;  %v7512_v31 = vld [vmem:[#allocation3 + $0x248] ss:$16 sps:$4 sm:$0xff]  }
 0x1ee   : > { %v1466_v22 = vpop.f32.mrf.mxu0  ;;  %v9237_v10 = vpop.f32.mrf.mxu1  ;;  %4475 = vmatprep.subr.bf16.mxu1 %v7541_v30  ;;  %11765 = vst [vmem:[#allocation105_spill] sm:$0xff] %v9244_v47  ;;  %v7514_v30 = vld [vmem:[#allocation3 + $0x24c] ss:$16 sps:$4 sm:$0xff]  }
 0x1ef   : > { %11763 = vst [vmem:[#allocation103_spill] sm:$0xff] %v9231_v46  ;;  %v1467_v56 = vadd.f32 %v1466_v22, %v8968_v29  ;;  %3845 = vmatprep.mubr.bf16.mxu1 %v9231_v46  ;;  %4289 = vmatpush1.bf16.msra.mxu0 %v7506_v39  ;;  %v1835_v39 = vmax.f32 %v1465_v60, 0.0  ;;  %v1834_v22 = vmax.f32 %v1463_v12, 0.0  ;;  %v9264_v37 = vpack.c.bf16 %v1717_v38, %v1710_v5  ;;  %v7520_v5 = vld [vmem:[#allocation3 + $0x20c] ss:$16 sps:$4 sm:$0xff]  }
 0x1f0   : > { %v1468_v2 = vpop.f32.mrf.mxu0  ;;  %v9247_v54 = vpop.f32.mrf.mxu1  ;;  %3846 = vmatmul.mubr.bf16.gmra.mxu1 %v9235_v62  ;;  %4290 = vmatprep.subr.bf16.mxu0 %v7511_v27  ;;  %v1568_v12 = vadd.f32 %v8957_v48, %v9039_v20 }
 0x1f1   : > { %v1469_v55 = vadd.f32 %v1468_v2, %v8971_v57  ;;  %v1841_v32 = vmax.f32 %v1467_v56, 0.0  ;;  %v7517_v56 = vld [vmem:[#allocation3 + $0x22c] ss:$16 sps:$4 sm:$0xff]   ;;  %11768 = vst [vmem:[#allocation108_spill] sm:$0xff] %v9264_v37 }
 0x1f2   : > { %v1472_v11 = vpop.f32.mrf.mxu0  ;;  %v9251_v34 = vpop.f32.mrf.mxu1  ;;  %6782 = vmatmul.mubr.msk.bf16.gmra.mxu0 %vm3268_vm0, %v9244_v47 }
 0x1f3   : > { %v1842_v61 = vmax.f32 %v1469_v55, 0.0  ;;  %3958 = vmatprep.mubr.bf16.mxu0 %v11756_v14  ;;  %4291 = vmatpush1.bf16.msra.mxu0 %v7509_v4  ;;  %v9260_v46 = vpack.c.bf16 %v1841_v32, %v1834_v22  ;;  %v7515_v4 = vld [vmem:[#allocation3 + $0x228] ss:$16 sps:$4 sm:$0xff]   ;;  %v1473_v55 = vadd.f32 %v1472_v11, %v8968_v29  ;;  %v1724_v22 = vmax.f32 %v1568_v12, 0.0 }
 0x1f4   : > { %v1474_v27 = vpop.f32.mrf.mxu0  ;;  %v9256_v62 = vpop.f32.mrf.mxu1  ;;  %4292 = vmatprep.subr.bf16.mxu0 %v7514_v30  ;;  %v1571_v30 = vadd.f32 %v8975_v21, %v9039_v20  ;;  %v7518_v11 = vld [vmem:[#allocation3 + $0x208] ss:$16 sps:$4 sm:$0xff]  }
 0x1f5   : > { %v9258_v2 = vpack.c.bf16 %v1842_v61, %v1835_v39  ;;  %11767 = vst [vmem:[#allocation107_spill] sm:$0xff] %v9260_v46  ;;  %v1475_v49 = vadd.f32 %v1474_v27, %v8971_v57 }
 0x1f6   : > { %v1476_v63 = vpop.f32.mrf.mxu0  ;;  %v9262_v47 = vpop.f32.mrf.mxu1  ;;  %v1731_v27 = vmax.f32 %v1571_v30, 0.0 }
 0x1f7   : > { %11766 = vst [vmem:[#allocation106_spill] sm:$0xff] %v9258_v2  ;;  %v1477_v60 = vadd.f32 %v1476_v63, %v8968_v29  ;;  %3855 = vmatprep.mubr.bf16.mxu1 %v9258_v2  ;;  %4293 = vmatpush1.bf16.msra.mxu0 %v7512_v31  ;;  %v1849_v48 = vmax.f32 %v1475_v49, 0.0 }
 0x1f8   : > { %v1478_v32 = vpop.f32.mrf.mxu0  ;;  %v9274_v39 = vpop.f32.mrf.mxu1  ;;  %3856 = vmatmul.mubr.bf16.gmra.mxu1 %v9260_v46  ;;  %4294 = vmatprep.subr.bf16.mxu0 %v7517_v56  ;;  %v1848_v46 = vmax.f32 %v1473_v55, 0.0  ;;  %v7521_v55 = vld [vmem:[#allocation3 + $0x3e8] ss:$16 sps:$4 sm:$0xff]  }
 0x1f9   : > { %v1479_v63 = vadd.f32 %v1478_v32, %v8971_v57  ;;  %v1855_v38 = vmax.f32 %v1477_v60, 0.0  ;;  %v7523_v60 = vld [vmem:[#allocation3 + $0x3ec] ss:$16 sps:$4 sm:$0xff]  }
 0x1fa   : > { %v1482_v61 = vpop.f32.mrf.mxu0  ;;  %v9278_v31 = vpop.f32.mrf.mxu1  ;;  %6783 = vmatmul.mubr.msk.bf16.gmra.mxu0 %vm3268_vm0, %v9264_v37 }
 0x1fb   : > { %v1856_v21 = vmax.f32 %v1479_v63, 0.0  ;;  %3968 = vmatprep.mubr.bf16.mxu0 %v11756_v14  ;;  %4295 = vmatpush1.bf16.msra.mxu0 %v7515_v4  ;;  %v9289_v37 = vpack.c.bf16 %v1855_v38, %v1848_v46  ;;  %v1579_v4 = vadd.f32 %v8960_v16, %v9039_v20  ;;  %v1483_v7 = vadd.f32 %v1482_v61, %v8968_v29 }
 0x1fc   : > { %v1484_v56 = vpop.f32.mrf.mxu0  ;;  %v9283_v2 = vpop.f32.mrf.mxu1  ;;  %4296 = vmatprep.subr.bf16.mxu0 %v7520_v5  ;;  %v9298_v5 = vpack.c.bf16 %v1731_v27, %v1724_v22  ;;  %v1738_v61 = vmax.f32 %v1576_v28, 0.0 }
 0x1fd   : > { %v9285_v32 = vpack.c.bf16 %v1856_v21, %v1849_v48  ;;  %11770 = vst [vmem:[#allocation110_spill] sm:$0xff] %v9289_v37  ;;  %v1485_v12 = vadd.f32 %v1484_v56, %v8971_v57  ;;  %v7526_v48 = vld [vmem:[#allocation3 + $0x3cc] ss:$16 sps:$4 sm:$0xff]   ;;  %v1745_v22 = vmax.f32 %v1579_v4, 0.0 }
 0x1fe   : > { %v1486_v49 = vpop.f32.mrf.mxu0  ;;  %v9291_v63 = vpop.f32.mrf.mxu1  ;;  %11771 = vst [vmem:[#allocation111_spill] sm:$0xff] %v9298_v5  ;;  %v2206_v21 = vld [vmem:[%s11503_s4] sm:$0xf] }
 0x1ff   : > { %11769 = vst [vmem:[#allocation109_spill] sm:$0xff] %v9285_v32  ;;  %v1487_v30 = vadd.f32 %v1486_v49, %v8968_v29  ;;  %3865 = vmatprep.mubr.bf16.mxu1 %v9285_v32  ;;  %4297 = vmatpush1.bf16.msra.mxu0 %v7518_v11  ;;  %v1863_v27 = vmax.f32 %v1485_v12, 0.0  ;;  %v9316_v23 = vrot.slane %v2206_v21, %v11772_v53  ;;  %v7527_v53 = vld [vmem:[#allocation3 + $0x3a8] ss:$16 sps:$4 sm:$0xff]  }
 0x200   : > { %v1488_v46 = vpop.f32.mrf.mxu0  ;;  %v9301_v38 = vpop.f32.mrf.mxu1  ;;  %3866 = vmatmul.mubr.bf16.gmra.mxu1 %v9289_v37  ;;  %4298 = vmatprep.subr.bf16.mxu0 %v7523_v60  ;;  %v7524_v60 = vld [vmem:[#allocation3 + $0x3c8] ss:$16 sps:$4 sm:$0xff]  }
 0x201   : > { %v1489_v16 = vadd.f32 %v1488_v46, %v8971_v57  ;;  %v1869_v56 = vmax.f32 %v1487_v30, 0.0  ;;  %v1862_v46 = vmax.f32 %v1483_v7, 0.0  ;;  %v7529_v30 = vld [vmem:[#allocation3 + $0x3ac] ss:$16 sps:$4 sm:$0xff]  }
 0x202   : > { %v1492_v11 = vpop.f32.mrf.mxu0  ;;  %v9308_v49 = vpop.f32.mrf.mxu1  ;;  %6784 = vmatmul.mubr.msk.bf16.gmra.mxu0 %vm3268_vm0, %v9298_v5  ;;  %v11774_v5 = vld [vmem:[#allocation10_spill] sm:$0xff] }
 0x203   : > { %v1870_v32 = vmax.f32 %v1489_v16, 0.0  ;;  %3978 = vmatprep.mubr.bf16.mxu0 %v11756_v14  ;;  %4299 = vmatpush2.bf16.msra.mxu0 %v7521_v55  ;;  %v9321_v28 = vrot.slane %v2206_v21, %v11774_v5  ;;  %v9323_v4 = vpack.c.bf16 %v1869_v56, %v1862_v46  ;;  %v9327_v55 = vpack.c.bf16 %v1745_v22, %v1738_v61 }
 0x204   : > { %v1494_v37 = vpop.f32.mrf.mxu0  ;;  %v9313_v36 = vpop.f32.mrf.mxu1  ;;  %4300 = vmatprep.subr.bf16.mxu0 %v7526_v48  ;;  %v1587_v21 = vadd.f32 %v9005_v51, %v9039_v20  ;;  %v1493_v56 = vadd.f32 %v1492_v11, %v8968_v29  ;;  %v3352_v61 = vadd.f32 %v9167_v50, %v9316_v23  ;;  %v7530_v50 = vld [vmem:[#allocation3 + $0x388] ss:$16 sps:$4 sm:$0xff]  }
 0x205   : > { %v9318_v52 = vpack.c.bf16 %v1870_v32, %v1863_v27  ;;  %11775 = vst [vmem:[#allocation113_spill] sm:$0xff] %v9323_v4  ;;  %11776 = vst [vmem:[#allocation114_spill] sm:$0xff] %v9327_v55  ;;  %v1495_v7 = vadd.f32 %v1494_v37, %v8971_v57  ;;  %v1584_v32 = vadd.f32 %v8994_v33, %v9039_v20  ;;  %v7532_v37 = vld [vmem:[#allocation3 + $0x38c] ss:$16 sps:$4 sm:$0xff]  }
 0x206   : > { %v1496_v12 = vpop.f32.mrf.mxu0  ;;  %v9325_v16 = vpop.f32.mrf.mxu1 }
 0x207   : > { %11773 = vst [vmem:[#allocation112_spill] sm:$0xff] %v9318_v52  ;;  %v1497_v48 = vadd.f32 %v1496_v12, %v8968_v29  ;;  %3875 = vmatprep.mubr.bf16.mxu1 %v9318_v52  ;;  %4301 = vmatpush2.bf16.msra.mxu0 %v7524_v60  ;;  %v3354_v29 = vadd.f32 %v9171_v25, %v9321_v28  ;;  %v1877_v51 = vmax.f32 %v1495_v7, 0.0  ;;  %v7535_v52 = vld [vmem:[#allocation3 + $0x36c] ss:$16 sps:$4 sm:$0xff]  }
 0x208   : > { %v1498_v27 = vpop.f32.mrf.mxu0  ;;  %v9337_v46 = vpop.f32.mrf.mxu1  ;;  %3876 = vmatmul.mubr.bf16.gmra.mxu1 %v9323_v4  ;;  %4302 = vmatprep.subr.bf16.mxu0 %v7529_v30  ;;  %v1752_v30 = vmax.f32 %v1584_v32, 0.0  ;;  %v3358_v32 = vadd.f32 %v9181_v43, %v9321_v28  ;;  %v7538_v43 = vld [vmem:[#allocation3 + $0x34c] ss:$16 sps:$4 sm:$0xff]  }
 0x209   : > { %v1499_v22 = vadd.f32 %v1498_v27, %v8971_v57  ;;  %v1883_v60 = vmax.f32 %v1497_v48, 0.0  ;;  %v1759_v57 = vmax.f32 %v1587_v21, 0.0  ;;  %v1876_v48 = vmax.f32 %v1493_v56, 0.0  ;;  %v7533_v56 = vld [vmem:[#allocation3 + $0x368] ss:$16 sps:$4 sm:$0xff]  }
 0x20a   : > { %v9343_v12 = vpop.f32.mrf.mxu1  ;;  %v3544_v33 = vpop.f32.mrf.mxu0  ;;  %6785 = vmatmul.mubr.msk.bf16.gmra.mxu0 %vm3268_vm0, %v9327_v55  ;;  %v3356_v55 = vadd.f32 %v9175_v1, %v9316_v23  ;;  %v1592_v1 = vadd.f32 %v8990_v17, %v9039_v20 }
 0x20b   : > { %v1884_v11 = vmax.f32 %v1499_v22, 0.0  ;;  %v9349_v5 = vadd.f32 %v3544_v33, %v3352_v61  ;;  %3988 = vmatprep.mubr.bf16.mxu0 %v11756_v14  ;;  %4303 = vmatpush2.bf16.msra.mxu0 %v7527_v53  ;;  %v9360_v61 = vpack.c.bf16 %v1883_v60, %v1876_v48 }
 0x20c   : > { %v9352_v27 = vpop.f32.mrf.mxu1  ;;  %v3546_v4 = vpop.f32.mrf.mxu0  ;;  %4304 = vmatprep.subr.bf16.mxu0 %v7532_v37  ;;  %v9373_v37 = vpack.c.bf16 %v1759_v57, %v1752_v30 }
 0x20d   : > { %v9356_v25 = vadd.f32 %v3546_v4, %v3354_v29  ;;  %v9358_v7 = vpack.c.bf16 %v1884_v11, %v1877_v51  ;;  %11778 = vst [vmem:[#allocation116_spill] sm:$0xff] %v9360_v61  ;;  %v1595_v4 = vadd.f32 %v8997_v59, %v9039_v20  ;;  %v11781_v51 = vld [vmem:[#allocation12_spill] sm:$0xff]  ;;  %v3364_v59 = vadd.f32 %v9197_v19, %v9321_v28 }
 0x20e   : > { %v9362_v22 = vpop.f32.mrf.mxu1  ;;  %v3548_v53 = vpop.f32.mrf.mxu0  ;;  %11779 = vst [vmem:[#allocation117_spill] sm:$0xff] %v9373_v37 }
 0x20f   : > { %11777 = vst [vmem:[#allocation115_spill] sm:$0xff] %v9358_v7  ;;  %v9366_v21 = vadd.f32 %v3548_v53, %v3356_v55  ;;  %3885 = vmatprep.mubr.bf16.mxu1 %v9358_v7  ;;  %4305 = vmatpush2.bf16.msra.mxu0 %v7530_v50  ;;  %v3362_v55 = vadd.f32 %v9193_v24, %v9316_v23  ;;  %v1766_v24 = vmax.f32 %v1592_v1, 0.0  ;;  %v1773_v30 = vmax.f32 %v1595_v4, 0.0  ;;  %v7544_v53 = vld [vmem:[#allocation3 + $0x32c] ss:$16 sps:$4 sm:$0xff]  }
 0x210   : > { %v9375_v60 = vpop.f32.mrf.mxu1  ;;  %v3550_v33 = vpop.f32.mrf.mxu0  ;;  %3886 = vmatmul.mubr.bf16.gmra.mxu1 %v9360_v61  ;;  %4306 = vmatprep.subr.bf16.mxu0 %v7535_v52  ;;  %v7536_v52 = vld [vmem:[#allocation3 + $0x348] ss:$16 sps:$4 sm:$0xff]   ;;  %v7550_v7 = vld [vmem:[#allocation3 + $0x30c] ss:$16 sps:$4 sm:$0xff]  }
 0x211   : > { %v9380_v29 = vadd.f32 %v3550_v33, %v3358_v32  ;;  %4121 = vmatprep.mubr.bf16.mxu1 %v11781_v51  ;;  %v3366_v32 = vadd.f32 %v9202_v42, %v9316_v23  ;;  %v7539_v51 = vld [vmem:[#allocation3 + $0x4e8] ss:$16 sps:$4 sm:$0xff]   ;;  %v1603_v42 = vadd.f32 %v9036_v3, %v9039_v20  ;;  %v7553_v3 = vld [vmem:[#allocation3 + $0x4ac] ss:$16 sps:$4 sm:$0xff]  }
 0x212   : > { %v9383_v17 = vpop.f32.mrf.mxu1  ;;  %v3554_v11 = vpop.f32.mrf.mxu0  ;;  %6786 = vmatmul.mubr.msk.bf16.gmra.mxu0 %vm3268_vm0, %v9373_v37  ;;  %v7542_v4 = vld [vmem:[#allocation3 + $0x328] ss:$16 sps:$4 sm:$0xff]   ;;  %v9404_v37 = vpack.c.bf16 %v1773_v30, %v1766_v24  ;;  %v11788_v24 = vld [vmem:[#allocation14_spill] sm:$0xff] }
 0x213   : > { %11780 = vst [vmem:[#allocation118_spill] sm:$0xff] %v9380_v29  ;;  %v9389_v50 = vadd.f32 %v3554_v11, %v3362_v55  ;;  %3998 = vmatprep.mubr.bf16.mxu0 %v11756_v14  ;;  %4307 = vmatpush2.bf16.msra.mxu0 %v7533_v56  ;;  %v7547_v11 = vld [vmem:[#allocation3 + $0x4cc] ss:$16 sps:$4 sm:$0xff]   ;;  %v3368_v56 = vadd.f32 %v9208_v40, %v9321_v28  ;;  %v11786_v61 = vld [vmem:[#allocation13_spill] sm:$0xff] }
 0x214   : > { %v9392_v57 = vpop.f32.mrf.mxu1  ;;  %v3556_v48 = vpop.f32.mrf.mxu0  ;;  %4308 = vmatprep.subr.bf16.mxu0 %v7538_v43  ;;  %11785 = vst [vmem:[#allocation121_spill] sm:$0xff] %v9404_v37  ;;  %v1600_v43 = vadd.f32 %v9027_v41, %v9039_v20  ;;  %v3372_v40 = vadd.f32 %v9220_v15, %v9316_v23  ;;  %v7545_v30 = vld [vmem:[#allocation3 + $0x4c8] ss:$16 sps:$4 sm:$0xff]  }
 0x215   : > { %11782 = vst [vmem:[#allocation12_spill] sm:$0xff] %v9389_v50  ;;  %v9396_v33 = vadd.f32 %v3556_v48, %v3364_v59  ;;  %v7548_v15 = vld [vmem:[#allocation3 + $0x308] ss:$16 sps:$4 sm:$0xff]  }
 0x216   : > { %v9398_v19 = vpop.f32.mrf.mxu1  ;;  %v3558_v55 = vpop.f32.mrf.mxu0  ;;  %v11805_v50 = vld [vmem:[#allocation27_spill] sm:$0xff] }
 0x217   : > { %11783 = vst [vmem:[#allocation119_spill] sm:$0xff] %v9396_v33  ;;  %v9402_v1 = vadd.f32 %v3558_v55, %v3366_v32  ;;  %4309 = vmatpush2.bf16.msra.mxu0 %v7536_v52  ;;  %v1780_v55 = vmax.f32 %v1600_v43, 0.0 }
 0x218   : > { %v9410_v59 = vpop.f32.mrf.mxu1  ;;  %v3560_v48 = vpop.f32.mrf.mxu0  ;;  %4122 = vmatmul.mubr.bf16.vlgmr.msra.gmra.mxu1 %v11786_v61  ;;  %4310 = vmatprep.subr.bf16.mxu0 %v7544_v53  ;;  %v3374_v61 = vadd.f32 %v9224_v13, %v9321_v28 }
 0x219   : > { %11784 = vst [vmem:[#allocation120_spill] sm:$0xff] %v9402_v1  ;;  %v9415_v52 = vadd.f32 %v3560_v48, %v3368_v56  ;;  %4131 = vmatprep.mubr.bf16.mxu1 %v11788_v24  ;;  %4476 = vmatpush1.bf16.msra.mxu1 %v7539_v51  ;;  %v1787_v51 = vmax.f32 %v1603_v42, 0.0  ;;  %v3376_v24 = vadd.f32 %v9229_v26, %v9316_v23  ;;  %v11803_v1 = vld [vmem:[#allocation25_spill] sm:$0xff] }
 0x21a   : > { %v9418_v41 = vpop.f32.mrf.mxu1  ;;  %v3564_v32 = vpop.f32.mrf.mxu0  ;;  %6787 = vmatmul.mubr.msk.bf16.gmra.mxu0 %vm3268_vm0, %v9404_v37  ;;  %4477 = vmatprep.subr.bf16.mxu1 %v7547_v11  ;;  %v7551_v37 = vld [vmem:[#allocation3 + $0x4a8] ss:$16 sps:$4 sm:$0xff]   ;;  %v1611_v26 = vadd.f32 %v9030_v45, %v9039_v20  ;;  %v7559_v45 = vld [vmem:[#allocation3 + $0x46c] ss:$16 sps:$4 sm:$0xff]  }
 0x21b   : > { %11787 = vst [vmem:[#allocation13_spill] sm:$0xff] %v9415_v52  ;;  %v9424_v53 = vadd.f32 %v3564_v32, %v3372_v40  ;;  %4008 = vmatprep.mubr.bf16.mxu0 %v11756_v14  ;;  %4311 = vmatpush2.bf16.msra.mxu0 %v7542_v4  ;;  %v7556_v32 = vld [vmem:[#allocation3 + $0x48c] ss:$16 sps:$4 sm:$0xff]   ;;  %v3378_v4 = vadd.f32 %v9237_v10, %v9321_v28 }
 0x21c   : > { %v9427_v56 = vpop.f32.mrf.mxu1  ;;  %v3566_v48 = vpop.f32.mrf.mxu0  ;;  %4312 = vmatprep.subr.bf16.mxu0 %v7550_v7  ;;  %v1608_v7 = vadd.f32 %v9022_v18, %v9039_v20  ;;  %v9443_v42 = vpack.c.bf16 %v1787_v51, %v1780_v55  ;;  %v3384_v55 = vadd.f32 %v9251_v34, %v9321_v28 }
 0x21d   : > { %11789 = vst [vmem:[#allocation14_spill] sm:$0xff] %v9424_v53  ;;  %v9431_v11 = vadd.f32 %v3566_v48, %v3374_v61  ;;  %4478 = vmatpush1.bf16.msra.mxu1 %v7545_v30  ;;  %v11793_v48 = vld [vmem:[#allocation15_spill] sm:$0xff] }
 0x21e   : > { %v9433_v13 = vpop.f32.mrf.mxu1  ;;  %v3568_v40 = vpop.f32.mrf.mxu0  ;;  %4479 = vmatprep.subr.bf16.mxu1 %v7553_v3  ;;  %11792 = vst [vmem:[#allocation124_spill] sm:$0xff] %v9443_v42  ;;  %v3382_v3 = vadd.f32 %v9247_v54, %v9316_v23  ;;  %v1794_v54 = vmax.f32 %v1608_v7, 0.0  ;;  %v3388_v7 = vadd.f32 %v9262_v47, %v9321_v28 }
 0x21f   : > { %11790 = vst [vmem:[#allocation122_spill] sm:$0xff] %v9431_v11  ;;  %v9437_v43 = vadd.f32 %v3568_v40, %v3376_v24  ;;  %4313 = vmatpush2.bf16.msra.mxu0 %v7548_v15  ;;  %v11795_v24 = vld [vmem:[#allocation16_spill] sm:$0xff]  ;;  %v7554_v15 = vld [vmem:[#allocation3 + $0x488] ss:$16 sps:$4 sm:$0xff]  }
 0x220   : > { %v9445_v30 = vpop.f32.mrf.mxu1  ;;  %v3570_v61 = vpop.f32.mrf.mxu0  ;;  %4132 = vmatmul.mubr.bf16.gmra.mxu1 %v11793_v48  ;;  %v3386_v48 = vadd.f32 %v9256_v62, %v9316_v23  ;;  %v1616_v62 = vadd.f32 %v9059_v44, %v9039_v20 }
 0x221   : > { %11791 = vst [vmem:[#allocation123_spill] sm:$0xff] %v9437_v43  ;;  %v9450_v10 = vadd.f32 %v3570_v61, %v3378_v4  ;;  %4141 = vmatprep.mubr.bf16.mxu1 %v11795_v24  ;;  %4480 = vmatpush1.bf16.msra.mxu1 %v7551_v37  ;;  %v1801_v4 = vmax.f32 %v1611_v26, 0.0  ;;  %v11797_v43 = vld [vmem:[#allocation17_spill] sm:$0xff] }
 0x222   : > { %v9453_v18 = vpop.f32.mrf.mxu1  ;;  %v3574_v40 = vpop.f32.mrf.mxu0  ;;  %6788 = vmatmul.mubr.msk.bf16.gmra.mxu0 %vm3268_vm0, %v9443_v42  ;;  %4481 = vmatprep.subr.bf16.mxu1 %v7556_v32  ;;  %v7557_v32 = vld [vmem:[#allocation3 + $0x468] ss:$16 sps:$4 sm:$0xff]   ;;  %v7595_v42 = vld [vmem:[#allocation3 + $0x66c] ss:$16 sps:$4 sm:$0xff]  }
 0x223   : > { %11794 = vst [vmem:[#allocation15_spill] sm:$0xff] %v9450_v10  ;;  %v9459_v51 = vadd.f32 %v3574_v40, %v3382_v3  ;;  %4018 = vmatprep.mubr.bf16.mxu0 %v11756_v14  ;;  %v7562_v3 = vld [vmem:[#allocation3 + $0x44c] ss:$16 sps:$4 sm:$0xff]   ;;  %4676 = vmatprep.subr.bf16.mxu0 %v7595_v42  ;;  %v9474_v40 = vpack.c.bf16 %v1801_v4, %v1794_v54  ;;  %v7560_v42 = vld [vmem:[#allocation3 + $0x448] ss:$16 sps:$4 sm:$0xff]  }
 0x224   : > { %v9462_v61 = vpop.f32.mrf.mxu1  ;;  %v3576_v37 = vpop.f32.mrf.mxu0 }
 0x225   : > { %v9466_v24 = vadd.f32 %v3576_v37, %v3384_v55  ;;  %4482 = vmatpush1.bf16.msra.mxu1 %v7554_v15  ;;  %11796 = vst [vmem:[#allocation16_spill] sm:$0xff] %v9474_v40  ;;  %v1619_v15 = vadd.f32 %v9069_v8, %v9039_v20  ;;  %v7565_v8 = vld [vmem:[#allocation3 + $0x42c] ss:$16 sps:$4 sm:$0xff]  }
 0x226   : > { %v9468_v10 = vpop.f32.mrf.mxu1  ;;  %v3578_v34 = vpop.f32.mrf.mxu0  ;;  %4483 = vmatprep.subr.bf16.mxu1 %v7559_v45  ;;  %v3392_v45 = vadd.f32 %v9274_v39, %v9316_v23  ;;  %v1808_v39 = vmax.f32 %v1616_v62, 0.0 }
 0x227   : > { %v9472_v26 = vadd.f32 %v3578_v34, %v3386_v48  ;;  %v11798_v48 = vld [vmem:[#allocation18_spill] sm:$0xff]  ;;  %v1815_v34 = vmax.f32 %v1619_v15, 0.0 }
 0x228   : > { %v9480_v55 = vpop.f32.mrf.mxu1  ;;  %v3580_v37 = vpop.f32.mrf.mxu0  ;;  %4142 = vmatmul.mubr.bf16.gmra.mxu1 %v11797_v43  ;;  %v3394_v43 = vadd.f32 %v9278_v31, %v9321_v28  ;;  %v7568_v31 = vld [vmem:[#allocation3 + $0x40c] ss:$16 sps:$4 sm:$0xff]  }
 0x229   : > { %v9485_v47 = vadd.f32 %v3580_v37, %v3388_v7  ;;  %4151 = vmatprep.mubr.bf16.mxu1 %v11798_v48  ;;  %4484 = vmatpush1.bf16.msra.mxu1 %v7557_v32  ;;  %v3396_v37 = vadd.f32 %v9283_v2, %v9316_v23  ;;  %v9509_v15 = vpack.c.bf16 %v1815_v34, %v1808_v39  ;;  %v11800_v2 = vld [vmem:[#allocation19_spill] sm:$0xff] }
 0x22a   : > { %v9488_v54 = vpop.f32.mrf.mxu1  ;;  %v3584_v44 = vpop.f32.mrf.mxu0  ;;  %6789 = vmatmul.mubr.msk.bf16.gmra.mxu0 %vm3268_vm0, %v9474_v40  ;;  %4485 = vmatprep.subr.bf16.mxu1 %v7562_v3  ;;  %v7563_v3 = vld [vmem:[#allocation3 + $0x428] ss:$16 sps:$4 sm:$0xff]   ;;  %v3404_v39 = vadd.f32 %v9308_v49, %v9321_v28  ;;  %v3408_v49 = vadd.f32 %v9325_v16, %v9321_v28 }
 0x22b   : > { %v9494_v4 = vadd.f32 %v3584_v44, %v3392_v45  ;;  %4028 = vmatprep.mubr.bf16.mxu0 %v11756_v14  ;;  %v3398_v45 = vadd.f32 %v9291_v63, %v9321_v28  ;;  %11799 = vst [vmem:[#allocation17_spill] sm:$0xff] %v9509_v15  ;;  %v7572_v16 = vld [vmem:[#allocation3 + $0x5c8] ss:$16 sps:$4 sm:$0xff]  }
 0x22c   : > { %v9497_v7 = vpop.f32.mrf.mxu1  ;;  %v3586_v32 = vpop.f32.mrf.mxu0 }
 0x22d   : > { %v9501_v48 = vadd.f32 %v3586_v32, %v3394_v43  ;;  %4486 = vmatpush1.bf16.msra.mxu1 %v7560_v42  ;;  %v3402_v42 = vadd.f32 %v9301_v38, %v9316_v23  ;;  %v11801_v32 = vld [vmem:[#allocation20_spill] sm:$0xff] }
 0x22e   : > { %v9503_v40 = vpop.f32.mrf.mxu1  ;;  %v3588_v11 = vpop.f32.mrf.mxu0  ;;  %4487 = vmatprep.subr.bf16.mxu1 %v7565_v8  ;;  %v7566_v8 = vld [vmem:[#allocation3 + $0x408] ss:$16 sps:$4 sm:$0xff]  }
 0x22f   : > { %v9507_v62 = vadd.f32 %v3588_v11, %v3396_v37  ;;  %v7571_v11 = vld [vmem:[#allocation3 + $0x5ec] ss:$16 sps:$4 sm:$0xff]   ;;  %v3406_v37 = vadd.f32 %v9313_v36, %v9316_v23  ;;  %v1635_v36 = vadd.f32 %v9101_v6, %v9039_v20  ;;  %v3414_v6 = vadd.f32 %v9343_v12, %v9321_v28 }
 0x230   : > { %v9511_v44 = vpop.f32.mrf.mxu1  ;;  %v3590_v53 = vpop.f32.mrf.mxu0  ;;  %4152 = vmatmul.mubr.bf16.gmra.mxu1 %v11800_v2  ;;  %v7580_v12 = vld [vmem:[#allocation3 + $0x58c] ss:$16 sps:$4 sm:$0xff]  }
 0x231   : > { %v9516_v43 = vadd.f32 %v3590_v53, %v3398_v45  ;;  %4161 = vmatprep.mubr.bf16.mxu1 %v11801_v32  ;;  %4488 = vmatpush1.bf16.msra.mxu1 %v7563_v3  ;;  %v7569_v45 = vld [vmem:[#allocation3 + $0x5e8] ss:$16 sps:$4 sm:$0xff]   ;;  %v7574_v32 = vld [vmem:[#allocation3 + $0x5cc] ss:$16 sps:$4 sm:$0xff]  }
 0x232   : > { %v9519_v52 = vpop.f32.mrf.mxu1  ;;  %v3594_v63 = vpop.f32.mrf.mxu0  ;;  %6790 = vmatmul.mubr.msk.bf16.gmra.mxu0 %vm3268_vm0, %v9509_v15  ;;  %4489 = vmatprep.subr.bf16.mxu1 %v7568_v31 }
 0x233   : > { %v9525_v34 = vadd.f32 %v3594_v63, %v3402_v42  ;;  %4038 = vmatprep.mubr.bf16.mxu0 %v11756_v14  ;;  %v1632_v63 = vadd.f32 %v9091_v0, %v9039_v20  ;;  %v7577_v20 = vld [vmem:[#allocation3 + $0x5ac] ss:$16 sps:$4 sm:$0xff]  }
 0x234   : > { %v9528_v38 = vpop.f32.mrf.mxu1  ;;  %v3596_v53 = vpop.f32.mrf.mxu0 }
 0x235   : > { %v9532_v3 = vadd.f32 %v3596_v53, %v3404_v39  ;;  %4490 = vmatpush1.bf16.msra.mxu1 %v7566_v8  ;;  %v11802_v53 = vld [vmem:[#allocation21_spill] sm:$0xff] }
 0x236   : > { %v9534_v2 = vpop.f32.mrf.mxu1  ;;  %v3598_v31 = vpop.f32.mrf.mxu0  ;;  %4491 = vmatprep.subr.bf16.mxu1 %v7571_v11  ;;  %v3412_v11 = vadd.f32 %v9337_v46, %v9316_v23  ;;  %v1836_v46 = vmax.f32 %v1632_v63, 0.0 }
 0x237   : > { %v9538_v42 = vadd.f32 %v3598_v31, %v3406_v37 }
 0x238   : > { %v9544_v39 = vpop.f32.mrf.mxu1  ;;  %v3600_v8 = vpop.f32.mrf.mxu0  ;;  %4162 = vmatmul.mubr.bf16.gmra.mxu1 %v11802_v53 }
 0x239   : > { %v9549_v15 = vadd.f32 %v3600_v8, %v3408_v49  ;;  %4171 = vmatprep.mubr.bf16.mxu1 %v11803_v1  ;;  %4492 = vmatpush2.bf16.msra.mxu1 %v7569_v45  ;;  %v1843_v49 = vmax.f32 %v1635_v36, 0.0  ;;  %v3416_v8 = vadd.f32 %v9352_v27, %v9316_v23  ;;  %v3422_v27 = vadd.f32 %v9375_v60, %v9316_v23 }
 0x23a   : > { %v9552_v37 = vpop.f32.mrf.mxu1  ;;  %v3604_v0 = vpop.f32.mrf.mxu0  ;;  %6791 = vmatmul.mubr.msk.bf16.gmra.mxu0 %vm3268_vm0, %v9085_v35  ;;  %4493 = vmatprep.subr.bf16.mxu1 %v7574_v32  ;;  %v7575_v32 = vld [vmem:[#allocation3 + $0x5a8] ss:$16 sps:$4 sm:$0xff]  }
 0x23b   : > { %v9558_v31 = vadd.f32 %v3604_v0, %v3412_v11  ;;  %4048 = vmatprep.mubr.bf16.mxu0 %v11756_v14  ;;  %v3418_v11 = vadd.f32 %v9362_v22, %v9321_v28  ;;  %v9573_v36 = vpack.c.bf16 %v1843_v49, %v1836_v46  ;;  %v7583_v22 = vld [vmem:[#allocation3 + $0x56c] ss:$16 sps:$4 sm:$0xff]   ;;  %v3426_v46 = vadd.f32 %v9392_v57, %v9316_v23 }
 0x23c   : > { %v9561_v1 = vpop.f32.mrf.mxu1  ;;  %v3606_v45 = vpop.f32.mrf.mxu0  ;;  %v3432_v57 = vadd.f32 %v9410_v59, %v9316_v23 }
 0x23d   : > { %v9565_v53 = vadd.f32 %v3606_v45, %v3414_v6  ;;  %4494 = vmatpush2.bf16.msra.mxu1 %v7572_v16  ;;  %11804 = vst [vmem:[#allocation18_spill] sm:$0xff] %v9573_v36  ;;  %v11806_v6 = vld [vmem:[#allocation31_spill] sm:$0xff] }
 0x23e   : > { %v9567_v35 = vpop.f32.mrf.mxu1  ;;  %v3608_v33 = vpop.f32.mrf.mxu0  ;;  %4495 = vmatprep.subr.bf16.mxu1 %v7577_v20  ;;  %v7578_v20 = vld [vmem:[#allocation3 + $0x588] ss:$16 sps:$4 sm:$0xff]  }
 0x23f   : > { %v9571_v63 = vadd.f32 %v3608_v33, %v3416_v8  ;;  %v7581_v8 = vld [vmem:[#allocation3 + $0x568] ss:$16 sps:$4 sm:$0xff]  }
 0x240   : > { %v3610_v0 = vpop.f32.mrf.mxu0  ;;  %4172 = vmatmul.mubr.bf16.gmra.mxu1 %v11805_v50  ;;  %v9581_v45 = vpop.f32.mrf.mxu1  ;;  %v3424_v50 = vadd.f32 %v9383_v17, %v9321_v28  ;;  %v3428_v17 = vadd.f32 %v9398_v19, %v9321_v28  ;;  %v7589_v19 = vld [vmem:[#allocation3 + $0x52c] ss:$16 sps:$4 sm:$0xff]  }
 0x241   : > { %v9578_v16 = vadd.f32 %v3610_v0, %v3418_v11  ;;  %4181 = vmatprep.mubr.bf16.mxu1 %v11806_v6  ;;  %4496 = vmatpush2.bf16.msra.mxu1 %v7575_v32 }
 0x242   : > { %v3614_v29 = vpop.f32.mrf.mxu0  ;;  %6792 = vmatmul.mubr.msk.bf16.gmra.mxu0 %vm3268_vm0, %v9573_v36  ;;  %4497 = vmatprep.subr.bf16.mxu1 %v7580_v12  ;;  %v9594_v32 = vpop.f32.mrf.mxu1  ;;  %v7586_v12 = vld [vmem:[#allocation3 + $0x54c] ss:$16 sps:$4 sm:$0xff]   ;;  %v11810_v36 = vld [vmem:[#allocation93_spill] sm:$0xff] }
 0x243   : > { %v9587_v33 = vadd.f32 %v3614_v29, %v3422_v27  ;;  %4058 = vmatprep.mubr.bf16.mxu0 %v11756_v14  ;;  %v11807_v27 = vld [vmem:[#allocation33_spill] sm:$0xff] }
 0x244   : > { %v3616_v60 = vpop.f32.mrf.mxu0 }
 0x245   : > { %v9592_v49 = vadd.f32 %v3616_v60, %v3424_v50  ;;  %4498 = vmatpush2.bf16.msra.mxu1 %v7578_v20  ;;  %v7584_v20 = vld [vmem:[#allocation3 + $0x548] ss:$16 sps:$4 sm:$0xff]   ;;  %v9606_v50 = vpop.f32.mrf.mxu1  ;;  %v3434_v60 = vadd.f32 %v9418_v41, %v9321_v28  ;;  %v3438_v41 = vadd.f32 %v9433_v13, %v9321_v28  ;;  %v3444_v13 = vadd.f32 %v9453_v18, %v9321_v28 }
 0x246   : > { %v3618_v11 = vpop.f32.mrf.mxu0  ;;  %4499 = vmatprep.subr.bf16.mxu1 %v7583_v22  ;;  %v3448_v18 = vadd.f32 %v9468_v10, %v9321_v28  ;;  %v3454_v10 = vadd.f32 %v9488_v54, %v9321_v28 }
 0x247   : > { %v9598_v29 = vadd.f32 %v3618_v11, %v3426_v46  ;;  %v7587_v11 = vld [vmem:[#allocation3 + $0x528] ss:$16 sps:$4 sm:$0xff]  }
 0x248   : > { %v3620_v0 = vpop.f32.mrf.mxu0  ;;  %4182 = vmatmul.mubr.bf16.gmra.mxu1 %v11807_v27 }
 0x249   : > { %v9603_v6 = vadd.f32 %v3620_v0, %v3428_v17  ;;  %4191 = vmatprep.mubr.bf16.mxu1 %v8570_v58  ;;  %4500 = vmatpush2.bf16.msra.mxu1 %v7581_v8  ;;  %v3436_v58 = vadd.f32 %v9427_v56, %v9316_v23  ;;  %v9619_v17 = vpop.f32.mrf.mxu1  ;;  %v3442_v56 = vadd.f32 %v9445_v30, %v9316_v23 }
 0x24a   : > { %v3624_v22 = vpop.f32.mrf.mxu0  ;;  %6793 = vmatmul.mubr.msk.bf16.gmra.mxu0 %vm3268_vm0, %v9117_v9  ;;  %4501 = vmatprep.subr.bf16.mxu1 %v7586_v12  ;;  %v7592_v12 = vld [vmem:[#allocation3 + $0x50c] ss:$16 sps:$4 sm:$0xff]  }
 0x24b   : > { %v9612_v46 = vadd.f32 %v3624_v22, %v3432_v57  ;;  %4068 = vmatprep.mubr.bf16.mxu0 %v11756_v14  ;;  %v11808_v22 = vld [vmem:[#allocation38_spill] sm:$0xff]  ;;  %v9631_v9 = vpop.f32.mrf.mxu1 }
 0x24c   : > { %v3626_v59 = vpop.f32.mrf.mxu0 }
 0x24d   : > { %v9617_v8 = vadd.f32 %v3626_v59, %v3434_v60  ;;  %4502 = vmatpush2.bf16.msra.mxu1 %v7584_v20  ;;  %v11809_v20 = vld [vmem:[#allocation41_spill] sm:$0xff] }
 0x24e   : > { %v3628_v0 = vpop.f32.mrf.mxu0  ;;  %4503 = vmatprep.subr.bf16.mxu1 %v7589_v19  ;;  %v7590_v59 = vld [vmem:[#allocation3 + $0x508] ss:$16 sps:$4 sm:$0xff]  }
 0x24f   : > { %v9623_v27 = vadd.f32 %v3628_v0, %v3436_v58  ;;  %v3446_v0 = vadd.f32 %v9462_v61, %v9316_v23  ;;  %v3452_v61 = vadd.f32 %v9480_v55, %v9316_v23  ;;  %v3456_v55 = vadd.f32 %v9497_v7, %v9316_v23  ;;  %v11819_v7 = vld [vmem:[#allocation49_spill] sm:$0xff] }
 0x250   : > { %v3630_v57 = vpop.f32.mrf.mxu0  ;;  %4192 = vmatmul.mubr.bf16.gmra.mxu1 %v11808_v22 }
 0x251   : > { %v9628_v60 = vadd.f32 %v3630_v57, %v3438_v41  ;;  %4201 = vmatprep.mubr.bf16.mxu1 %v11809_v20  ;;  %4504 = vmatpush2.bf16.msra.mxu1 %v7587_v11  ;;  %v9644_v41 = vpop.f32.mrf.mxu1  ;;  %v11811_v20 = vld [vmem:[#allocation43_spill] sm:$0xff] }
 0x252   : > { %v3634_v19 = vpop.f32.mrf.mxu0  ;;  %6794 = vmatmul.mubr.msk.bf16.gmra.mxu0 %vm3268_vm0, %v11810_v36  ;;  %4505 = vmatprep.subr.bf16.mxu1 %v7592_v12  ;;  %v7601_v12 = vld [vmem:[%s11504_s5 + $0x74] ss:$8 sps:$4 sm:$0xff]  }
 0x253   : > { %v9637_v58 = vadd.f32 %v3634_v19, %v3442_v56  ;;  %4078 = vmatprep.mubr.bf16.mxu0 %v11756_v14  ;;  %v11812_v19 = vld [vmem:[#allocation45_spill] sm:$0xff]  ;;  %v11813_v36 = vld [vmem:[#allocation92_spill] sm:$0xff] }
 0x254   : > { %v3636_v30 = vpop.f32.mrf.mxu0  ;;  %v7593_v14 = vld [vmem:[#allocation3 + $0x668] ss:$16 sps:$4 sm:$0xff]  }
 0x255   : > { %v9642_v11 = vadd.f32 %v3636_v30, %v3444_v13  ;;  %4506 = vmatpush2.bf16.msra.mxu1 %v7590_v59  ;;  %v9659_v13 = vpop.f32.mrf.mxu1 }
 0x256   : > { %v3638_v57 = vpop.f32.mrf.mxu0  ;;  %5449 = vmatprep.subr.bf16.mxu1 %v7601_v12 }
 0x257   : > { %v9651_v22 = vadd.f32 %v3638_v57, %v3446_v0  ;;  %v11815_v57 = vld [vmem:[#allocation28_spill] sm:$0xff] }
 0x258   : > { %v3640_v56 = vpop.f32.mrf.mxu0  ;;  %4202 = vmatmul.mubr.bf16.gmra.mxu1 %v11811_v20 }
 0x259   : > { %v9656_v59 = vadd.f32 %v3640_v56, %v3448_v18  ;;  %4211 = vmatprep.mubr.bf16.mxu1 %v11812_v19  ;;  %v9672_v56 = vpop.f32.mrf.mxu1  ;;  %v3458_v19 = vadd.f32 %v9503_v40, %v9321_v28  ;;  %v3464_v40 = vadd.f32 %v9519_v52, %v9321_v28  ;;  %v3468_v52 = vadd.f32 %v9534_v2, %v9321_v28  ;;  %v11826_v2 = vld [vmem:[#allocation40_spill] sm:$0xff] }
 0x25a   : > { %v3644_v30 = vpop.f32.mrf.mxu0  ;;  %6795 = vmatmul.mubr.msk.bf16.gmra.mxu0 %vm3268_vm0, %v11813_v36 }
 0x25b   : > { %v9665_v0 = vadd.f32 %v3644_v30, %v3452_v61  ;;  %4314 = vmatprep.mubr.bf16.mxu0 %v11815_v57  ;;  %v11818_v61 = vld [vmem:[#allocation46_spill] sm:$0xff]  ;;  %v3462_v57 = vadd.f32 %v9511_v44, %v9316_v23 }
 0x25c   : > { %v3646_v12 = vpop.f32.mrf.mxu0  ;;  %v7598_v30 = vld [vmem:[#allocation3 + $0x64c] ss:$16 sps:$4 sm:$0xff]  }
 0x25d   : > { %11814 = vst [vmem:[#allocation19_spill] sm:$0xff] %v9665_v0  ;;  %v9670_v18 = vadd.f32 %v3646_v12, %v3454_v10  ;;  %v9684_v10 = vpop.f32.mrf.mxu1  ;;  %v7604_v44 = vld [vmem:[#allocation3 + $0x62c] ss:$16 sps:$4 sm:$0xff]  }
 0x25e   : > { %v3648_v20 = vpop.f32.mrf.mxu0 }
 0x25f   : > { %11816 = vst [vmem:[#allocation20_spill] sm:$0xff] %v9670_v18  ;;  %v9676_v36 = vadd.f32 %v3648_v20, %v3456_v55  ;;  %v11820_v18 = vld [vmem:[#allocation36_spill] sm:$0xff]  ;;  %v11822_v20 = vld [vmem:[#allocation35_spill] sm:$0xff] }
 0x260   : > { %v3650_v54 = vpop.f32.mrf.mxu0  ;;  %4212 = vmatmul.mubr.bf16.gmra.mxu1 %v11818_v61  ;;  %v7596_v61 = vld [vmem:[#allocation3 + $0x648] ss:$16 sps:$4 sm:$0xff]  }
 0x261   : > { %11817 = vst [vmem:[#allocation21_spill] sm:$0xff] %v9676_v36  ;;  %v9681_v0 = vadd.f32 %v3650_v54, %v3458_v19  ;;  %4221 = vmatprep.mubr.bf16.mxu1 %v11819_v7  ;;  %v3466_v19 = vadd.f32 %v9528_v38, %v9316_v23  ;;  %v9696_v7 = vpop.f32.mrf.mxu1  ;;  %v3472_v38 = vadd.f32 %v9544_v39, %v9316_v23 }
 0x262   : > { %v3654_v12 = vpop.f32.mrf.mxu0  ;;  %4315 = vmatmul.mubr.bf16.vlgmr.msra.gmra.mxu0 %v11820_v18  ;;  %v3476_v39 = vadd.f32 %v9561_v1, %v9316_v23 }
 0x263   : > { %v9689_v55 = vadd.f32 %v3654_v12, %v3462_v57  ;;  %4324 = vmatprep.mubr.bf16.mxu0 %v11822_v20  ;;  %4677 = vmatpush1.bf16.msra.mxu0 %v7593_v14  ;;  %v7602_v12 = vld [vmem:[#allocation3 + $0x628] ss:$16 sps:$4 sm:$0xff]  }
 0x264   : > { %v3656_v36 = vpop.f32.mrf.mxu0  ;;  %4678 = vmatprep.subr.bf16.mxu0 %v7598_v30  ;;  %v11824_v20 = vld [vmem:[#allocation51_spill] sm:$0xff]  ;;  %v7610_v30 = vld [vmem:[#allocation3 + $0x60c] ss:$16 sps:$4 sm:$0xff]  }
 0x265   : > { %11821 = vst [vmem:[#allocation25_spill] sm:$0xff] %v9689_v55  ;;  %v9694_v54 = vadd.f32 %v3656_v36, %v3464_v40  ;;  %v11825_v40 = vld [vmem:[#allocation22_spill] sm:$0xff] }
 0x266   : > { %v3658_v18 = vpop.f32.mrf.mxu0 }
 0x267   : > { %11823 = vst [vmem:[#allocation27_spill] sm:$0xff] %v9694_v54  ;;  %v9700_v57 = vadd.f32 %v3658_v18, %v3466_v19  ;;  %4679 = vmatpush1.bf16.msra.mxu0 %v7596_v61  ;;  %v9708_v54 = vpop.f32.mrf.mxu1  ;;  %v3474_v61 = vadd.f32 %v9552_v37, %v9321_v28  ;;  %v11827_v18 = vld [vmem:[#allocation39_spill] sm:$0xff] }
 0x268   : > { %v3660_v14 = vpop.f32.mrf.mxu0  ;;  %4222 = vmatmul.mubr.bf16.gmra.mxu1 %v11824_v20  ;;  %4680 = vmatprep.subr.bf16.mxu0 %v7604_v44  ;;  %v7608_v44 = vld [vmem:[#allocation3 + $0x608] ss:$16 sps:$4 sm:$0xff]  }
 0x269   : > { %v9705_v36 = vadd.f32 %v3660_v14, %v3468_v52  ;;  %4231 = vmatprep.mubr.bf16.mxu1 %v11825_v40  ;;  %v9720_v14 = vpop.f32.mrf.mxu1 }
 0x26a   : > { %v3664_v55 = vpop.f32.mrf.mxu0  ;;  %4325 = vmatmul.mubr.bf16.gmra.mxu0 %v11826_v2  ;;  %v3478_v2 = vadd.f32 %v9567_v35, %v9321_v28  ;;  %v11831_v35 = vld [vmem:[#allocation42_spill] sm:$0xff] }
 0x26b   : > { %v9713_v19 = vadd.f32 %v3664_v55, %v3472_v38  ;;  %4334 = vmatprep.mubr.bf16.mxu0 %v11827_v18  ;;  %4681 = vmatpush1.bf16.msra.mxu0 %v7602_v12  ;;  %v11829_v12 = vld [vmem:[#allocation29_spill] sm:$0xff] }
 0x26c   : > { %v3666_v20 = vpop.f32.mrf.mxu0  ;;  %4682 = vmatprep.subr.bf16.mxu0 %v7610_v30  ;;  %v3482_v30 = vadd.f32 %v9581_v45, %v9316_v23  ;;  %v11832_v45 = vld [vmem:[#allocation44_spill] sm:$0xff] }
 0x26d   : > { %v9718_v52 = vadd.f32 %v3666_v20, %v3474_v61  ;;  %v11830_v61 = vld [vmem:[#allocation24_spill] sm:$0xff] }
 0x26e   : > { %v3668_v40 = vpop.f32.mrf.mxu0 }
 0x26f   : > { %11828 = vst [vmem:[#allocation31_spill] sm:$0xff] %v9718_v52  ;;  %v9724_v37 = vadd.f32 %v3668_v40, %v3476_v39  ;;  %4683 = vmatpush1.bf16.msra.mxu0 %v7608_v44  ;;  %v3484_v44 = vadd.f32 %v9594_v32, %v9321_v28  ;;  %v3488_v32 = vadd.f32 %v9619_v17, %v9321_v28 }
 0x270   : > { %v3670_v55 = vpop.f32.mrf.mxu0  ;;  %v3767_v38 = vpop.f32.mrf.mxu1  ;;  %4232 = vmatmul.mubr.bf16.gmra.mxu1 %v11829_v12 }
 0x271   : > { %v9729_v18 = vadd.f32 %v3670_v55, %v3478_v2  ;;  %v9732_v1 = vadd.f32 %v3767_v38, %v9459_v51  ;;  %4241 = vmatprep.mubr.bf16.mxu1 %v11830_v61  ;;  %v3486_v51 = vadd.f32 %v9606_v50, %v9316_v23  ;;  %v3492_v50 = vadd.f32 %v9631_v9, %v9316_v23  ;;  %v11836_v9 = vld [vmem:[#allocation47_spill] sm:$0xff] }
 0x272   : > { %v3674_v20 = vpop.f32.mrf.mxu0  ;;  %v3769_v52 = vpop.f32.mrf.mxu1  ;;  %4335 = vmatmul.mubr.bf16.gmra.mxu0 %v11831_v35 }
 0x273   : > { %v9738_v39 = vadd.f32 %v3674_v20, %v3482_v30  ;;  %v9741_v40 = vadd.f32 %v3769_v52, %v9466_v24  ;;  %4344 = vmatprep.mubr.bf16.mxu0 %v11832_v45  ;;  %v11833_v45 = vld [vmem:[#allocation54_spill] sm:$0xff] }
 0x274   : > { %v3676_v2 = vpop.f32.mrf.mxu0  ;;  %v3771_v55 = vpop.f32.mrf.mxu1 }
 0x275   : > { %v9746_v38 = vadd.f32 %v3676_v2, %v3484_v44  ;;  %v9749_v12 = vadd.f32 %v3771_v55, %v9472_v26  ;;  %v11834_v2 = vld [vmem:[#allocation37_spill] sm:$0xff] }
 0x276   : > { %v3678_v61 = vpop.f32.mrf.mxu0  ;;  %v3773_v35 = vpop.f32.mrf.mxu1 }
 0x277   : > { %v9753_v30 = vadd.f32 %v3678_v61, %v3486_v51  ;;  %v9756_v24 = vadd.f32 %v3773_v35, %v9485_v47  ;;  %v11835_v51 = vld [vmem:[#allocation48_spill] sm:$0xff]  ;;  %v3494_v47 = vadd.f32 %v9644_v41, %v9321_v28  ;;  %v3498_v41 = vadd.f32 %v9672_v56, %v9321_v28 }
 0x278   : > { %v3680_v52 = vpop.f32.mrf.mxu0  ;;  %v3777_v20 = vpop.f32.mrf.mxu1  ;;  %4242 = vmatmul.mubr.bf16.gmra.mxu1 %v11833_v45 }
 0x279   : > { %v9761_v44 = vadd.f32 %v3680_v52, %v3488_v32  ;;  %v9764_v26 = vadd.f32 %v3777_v20, %v9494_v4  ;;  %4251 = vmatprep.mubr.bf16.mxu1 %v11834_v2  ;;  %v3496_v4 = vadd.f32 %v9659_v13, %v9316_v23  ;;  %v3502_v13 = vadd.f32 %v9684_v10, %v9316_v23  ;;  %v11840_v10 = vld [vmem:[#allocation52_spill] sm:$0xff] }
 0x27a   : > { %v3684_v17 = vpop.f32.mrf.mxu0  ;;  %v3779_v55 = vpop.f32.mrf.mxu1  ;;  %4345 = vmatmul.mubr.bf16.gmra.mxu0 %v11835_v51 }
 0x27b   : > { %v9770_v61 = vadd.f32 %v3684_v17, %v3492_v50  ;;  %v9773_v35 = vadd.f32 %v3779_v55, %v9501_v48  ;;  %4354 = vmatprep.mubr.bf16.mxu0 %v11836_v9  ;;  %v11837_v9 = vld [vmem:[#allocation30_spill] sm:$0xff] }
 0x27c   : > { %v3686_v32 = vpop.f32.mrf.mxu0  ;;  %v3781_v52 = vpop.f32.mrf.mxu1 }
 0x27d   : > { %v9778_v20 = vadd.f32 %v3686_v32, %v3494_v47  ;;  %v9781_v45 = vadd.f32 %v3781_v52, %v9507_v62  ;;  %v11838_v32 = vld [vmem:[#allocation56_spill] sm:$0xff] }
 0x27e   : > { %v3688_v2 = vpop.f32.mrf.mxu0  ;;  %v3783_v51 = vpop.f32.mrf.mxu1 }
 0x27f   : > { %v9785_v50 = vadd.f32 %v3688_v2, %v3496_v4  ;;  %v9788_v48 = vadd.f32 %v3783_v51, %v9516_v43  ;;  %v11839_v4 = vld [vmem:[#allocation50_spill] sm:$0xff]  ;;  %v3504_v43 = vadd.f32 %v9696_v7, %v9321_v28  ;;  %v3508_v7 = vadd.f32 %v9720_v14, %v9321_v28  ;;  %v11844_v14 = vld [vmem:[#allocation53_spill] sm:$0xff] }
 0x280   : > { %v3690_v17 = vpop.f32.mrf.mxu0  ;;  %v3787_v55 = vpop.f32.mrf.mxu1  ;;  %4252 = vmatmul.mubr.bf16.gmra.mxu1 %v11837_v9 }
 0x281   : > { %v9793_v47 = vadd.f32 %v3690_v17, %v3498_v41  ;;  %v9796_v62 = vadd.f32 %v3787_v55, %v9525_v34  ;;  %4261 = vmatprep.mubr.bf16.mxu1 %v11838_v32  ;;  %v3506_v34 = vadd.f32 %v9708_v54, %v9316_v23 }
 0x282   : > { %v3694_v56 = vpop.f32.mrf.mxu0  ;;  %v3789_v52 = vpop.f32.mrf.mxu1  ;;  %4355 = vmatmul.mubr.bf16.gmra.mxu0 %v11839_v4 }
 0x283   : > { %v9802_v2 = vadd.f32 %v3694_v56, %v3502_v13  ;;  %v9805_v51 = vadd.f32 %v3789_v52, %v9532_v3  ;;  %4364 = vmatprep.mubr.bf16.mxu0 %v11840_v10  ;;  %v11841_v10 = vld [vmem:[#allocation58_spill] sm:$0xff] }
 0x284   : > { %v3696_v41 = vpop.f32.mrf.mxu0  ;;  %v3791_v17 = vpop.f32.mrf.mxu1 }
 0x285   : > { %v9810_v55 = vadd.f32 %v3696_v41, %v3504_v43  ;;  %v9813_v9 = vadd.f32 %v3791_v17, %v9538_v42  ;;  %v11842_v42 = vld [vmem:[#allocation60_spill] sm:$0xff]  ;;  %v11843_v17 = vld [vmem:[#allocation23_spill] sm:$0xff] }
 0x286   : > { %v3698_v32 = vpop.f32.mrf.mxu0  ;;  %v3793_v4 = vpop.f32.mrf.mxu1 }
 0x287   : > { %v9817_v13 = vadd.f32 %v3698_v32, %v3506_v34  ;;  %v9820_v3 = vadd.f32 %v3793_v4, %v9549_v15 }
 0x288   : > { %v3700_v56 = vpop.f32.mrf.mxu0  ;;  %v3797_v52 = vpop.f32.mrf.mxu1  ;;  %4262 = vmatmul.mubr.bf16.gmra.mxu1 %v11841_v10 }
 0x289   : > { %v9823_v23 = vadd.f32 %v3700_v56, %v3508_v7  ;;  %v9826_v54 = vadd.f32 %v3797_v52, %v9558_v31  ;;  %4271 = vmatprep.mubr.bf16.mxu1 %v11842_v42  ;;  %v11845_v42 = vld [vmem:[#allocation61_spill] sm:$0xff] }
 0x28a   : > { %v3737_v43 = vpop.f32.mrf.mxu0  ;;  %v3799_v41 = vpop.f32.mrf.mxu1  ;;  %4365 = vmatmul.mubr.bf16.gmra.mxu0 %v11843_v17 }
 0x28b   : > { %v9831_v28 = vadd.f32 %v3737_v43, %v9349_v5  ;;  %v9834_v15 = vadd.f32 %v3799_v41, %v9565_v53  ;;  %4374 = vmatprep.mubr.bf16.mxu0 %v11844_v14  ;;  %v11846_v43 = vld [vmem:[#allocation118_spill] sm:$0xff] }
 0x28c   : > { %v3739_v34 = vpop.f32.mrf.mxu0  ;;  %v3801_v32 = vpop.f32.mrf.mxu1 }
 0x28d   : > { %v9838_v4 = vadd.f32 %v3739_v34, %v9356_v25  ;;  %v9841_v31 = vadd.f32 %v3801_v32, %v9571_v63  ;;  %v11847_v63 = vld [vmem:[#allocation81_spill] sm:$0xff]  ;;  %v11848_v34 = vld [vmem:[#allocation26_spill] sm:$0xff] }
 0x28e   : > { %v3741_v7 = vpop.f32.mrf.mxu0  ;;  %v3803_v56 = vpop.f32.mrf.mxu1 }
 0x28f   : > { %v9844_v52 = vadd.f32 %v3741_v7, %v9366_v21  ;;  %v9847_v5 = vadd.f32 %v3803_v56, %v9578_v16  ;;  %v11849_v21 = vld [vmem:[#allocation12_spill] sm:$0xff]  ;;  %v11851_v7 = vld [vmem:[#allocation55_spill] sm:$0xff] }
 0x290   : > { %v3743_v53 = vpop.f32.mrf.mxu0  ;;  %v3807_v10 = vpop.f32.mrf.mxu1  ;;  %4272 = vmatmul.mubr.bf16.gmra.mxu1 %v11845_v42  ;;  %v11852_v42 = vld [vmem:[#allocation119_spill] sm:$0xff] }
 0x291   : > { %v9851_v41 = vadd.f32 %v3743_v53, %v11846_v43  ;;  %v9854_v25 = vadd.f32 %v3807_v10, %v9587_v33  ;;  %4507 = vmatprep.mubr.bf16.mxu1 %v11847_v63  ;;  %v7599_v10 = vld [vmem:[%s11504_s5 + $0x70] ss:$8 sps:$4 sm:$0xff]  }
 0x292   : > { %v3747_v17 = vpop.f32.mrf.mxu0  ;;  %v3809_v14 = vpop.f32.mrf.mxu1  ;;  %4375 = vmatmul.mubr.bf16.gmra.mxu0 %v11848_v34 }
 0x293   : > { %v9859_v32 = vadd.f32 %v3747_v17, %v11849_v21  ;;  %v9862_v16 = vadd.f32 %v3809_v14, %v9592_v49  ;;  %4384 = vmatprep.mubr.bf16.mxu0 %v11851_v7  ;;  %v7607_v49 = vld [vmem:[%s11504_s5 + $0x64] ss:$8 sps:$4 sm:$0xff]  }
 0x294   : > { %v3749_v56 = vpop.f32.mrf.mxu0  ;;  %v3811_v53 = vpop.f32.mrf.mxu1  ;;  %v11854_v14 = vld [vmem:[#allocation120_spill] sm:$0xff] }
 0x295   : > { %11850 = vst [vmem:[#allocation33_spill] sm:$0xff] %v9862_v16  ;;  %v9866_v43 = vadd.f32 %v3749_v56, %v11852_v42  ;;  %v9869_v33 = vadd.f32 %v3811_v53, %v9598_v29  ;;  %v11856_v29 = vld [vmem:[#allocation85_spill] sm:$0xff]  ;;  %v11859_v16 = vld [vmem:[#allocation86_spill] sm:$0xff] }
 0x296   : > { %v3751_v63 = vpop.f32.mrf.mxu0  ;;  %v3813_v17 = vpop.f32.mrf.mxu1  ;;  %v11857_v53 = vld [vmem:[#allocation13_spill] sm:$0xff] }
 0x297   : > { %11853 = vst [vmem:[#allocation38_spill] sm:$0xff] %v9869_v33  ;;  %v9878_v34 = vadd.f32 %v3751_v63, %v11854_v14  ;;  %v9881_v21 = vadd.f32 %v3813_v17, %v9603_v6  ;;  %v7605_v63 = vld [vmem:[%s11504_s5 + $0x60] ss:$8 sps:$4 sm:$0xff]   ;;  %v11860_v17 = vld [vmem:[#allocation34_spill] sm:$0xff] }
 0x298   : > { %v3753_v7 = vpop.f32.mrf.mxu0  ;;  %v3817_v56 = vpop.f32.mrf.mxu1  ;;  %4508 = vmatmul.mubr.bf16.vlgmr.msra.gmra.mxu1 %v11856_v29  ;;  %v11861_v29 = vld [vmem:[#allocation14_spill] sm:$0xff] }
 0x299   : > { %11855 = vst [vmem:[#allocation41_spill] sm:$0xff] %v9881_v21  ;;  %v9885_v42 = vadd.f32 %v3753_v7, %v11857_v53  ;;  %v9888_v33 = vadd.f32 %v3817_v56, %v9612_v46  ;;  %4517 = vmatprep.mubr.bf16.mxu1 %v11859_v16  ;;  %5450 = vmatpush1.bf16.msra.mxu1 %v7599_v10  ;;  %v7613_v7 = vld [vmem:[%s11504_s5 + $0x54] ss:$8 sps:$4 sm:$0xff]  }
 0x29a   : > { %v3757_v14 = vpop.f32.mrf.mxu0  ;;  %v3819_v6 = vpop.f32.mrf.mxu1  ;;  %4385 = vmatmul.mubr.bf16.gmra.mxu0 %v11860_v17  ;;  %5451 = vmatprep.subr.bf16.mxu1 %v7607_v49  ;;  %v11863_v16 = vld [vmem:[#allocation32_spill] sm:$0xff]  ;;  %v7611_v49 = vld [vmem:[%s11504_s5 + $0x50] ss:$8 sps:$4 sm:$0xff]  }
 0x29b   : > { %11858 = vst [vmem:[#allocation43_spill] sm:$0xff] %v9888_v33  ;;  %v9899_v53 = vadd.f32 %v3757_v14, %v11861_v29  ;;  %v9902_v46 = vadd.f32 %v3819_v6, %v9617_v8  ;;  %4394 = vmatprep.mubr.bf16.mxu0 %v11863_v16  ;;  %v11864_v33 = vld [vmem:[#allocation122_spill] sm:$0xff]  ;;  %v11866_v6 = vld [vmem:[#allocation123_spill] sm:$0xff] }
 0x29c   : > { %v3759_v10 = vpop.f32.mrf.mxu0  ;;  %v3821_v56 = vpop.f32.mrf.mxu1  ;;  %v7616_v8 = vld [vmem:[%s11504_s5 + $0x44] ss:$8 sps:$4 sm:$0xff]  }
 0x29d   : > { %11862 = vst [vmem:[#allocation45_spill] sm:$0xff] %v9902_v46  ;;  %v9906_v21 = vadd.f32 %v3759_v10, %v11864_v33  ;;  %v9909_v17 = vadd.f32 %v3821_v56, %v9623_v27  ;;  %5452 = vmatpush1.bf16.msra.mxu1 %v7605_v63  ;;  %v11868_v63 = vld [vmem:[#allocation90_spill] sm:$0xff]  ;;  %v11869_v56 = vld [vmem:[#allocation15_spill] sm:$0xff] }
 0x29e   : > { %v3761_v14 = vpop.f32.mrf.mxu0  ;;  %v3823_v29 = vpop.f32.mrf.mxu1  ;;  %5453 = vmatprep.subr.bf16.mxu1 %v7613_v7  ;;  %v11871_v7 = vld [vmem:[#allocation91_spill] sm:$0xff] }
 0x29f   : > { %11865 = vst [vmem:[#allocation28_spill] sm:$0xff] %v9909_v17  ;;  %v9918_v16 = vadd.f32 %v3761_v14, %v11866_v6  ;;  %v9921_v33 = vadd.f32 %v3823_v29, %v9628_v60  ;;  %v7614_v14 = vld [vmem:[%s11504_s5 + $0x40] ss:$8 sps:$4 sm:$0xff]  }
 0x2a0   : > { %v3763_v27 = vpop.f32.mrf.mxu0  ;;  %v3827_v10 = vpop.f32.mrf.mxu1  ;;  %4518 = vmatmul.mubr.bf16.gmra.mxu1 %v11868_v63  ;;  %v11872_v29 = vld [vmem:[#allocation57_spill] sm:$0xff] }
 0x2a1   : > { %11867 = vst [vmem:[#allocation46_spill] sm:$0xff] %v9921_v33  ;;  %v9925_v17 = vadd.f32 %v3763_v27, %v11869_v56  ;;  %v9928_v46 = vadd.f32 %v3827_v10, %v9637_v58  ;;  %4527 = vmatprep.mubr.bf16.mxu1 %v11871_v7  ;;  %5454 = vmatpush1.bf16.msra.mxu1 %v7611_v49  ;;  %v7619_v27 = vld [vmem:[%s11504_s5 + $0x34] ss:$8 sps:$4 sm:$0xff]  }
 0x2a2   : > { %v3829_v6 = vpop.f32.mrf.mxu1  ;;  %v3930_v60 = vpop.f32.mrf.mxu0  ;;  %4395 = vmatmul.mubr.bf16.gmra.mxu0 %v11872_v29  ;;  %5455 = vmatprep.subr.bf16.mxu1 %v7616_v8  ;;  %v11873_v10 = vld [vmem:[#allocation59_spill] sm:$0xff] }
 0x2a3   : > { %11870 = vst [vmem:[#allocation49_spill] sm:$0xff] %v9928_v46  ;;  %v9939_v63 = vadd.f32 %v3829_v6, %v9642_v11  ;;  %v3931_v58 = vadd.f32 %v3930_v60, %v9831_v28  ;;  %4404 = vmatprep.mubr.bf16.mxu0 %v11873_v10  ;;  %v7617_v8 = vld [vmem:[%s11504_s5 + $0x30] ss:$8 sps:$4 sm:$0xff]   ;;  %v7622_v11 = vld [vmem:[%s11504_s5 + $0x24] ss:$8 sps:$4 sm:$0xff]  }
 0x2a4   : > { %v3831_v49 = vpop.f32.mrf.mxu1  ;;  %v3932_v56 = vpop.f32.mrf.mxu0 }
 0x2a5   : > { %v9944_v7 = vadd.f32 %v3831_v49, %v9651_v22  ;;  %v3933_v46 = vadd.f32 %v3932_v56, %v9838_v4  ;;  %5456 = vmatpush1.bf16.msra.mxu1 %v7614_v14  ;;  %v11876_v4 = vld [vmem:[#allocation96_spill] sm:$0xff]  ;;  %v4861_v14 = vmax.f32 %v3931_v58, 0.0  ;;  %v11877_v49 = vld [vmem:[#allocation19_spill] sm:$0xff] }
 0x2a6   : > { %v3833_v29 = vpop.f32.mrf.mxu1  ;;  %v3934_v33 = vpop.f32.mrf.mxu0  ;;  %5457 = vmatprep.subr.bf16.mxu1 %v7619_v27  ;;  %v7625_v58 = vld [vmem:[%s11504_s5 + $0x14] ss:$8 sps:$4 sm:$0xff]  }
 0x2a7   : > { %11874 = vst [vmem:[#allocation36_spill] sm:$0xff] %v9944_v7  ;;  %v9954_v28 = vadd.f32 %v3833_v29, %v9656_v59  ;;  %v3935_v22 = vadd.f32 %v3934_v33, %v9844_v52  ;;  %v11879_v7 = vld [vmem:[#allocation70_spill] sm:$0xff]  ;;  %v7620_v59 = vld [vmem:[%s11504_s5 + $0x20] ss:$8 sps:$4 sm:$0xff]   ;;  %v4862_v29 = vmax.f32 %v3933_v46, 0.0 }
 0x2a8   : > { %v3837_v6 = vpop.f32.mrf.mxu1  ;;  %v3936_v60 = vpop.f32.mrf.mxu0  ;;  %4528 = vmatmul.mubr.bf16.gmra.mxu1 %v11876_v4 }
 0x2a9   : > { %11875 = vst [vmem:[#allocation35_spill] sm:$0xff] %v9954_v28  ;;  %v4865_v10 = vmax.f32 %v3935_v22, 0.0  ;;  %v9959_v56 = vadd.f32 %v3837_v6, %v11877_v49  ;;  %v3937_v27 = vadd.f32 %v3936_v60, %v9851_v41  ;;  %4537 = vmatprep.mubr.bf16.mxu1 %v11879_v7  ;;  %5458 = vmatpush1.bf16.msra.mxu1 %v7617_v8  ;;  %v11880_v28 = vld [vmem:[#allocation63_spill] sm:$0xff]  ;;  %v11881_v6 = vld [vmem:[#allocation20_spill] sm:$0xff]  ;;  %v11882_v60 = vld [vmem:[#allocation62_spill] sm:$0xff] }
 0x2aa   : > { %v3839_v52 = vpop.f32.mrf.mxu1  ;;  %v3940_v33 = vpop.f32.mrf.mxu0  ;;  %4405 = vmatmul.mubr.bf16.gmra.mxu0 %v11880_v28  ;;  %5459 = vmatprep.subr.bf16.mxu1 %v7622_v11  ;;  %v11883_v49 = vld [vmem:[#allocation21_spill] sm:$0xff]  ;;  %v7623_v28 = vld [vmem:[%s11504_s5 + $0x10] ss:$8 sps:$4 sm:$0xff]  }
 0x2ab   : > { %11878 = vst [vmem:[#allocation51_spill] sm:$0xff] %v9959_v56  ;;  %v9970_v22 = vpack.c.bf16 %v4865_v10, %v4861_v14  ;;  %v4866_v41 = vmax.f32 %v3937_v27, 0.0  ;;  %v9973_v7 = vadd.f32 %v3839_v52, %v11881_v6  ;;  %v3941_v8 = vadd.f32 %v3940_v33, %v9859_v32  ;;  %4414 = vmatprep.mubr.bf16.mxu0 %v11882_v60  ;;  %v7628_v32 = vld [vmem:[%s11504_s5 + $0x4] ss:$8 sps:$4 sm:$0xff]   ;;  %v11884_v6 = vld [vmem:[#allocation71_spill] sm:$0xff] }
 0x2ac   : > { %v3841_v46 = vpop.f32.mrf.mxu1  ;;  %v3942_v4 = vpop.f32.mrf.mxu0 }
 0x2ad   : > { %v9978_v56 = vadd.f32 %v3841_v46, %v11883_v49  ;;  %v3943_v11 = vadd.f32 %v3942_v4, %v9866_v43  ;;  %5460 = vmatpush1.bf16.msra.mxu1 %v7620_v59  ;;  %v9984_v14 = vpack.c.bf16 %v4866_v41, %v4862_v29  ;;  %v4869_v60 = vmax.f32 %v3941_v8, 0.0  ;;  %v11885_v29 = vld [vmem:[#allocation25_spill] sm:$0xff]  ;;  %v11886_v4 = vld [vmem:[#allocation74_spill] sm:$0xff] }
 0x2ae   : > { %v3843_v10 = vpop.f32.mrf.mxu1  ;;  %v3944_v27 = vpop.f32.mrf.mxu0  ;;  %5461 = vmatprep.subr.bf16.mxu1 %v7625_v58  ;;  %v7631_v8 = vld [vmem:[%s11504_s5 + $0xf4] ss:$8 sps:$4 sm:$0xff]  }
 0x2af   : > { %v9990_v52 = vadd.f32 %v3843_v10, %v9681_v0  ;;  %v3945_v33 = vadd.f32 %v3944_v27, %v9878_v34  ;;  %v7626_v0 = vld [vmem:[%s11504_s5] ss:$8 sps:$4 sm:$0xff]   ;;  %v4870_v49 = vmax.f32 %v3943_v11, 0.0 }
 0x2b0   : > { %v3847_v43 = vpop.f32.mrf.mxu1  ;;  %v3946_v59 = vpop.f32.mrf.mxu0  ;;  %4538 = vmatmul.mubr.bf16.gmra.mxu1 %v11884_v6  ;;  %v11887_v27 = vld [vmem:[#allocation65_spill] sm:$0xff]  ;;  %v11889_v6 = vld [vmem:[#allocation64_spill] sm:$0xff] }
 0x2b1   : > { %v4873_v46 = vmax.f32 %v3945_v33, 0.0  ;;  %v9995_v41 = vadd.f32 %v3847_v43, %v11885_v29  ;;  %v3947_v58 = vadd.f32 %v3946_v59, %v9885_v42  ;;  %4547 = vmatprep.mubr.bf16.mxu1 %v11886_v4  ;;  %5462 = vmatpush1.bf16.msra.mxu1 %v7623_v28  ;;  %v11888_v43 = vld [vmem:[#allocation27_spill] sm:$0xff] }
 0x2b2   : > { %v3849_v34 = vpop.f32.mrf.mxu1  ;;  %v3950_v10 = vpop.f32.mrf.mxu0  ;;  %4415 = vmatmul.mubr.bf16.gmra.mxu0 %v11887_v27  ;;  %5463 = vmatprep.subr.bf16.mxu1 %v7628_v32  ;;  %v11890_v27 = vld [vmem:[#allocation75_spill] sm:$0xff] }
 0x2b3   : > { %v10006_v33 = vpack.c.bf16 %v4873_v46, %v4869_v60  ;;  %v4874_v42 = vmax.f32 %v3947_v58, 0.0  ;;  %v10009_v59 = vadd.f32 %v3849_v34, %v11888_v43  ;;  %v3951_v28 = vadd.f32 %v3950_v10, %v9899_v53  ;;  %4424 = vmatprep.mubr.bf16.mxu0 %v11889_v6  ;;  %v7629_v60 = vld [vmem:[%s11504_s5 + $0xf0] ss:$8 sps:$4 sm:$0xff]   ;;  %v7634_v53 = vld [vmem:[%s11504_s5 + $0xe4] ss:$8 sps:$4 sm:$0xff]  }
 0x2b4   : > { %v3851_v11 = vpop.f32.mrf.mxu1  ;;  %v3952_v29 = vpop.f32.mrf.mxu0 }
 0x2b5   : > { %v10014_v4 = vadd.f32 %v3851_v11, %v9700_v57  ;;  %v3953_v32 = vadd.f32 %v3952_v29, %v9906_v21  ;;  %5464 = vmatpush1.bf16.msra.mxu1 %v7626_v0  ;;  %v10020_v46 = vpack.c.bf16 %v4874_v42, %v4870_v49  ;;  %v4877_v43 = vmax.f32 %v3951_v28, 0.0  ;;  %v11891_v42 = vld [vmem:[#allocation78_spill] sm:$0xff] }
 0x2b6   : > { %v3853_v58 = vpop.f32.mrf.mxu1  ;;  %v3954_v34 = vpop.f32.mrf.mxu0  ;;  %5465 = vmatprep.subr.bf16.mxu1 %v7631_v8 }
 0x2b7   : > { %v10026_v10 = vadd.f32 %v3853_v58, %v9705_v36  ;;  %v3955_v57 = vadd.f32 %v3954_v34, %v9918_v16  ;;  %v7632_v36 = vld [vmem:[%s11504_s5 + $0xe0] ss:$8 sps:$4 sm:$0xff]   ;;  %v4878_v11 = vmax.f32 %v3953_v32, 0.0  ;;  %v11892_v58 = vld [vmem:[#allocation67_spill] sm:$0xff] }
 0x2b8   : > { %v3857_v21 = vpop.f32.mrf.mxu1  ;;  %v3956_v0 = vpop.f32.mrf.mxu0  ;;  %4548 = vmatmul.mubr.bf16.gmra.mxu1 %v11890_v27  ;;  %v11893_v34 = vld [vmem:[#allocation31_spill] sm:$0xff] }
 0x2b9   : > { %v4881_v6 = vmax.f32 %v3955_v57, 0.0  ;;  %v10031_v49 = vadd.f32 %v3857_v21, %v9713_v19  ;;  %v3957_v8 = vadd.f32 %v3956_v0, %v9925_v17  ;;  %4557 = vmatprep.mubr.bf16.mxu1 %v11891_v42  ;;  %5466 = vmatpush2.bf16.msra.mxu1 %v7629_v60  ;;  %v7637_v19 = vld [vmem:[%s11504_s5 + $0xd4] ss:$8 sps:$4 sm:$0xff]  }
 0x2ba   : > { %v3859_v16 = vpop.f32.mrf.mxu1  ;;  %v3960_v29 = vpop.f32.mrf.mxu0  ;;  %4425 = vmatmul.mubr.bf16.gmra.mxu0 %v11892_v58  ;;  %5467 = vmatprep.subr.bf16.mxu1 %v7634_v53  ;;  %v11894_v21 = vld [vmem:[#allocation66_spill] sm:$0xff] }
 0x2bb   : > { %v10042_v28 = vpack.c.bf16 %v4881_v6, %v4877_v43  ;;  %v4882_v17 = vmax.f32 %v3957_v8, 0.0  ;;  %v10045_v57 = vadd.f32 %v3859_v16, %v11893_v34  ;;  %v3961_v60 = vadd.f32 %v3960_v29, %v9732_v1  ;;  %4434 = vmatprep.mubr.bf16.mxu0 %v11894_v21  ;;  %v7635_v43 = vld [vmem:[%s11504_s5 + $0xd0] ss:$8 sps:$4 sm:$0xff]   ;;  %v7640_v1 = vld [vmem:[%s11504_s5 + $0xc4] ss:$8 sps:$4 sm:$0xff]  }
 0x2bc   : > { %v3861_v32 = vpop.f32.mrf.mxu1  ;;  %v3962_v0 = vpop.f32.mrf.mxu0  ;;  %v11895_v29 = vld [vmem:[#allocation79_spill] sm:$0xff] }
 0x2bd   : > { %v10050_v27 = vadd.f32 %v3861_v32, %v9724_v37  ;;  %v3963_v53 = vadd.f32 %v3962_v0, %v9741_v40  ;;  %5468 = vmatpush2.bf16.msra.mxu1 %v7632_v36  ;;  %v10056_v6 = vpack.c.bf16 %v4882_v17, %v4878_v11  ;;  %v4885_v58 = vmax.f32 %v3961_v60, 0.0  ;;  %v11896_v17 = vld [vmem:[#allocation83_spill] sm:$0xff]  ;;  %v11897_v0 = vld [vmem:[#allocation69_spill] sm:$0xff] }
 0x2be   : > { %v3863_v8 = vpop.f32.mrf.mxu1  ;;  %v3964_v42 = vpop.f32.mrf.mxu0  ;;  %5469 = vmatprep.subr.bf16.mxu1 %v7637_v19 }
 0x2bf   : > { %v10062_v16 = vadd.f32 %v3863_v8, %v9729_v18  ;;  %v3965_v37 = vadd.f32 %v3964_v42, %v9749_v12  ;;  %v7638_v18 = vld [vmem:[%s11504_s5 + $0xc0] ss:$8 sps:$4 sm:$0xff]   ;;  %v4886_v21 = vmax.f32 %v3963_v53, 0.0 }
 0x2c0   : > { %v3867_v40 = vpop.f32.mrf.mxu1  ;;  %v3966_v36 = vpop.f32.mrf.mxu0  ;;  %4558 = vmatmul.mubr.bf16.gmra.mxu1 %v11895_v29  ;;  %v11898_v42 = vld [vmem:[#allocation68_spill] sm:$0xff] }
 0x2c1   : > { %v4889_v34 = vmax.f32 %v3965_v37, 0.0  ;;  %v10067_v11 = vadd.f32 %v3867_v40, %v9738_v39  ;;  %v3967_v19 = vadd.f32 %v3966_v36, %v9756_v24  ;;  %4567 = vmatprep.mubr.bf16.mxu1 %v11896_v17  ;;  %5470 = vmatpush2.bf16.msra.mxu1 %v7635_v43  ;;  %v7643_v39 = vld [vmem:[%s11504_s5 + $0xb4] ss:$8 sps:$4 sm:$0xff]   ;;  %v7641_v36 = vld [vmem:[%s11504_s5 + $0xb0] ss:$8 sps:$4 sm:$0xff]  }
 0x2c2   : > { %v3869_v12 = vpop.f32.mrf.mxu1  ;;  %v3970_v32 = vpop.f32.mrf.mxu0  ;;  %4435 = vmatmul.mubr.bf16.gmra.mxu0 %v11897_v0  ;;  %5471 = vmatprep.subr.bf16.mxu1 %v7640_v1  ;;  %v11899_v17 = vld [vmem:[#allocation84_spill] sm:$0xff] }
 0x2c3   : > { %v10078_v60 = vpack.c.bf16 %v4889_v34, %v4885_v58  ;;  %v4890_v24 = vmax.f32 %v3967_v19, 0.0  ;;  %v10081_v8 = vadd.f32 %v3869_v12, %v9746_v38  ;;  %v3971_v43 = vadd.f32 %v3970_v32, %v9764_v26  ;;  %4444 = vmatprep.mubr.bf16.mxu0 %v11898_v42  ;;  %v7646_v26 = vld [vmem:[%s11504_s5 + $0xa4] ss:$8 sps:$4 sm:$0xff]  }
 0x2c4   : > { %v3871_v53 = vpop.f32.mrf.mxu1  ;;  %v3972_v37 = vpop.f32.mrf.mxu0  ;;  %v11900_v0 = vld [vmem:[#allocation88_spill] sm:$0xff]  ;;  %v11901_v42 = vld [vmem:[#allocation73_spill] sm:$0xff] }
 0x2c5   : > { %v10086_v40 = vadd.f32 %v3871_v53, %v9753_v30  ;;  %v3973_v1 = vadd.f32 %v3972_v37, %v9773_v35  ;;  %5472 = vmatpush2.bf16.msra.mxu1 %v7638_v18  ;;  %v10092_v29 = vpack.c.bf16 %v4890_v24, %v4886_v21  ;;  %v4893_v18 = vmax.f32 %v3971_v43, 0.0 }
 0x2c6   : > { %v3873_v38 = vpop.f32.mrf.mxu1  ;;  %v3974_v58 = vpop.f32.mrf.mxu0  ;;  %5473 = vmatprep.subr.bf16.mxu1 %v7643_v39 }
 0x2c7   : > { %v10098_v34 = vadd.f32 %v3873_v38, %v9761_v44  ;;  %v3975_v30 = vadd.f32 %v3974_v58, %v9781_v45  ;;  %v7644_v44 = vld [vmem:[%s11504_s5 + $0xa0] ss:$8 sps:$4 sm:$0xff]   ;;  %v4894_v39 = vmax.f32 %v3973_v1, 0.0 }
 0x2c8   : > { %v3877_v35 = vpop.f32.mrf.mxu1  ;;  %v3976_v19 = vpop.f32.mrf.mxu0  ;;  %4568 = vmatmul.mubr.bf16.gmra.mxu1 %v11899_v17 }
 0x2c9   : > { %v4897_v12 = vmax.f32 %v3975_v30, 0.0  ;;  %v10103_v21 = vadd.f32 %v3877_v35, %v9770_v61  ;;  %v3977_v32 = vadd.f32 %v3976_v19, %v9788_v48  ;;  %4577 = vmatprep.mubr.bf16.mxu1 %v11900_v0  ;;  %5474 = vmatpush2.bf16.msra.mxu1 %v7641_v36  ;;  %v7649_v61 = vld [vmem:[%s11504_s5 + $0x94] ss:$8 sps:$4 sm:$0xff]   ;;  %v7647_v30 = vld [vmem:[%s11504_s5 + $0x90] ss:$8 sps:$4 sm:$0xff]  }
 0x2ca   : > { %v3879_v45 = vpop.f32.mrf.mxu1  ;;  %v3980_v24 = vpop.f32.mrf.mxu0  ;;  %4445 = vmatmul.mubr.bf16.gmra.mxu0 %v11901_v42  ;;  %5475 = vmatprep.subr.bf16.mxu1 %v7646_v26  ;;  %v11902_v36 = vld [vmem:[#allocation72_spill] sm:$0xff] }
 0x2cb   : > { %v10114_v43 = vpack.c.bf16 %v4897_v12, %v4893_v18  ;;  %v4898_v48 = vmax.f32 %v3977_v32, 0.0  ;;  %v10117_v53 = vadd.f32 %v3879_v45, %v9778_v20  ;;  %v3981_v37 = vadd.f32 %v3980_v24, %v9796_v62  ;;  %4454 = vmatprep.mubr.bf16.mxu0 %v11902_v36  ;;  %v7652_v62 = vld [vmem:[%s11504_s5 + $0x84] ss:$8 sps:$4 sm:$0xff]  }
 0x2cc   : > { %v3881_v1 = vpop.f32.mrf.mxu1  ;;  %v3982_v38 = vpop.f32.mrf.mxu0  ;;  %v11903_v12 = vld [vmem:[#allocation89_spill] sm:$0xff]  ;;  %v11904_v45 = vld [vmem:[#allocation94_spill] sm:$0xff]  ;;  %v11907_v36 = vld [vmem:[#allocation76_spill] sm:$0xff] }
 0x2cd   : > { %v10122_v58 = vadd.f32 %v3881_v1, %v9785_v50  ;;  %v3983_v26 = vadd.f32 %v3982_v38, %v9805_v51  ;;  %5476 = vmatpush2.bf16.msra.mxu1 %v7644_v44  ;;  %v10128_v35 = vpack.c.bf16 %v4898_v48, %v4894_v39  ;;  %v4901_v32 = vmax.f32 %v3981_v37, 0.0 }
 0x2ce   : > { %v3883_v20 = vpop.f32.mrf.mxu1  ;;  %v3984_v19 = vpop.f32.mrf.mxu0  ;;  %5477 = vmatprep.subr.bf16.mxu1 %v7649_v61  ;;  %v11905_v61 = vld [vmem:[#allocation77_spill] sm:$0xff] }
 0x2cf   : > { %v10134_v17 = vadd.f32 %v3883_v20, %v9793_v47  ;;  %v3985_v50 = vadd.f32 %v3984_v19, %v9813_v9  ;;  %v7650_v47 = vld [vmem:[%s11504_s5 + $0x80] ss:$8 sps:$4 sm:$0xff]   ;;  %v4902_v24 = vmax.f32 %v3983_v26, 0.0 }
 0x2d0   : > { %v3887_v51 = vpop.f32.mrf.mxu1  ;;  %v3986_v18 = vpop.f32.mrf.mxu0  ;;  %4578 = vmatmul.mubr.bf16.gmra.mxu1 %v11903_v12 }
 0x2d1   : > { %v4905_v0 = vmax.f32 %v3985_v50, 0.0  ;;  %v10139_v44 = vadd.f32 %v3887_v51, %v9802_v2  ;;  %v3987_v39 = vadd.f32 %v3986_v18, %v9820_v3  ;;  %4587 = vmatprep.mubr.bf16.mxu1 %v11904_v45  ;;  %5478 = vmatpush2.bf16.msra.mxu1 %v7647_v30  ;;  %v11909_v18 = vld [vmem:[#allocation95_spill] sm:$0xff]  ;;  %v11911_v45 = vld [vmem:[#allocation80_spill] sm:$0xff] }
 0x2d2   : > { %v3889_v9 = vpop.f32.mrf.mxu1  ;;  %v3990_v42 = vpop.f32.mrf.mxu0  ;;  %4455 = vmatmul.mubr.bf16.gmra.mxu0 %v11905_v61  ;;  %5479 = vmatprep.subr.bf16.mxu1 %v7652_v62 }
 0x2d3   : > { %v10147_v48 = vpack.c.bf16 %v4905_v0, %v4901_v32  ;;  %v4906_v37 = vmax.f32 %v3987_v39, 0.0  ;;  %v10150_v2 = vadd.f32 %v3889_v9, %v9810_v55  ;;  %v3991_v3 = vadd.f32 %v3990_v42, %v9826_v54  ;;  %4464 = vmatprep.mubr.bf16.mxu0 %v11907_v36 }
 0x2d4   : > { %v3891_v1 = vpop.f32.mrf.mxu1  ;;  %v3992_v38 = vpop.f32.mrf.mxu0  ;;  %v11913_v9 = vmov 0  }
 0x2d5   : > { %11906 = vst [vmem:[#allocation22_spill] sm:$0xff] %v10147_v48  ;;  %v10155_v30 = vadd.f32 %v3891_v1, %v9817_v13  ;;  %v3993_v26 = vadd.f32 %v3992_v38, %v9834_v15  ;;  %5480 = vmatpush2.bf16.msra.mxu1 %v7650_v47  ;;  %v10158_v20 = vpack.c.bf16 %v4906_v37, %v4902_v24  ;;  %v4909_v12 = vmax.f32 %v3991_v3, 0.0  ;;  %v11910_v15 = vld [vmem:[#allocation97_spill] sm:$0xff]  ;;  %v11916_v38 = vld [vmem:[#allocation38_spill] sm:$0xff] }
 0x2d6   : > { %v3893_v19 = vpop.f32.mrf.mxu1  ;;  %v3994_v62 = vpop.f32.mrf.mxu0  ;;  %v11914_v37 = vld [vmem:[#allocation33_spill] sm:$0xff] }
 0x2d7   : > { %11908 = vst [vmem:[#allocation40_spill] sm:$0xff] %v10158_v20  ;;  %v10161_v50 = vadd.f32 %v3893_v19, %v9823_v23  ;;  %v3995_v55 = vadd.f32 %v3994_v62, %v9841_v31  ;;  %v4910_v23 = vmax.f32 %v3993_v26, 0.0 }
 0x2d8   : > { %v3996_v54 = vpop.f32.mrf.mxu0  ;;  %v10164_v51 = vpop.f32.mrf.mxu1  ;;  %4588 = vmatmul.mubr.bf16.gmra.mxu1 %v11909_v18  ;;  %v11918_v18 = vld [vmem:[#allocation41_spill] sm:$0xff] }
 0x2d9   : > { %v4913_v13 = vmax.f32 %v3995_v55, 0.0  ;;  %v3997_v32 = vadd.f32 %v3996_v54, %v9847_v5  ;;  %4597 = vmatprep.mubr.bf16.mxu1 %v11910_v15  ;;  %v11917_v55 = vld [vmem:[#allocation98_spill] sm:$0xff] }
 0x2da   : > { %v4000_v0 = vpop.f32.mrf.mxu0  ;;  %v10169_v39 = vpop.f32.mrf.mxu1  ;;  %4465 = vmatmul.mubr.bf16.gmra.mxu0 %v11911_v45 }
 0x2db   : > { %v10172_v47 = vpack.c.bf16 %v4913_v13, %v4909_v12  ;;  %v4914_v31 = vmax.f32 %v3997_v32, 0.0  ;;  %v4001_v24 = vadd.f32 %v4000_v0, %v9854_v25  ;;  %4700 = vmatprep.mubr.bf16.mxu0 %v11913_v9  ;;  %v11919_v13 = vld [vmem:[#allocation100_spill] sm:$0xff]  ;;  %v11920_v0 = vld [vmem:[#allocation99_spill] sm:$0xff] }
 0x2dc   : > { %v4002_v42 = vpop.f32.mrf.mxu0  ;;  %v10176_v61 = vpop.f32.mrf.mxu1 }
 0x2dd   : > { %11912 = vst [vmem:[#allocation39_spill] sm:$0xff] %v10172_v47  ;;  %v4003_v5 = vadd.f32 %v4002_v42, %v11914_v37  ;;  %v10179_v3 = vpack.c.bf16 %v4914_v31, %v4910_v23  ;;  %v4917_v25 = vmax.f32 %v4001_v24, 0.0  ;;  %v11922_v42 = vld [vmem:[#allocation43_spill] sm:$0xff] }
 0x2de   : > { %v4004_v36 = vpop.f32.mrf.mxu0  ;;  %v10181_v1 = vpop.f32.mrf.mxu1  ;;  %v11928_v47 = vld [vmem:[#allocation103_spill] sm:$0xff] }
 0x2df   : > { %11915 = vst [vmem:[#allocation29_spill] sm:$0xff] %v10179_v3  ;;  %v4005_v19 = vadd.f32 %v4004_v36, %v11916_v38  ;;  %v4918_v45 = vmax.f32 %v4003_v5, 0.0  ;;  %v11923_v38 = vld [vmem:[#allocation45_spill] sm:$0xff] }
 0x2e0   : > { %v4006_v26 = vpop.f32.mrf.mxu0  ;;  %v10184_v62 = vpop.f32.mrf.mxu1  ;;  %4598 = vmatmul.mubr.bf16.gmra.mxu1 %v11917_v55 }
 0x2e1   : > { %v4921_v54 = vmax.f32 %v4005_v19, 0.0  ;;  %v4007_v12 = vadd.f32 %v4006_v26, %v11918_v18  ;;  %4607 = vmatprep.mubr.bf16.mxu1 %v11919_v13  ;;  %v11925_v13 = vld [vmem:[#allocation28_spill] sm:$0xff] }
 0x2e2   : > { %v4010_v32 = vpop.f32.mrf.mxu0  ;;  %v10189_v15 = vpop.f32.mrf.mxu1  ;;  %6796 = vmatmul.mubr.msk.bf16.vlgmr.msra.gmra.mxu0 %vm3268_vm0, %v11920_v0 }
 0x2e3   : > { %v10193_v23 = vpack.c.bf16 %v4921_v54, %v4917_v25  ;;  %v4922_v31 = vmax.f32 %v4007_v12, 0.0  ;;  %v4011_v37 = vadd.f32 %v4010_v32, %v11922_v42  ;;  %4710 = vmatprep.mubr.bf16.mxu0 %v11913_v9  ;;  %v11926_v54 = vld [vmem:[#allocation101_spill] sm:$0xff]  ;;  %v11927_v42 = vld [vmem:[#allocation46_spill] sm:$0xff] }
 0x2e4   : > { %v4012_v24 = vpop.f32.mrf.mxu0  ;;  %v10197_v36 = vpop.f32.mrf.mxu1 }
 0x2e5   : > { %11921 = vst [vmem:[#allocation24_spill] sm:$0xff] %v10193_v23  ;;  %v4013_v19 = vadd.f32 %v4012_v24, %v11923_v38  ;;  %v10200_v26 = vpack.c.bf16 %v4922_v31, %v4918_v45  ;;  %v4925_v12 = vmax.f32 %v4011_v37, 0.0  ;;  %v11929_v45 = vld [vmem:[#allocation102_spill] sm:$0xff] }
 0x2e6   : > { %v4014_v55 = vpop.f32.mrf.mxu0  ;;  %v10202_v18 = vpop.f32.mrf.mxu1 }
 0x2e7   : > { %11924 = vst [vmem:[#allocation42_spill] sm:$0xff] %v10200_v26  ;;  %v4015_v0 = vadd.f32 %v4014_v55, %v11925_v13  ;;  %v4926_v31 = vmax.f32 %v4013_v19, 0.0  ;;  %v11931_v13 = vld [vmem:[#allocation49_spill] sm:$0xff]  ;;  %v7655_v19 = vld [vmem:[%s11504_s5 + $0x174] ss:$8 sps:$4 sm:$0xff]  }
 0x2e8   : > { %v4016_v5 = vpop.f32.mrf.mxu0  ;;  %v10205_v25 = vpop.f32.mrf.mxu1  ;;  %4608 = vmatmul.mubr.bf16.gmra.mxu1 %v11926_v54  ;;  %5642 = vmatprep.subr.bf16.mxu0 %v7655_v19  ;;  %v11939_v19 = vld [vmem:[#allocation51_spill] sm:$0xff] }
 0x2e9   : > { %v4929_v32 = vmax.f32 %v4015_v0, 0.0  ;;  %v4017_v23 = vadd.f32 %v4016_v5, %v11927_v42  ;;  %4617 = vmatprep.mubr.bf16.mxu1 %v11928_v47 }
 0x2ea   : > { %v4020_v3 = vpop.f32.mrf.mxu0  ;;  %v10210_v24 = vpop.f32.mrf.mxu1  ;;  %6797 = vmatmul.mubr.msk.bf16.gmra.mxu0 %vm3268_vm0, %v11929_v45 }
 0x2eb   : > { %v10214_v38 = vpack.c.bf16 %v4929_v32, %v4925_v12  ;;  %v4930_v55 = vmax.f32 %v4017_v23, 0.0  ;;  %v4021_v26 = vadd.f32 %v4020_v3, %v11931_v13  ;;  %4720 = vmatprep.mubr.bf16.mxu0 %v11913_v9  ;;  %v11933_v12 = vld [vmem:[#allocation36_spill] sm:$0xff]  ;;  %v7653_v3 = vld [vmem:[%s11504_s5 + $0x170] ss:$8 sps:$4 sm:$0xff]  }
 0x2ec   : > { %v4022_v37 = vpop.f32.mrf.mxu0  ;;  %v10218_v0 = vpop.f32.mrf.mxu1  ;;  %v11934_v13 = vld [vmem:[#allocation104_spill] sm:$0xff]  ;;  %5643 = vmatpush1.bf16.msra.mxu0 %v7653_v3 }
 0x2ed   : > { %11930 = vst [vmem:[#allocation44_spill] sm:$0xff] %v10214_v38  ;;  %v4023_v5 = vadd.f32 %v4022_v37, %v9939_v63  ;;  %v10221_v47 = vpack.c.bf16 %v4930_v55, %v4926_v31  ;;  %v4933_v63 = vmax.f32 %v4021_v26, 0.0  ;;  %v11935_v55 = vld [vmem:[#allocation35_spill] sm:$0xff]  ;;  %v11936_v38 = vld [vmem:[#allocation106_spill] sm:$0xff] }
 0x2ee   : > { %v4024_v54 = vpop.f32.mrf.mxu0  ;;  %v10223_v42 = vpop.f32.mrf.mxu1 }
 0x2ef   : > { %11932 = vst [vmem:[#allocation54_spill] sm:$0xff] %v10221_v47  ;;  %v4025_v23 = vadd.f32 %v4024_v54, %v11933_v12  ;;  %v11937_v54 = vld [vmem:[#allocation105_spill] sm:$0xff]  ;;  %v4934_v20 = vmax.f32 %v4023_v5, 0.0 }
 0x2f0   : > { %v4026_v32 = vpop.f32.mrf.mxu0  ;;  %v10232_v45 = vpop.f32.mrf.mxu1  ;;  %4618 = vmatmul.mubr.bf16.gmra.mxu1 %v11934_v13  ;;  %v7658_v12 = vld [vmem:[%s11504_s5 + $0x164] ss:$8 sps:$4 sm:$0xff]  }
 0x2f1   : > { %v4937_v31 = vmax.f32 %v4025_v23, 0.0  ;;  %v4027_v37 = vadd.f32 %v4026_v32, %v11935_v55  ;;  %4627 = vmatprep.mubr.bf16.mxu1 %v11936_v38  ;;  %v7656_v38 = vld [vmem:[%s11504_s5 + $0x160] ss:$8 sps:$4 sm:$0xff]   ;;  %5644 = vmatprep.subr.bf16.mxu0 %v7658_v12 }
 0x2f2   : > { %v4030_v47 = vpop.f32.mrf.mxu0  ;;  %v10237_v48 = vpop.f32.mrf.mxu1  ;;  %6798 = vmatmul.mubr.msk.bf16.gmra.mxu0 %vm3268_vm0, %v11937_v54 }
 0x2f3   : > { %v10244_v13 = vpack.c.bf16 %v4937_v31, %v4933_v63  ;;  %v4938_v26 = vmax.f32 %v4027_v37, 0.0  ;;  %v4031_v23 = vadd.f32 %v4030_v47, %v11939_v19  ;;  %4730 = vmatprep.mubr.bf16.mxu0 %v11913_v9  ;;  %5645 = vmatpush1.bf16.msra.mxu0 %v7656_v38  ;;  %v7661_v47 = vld [vmem:[%s11504_s5 + $0x154] ss:$8 sps:$4 sm:$0xff]   ;;  %v7659_v37 = vld [vmem:[%s11504_s5 + $0x150] ss:$8 sps:$4 sm:$0xff]  }
 0x2f4   : > { %v4032_v3 = vpop.f32.mrf.mxu0  ;;  %v10251_v32 = vpop.f32.mrf.mxu1  ;;  %5646 = vmatprep.subr.bf16.mxu0 %v7661_v47 }
 0x2f5   : > { %11938 = vst [vmem:[#allocation37_spill] sm:$0xff] %v10244_v13  ;;  %v4033_v55 = vadd.f32 %v4032_v3, %v9973_v7  ;;  %v10254_v54 = vpack.c.bf16 %v4938_v26, %v4934_v20  ;;  %v11942_v7 = vld [vmem:[#allocation107_spill] sm:$0xff]  ;;  %v4941_v20 = vmax.f32 %v4031_v23, 0.0  ;;  %v11943_v3 = vld [vmem:[#allocation109_spill] sm:$0xff] }
 0x2f6   : > { %v4034_v5 = vpop.f32.mrf.mxu0  ;;  %v10256_v63 = vpop.f32.mrf.mxu1 }
 0x2f7   : > { %11940 = vst [vmem:[#allocation48_spill] sm:$0xff] %v10254_v54  ;;  %v4035_v31 = vadd.f32 %v4034_v5, %v9978_v56  ;;  %5647 = vmatpush1.bf16.msra.mxu0 %v7659_v37  ;;  %v11944_v56 = vld [vmem:[#allocation108_spill] sm:$0xff] }
 0x2f8   : > { %v4036_v19 = vpop.f32.mrf.mxu0  ;;  %v10265_v12 = vpop.f32.mrf.mxu1  ;;  %4628 = vmatmul.mubr.bf16.gmra.mxu1 %v11942_v7  ;;  %v7664_v5 = vld [vmem:[%s11504_s5 + $0x144] ss:$8 sps:$4 sm:$0xff]  }
 0x2f9   : > { %11941 = vst [vmem:[#allocation47_spill] sm:$0xff] %v10265_v12  ;;  %v4945_v26 = vmax.f32 %v4035_v31, 0.0  ;;  %v4037_v38 = vadd.f32 %v4036_v19, %v9990_v52  ;;  %4637 = vmatprep.mubr.bf16.mxu1 %v11943_v3  ;;  %v4942_v12 = vmax.f32 %v4033_v55, 0.0  ;;  %v7662_v52 = vld [vmem:[%s11504_s5 + $0x140] ss:$8 sps:$4 sm:$0xff]   ;;  %5648 = vmatprep.subr.bf16.mxu0 %v7664_v5 }
 0x2fa   : > { %v4040_v13 = vpop.f32.mrf.mxu0  ;;  %v10270_v54 = vpop.f32.mrf.mxu1  ;;  %6799 = vmatmul.mubr.msk.bf16.gmra.mxu0 %vm3268_vm0, %v11944_v56 }
 0x2fb   : > { %v10277_v7 = vpack.c.bf16 %v4945_v26, %v4941_v20  ;;  %v4946_v23 = vmax.f32 %v4037_v38, 0.0  ;;  %v4041_v47 = vadd.f32 %v4040_v13, %v9995_v41  ;;  %4740 = vmatprep.mubr.bf16.mxu0 %v11913_v9  ;;  %5649 = vmatpush1.bf16.msra.mxu0 %v7662_v52  ;;  %v7667_v41 = vld [vmem:[%s11504_s5 + $0x134] ss:$8 sps:$4 sm:$0xff]   ;;  %v7665_v26 = vld [vmem:[%s11504_s5 + $0x130] ss:$8 sps:$4 sm:$0xff]  }
 0x2fc   : > { %v4042_v31 = vpop.f32.mrf.mxu0  ;;  %v10284_v37 = vpop.f32.mrf.mxu1  ;;  %5650 = vmatprep.subr.bf16.mxu0 %v7667_v41  ;;  %v11948_v52 = vld [vmem:[#allocation112_spill] sm:$0xff] }
 0x2fd   : > { %11945 = vst [vmem:[#allocation30_spill] sm:$0xff] %v10277_v7  ;;  %v4043_v19 = vadd.f32 %v4042_v31, %v10009_v59  ;;  %v10287_v3 = vpack.c.bf16 %v4946_v23, %v4942_v12  ;;  %v11947_v59 = vld [vmem:[#allocation110_spill] sm:$0xff]  ;;  %v4949_v12 = vmax.f32 %v4041_v47, 0.0 }
 0x2fe   : > { %v4044_v55 = vpop.f32.mrf.mxu0  ;;  %v10289_v20 = vpop.f32.mrf.mxu1 }
 0x2ff   : > { %11946 = vst [vmem:[#allocation56_spill] sm:$0xff] %v10289_v20  ;;  %v4045_v13 = vadd.f32 %v4044_v55, %v10014_v4  ;;  %5651 = vmatpush1.bf16.msra.mxu0 %v7665_v26  ;;  %v11949_v4 = vld [vmem:[#allocation111_spill] sm:$0xff]  ;;  %v7670_v55 = vld [vmem:[%s11504_s5 + $0x124] ss:$8 sps:$4 sm:$0xff]   ;;  %v4950_v7 = vmax.f32 %v4043_v19, 0.0 }
 0x300   : > { %v4046_v38 = vpop.f32.mrf.mxu0  ;;  %v10298_v56 = vpop.f32.mrf.mxu1  ;;  %4638 = vmatmul.mubr.bf16.gmra.mxu1 %v11947_v59  ;;  %5652 = vmatprep.subr.bf16.mxu0 %v7670_v55 }
 0x301   : > { %v4953_v5 = vmax.f32 %v4045_v13, 0.0  ;;  %v4047_v23 = vadd.f32 %v4046_v38, %v10026_v10  ;;  %4647 = vmatprep.mubr.bf16.mxu1 %v11948_v52  ;;  %v7668_v10 = vld [vmem:[%s11504_s5 + $0x120] ss:$8 sps:$4 sm:$0xff]  }
 0x302   : > { %v4050_v31 = vpop.f32.mrf.mxu0  ;;  %v10303_v20 = vpop.f32.mrf.mxu1  ;;  %6800 = vmatmul.mubr.msk.bf16.gmra.mxu0 %vm3268_vm0, %v11949_v4 }
 0x303   : > { %v10310_v59 = vpack.c.bf16 %v4953_v5, %v4949_v12  ;;  %v4954_v47 = vmax.f32 %v4047_v23, 0.0  ;;  %v4051_v41 = vadd.f32 %v4050_v31, %v10031_v49  ;;  %4750 = vmatprep.mubr.bf16.mxu0 %v11913_v9  ;;  %5653 = vmatpush1.bf16.msra.mxu0 %v7668_v10  ;;  %v7673_v49 = vld [vmem:[%s11504_s5 + $0x114] ss:$8 sps:$4 sm:$0xff]   ;;  %v7671_v23 = vld [vmem:[%s11504_s5 + $0x110] ss:$8 sps:$4 sm:$0xff]  }
 0x304   : > { %v4052_v13 = vpop.f32.mrf.mxu0  ;;  %v10317_v26 = vpop.f32.mrf.mxu1  ;;  %5654 = vmatprep.subr.bf16.mxu0 %v7673_v49  ;;  %v11953_v10 = vld [vmem:[#allocation115_spill] sm:$0xff] }
 0x305   : > { %11950 = vst [vmem:[#allocation50_spill] sm:$0xff] %v10310_v59  ;;  %v4053_v38 = vadd.f32 %v4052_v13, %v10045_v57  ;;  %v10320_v52 = vpack.c.bf16 %v4954_v47, %v4950_v7  ;;  %v11952_v57 = vld [vmem:[#allocation113_spill] sm:$0xff]  ;;  %v4957_v7 = vmax.f32 %v4051_v41, 0.0 }
 0x306   : > { %v4054_v19 = vpop.f32.mrf.mxu0  ;;  %v10322_v12 = vpop.f32.mrf.mxu1 }
 0x307   : > { %11951 = vst [vmem:[#allocation52_spill] sm:$0xff] %v10322_v12  ;;  %v4055_v5 = vadd.f32 %v4054_v19, %v10050_v27  ;;  %5655 = vmatpush1.bf16.msra.mxu0 %v7671_v23  ;;  %v11954_v27 = vld [vmem:[#allocation114_spill] sm:$0xff]  ;;  %v4958_v59 = vmax.f32 %v4053_v38, 0.0 }
 0x308   : > { %v4056_v31 = vpop.f32.mrf.mxu0  ;;  %v10331_v4 = vpop.f32.mrf.mxu1  ;;  %4648 = vmatmul.mubr.bf16.gmra.mxu1 %v11952_v57  ;;  %v7676_v19 = vld [vmem:[%s11504_s5 + $0x104] ss:$8 sps:$4 sm:$0xff]  }
 0x309   : > { %v4961_v55 = vmax.f32 %v4055_v5, 0.0  ;;  %v4057_v47 = vadd.f32 %v4056_v31, %v10062_v16  ;;  %4657 = vmatprep.mubr.bf16.mxu1 %v11953_v10  ;;  %v7674_v16 = vld [vmem:[%s11504_s5 + $0x100] ss:$8 sps:$4 sm:$0xff]   ;;  %5656 = vmatprep.subr.bf16.mxu0 %v7676_v19 }
 0x30a   : > { %v4060_v13 = vpop.f32.mrf.mxu0  ;;  %v10336_v12 = vpop.f32.mrf.mxu1  ;;  %6801 = vmatmul.mubr.msk.bf16.gmra.mxu0 %vm3268_vm0, %v11954_v27 }
 0x30b   : > { %v10343_v57 = vpack.c.bf16 %v4961_v55, %v4957_v7  ;;  %v4962_v41 = vmax.f32 %v4057_v47, 0.0  ;;  %v4061_v49 = vadd.f32 %v4060_v13, %v10067_v11  ;;  %4760 = vmatprep.mubr.bf16.mxu0 %v11913_v9  ;;  %5657 = vmatpush1.bf16.msra.mxu0 %v7674_v16  ;;  %v7679_v11 = vld [vmem:[%s11504_s5 + $0x1f4] ss:$8 sps:$4 sm:$0xff]   ;;  %v7677_v47 = vld [vmem:[%s11504_s5 + $0x1f0] ss:$8 sps:$4 sm:$0xff]  }
 0x30c   : > { %v4062_v5 = vpop.f32.mrf.mxu0  ;;  %v10350_v23 = vpop.f32.mrf.mxu1  ;;  %5658 = vmatprep.subr.bf16.mxu0 %v7679_v11 }
 0x30d   : > { %v4063_v31 = vadd.f32 %v4062_v5, %v10081_v8  ;;  %v10353_v10 = vpack.c.bf16 %v4962_v41, %v4958_v59  ;;  %v11956_v8 = vld [vmem:[#allocation116_spill] sm:$0xff]  ;;  %v4965_v59 = vmax.f32 %v4061_v49, 0.0 }
 0x30e   : > { %v4064_v38 = vpop.f32.mrf.mxu0  ;;  %v10355_v7 = vpop.f32.mrf.mxu1 }
 0x30f   : > { %11955 = vst [vmem:[#allocation58_spill] sm:$0xff] %v10355_v7  ;;  %v4065_v55 = vadd.f32 %v4064_v38, %v10086_v40  ;;  %5659 = vmatpush2.bf16.msra.mxu0 %v7677_v47  ;;  %v11957_v40 = vld [vmem:[#allocation117_spill] sm:$0xff]  ;;  %v4966_v7 = vmax.f32 %v4063_v31, 0.0 }
 0x310   : > { %v4066_v13 = vpop.f32.mrf.mxu0  ;;  %v10364_v27 = vpop.f32.mrf.mxu1  ;;  %4658 = vmatmul.mubr.bf16.gmra.mxu1 %v11956_v8  ;;  %v7682_v38 = vld [vmem:[%s11504_s5 + $0x1e4] ss:$8 sps:$4 sm:$0xff]  }
 0x311   : > { %v4969_v19 = vmax.f32 %v4065_v55, 0.0  ;;  %v4067_v41 = vadd.f32 %v4066_v13, %v10098_v34  ;;  %5481 = vmatprep.mubr.bf16.mxu1 %v9984_v14  ;;  %v7680_v14 = vld [vmem:[%s11504_s5 + $0x1e0] ss:$8 sps:$4 sm:$0xff]   ;;  %5660 = vmatprep.subr.bf16.mxu0 %v7682_v38 }
 0x312   : > { %v4070_v16 = vpop.f32.mrf.mxu0  ;;  %v10369_v5 = vpop.f32.mrf.mxu1  ;;  %6802 = vmatmul.mubr.msk.bf16.gmra.mxu0 %vm3268_vm0, %v11957_v40 }
 0x313   : > { %v10376_v8 = vpack.c.bf16 %v4969_v19, %v4965_v59  ;;  %v4970_v49 = vmax.f32 %v4067_v41, 0.0  ;;  %v4071_v11 = vadd.f32 %v4070_v16, %v10103_v21  ;;  %4770 = vmatprep.mubr.bf16.mxu0 %v11913_v9  ;;  %5661 = vmatpush2.bf16.msra.mxu0 %v7680_v14  ;;  %v7685_v21 = vld [vmem:[%s11504_s5 + $0x1d4] ss:$8 sps:$4 sm:$0xff]   ;;  %v7683_v41 = vld [vmem:[%s11504_s5 + $0x1d0] ss:$8 sps:$4 sm:$0xff]  }
 0x314   : > { %v4072_v34 = vpop.f32.mrf.mxu0  ;;  %v10383_v55 = vpop.f32.mrf.mxu1  ;;  %5662 = vmatprep.subr.bf16.mxu0 %v7685_v21 }
 0x315   : > { %v4073_v47 = vadd.f32 %v4072_v34, %v10117_v53  ;;  %v10386_v13 = vpack.c.bf16 %v4970_v49, %v4966_v7  ;;  %v4973_v53 = vmax.f32 %v4071_v11, 0.0  ;;  %v7688_v34 = vld [vmem:[%s11504_s5 + $0x1c4] ss:$8 sps:$4 sm:$0xff]  }
 0x316   : > { %v4074_v31 = vpop.f32.mrf.mxu0  ;;  %v10388_v59 = vpop.f32.mrf.mxu1 }
 0x317   : > { %11958 = vst [vmem:[#allocation60_spill] sm:$0xff] %v10388_v59  ;;  %v4075_v19 = vadd.f32 %v4074_v31, %v10122_v58  ;;  %5663 = vmatpush2.bf16.msra.mxu0 %v7683_v41  ;;  %v11959_v58 = vld [vmem:[#allocation121_spill] sm:$0xff]  ;;  %v4974_v31 = vmax.f32 %v4073_v47, 0.0  ;;  %v7718_v41 = vld [vmem:[%s11503_s4] sm:$0xf] }
 0x318   : > { %v4076_v16 = vpop.f32.mrf.mxu0  ;;  %v10397_v40 = vpop.f32.mrf.mxu1  ;;  %5482 = vmatmul.mubr.bf16.vlgmr.msra.gmra.mxu1 %v9970_v22  ;;  %5664 = vmatprep.subr.bf16.mxu0 %v7688_v34  ;;  %v11961_v47 = vld [vmem:[#allocation9_spill] sm:$0xff]  ;;  %v7691_v34 = vld [vmem:[%s11504_s5 + $0x1b4] ss:$8 sps:$4 sm:$0xff]  }
 0x319   : > { %v4977_v7 = vmax.f32 %v4075_v19, 0.0  ;;  %v4077_v38 = vadd.f32 %v4076_v16, %v10134_v17  ;;  %5491 = vmatprep.mubr.bf16.mxu1 %v10020_v46  ;;  %v7686_v46 = vld [vmem:[%s11504_s5 + $0x1c0] ss:$8 sps:$4 sm:$0xff]   ;;  %v11962_v16 = vsub.s32 2, %v11961_v47 }
 0x31a   : > { %v4080_v49 = vpop.f32.mrf.mxu0  ;;  %v10402_v14 = vpop.f32.mrf.mxu1  ;;  %6803 = vmatmul.mubr.msk.bf16.gmra.mxu0 %vm3268_vm0, %v11959_v58 }
 0x31b   : > { %v10409_v22 = vpack.c.bf16 %v4977_v7, %v4973_v53  ;;  %v4978_v11 = vmax.f32 %v4077_v38, 0.0  ;;  %v4081_v21 = vadd.f32 %v4080_v49, %v10139_v44  ;;  %4780 = vmatprep.mubr.bf16.mxu0 %v11913_v9  ;;  %v10423_v53 = vrot.slane %v7718_v41, %v11962_v16  ;;  %5665 = vmatpush2.bf16.msra.mxu0 %v7686_v46 }
 0x31c   : > { %v4082_v17 = vpop.f32.mrf.mxu0  ;;  %v10416_v19 = vpop.f32.mrf.mxu1  ;;  %v11963_v38 = vsub.s32 3, %v11961_v47  ;;  %5666 = vmatprep.subr.bf16.mxu0 %v7691_v34  ;;  %v11965_v47 = vld [vmem:[#allocation124_spill] sm:$0xff] }
 0x31d   : > { %11960 = vst [vmem:[#allocation23_spill] sm:$0xff] %v10409_v22  ;;  %v4083_v44 = vadd.f32 %v4082_v17, %v10150_v2  ;;  %v10426_v7 = vpack.c.bf16 %v4978_v11, %v4974_v31  ;;  %v7689_v2 = vld [vmem:[%s11504_s5 + $0x1b0] ss:$8 sps:$4 sm:$0xff]   ;;  %v4124_v46 = vadd.f32 %v10164_v51, %v10423_v53  ;;  %v4981_v17 = vmax.f32 %v4081_v21, 0.0 }
 0x31e   : > { %v10430_v49 = vrot.slane %v7718_v41, %v11963_v38  ;;  %v4084_v58 = vpop.f32.mrf.mxu0  ;;  %v10432_v59 = vpop.f32.mrf.mxu1 }
 0x31f   : > { %11964 = vst [vmem:[#allocation53_spill] sm:$0xff] %v10432_v59  ;;  %v4085_v22 = vadd.f32 %v4084_v58, %v10155_v30  ;;  %5667 = vmatpush2.bf16.msra.mxu0 %v7689_v2  ;;  %v4982_v51 = vmax.f32 %v4083_v44, 0.0 }
 0x320   : > { %v4086_v31 = vpop.f32.mrf.mxu0  ;;  %v10441_v11 = vpop.f32.mrf.mxu1  ;;  %5492 = vmatmul.mubr.bf16.gmra.mxu1 %v10006_v33  ;;  %v4126_v30 = vadd.f32 %v10169_v39, %v10430_v49  ;;  %v7694_v33 = vld [vmem:[%s11504_s5 + $0x1a4] ss:$8 sps:$4 sm:$0xff]  }
 0x321   : > { %v4985_v41 = vmax.f32 %v4085_v22, 0.0  ;;  %v4087_v16 = vadd.f32 %v4086_v31, %v10161_v50  ;;  %5501 = vmatprep.mubr.bf16.mxu1 %v10056_v6  ;;  %v7692_v6 = vld [vmem:[%s11504_s5 + $0x1a0] ss:$8 sps:$4 sm:$0xff]   ;;  %5668 = vmatprep.subr.bf16.mxu0 %v7694_v33  ;;  %v4134_v33 = vadd.f32 %v10184_v62, %v10423_v53 }
 0x322   : > { %v10450_v38 = vpop.f32.mrf.mxu1  ;;  %v4316_v58 = vpop.f32.mrf.mxu0  ;;  %6804 = vmatmul.mubr.msk.bf16.gmra.mxu0 %vm3268_vm0, %v11965_v47  ;;  %v4128_v47 = vadd.f32 %v10176_v61, %v10423_v53  ;;  %v7695_v61 = vld [vmem:[%s11504_s5 + $0x190] ss:$8 sps:$4 sm:$0xff]  }
 0x323   : > { %v10457_v22 = vpack.c.bf16 %v4985_v41, %v4981_v17  ;;  %v4986_v50 = vmax.f32 %v4087_v16, 0.0  ;;  %v10459_v21 = vadd.f32 %v4316_v58, %v4124_v46  ;;  %4790 = vmatprep.mubr.bf16.mxu0 %v11913_v9  ;;  %5669 = vmatpush2.bf16.msra.mxu0 %v7692_v6  ;;  %v7697_v17 = vld [vmem:[%s11504_s5 + $0x194] ss:$8 sps:$4 sm:$0xff]   ;;  %v4130_v41 = vadd.f32 %v10181_v1, %v10430_v49 }
 0x324   : > { %v10465_v39 = vpop.f32.mrf.mxu1  ;;  %v4318_v34 = vpop.f32.mrf.mxu0  ;;  %5670 = vmatprep.subr.bf16.mxu0 %v7697_v17  ;;  %v11967_v6 = vld [vmem:[#allocation16_spill] sm:$0xff]  ;;  %v4138_v17 = vadd.f32 %v10197_v36, %v10423_v53 }
 0x325   : > { %v10469_v2 = vadd.f32 %v4318_v34, %v4126_v30  ;;  %v10471_v44 = vpack.c.bf16 %v4986_v50, %v4982_v51  ;;  %v7700_v34 = vld [vmem:[%s11504_s5 + $0x184] ss:$8 sps:$4 sm:$0xff]  }
 0x326   : > { %v10473_v31 = vpop.f32.mrf.mxu1  ;;  %v4320_v46 = vpop.f32.mrf.mxu0 }
 0x327   : > { %11966 = vst [vmem:[#allocation61_spill] sm:$0xff] %v10473_v31  ;;  %v10480_v16 = vadd.f32 %v4320_v46, %v4128_v47  ;;  %5671 = vmatpush2.bf16.msra.mxu0 %v7695_v61 }
 0x328   : > { %v10485_v30 = vpop.f32.mrf.mxu1  ;;  %v4322_v58 = vpop.f32.mrf.mxu0  ;;  %5502 = vmatmul.mubr.bf16.gmra.mxu1 %v10042_v28  ;;  %v4136_v28 = vadd.f32 %v10189_v15, %v10430_v49  ;;  %5672 = vmatprep.subr.bf16.mxu0 %v7700_v34  ;;  %v4144_v34 = vadd.f32 %v10205_v25, %v10423_v53 }
 0x329   : > { %v10490_v51 = vadd.f32 %v4322_v58, %v4130_v41  ;;  %5511 = vmatprep.mubr.bf16.mxu1 %v10092_v29  ;;  %v7698_v29 = vld [vmem:[%s11504_s5 + $0x180] ss:$8 sps:$4 sm:$0xff]   ;;  %v4140_v58 = vadd.f32 %v10202_v18, %v10430_v49  ;;  %v4146_v18 = vadd.f32 %v10210_v24, %v10430_v49 }
 0x32a   : > { %v10493_v1 = vpop.f32.mrf.mxu1  ;;  %v4326_v50 = vpop.f32.mrf.mxu0  ;;  %6805 = vmatmul.mubr.msk.bf16.gmra.mxu0 %vm3268_vm0, %v11967_v6 }
 0x32b   : > { %v10502_v47 = vadd.f32 %v4326_v50, %v4134_v33  ;;  %4800 = vmatprep.mubr.bf16.mxu0 %v11913_v9  ;;  %5673 = vmatpush2.bf16.msra.mxu0 %v7698_v29 }
 0x32c   : > { %v10508_v62 = vpop.f32.mrf.mxu1  ;;  %v4328_v46 = vpop.f32.mrf.mxu0 }
 0x32d   : > { %v10512_v41 = vadd.f32 %v4328_v46, %v4136_v28  ;;  %v11969_v46 = vld [vmem:[#allocation17_spill] sm:$0xff] }
 0x32e   : > { %v10514_v61 = vpop.f32.mrf.mxu1  ;;  %v4330_v15 = vpop.f32.mrf.mxu0 }
 0x32f   : > { %11968 = vst [vmem:[#allocation118_spill] sm:$0xff] %v10514_v61  ;;  %v10518_v33 = vadd.f32 %v4330_v15, %v4138_v17  ;;  %v4148_v15 = vadd.f32 %v10218_v0, %v10423_v53  ;;  %v11973_v0 = vld [vmem:[#allocation40_spill] sm:$0xff] }
 0x330   : > { %v10520_v50 = vpop.f32.mrf.mxu1  ;;  %v4332_v6 = vpop.f32.mrf.mxu0  ;;  %5512 = vmatmul.mubr.bf16.gmra.mxu1 %v10078_v60 }
 0x331   : > { %v10525_v36 = vadd.f32 %v4332_v6, %v4140_v58  ;;  %5521 = vmatprep.mubr.bf16.mxu1 %v10128_v35 }
 0x332   : > { %v10528_v28 = vpop.f32.mrf.mxu1  ;;  %v4336_v29 = vpop.f32.mrf.mxu0  ;;  %6806 = vmatmul.mubr.msk.bf16.gmra.mxu0 %vm3268_vm0, %v11969_v46  ;;  %v4150_v46 = vadd.f32 %v10223_v42, %v10430_v49  ;;  %v4156_v42 = vadd.f32 %v10237_v48, %v10430_v49 }
 0x333   : > { %v10534_v17 = vadd.f32 %v4336_v29, %v4144_v34  ;;  %4810 = vmatprep.mubr.bf16.mxu0 %v11913_v9  ;;  %v4154_v29 = vadd.f32 %v10232_v45, %v10423_v53 }
 0x334   : > { %v10537_v60 = vpop.f32.mrf.mxu1  ;;  %v4338_v25 = vpop.f32.mrf.mxu0 }
 0x335   : > { %v10541_v35 = vadd.f32 %v4338_v25, %v4146_v18 }
 0x336   : > { %v10543_v58 = vpop.f32.mrf.mxu1  ;;  %v4340_v6 = vpop.f32.mrf.mxu0 }
 0x337   : > { %11970 = vst [vmem:[#allocation81_spill] sm:$0xff] %v10543_v58  ;;  %v10547_v61 = vadd.f32 %v4340_v6, %v4148_v15  ;;  %v11974_v58 = vld [vmem:[#allocation82_spill] sm:$0xff]  ;;  %v4158_v6 = vadd.f32 %v10251_v32, %v10423_v53  ;;  %v11981_v32 = vld [vmem:[#allocation29_spill] sm:$0xff] }
 0x338   : > { %v10549_v24 = vpop.f32.mrf.mxu1  ;;  %v4342_v34 = vpop.f32.mrf.mxu0  ;;  %5522 = vmatmul.mubr.bf16.gmra.mxu1 %v10114_v43 }
 0x339   : > { %11971 = vst [vmem:[#allocation26_spill] sm:$0xff] %v10547_v61  ;;  %v10554_v31 = vadd.f32 %v4342_v34, %v4150_v46  ;;  %5531 = vmatprep.mubr.bf16.mxu1 %v11973_v0 }
 0x33a   : > { %v10557_v18 = vpop.f32.mrf.mxu1  ;;  %v4346_v25 = vpop.f32.mrf.mxu0  ;;  %6807 = vmatmul.mubr.msk.bf16.gmra.mxu0 %vm3268_vm0, %v11974_v58  ;;  %v4160_v58 = vadd.f32 %v10256_v63, %v10430_v49  ;;  %v4166_v63 = vadd.f32 %v10270_v54, %v10430_v49 }
 0x33b   : > { %11972 = vst [vmem:[#allocation12_spill] sm:$0xff] %v10554_v31  ;;  %v10563_v15 = vadd.f32 %v4346_v25, %v4154_v29  ;;  %4820 = vmatprep.mubr.bf16.mxu0 %v11913_v9  ;;  %v11978_v25 = vld [vmem:[#allocation22_spill] sm:$0xff] }
 0x33c   : > { %v10566_v43 = vpop.f32.mrf.mxu1  ;;  %v4348_v45 = vpop.f32.mrf.mxu0 }
 0x33d   : > { %11975 = vst [vmem:[#allocation55_spill] sm:$0xff] %v10563_v15  ;;  %v10570_v46 = vadd.f32 %v4348_v45, %v4156_v42  ;;  %v11979_v15 = vld [vmem:[#allocation47_spill] sm:$0xff] }
 0x33e   : > { %v10572_v34 = vpop.f32.mrf.mxu1  ;;  %v4350_v0 = vpop.f32.mrf.mxu0  ;;  %v4164_v31 = vadd.f32 %v11979_v15, %v10423_v53 }
 0x33f   : > { %11976 = vst [vmem:[#allocation119_spill] sm:$0xff] %v10572_v34  ;;  %v10576_v59 = vadd.f32 %v4350_v0, %v4158_v6  ;;  %v11982_v34 = vld [vmem:[#allocation18_spill] sm:$0xff] }
 0x340   : > { %v10578_v48 = vpop.f32.mrf.mxu1  ;;  %v4352_v29 = vpop.f32.mrf.mxu0  ;;  %5532 = vmatmul.mubr.bf16.gmra.mxu1 %v11978_v25 }
 0x341   : > { %11977 = vst [vmem:[#allocation120_spill] sm:$0xff] %v10576_v59  ;;  %v10583_v61 = vadd.f32 %v4352_v29, %v4160_v58  ;;  %5541 = vmatprep.mubr.bf16.mxu1 %v11981_v32  ;;  %v4168_v58 = vadd.f32 %v10284_v37, %v10423_v53 }
 0x342   : > { %v10586_v42 = vpop.f32.mrf.mxu1  ;;  %v4356_v45 = vpop.f32.mrf.mxu0  ;;  %6808 = vmatmul.mubr.msk.bf16.gmra.mxu0 %vm3268_vm0, %v11982_v34 }
 0x343   : > { %11980 = vst [vmem:[#allocation85_spill] sm:$0xff] %v10583_v61  ;;  %v10592_v6 = vadd.f32 %v4356_v45, %v4164_v31  ;;  %4830 = vmatprep.mubr.bf16.mxu0 %v11913_v9  ;;  %v11988_v31 = vld [vmem:[#allocation39_spill] sm:$0xff]  ;;  %v4174_v45 = vadd.f32 %v10298_v56, %v10423_v53  ;;  %v4178_v56 = vadd.f32 %v10317_v26, %v10423_v53 }
 0x344   : > { %v10595_v0 = vpop.f32.mrf.mxu1  ;;  %v4358_v15 = vpop.f32.mrf.mxu0 }
 0x345   : > { %11983 = vst [vmem:[#allocation13_spill] sm:$0xff] %v10592_v6  ;;  %v10599_v29 = vadd.f32 %v4358_v15, %v4166_v63  ;;  %v11989_v6 = vld [vmem:[#allocation42_spill] sm:$0xff]  ;;  %v11990_v63 = vld [vmem:[#allocation87_spill] sm:$0xff]  ;;  %v4176_v15 = vadd.f32 %v10303_v20, %v10430_v49 }
 0x346   : > { %v10601_v25 = vpop.f32.mrf.mxu1  ;;  %v4360_v32 = vpop.f32.mrf.mxu0 }
 0x347   : > { %11984 = vst [vmem:[#allocation86_spill] sm:$0xff] %v10599_v29  ;;  %11985 = vst [vmem:[#allocation34_spill] sm:$0xff] %v10601_v25  ;;  %v10603_v61 = vadd.f32 %v4360_v32, %v4168_v58 }
 0x348   : > { %v10605_v34 = vpop.f32.mrf.mxu1  ;;  %v10607_v54 = vpop.f32.mrf.mxu0  ;;  %5542 = vmatmul.mubr.bf16.gmra.mxu1 %v11988_v31 }
 0x349   : > { %11986 = vst [vmem:[#allocation14_spill] sm:$0xff] %v10603_v61  ;;  %11987 = vst [vmem:[#allocation32_spill] sm:$0xff] %v10607_v54  ;;  %5551 = vmatprep.mubr.bf16.mxu1 %v11989_v6 }
 0x34a   : > { %v10613_v59 = vpop.f32.mrf.mxu1  ;;  %v4366_v37 = vpop.f32.mrf.mxu0  ;;  %6809 = vmatmul.mubr.msk.bf16.gmra.mxu0 %vm3268_vm0, %v11990_v63 }
 0x34b   : > { %v10619_v58 = vadd.f32 %v4366_v37, %v4174_v45  ;;  %4840 = vmatprep.mubr.bf16.mxu0 %v11913_v9  ;;  %v11995_v45 = vld [vmem:[#allocation24_spill] sm:$0xff]  ;;  %v4184_v37 = vadd.f32 %v10331_v4, %v10423_v53  ;;  %v4188_v4 = vadd.f32 %v10350_v23, %v10423_v53 }
 0x34c   : > { %v10622_v32 = vpop.f32.mrf.mxu1  ;;  %v4368_v31 = vpop.f32.mrf.mxu0 }
 0x34d   : > { %11991 = vst [vmem:[#allocation122_spill] sm:$0xff] %v10619_v58  ;;  %v10626_v6 = vadd.f32 %v4368_v31, %v4176_v15  ;;  %v11996_v58 = vld [vmem:[#allocation54_spill] sm:$0xff]  ;;  %v11997_v15 = vld [vmem:[#allocation93_spill] sm:$0xff] }
 0x34e   : > { %v10628_v25 = vpop.f32.mrf.mxu1  ;;  %v4370_v61 = vpop.f32.mrf.mxu0 }
 0x34f   : > { %11992 = vst [vmem:[#allocation123_spill] sm:$0xff] %v10626_v6  ;;  %11993 = vst [vmem:[#allocation90_spill] sm:$0xff] %v10628_v25  ;;  %v10630_v29 = vadd.f32 %v4370_v61, %v4178_v56  ;;  %v4186_v61 = vadd.f32 %v10336_v12, %v10430_v49 }
 0x350   : > { %v10632_v63 = vpop.f32.mrf.mxu1  ;;  %v10634_v20 = vpop.f32.mrf.mxu0  ;;  %5552 = vmatmul.mubr.bf16.gmra.mxu1 %v11995_v45 }
 0x351   : > { %11994 = vst [vmem:[#allocation15_spill] sm:$0xff] %v10630_v29  ;;  %5561 = vmatprep.mubr.bf16.mxu1 %v11996_v58 }
 0x352   : > { %v10640_v54 = vpop.f32.mrf.mxu1  ;;  %v4376_v26 = vpop.f32.mrf.mxu0  ;;  %6810 = vmatmul.mubr.msk.bf16.gmra.mxu0 %vm3268_vm0, %v11997_v15 }
 0x353   : > { %v10646_v31 = vadd.f32 %v4376_v26, %v4184_v37  ;;  %4850 = vmatprep.mubr.bf16.mxu0 %v11913_v9  ;;  %v12003_v37 = vld [vmem:[#allocation44_spill] sm:$0xff]  ;;  %v4194_v9 = vadd.f32 %v10364_v27, %v10423_v53 }
 0x354   : > { %v10649_v56 = vpop.f32.mrf.mxu1  ;;  %v4378_v45 = vpop.f32.mrf.mxu0  ;;  %v12004_v26 = vld [vmem:[#allocation48_spill] sm:$0xff] }
 0x355   : > { %11998 = vst [vmem:[#allocation91_spill] sm:$0xff] %v10646_v31  ;;  %v10653_v58 = vadd.f32 %v4378_v45, %v4186_v61  ;;  %v12005_v61 = vld [vmem:[#allocation92_spill] sm:$0xff] }
 0x356   : > { %v10655_v25 = vpop.f32.mrf.mxu1  ;;  %v4380_v29 = vpop.f32.mrf.mxu0 }
 0x357   : > { %11999 = vst [vmem:[#allocation57_spill] sm:$0xff] %v10653_v58  ;;  %12000 = vst [vmem:[#allocation59_spill] sm:$0xff] %v10655_v25  ;;  %v10657_v6 = vadd.f32 %v4380_v29, %v4188_v4  ;;  %v4196_v29 = vadd.f32 %v10369_v5, %v10430_v49  ;;  %v12010_v5 = vld [vmem:[#allocation37_spill] sm:$0xff] }
 0x358   : > { %v10659_v15 = vpop.f32.mrf.mxu0  ;;  %v10661_v12 = vpop.f32.mrf.mxu1  ;;  %5562 = vmatmul.mubr.bf16.gmra.mxu1 %v12003_v37  ;;  %v4198_v37 = vadd.f32 %v10383_v55, %v10423_v53 }
 0x359   : > { %12001 = vst [vmem:[#allocation96_spill] sm:$0xff] %v10657_v6  ;;  %12002 = vst [vmem:[#allocation19_spill] sm:$0xff] %v10659_v15  ;;  %5571 = vmatprep.mubr.bf16.mxu1 %v12004_v26 }
 0x35a   : > { %v4386_v31 = vpop.f32.mrf.mxu0  ;;  %v10667_v23 = vpop.f32.mrf.mxu1  ;;  %6811 = vmatmul.mubr.msk.bf16.gmra.mxu0 %vm3268_vm0, %v12005_v61 }
 0x35b   : > { %v10673_v45 = vadd.f32 %v4386_v31, %v4194_v9  ;;  %v4204_v31 = vadd.f32 %v10397_v40, %v10423_v53 }
 0x35c   : > { %v4388_v4 = vpop.f32.mrf.mxu0  ;;  %v10675_v25 = vpop.f32.mrf.mxu1 }
 0x35d   : > { %12006 = vst [vmem:[#allocation70_spill] sm:$0xff] %v10673_v45  ;;  %v10679_v27 = vadd.f32 %v4388_v4, %v4196_v29  ;;  %v4206_v29 = vadd.f32 %v10402_v14, %v10430_v49  ;;  %v12015_v14 = vld [vmem:[#allocation30_spill] sm:$0xff] }
 0x35e   : > { %v4390_v26 = vpop.f32.mrf.mxu0  ;;  %v10681_v6 = vpop.f32.mrf.mxu1 }
 0x35f   : > { %12007 = vst [vmem:[#allocation63_spill] sm:$0xff] %v10679_v27  ;;  %v10683_v58 = vadd.f32 %v4390_v26, %v4198_v37 }
 0x360   : > { %v10685_v15 = vpop.f32.mrf.mxu0  ;;  %v10687_v61 = vpop.f32.mrf.mxu1  ;;  %5572 = vmatmul.mubr.bf16.gmra.mxu1 %v12010_v5 }
 0x361   : > { %12008 = vst [vmem:[#allocation20_spill] sm:$0xff] %v10683_v58  ;;  %12009 = vst [vmem:[#allocation62_spill] sm:$0xff] %v10685_v15  ;;  %5581 = vmatprep.mubr.bf16.mxu1 %v10287_v3  ;;  %v4208_v58 = vadd.f32 %v10416_v19, %v10423_v53 }
 0x362   : > { %v4396_v9 = vpop.f32.mrf.mxu0  ;;  %v10693_v55 = vpop.f32.mrf.mxu1 }
 0x363   : > { %v10697_v4 = vadd.f32 %v4396_v9, %v4204_v31  ;;  %v4214_v31 = vadd.f32 %v10441_v11, %v10423_v53 }
 0x364   : > { %v4398_v37 = vpop.f32.mrf.mxu0  ;;  %v10699_v26 = vpop.f32.mrf.mxu1 }
 0x365   : > { %12011 = vst [vmem:[#allocation21_spill] sm:$0xff] %v10697_v4  ;;  %v10703_v5 = vadd.f32 %v4398_v37, %v4206_v29  ;;  %v4216_v29 = vadd.f32 %v10450_v38, %v10430_v49  ;;  %v12020_v38 = vld [vmem:[#allocation50_spill] sm:$0xff] }
 0x366   : > { %v4400_v27 = vpop.f32.mrf.mxu0  ;;  %v10705_v40 = vpop.f32.mrf.mxu1 }
 0x367   : > { %12012 = vst [vmem:[#allocation71_spill] sm:$0xff] %v10703_v5  ;;  %v10707_v3 = vadd.f32 %v4400_v27, %v4208_v58 }
 0x368   : > { %v10709_v15 = vpop.f32.mrf.mxu0  ;;  %v10711_v45 = vpop.f32.mrf.mxu1  ;;  %5582 = vmatmul.mubr.bf16.gmra.mxu1 %v12015_v14 }
 0x369   : > { %12013 = vst [vmem:[#allocation25_spill] sm:$0xff] %v10707_v3  ;;  %12014 = vst [vmem:[#allocation74_spill] sm:$0xff] %v10709_v15  ;;  %5591 = vmatprep.mubr.bf16.mxu1 %v10320_v52  ;;  %v4218_v3 = vadd.f32 %v10465_v39, %v10423_v53 }
 0x36a   : > { %v4406_v9 = vpop.f32.mrf.mxu0  ;;  %v10717_v19 = vpop.f32.mrf.mxu1 }
 0x36b   : > { %v10721_v37 = vadd.f32 %v4406_v9, %v4214_v31  ;;  %v4224_v31 = vadd.f32 %v10485_v30, %v10423_v53 }
 0x36c   : > { %v4408_v58 = vpop.f32.mrf.mxu0  ;;  %v10723_v27 = vpop.f32.mrf.mxu1 }
 0x36d   : > { %12016 = vst [vmem:[#allocation65_spill] sm:$0xff] %v10721_v37  ;;  %v10727_v14 = vadd.f32 %v4408_v58, %v4216_v29  ;;  %v4226_v29 = vadd.f32 %v10493_v1, %v10430_v49  ;;  %v4234_v1 = vadd.f32 %v10520_v50, %v10423_v53 }
 0x36e   : > { %v4410_v5 = vpop.f32.mrf.mxu0  ;;  %v10729_v11 = vpop.f32.mrf.mxu1 }
 0x36f   : > { %12017 = vst [vmem:[#allocation27_spill] sm:$0xff] %v10727_v14  ;;  %v10731_v52 = vadd.f32 %v4410_v5, %v4218_v3 }
 0x370   : > { %v10733_v15 = vpop.f32.mrf.mxu0  ;;  %v10735_v4 = vpop.f32.mrf.mxu1  ;;  %5592 = vmatmul.mubr.bf16.gmra.mxu1 %v12020_v38 }
 0x371   : > { %12018 = vst [vmem:[#allocation64_spill] sm:$0xff] %v10731_v52  ;;  %12019 = vst [vmem:[#allocation75_spill] sm:$0xff] %v10733_v15  ;;  %5601 = vmatprep.mubr.bf16.mxu1 %v10353_v10  ;;  %v4228_v52 = vadd.f32 %v10508_v62, %v10423_v53 }
 0x372   : > { %v4416_v9 = vpop.f32.mrf.mxu0  ;;  %v10741_v39 = vpop.f32.mrf.mxu1 }
 0x373   : > { %v10745_v58 = vadd.f32 %v4416_v9, %v4224_v31  ;;  %v4236_v9 = vadd.f32 %v10528_v28, %v10430_v49  ;;  %v4244_v28 = vadd.f32 %v10549_v24, %v10423_v53 }
 0x374   : > { %v4418_v5 = vpop.f32.mrf.mxu0  ;;  %v10747_v3 = vpop.f32.mrf.mxu1 }
 0x375   : > { %12021 = vst [vmem:[#allocation78_spill] sm:$0xff] %v10745_v58  ;;  %v10751_v38 = vadd.f32 %v4418_v5, %v4226_v29  ;;  %v4238_v5 = vadd.f32 %v10537_v60, %v10423_v53 }
 0x376   : > { %v4420_v14 = vpop.f32.mrf.mxu0  ;;  %v10753_v30 = vpop.f32.mrf.mxu1 }
 0x377   : > { %12022 = vst [vmem:[#allocation67_spill] sm:$0xff] %v10751_v38  ;;  %v10755_v10 = vadd.f32 %v4420_v14, %v4228_v52 }
 0x378   : > { %v10757_v15 = vpop.f32.mrf.mxu0  ;;  %v10759_v37 = vpop.f32.mrf.mxu1  ;;  %5602 = vmatmul.mubr.bf16.gmra.mxu1 %v10343_v57 }
 0x379   : > { %12023 = vst [vmem:[#allocation31_spill] sm:$0xff] %v10755_v10  ;;  %12024 = vst [vmem:[#allocation66_spill] sm:$0xff] %v10757_v15  ;;  %5611 = vmatprep.mubr.bf16.mxu1 %v10386_v13 }
 0x37a   : > { %v4426_v31 = vpop.f32.mrf.mxu0  ;;  %v10765_v62 = vpop.f32.mrf.mxu1 }
 0x37b   : > { %v10769_v29 = vadd.f32 %v4426_v31, %v4234_v1  ;;  %v4246_v31 = vadd.f32 %v10557_v18, %v10430_v49  ;;  %v12033_v18 = vld [vmem:[#allocation23_spill] sm:$0xff] }
 0x37c   : > { %v4428_v14 = vpop.f32.mrf.mxu0  ;;  %v10771_v52 = vpop.f32.mrf.mxu1 }
 0x37d   : > { %12025 = vst [vmem:[#allocation79_spill] sm:$0xff] %v10769_v29  ;;  %v10775_v57 = vadd.f32 %v4428_v14, %v4236_v9 }
 0x37e   : > { %v4430_v10 = vpop.f32.mrf.mxu0  ;;  %v10777_v50 = vpop.f32.mrf.mxu1 }
 0x37f   : > { %12026 = vst [vmem:[#allocation83_spill] sm:$0xff] %v10775_v57  ;;  %v10779_v13 = vadd.f32 %v4430_v10, %v4238_v5  ;;  %v4248_v5 = vadd.f32 %v10566_v43, %v10423_v53 }
 0x380   : > { %v10781_v38 = vpop.f32.mrf.mxu0  ;;  %v10783_v15 = vpop.f32.mrf.mxu1  ;;  %5612 = vmatmul.mubr.bf16.gmra.mxu1 %v10376_v8 }
 0x381   : > { %12027 = vst [vmem:[#allocation69_spill] sm:$0xff] %v10779_v13  ;;  %12028 = vst [vmem:[#allocation68_spill] sm:$0xff] %v10781_v38  ;;  %5621 = vmatprep.mubr.bf16.mxu1 %v10426_v7 }
 0x382   : > { %v4436_v1 = vpop.f32.mrf.mxu0  ;;  %v10789_v60 = vpop.f32.mrf.mxu1 }
 0x383   : > { %v10793_v9 = vadd.f32 %v4436_v1, %v4244_v28  ;;  %v4254_v28 = vadd.f32 %v10578_v48, %v10423_v53 }
 0x384   : > { %v4438_v10 = vpop.f32.mrf.mxu0  ;;  %v10795_v14 = vpop.f32.mrf.mxu1 }
 0x385   : > { %12029 = vst [vmem:[#allocation84_spill] sm:$0xff] %v10793_v9  ;;  %v10799_v8 = vadd.f32 %v4438_v10, %v4246_v31  ;;  %v4256_v31 = vadd.f32 %v10586_v42, %v10430_v49  ;;  %v4264_v42 = vadd.f32 %v10605_v34, %v10423_v53 }
 0x386   : > { %v4440_v13 = vpop.f32.mrf.mxu0  ;;  %v10801_v24 = vpop.f32.mrf.mxu1 }
 0x387   : > { %12030 = vst [vmem:[#allocation88_spill] sm:$0xff] %v10799_v8  ;;  %v10803_v7 = vadd.f32 %v4440_v13, %v4248_v5 }
 0x388   : > { %v10805_v57 = vpop.f32.mrf.mxu0  ;;  %v10807_v38 = vpop.f32.mrf.mxu1  ;;  %5622 = vmatmul.mubr.bf16.gmra.mxu1 %v12033_v18 }
 0x389   : > { %12031 = vst [vmem:[#allocation73_spill] sm:$0xff] %v10803_v7  ;;  %12032 = vst [vmem:[#allocation72_spill] sm:$0xff] %v10805_v57  ;;  %5631 = vmatprep.mubr.bf16.mxu1 %v10471_v44  ;;  %v4258_v7 = vadd.f32 %v10595_v0, %v10423_v53  ;;  %v4266_v0 = vadd.f32 %v10613_v59, %v10430_v49  ;;  %v4274_v59 = vadd.f32 %v10632_v63, %v10423_v53 }
 0x38a   : > { %v4446_v1 = vpop.f32.mrf.mxu0  ;;  %v10813_v43 = vpop.f32.mrf.mxu1 }
 0x38b   : > { %v10817_v10 = vadd.f32 %v4446_v1, %v4254_v28 }
 0x38c   : > { %v4448_v13 = vpop.f32.mrf.mxu0  ;;  %v10819_v5 = vpop.f32.mrf.mxu1 }
 0x38d   : > { %12034 = vst [vmem:[#allocation89_spill] sm:$0xff] %v10817_v10  ;;  %v10823_v18 = vadd.f32 %v4448_v13, %v4256_v31 }
 0x38e   : > { %v4450_v8 = vpop.f32.mrf.mxu0  ;;  %v10825_v48 = vpop.f32.mrf.mxu1 }
 0x38f   : > { %12035 = vst [vmem:[#allocation94_spill] sm:$0xff] %v10823_v18  ;;  %v10827_v44 = vadd.f32 %v4450_v8, %v4258_v7  ;;  %v4268_v7 = vadd.f32 %v10622_v32, %v10423_v53  ;;  %v4276_v32 = vadd.f32 %v10640_v54, %v10430_v49 }
 0x390   : > { %v10829_v57 = vpop.f32.mrf.mxu0  ;;  %v10831_v9 = vpop.f32.mrf.mxu1  ;;  %5632 = vmatmul.mubr.bf16.gmra.mxu1 %v10457_v22 }
 0x391   : > { %12036 = vst [vmem:[#allocation77_spill] sm:$0xff] %v10827_v44  ;;  %12037 = vst [vmem:[#allocation76_spill] sm:$0xff] %v10829_v57 }
 0x392   : > { %v4456_v28 = vpop.f32.mrf.mxu0  ;;  %v10836_v1 = vpop.f32.mrf.mxu1 }
 0x393   : > { %v10840_v31 = vadd.f32 %v4456_v28, %v4264_v42 }
 0x394   : > { %v4458_v13 = vpop.f32.mrf.mxu0  ;;  %v10842_v8 = vpop.f32.mrf.mxu1 }
 0x395   : > { %12038 = vst [vmem:[#allocation95_spill] sm:$0xff] %v10840_v31  ;;  %v10846_v44 = vadd.f32 %v4458_v13, %v4266_v0 }
 0x396   : > { %v4460_v22 = vpop.f32.mrf.mxu0  ;;  %v10848_v18 = vpop.f32.mrf.mxu1 }
 0x397   : > { %12039 = vst [vmem:[#allocation97_spill] sm:$0xff] %v10846_v44  ;;  %v10850_v34 = vadd.f32 %v4460_v22, %v4268_v7  ;;  %v4278_v7 = vadd.f32 %v10649_v56, %v10423_v53  ;;  %v4512_v56 = vadd.f32 %v10667_v23, %v10469_v2 }
 0x398   : > { %v10852_v57 = vpop.f32.mrf.mxu0  ;;  %v10854_v10 = vpop.f32.mrf.mxu1 }
 0x399   : > { %12040 = vst [vmem:[#allocation80_spill] sm:$0xff] %v10850_v34  ;;  %12041 = vst [vmem:[#allocation33_spill] sm:$0xff] %v10852_v57 }
 0x39a   : > { %v4466_v42 = vpop.f32.mrf.mxu0  ;;  %v10858_v28 = vpop.f32.mrf.mxu1 }
 0x39b   : > { %v10862_v0 = vadd.f32 %v4466_v42, %v4274_v59  ;;  %v4510_v42 = vadd.f32 %v10661_v12, %v10459_v21 }
 0x39c   : > { %v4468_v13 = vpop.f32.mrf.mxu0  ;;  %v10864_v44 = vpop.f32.mrf.mxu1 }
 0x39d   : > { %12042 = vst [vmem:[#allocation38_spill] sm:$0xff] %v10862_v0  ;;  %v10868_v22 = vadd.f32 %v4468_v13, %v4276_v32 }
 0x39e   : > { %v4470_v34 = vpop.f32.mrf.mxu0  ;;  %v10870_v57 = vpop.f32.mrf.mxu1 }
 0x39f   : > { %12043 = vst [vmem:[#allocation98_spill] sm:$0xff] %v10868_v22  ;;  %v10872_v63 = vadd.f32 %v4470_v34, %v4278_v7  ;;  %v4514_v34 = vadd.f32 %v10675_v25, %v10480_v16  ;;  %v4520_v16 = vadd.f32 %v10687_v61, %v10502_v47  ;;  %v4526_v47 = vadd.f32 %v10705_v40, %v10525_v36 }
 0x3a0   : > { %v10874_v31 = vpop.f32.mrf.mxu0  ;;  %v10876_v29 = vpop.f32.mrf.mxu1 }
 0x3a1   : > { %12044 = vst [vmem:[#allocation41_spill] sm:$0xff] %v10872_v63  ;;  %12045 = vst [vmem:[#allocation100_spill] sm:$0xff] %v10874_v31  ;;  %v4516_v63 = vadd.f32 %v10681_v6, %v10490_v51  ;;  %v4522_v6 = vadd.f32 %v10693_v55, %v10512_v41 }
 0x3a2   : > { %12046 = vst [vmem:[#allocation99_spill] sm:$0xff] %v10876_v29  ;;  %v10878_v54 = vpop.f32.mrf.mxu1  ;;  %v4702_v59 = vpop.f32.mrf.mxu0 }
 0x3a3   : > { %12047 = vst [vmem:[#allocation43_spill] sm:$0xff] %v10878_v54  ;;  %v4703_v32 = vadd.f32 %v4702_v59, %v4510_v42 }
 0x3a4   : > { %v10882_v0 = vpop.f32.mrf.mxu1  ;;  %v4704_v53 = vpop.f32.mrf.mxu0 }
 0x3a5   : > { %12048 = vst [vmem:[#allocation45_spill] sm:$0xff] %v10882_v0  ;;  %v4705_v22 = vadd.f32 %v4704_v53, %v4512_v56  ;;  %v4863_v12 = vmax.f32 %v4703_v32, 0.0  ;;  %v4524_v53 = vadd.f32 %v10699_v26, %v10518_v33  ;;  %v4530_v26 = vadd.f32 %v10711_v45, %v10534_v17 }
 0x3a6   : > { %v10888_v13 = vpop.f32.mrf.mxu1  ;;  %v4706_v7 = vpop.f32.mrf.mxu0 }
 0x3a7   : > { %v4707_v31 = vadd.f32 %v4706_v7, %v4514_v34  ;;  %v4864_v25 = vmax.f32 %v4705_v22, 0.0 }
 0x3a8   : > { %v10892_v58 = vpop.f32.mrf.mxu1  ;;  %v4708_v21 = vpop.f32.mrf.mxu0 }
 0x3a9   : > { %v4867_v0 = vmax.f32 %v4707_v31, 0.0  ;;  %v4709_v54 = vadd.f32 %v4708_v21, %v4516_v63 }
 0x3aa   : > { %v10894_v29 = vpop.f32.mrf.mxu1  ;;  %v4712_v2 = vpop.f32.mrf.mxu0 }
 0x3ab   : > { %v4991_v23 = vpack.c.bf16 %v4867_v0, %v4863_v12  ;;  %v4868_v59 = vmax.f32 %v4709_v54, 0.0  ;;  %v4713_v31 = vadd.f32 %v4712_v2, %v4520_v16  ;;  %v4532_v16 = vadd.f32 %v10717_v19, %v10541_v35 }
 0x3ac   : > { %v10898_v42 = vpop.f32.mrf.mxu1  ;;  %v4714_v51 = vpop.f32.mrf.mxu0 }
 0x3ad   : > { %v4992_v63 = vpack.c.bf16 %v4868_v59, %v4864_v25  ;;  %v4715_v61 = vadd.f32 %v4714_v51, %v4522_v6  ;;  %v4871_v32 = vmax.f32 %v4713_v31, 0.0  ;;  %v12049_v25 = vld [vmem:[#allocation26_spill] sm:$0xff]  ;;  %v12050_v31 = vld [vmem:[#allocation12_spill] sm:$0xff] }
 0x3ae   : > { %v10904_v56 = vpop.f32.mrf.mxu1  ;;  %v4716_v34 = vpop.f32.mrf.mxu0  ;;  %v4536_v17 = vadd.f32 %v10729_v11, %v12050_v31  ;;  %v7701_v31 = vld [vmem:[%s11506_s7 + $0x78] sm:$0xff]  }
 0x3af   : > { %v4717_v0 = vadd.f32 %v4716_v34, %v4524_v53  ;;  %5674 = vmatprep.mubr.bf16.mxu0 %v4992_v63  ;;  %v4872_v21 = vmax.f32 %v4715_v61, 0.0  ;;  %6924 = vmatprep.subr.bf16.mxu1 %v7701_v31 }
 0x3b0   : > { %v10908_v22 = vpop.f32.mrf.mxu1  ;;  %v4718_v54 = vpop.f32.mrf.mxu0  ;;  %5675 = vmatmul.mubr.bf16.vlgmr.msra.gmra.mxu0 %v4991_v23  ;;  %v4534_v23 = vadd.f32 %v10723_v27, %v12049_v25 }
 0x3b1   : > { %v4875_v41 = vmax.f32 %v4717_v0, 0.0  ;;  %v4719_v55 = vadd.f32 %v4718_v54, %v4526_v47  ;;  %v12051_v54 = vld [vmem:[#allocation55_spill] sm:$0xff] }
 0x3b2   : > { %v10910_v7 = vpop.f32.mrf.mxu1  ;;  %v4722_v33 = vpop.f32.mrf.mxu0 }
 0x3b3   : > { %v4995_v12 = vpack.c.bf16 %v4875_v41, %v4871_v32  ;;  %v4876_v2 = vmax.f32 %v4719_v55, 0.0  ;;  %v4723_v59 = vadd.f32 %v4722_v33, %v4530_v26  ;;  %v4540_v32 = vadd.f32 %v10735_v4, %v12051_v54 }
 0x3b4   : > { %v10914_v36 = vpop.f32.mrf.mxu1  ;;  %v4724_v40 = vpop.f32.mrf.mxu0 }
 0x3b5   : > { %v4996_v51 = vpack.c.bf16 %v4876_v2, %v4872_v21  ;;  %v4725_v45 = vadd.f32 %v4724_v40, %v4532_v16  ;;  %v4879_v61 = vmax.f32 %v4723_v59, 0.0  ;;  %v4542_v21 = vadd.f32 %v10741_v39, %v10570_v46  ;;  %v12052_v2 = vld [vmem:[#allocation120_spill] sm:$0xff]  ;;  %v12053_v59 = vld [vmem:[#allocation85_spill] sm:$0xff] }
 0x3b6   : > { %v10920_v6 = vpop.f32.mrf.mxu1  ;;  %v4726_v53 = vpop.f32.mrf.mxu0  ;;  %v4546_v4 = vadd.f32 %v10753_v30, %v12053_v59  ;;  %v7702_v46 = vld [vmem:[%s11506_s7 + $0x38] sm:$0xff]  }
 0x3b7   : > { %v4727_v63 = vadd.f32 %v4726_v53, %v4534_v23  ;;  %5684 = vmatprep.mubr.bf16.mxu0 %v4996_v51  ;;  %v4880_v41 = vmax.f32 %v4725_v45, 0.0  ;;  %v12054_v30 = vld [vmem:[#allocation56_spill] sm:$0xff]  ;;  %6925 = vmatpush3.bf16.msra.mxu1 %v7702_v46 }
 0x3b8   : > { %v10924_v34 = vpop.f32.mrf.mxu1  ;;  %v4728_v47 = vpop.f32.mrf.mxu0  ;;  %5685 = vmatmul.mubr.bf16.gmra.mxu0 %v4995_v12  ;;  %v4544_v12 = vadd.f32 %v10747_v3, %v12052_v2 }
 0x3b9   : > { %v4883_v35 = vmax.f32 %v4727_v63, 0.0  ;;  %v4729_v19 = vadd.f32 %v4728_v47, %v4536_v17  ;;  %v4170_v47 = vadd.f32 %v12054_v30, %v10430_v49  ;;  %v12060_v30 = vld [vmem:[#allocation122_spill] sm:$0xff] }
 0x3ba   : > { %v10926_v0 = vpop.f32.mrf.mxu1  ;;  %v4732_v27 = vpop.f32.mrf.mxu0 }
 0x3bb   : > { %v4999_v55 = vpack.c.bf16 %v4883_v35, %v4879_v61  ;;  %v4884_v33 = vmax.f32 %v4729_v19, 0.0  ;;  %v4733_v40 = vadd.f32 %v4732_v27, %v4540_v32  ;;  %v12055_v19 = vld [vmem:[#allocation13_spill] sm:$0xff] }
 0x3bc   : > { %v10930_v11 = vpop.f32.mrf.mxu1  ;;  %v4734_v26 = vpop.f32.mrf.mxu0  ;;  %v4550_v27 = vadd.f32 %v10759_v37, %v12055_v19 }
 0x3bd   : > { %v5000_v16 = vpack.c.bf16 %v4884_v33, %v4880_v41  ;;  %v4735_v51 = vadd.f32 %v4734_v26, %v4542_v21  ;;  %v4887_v17 = vmax.f32 %v4733_v40, 0.0  ;;  %v12056_v33 = vld [vmem:[#allocation32_spill] sm:$0xff]  ;;  %v12057_v21 = vld [vmem:[#allocation86_spill] sm:$0xff] }
 0x3be   : > { %v10936_v25 = vpop.f32.mrf.mxu1  ;;  %v4736_v23 = vpop.f32.mrf.mxu0  ;;  %v4363_v26 = vadd.f32 %v12056_v33, %v4170_v47  ;;  %v4552_v2 = vadd.f32 %v10765_v62, %v12057_v21  ;;  %v12059_v62 = vld [vmem:[#allocation52_spill] sm:$0xff]  ;;  %v4560_v47 = vadd.f32 %v10783_v15, %v12060_v30  ;;  %v12062_v33 = vld [vmem:[#allocation15_spill] sm:$0xff] }
 0x3bf   : > { %v4737_v53 = vadd.f32 %v4736_v23, %v4544_v12  ;;  %5694 = vmatprep.mubr.bf16.mxu0 %v5000_v16  ;;  %v4888_v54 = vmax.f32 %v4735_v51, 0.0  ;;  %v12058_v12 = vld [vmem:[#allocation14_spill] sm:$0xff] }
 0x3c0   : > { %v10946_v39 = vpop.f32.mrf.mxu1  ;;  %v4738_v3 = vpop.f32.mrf.mxu0  ;;  %5695 = vmatmul.mubr.bf16.gmra.mxu0 %v4999_v55  ;;  %v4554_v40 = vadd.f32 %v10771_v52, %v12058_v12 }
 0x3c1   : > { %v4891_v45 = vmax.f32 %v4737_v53, 0.0  ;;  %v4739_v63 = vadd.f32 %v4738_v3, %v4546_v4  ;;  %v4556_v53 = vadd.f32 %v10777_v50, %v4363_v26  ;;  %v4564_v26 = vadd.f32 %v10795_v14, %v12062_v33 }
 0x3c2   : > { %v10950_v61 = vpop.f32.mrf.mxu1  ;;  %v4742_v35 = vpop.f32.mrf.mxu0 }
 0x3c3   : > { %v5003_v32 = vpack.c.bf16 %v4891_v45, %v4887_v17  ;;  %v4892_v41 = vmax.f32 %v4739_v63, 0.0  ;;  %v4743_v16 = vadd.f32 %v4742_v35, %v4550_v27  ;;  %v4180_v45 = vadd.f32 %v12059_v62, %v10430_v49 }
 0x3c4   : > { %v4744_v55 = vpop.f32.mrf.mxu0  ;;  %v10959_v59 = vpop.f32.mrf.mxu1 }
 0x3c5   : > { %v5004_v23 = vpack.c.bf16 %v4892_v41, %v4888_v54  ;;  %v4745_v37 = vadd.f32 %v4744_v55, %v4552_v2  ;;  %v4895_v46 = vmax.f32 %v4743_v16, 0.0  ;;  %v4373_v27 = vadd.f32 %v10634_v20, %v4180_v45  ;;  %v12061_v41 = vld [vmem:[#allocation123_spill] sm:$0xff] }
 0x3c6   : > { %v4746_v4 = vpop.f32.mrf.mxu0  ;;  %v10964_v63 = vpop.f32.mrf.mxu1  ;;  %v7703_v20 = vld [vmem:[%s11506_s7 + $0x70] sm:$0xff]  }
 0x3c7   : > { %v4747_v51 = vadd.f32 %v4746_v4, %v4554_v40  ;;  %5704 = vmatprep.mubr.bf16.mxu0 %v5004_v23  ;;  %v4896_v35 = vmax.f32 %v4745_v37, 0.0  ;;  %v4566_v40 = vadd.f32 %v10801_v24, %v4373_v27  ;;  %6926 = vmatprep.subr.bf16.mxu1 %v7703_v20  ;;  %v12063_v37 = vld [vmem:[#allocation58_spill] sm:$0xff] }
 0x3c8   : > { %v4748_v31 = vpop.f32.mrf.mxu0  ;;  %5705 = vmatmul.mubr.bf16.gmra.mxu0 %v5003_v32  ;;  %v4562_v32 = vadd.f32 %v10789_v60, %v12061_v41  ;;  %v10973_v2 = vpop.f32.mrf.mxu1  ;;  %v7704_v60 = vld [vmem:[%s11506_s7 + $0x30] sm:$0xff]   ;;  %v4190_v24 = vadd.f32 %v12063_v37, %v10430_v49 }
 0x3c9   : > { %v4899_v3 = vmax.f32 %v4747_v51, 0.0  ;;  %v4749_v17 = vadd.f32 %v4748_v31, %v4556_v53  ;;  %6927 = vmatpush3.bf16.msra.mxu1 %v7704_v60 }
 0x3ca   : > { %v4752_v52 = vpop.f32.mrf.mxu0  ;;  %v10984_v51 = vpop.f32.mrf.mxu1 }
 0x3cb   : > { %v5007_v19 = vpack.c.bf16 %v4899_v3, %v4895_v46  ;;  %v4900_v50 = vmax.f32 %v4749_v17, 0.0  ;;  %v4753_v55 = vadd.f32 %v4752_v52, %v4560_v47  ;;  %v12064_v46 = vld [vmem:[#allocation91_spill] sm:$0xff] }
 0x3cc   : > { %v4754_v54 = vpop.f32.mrf.mxu0  ;;  %v4570_v3 = vadd.f32 %v10807_v38, %v12064_v46  ;;  %v12065_v52 = vld [vmem:[#allocation19_spill] sm:$0xff] }
 0x3cd   : > { %v5008_v21 = vpack.c.bf16 %v4900_v50, %v4896_v35  ;;  %v4755_v15 = vadd.f32 %v4754_v54, %v4562_v32  ;;  %v4903_v14 = vmax.f32 %v4753_v55, 0.0  ;;  %v4383_v30 = vadd.f32 %v12065_v52, %v4190_v24  ;;  %v12066_v35 = vld [vmem:[#allocation57_spill] sm:$0xff]  ;;  %v12067_v50 = vld [vmem:[#allocation96_spill] sm:$0xff]  ;;  %v10993_v32 = vpop.f32.mrf.mxu1 }
 0x3ce   : > { %v4756_v12 = vpop.f32.mrf.mxu0  ;;  %v4574_v27 = vadd.f32 %v10819_v5, %v12067_v50  ;;  %v7707_v5 = vld [vmem:[%s11506_s7 + $0x60] sm:$0xff]   ;;  %v7709_v46 = vld [vmem:[%s11506_s7 + $0x58] sm:$0xff]  }
 0x3cf   : > { %v4757_v16 = vadd.f32 %v4756_v12, %v4564_v26  ;;  %5714 = vmatprep.mubr.bf16.mxu0 %v5008_v21  ;;  %v4904_v17 = vmax.f32 %v4755_v15, 0.0  ;;  %v4576_v26 = vadd.f32 %v10825_v48, %v4383_v30  ;;  %v7705_v21 = vld [vmem:[%s11506_s7 + $0x68] sm:$0xff]   ;;  %v11007_v60 = vpop.f32.mrf.mxu1  ;;  %v12072_v30 = vld [vmem:[#allocation20_spill] sm:$0xff] }
 0x3d0   : > { %v4758_v23 = vpop.f32.mrf.mxu0  ;;  %5715 = vmatmul.mubr.bf16.gmra.mxu0 %v5007_v19  ;;  %v4572_v19 = vadd.f32 %v10813_v43, %v12066_v35  ;;  %v7706_v43 = vld [vmem:[%s11506_s7 + $0x28] sm:$0xff]   ;;  %6928 = vmatprep.subr.bf16.mxu1 %v7705_v21 }
 0x3d1   : > { %v4907_v4 = vmax.f32 %v4757_v16, 0.0  ;;  %v4759_v53 = vadd.f32 %v4758_v23, %v4566_v40  ;;  %v12068_v16 = vld [vmem:[#allocation60_spill] sm:$0xff]  ;;  %6929 = vmatpush3.bf16.msra.mxu1 %v7706_v43 }
 0x3d2   : > { %v4762_v31 = vpop.f32.mrf.mxu0  ;;  %v4200_v20 = vadd.f32 %v12068_v16, %v10430_v49  ;;  %6930 = vmatprep.subr.bf16.mxu1 %v7707_v5  ;;  %v12075_v16 = vld [vmem:[#allocation74_spill] sm:$0xff] }
 0x3d3   : > { %v5011_v62 = vpack.c.bf16 %v4907_v4, %v4903_v14  ;;  %v4908_v45 = vmax.f32 %v4759_v53, 0.0  ;;  %v4763_v41 = vadd.f32 %v4762_v31, %v4570_v3  ;;  %v7708_v14 = vld [vmem:[%s11506_s7 + $0x20] sm:$0xff]   ;;  %v12069_v4 = vld [vmem:[#allocation70_spill] sm:$0xff] }
 0x3d4   : > { %v4764_v47 = vpop.f32.mrf.mxu0  ;;  %v4580_v53 = vadd.f32 %v10831_v9, %v12069_v4  ;;  %v12070_v3 = vld [vmem:[#allocation62_spill] sm:$0xff]  ;;  %v11022_v9 = vpop.f32.mrf.mxu1 }
 0x3d5   : > { %v5012_v54 = vpack.c.bf16 %v4908_v45, %v4904_v17  ;;  %v4765_v38 = vadd.f32 %v4764_v47, %v4572_v19  ;;  %v4911_v40 = vmax.f32 %v4763_v41, 0.0  ;;  %v4393_v17 = vadd.f32 %v12070_v3, %v4200_v20  ;;  %v12071_v45 = vld [vmem:[#allocation63_spill] sm:$0xff]  ;;  %6931 = vmatpush3.bf16.msra.mxu1 %v7708_v14 }
 0x3d6   : > { %v4766_v33 = vpop.f32.mrf.mxu0  ;;  %v4582_v52 = vadd.f32 %v10836_v1, %v12071_v45  ;;  %v4584_v47 = vadd.f32 %v10842_v8, %v12072_v30  ;;  %6932 = vmatprep.subr.bf16.mxu1 %v7709_v46  ;;  %v11030_v43 = vpop.f32.mrf.mxu1  ;;  %v12076_v14 = vld [vmem:[#allocation71_spill] sm:$0xff] }
 0x3d7   : > { %v4767_v55 = vadd.f32 %v4766_v33, %v4574_v27  ;;  %5724 = vmatprep.mubr.bf16.mxu0 %v5012_v54  ;;  %v4912_v37 = vmax.f32 %v4765_v38, 0.0  ;;  %v7710_v27 = vld [vmem:[%s11506_s7 + $0x18] sm:$0xff]   ;;  %v4586_v54 = vadd.f32 %v10848_v18, %v4393_v17  ;;  %v4592_v4 = vadd.f32 %v10858_v28, %v12076_v14  ;;  %v12078_v28 = vld [vmem:[#allocation61_spill] sm:$0xff] }
 0x3d8   : > { %v4768_v12 = vpop.f32.mrf.mxu0  ;;  %5725 = vmatmul.mubr.bf16.gmra.mxu0 %v5011_v62  ;;  %v11039_v46 = vpop.f32.mrf.mxu1 }
 0x3d9   : > { %v4915_v15 = vmax.f32 %v4767_v55, 0.0  ;;  %v4769_v48 = vadd.f32 %v4768_v12, %v4576_v26  ;;  %v12073_v55 = vld [vmem:[#allocation53_spill] sm:$0xff]  ;;  %6933 = vmatpush3.bf16.msra.mxu1 %v7710_v27  ;;  %v12080_v27 = vld [vmem:[#allocation99_spill] sm:$0xff] }
 0x3da   : > { %v4772_v23 = vpop.f32.mrf.mxu0  ;;  %v4210_v21 = vadd.f32 %v12073_v55, %v10430_v49  ;;  %v12074_v12 = vld [vmem:[#allocation21_spill] sm:$0xff]  ;;  %v12083_v55 = vld [vmem:[#allocation43_spill] sm:$0xff] }
 0x3db   : > { %v5015_v24 = vpack.c.bf16 %v4915_v15, %v4911_v40  ;;  %v4916_v31 = vmax.f32 %v4769_v48, 0.0  ;;  %v4773_v19 = vadd.f32 %v4772_v23, %v4580_v53  ;;  %v4590_v40 = vadd.f32 %v10854_v10, %v12074_v12  ;;  %v12077_v53 = vld [vmem:[#allocation25_spill] sm:$0xff] }
 0x3dc   : > { %v4774_v62 = vpop.f32.mrf.mxu0  ;;  %v4403_v20 = vadd.f32 %v12075_v16, %v4210_v21  ;;  %v12085_v12 = vld [vmem:[#allocation45_spill] sm:$0xff] }
 0x3dd   : > { %v5016_v35 = vpack.c.bf16 %v4916_v31, %v4912_v37  ;;  %v4775_v41 = vadd.f32 %v4774_v62, %v4582_v52  ;;  %v4919_v26 = vmax.f32 %v4773_v19, 0.0  ;;  %v4594_v37 = vadd.f32 %v10864_v44, %v12077_v53  ;;  %v11044_v19 = vpop.f32.mrf.mxu1  ;;  %v7711_v53 = vld [vmem:[%s11506_s7 + $0x50] sm:$0xff]  }
 0x3de   : > { %v4776_v50 = vpop.f32.mrf.mxu0  ;;  %v4596_v17 = vadd.f32 %v10870_v57, %v4403_v20  ;;  %6934 = vmatprep.subr.bf16.mxu1 %v7711_v53 }
 0x3df   : > { %v4777_v33 = vadd.f32 %v4776_v50, %v4584_v47  ;;  %5734 = vmatprep.mubr.bf16.mxu0 %v5016_v35  ;;  %v4920_v18 = vmax.f32 %v4775_v41, 0.0  ;;  %v4220_v35 = vadd.f32 %v12078_v28, %v10430_v49  ;;  %v12079_v50 = vld [vmem:[#allocation65_spill] sm:$0xff] }
 0x3e0   : > { %v4778_v1 = vpop.f32.mrf.mxu0  ;;  %5735 = vmatmul.mubr.bf16.gmra.mxu0 %v5015_v24 }
 0x3e1   : > { %v4923_v8 = vmax.f32 %v4777_v33, 0.0  ;;  %v4779_v38 = vadd.f32 %v4778_v1, %v4586_v54  ;;  %v4600_v54 = vadd.f32 %v12080_v27, %v12079_v50  ;;  %v12081_v1 = vld [vmem:[#allocation75_spill] sm:$0xff]  ;;  %v7713_v27 = vld [vmem:[%s11506_s7 + $0x48] sm:$0xff]  }
 0x3e2   : > { %v4782_v5 = vpop.f32.mrf.mxu0 }
 0x3e3   : > { %v5019_v15 = vpack.c.bf16 %v4923_v8, %v4919_v26  ;;  %v4924_v48 = vmax.f32 %v4779_v38, 0.0  ;;  %v4783_v31 = vadd.f32 %v4782_v5, %v4590_v40  ;;  %v4413_v26 = vadd.f32 %v12081_v1, %v4220_v35  ;;  %v12082_v38 = vld [vmem:[#allocation27_spill] sm:$0xff]  ;;  %v12084_v5 = vld [vmem:[#allocation64_spill] sm:$0xff]  ;;  %v12088_v35 = vld [vmem:[#allocation66_spill] sm:$0xff] }
 0x3e4   : > { %v4784_v23 = vpop.f32.mrf.mxu0  ;;  %v4602_v21 = vadd.f32 %v12083_v55, %v12082_v38  ;;  %v4604_v40 = vadd.f32 %v12085_v12, %v12084_v5 }
 0x3e5   : > { %v5020_v24 = vpack.c.bf16 %v4924_v48, %v4920_v18  ;;  %v4785_v10 = vadd.f32 %v4784_v23, %v4592_v4  ;;  %v4927_v52 = vmax.f32 %v4783_v31, 0.0  ;;  %v11053_v48 = vpop.f32.mrf.mxu1  ;;  %v4606_v20 = vadd.f32 %v10888_v13, %v4413_v26 }
 0x3e6   : > { %v4786_v3 = vpop.f32.mrf.mxu0 }
 0x3e7   : > { %v4787_v62 = vadd.f32 %v4786_v3, %v4594_v37  ;;  %5744 = vmatprep.mubr.bf16.mxu0 %v5020_v24  ;;  %v4928_v41 = vmax.f32 %v4785_v10, 0.0  ;;  %v7712_v3 = vld [vmem:[%s11506_s7 + $0x10] sm:$0xff]   ;;  %v11064_v13 = vpop.f32.mrf.mxu1 }
 0x3e8   : > { %v4788_v45 = vpop.f32.mrf.mxu0  ;;  %5745 = vmatmul.mubr.bf16.gmra.mxu0 %v5019_v15  ;;  %6935 = vmatpush3.bf16.msra.mxu1 %v7712_v3 }
 0x3e9   : > { %v4931_v30 = vmax.f32 %v4787_v62, 0.0  ;;  %v4789_v47 = vadd.f32 %v4788_v45, %v4596_v17  ;;  %v12086_v17 = vld [vmem:[#allocation118_spill] sm:$0xff]  ;;  %6936 = vmatprep.subr.bf16.mxu1 %v7713_v27 }
 0x3ea   : > { %v4792_v44 = vpop.f32.mrf.mxu0  ;;  %v4230_v10 = vadd.f32 %v12086_v17, %v10430_v49  ;;  %v12087_v45 = vld [vmem:[#allocation78_spill] sm:$0xff] }
 0x3eb   : > { %v5023_v33 = vpack.c.bf16 %v4931_v30, %v4927_v52  ;;  %v4932_v57 = vmax.f32 %v4789_v47, 0.0  ;;  %v4793_v15 = vadd.f32 %v4792_v44, %v4600_v54  ;;  %v4610_v52 = vadd.f32 %v10892_v58, %v12087_v45  ;;  %v12089_v54 = vld [vmem:[#allocation67_spill] sm:$0xff]  ;;  %v7714_v58 = vld [vmem:[%s11506_s7 + $0x8] sm:$0xff]  }
 0x3ec   : > { %v4794_v8 = vpop.f32.mrf.mxu0  ;;  %v4423_v44 = vadd.f32 %v12088_v35, %v4230_v10  ;;  %6937 = vmatpush3.bf16.msra.mxu1 %v7714_v58  ;;  %v12094_v10 = vld [vmem:[#allocation83_spill] sm:$0xff]  ;;  %v12095_v45 = vld [vmem:[#allocation69_spill] sm:$0xff] }
 0x3ed   : > { %v5024_v18 = vpack.c.bf16 %v4932_v57, %v4928_v41  ;;  %v4795_v23 = vadd.f32 %v4794_v8, %v4602_v21  ;;  %v4935_v37 = vmax.f32 %v4793_v15, 0.0  ;;  %v4612_v41 = vadd.f32 %v10894_v29, %v12089_v54  ;;  %v11079_v8 = vpop.f32.mrf.mxu1  ;;  %v7716_v15 = vld [vmem:[%s11506_s7] sm:$0xff]  }
 0x3ee   : > { %v4796_v16 = vpop.f32.mrf.mxu0  ;;  %v4616_v55 = vadd.f32 %v10904_v56, %v4423_v44 }
 0x3ef   : > { %v4797_v14 = vadd.f32 %v4796_v16, %v4604_v40  ;;  %5754 = vmatprep.mubr.bf16.mxu0 %v5024_v18  ;;  %v4936_v30 = vmax.f32 %v4795_v23, 0.0  ;;  %v12091_v16 = vld [vmem:[#allocation81_spill] sm:$0xff] }
 0x3f0   : > { %v4798_v4 = vpop.f32.mrf.mxu0  ;;  %5755 = vmatmul.mubr.bf16.gmra.mxu0 %v5023_v33  ;;  %v12090_v33 = vld [vmem:[#allocation31_spill] sm:$0xff]  ;;  %v4240_v56 = vadd.f32 %v12091_v16, %v10430_v49 }
 0x3f1   : > { %v4939_v24 = vmax.f32 %v4797_v14, 0.0  ;;  %v4799_v31 = vadd.f32 %v4798_v4, %v4606_v20  ;;  %v4614_v57 = vadd.f32 %v10898_v42, %v12090_v33  ;;  %v7715_v42 = vld [vmem:[%s11506_s7 + $0x40] sm:$0xff]   ;;  %v11090_v20 = vpop.f32.mrf.mxu1  ;;  %v12092_v14 = vld [vmem:[#allocation79_spill] sm:$0xff] }
 0x3f2   : > { %v4802_v62 = vpop.f32.mrf.mxu0  ;;  %6938 = vmatprep.subr.bf16.mxu1 %v7715_v42  ;;  %v4620_v4 = vadd.f32 %v10908_v22, %v12092_v14  ;;  %v12099_v42 = vld [vmem:[#allocation88_spill] sm:$0xff] }
 0x3f3   : > { %v5027_v47 = vpack.c.bf16 %v4939_v24, %v4935_v37  ;;  %v4940_v28 = vmax.f32 %v4799_v31, 0.0  ;;  %v4803_v26 = vadd.f32 %v4802_v62, %v4610_v52  ;;  %6939 = vmatpush3.bf16.msra.mxu1 %v7716_v15  ;;  %v12093_v31 = vld [vmem:[#allocation68_spill] sm:$0xff]  ;;  %v4622_v62 = vadd.f32 %v10910_v7, %v12094_v10  ;;  %v12096_v7 = vld [vmem:[#allocation119_spill] sm:$0xff]  ;;  %v12102_v10 = vld [vmem:[#allocation89_spill] sm:$0xff] }
 0x3f4   : > { %v4804_v50 = vpop.f32.mrf.mxu0  ;;  %v4433_v3 = vadd.f32 %v12093_v31, %v4240_v56  ;;  %v4624_v52 = vadd.f32 %v10914_v36, %v12095_v45 }
 0x3f5   : > { %v5028_v1 = vpack.c.bf16 %v4940_v28, %v4936_v30  ;;  %v4805_v21 = vadd.f32 %v4804_v50, %v4612_v41  ;;  %v4943_v12 = vmax.f32 %v4803_v26, 0.0  ;;  %v11099_v28 = vpop.f32.mrf.mxu1  ;;  %v12097_v26 = vld [vmem:[#allocation84_spill] sm:$0xff] }
 0x3f6   : > { %v4806_v38 = vpop.f32.mrf.mxu0  ;;  %v4626_v22 = vadd.f32 %v10920_v6, %v4433_v3  ;;  %v4630_v58 = vadd.f32 %v10924_v34, %v12097_v26 }
 0x3f7   : > { %v4807_v5 = vadd.f32 %v4806_v38, %v4614_v57  ;;  %5764 = vmatprep.mubr.bf16.mxu0 %v5028_v1  ;;  %v4944_v53 = vmax.f32 %v4805_v21, 0.0  ;;  %v4250_v57 = vadd.f32 %v12096_v7, %v10430_v49  ;;  %v11104_v1 = vpop.f32.mrf.mxu1  ;;  %v12098_v21 = vld [vmem:[#allocation72_spill] sm:$0xff] }
 0x3f8   : > { %v4808_v29 = vpop.f32.mrf.mxu0  ;;  %5765 = vmatmul.mubr.bf16.gmra.mxu0 %v5027_v47 }
 0x3f9   : > { %v4947_v40 = vmax.f32 %v4807_v5, 0.0  ;;  %v4809_v18 = vadd.f32 %v4808_v29, %v4616_v55  ;;  %v4443_v5 = vadd.f32 %v12098_v21, %v4250_v57  ;;  %v11113_v56 = vpop.f32.mrf.mxu1 }
 0x3fa   : > { %v4812_v23 = vpop.f32.mrf.mxu0 }
 0x3fb   : > { %v5031_v37 = vpack.c.bf16 %v4947_v40, %v4943_v12  ;;  %v4948_v24 = vmax.f32 %v4809_v18, 0.0  ;;  %v4813_v47 = vadd.f32 %v4812_v23, %v4620_v4  ;;  %v4632_v12 = vadd.f32 %v10926_v0, %v12099_v42  ;;  %v12100_v40 = vld [vmem:[#allocation73_spill] sm:$0xff]  ;;  %v12101_v0 = vld [vmem:[#allocation34_spill] sm:$0xff] }
 0x3fc   : > { %v4814_v17 = vpop.f32.mrf.mxu0  ;;  %v4634_v18 = vadd.f32 %v10930_v11, %v12100_v40  ;;  %v4636_v14 = vadd.f32 %v10936_v25, %v4443_v5  ;;  %v4260_v3 = vadd.f32 %v12101_v0, %v10430_v49  ;;  %v12107_v5 = vld [vmem:[#allocation95_spill] sm:$0xff]  ;;  %v12108_v40 = vld [vmem:[#allocation33_spill] sm:$0xff] }
 0x3fd   : > { %v5032_v30 = vpack.c.bf16 %v4948_v24, %v4944_v53  ;;  %v4815_v44 = vadd.f32 %v4814_v17, %v4622_v62  ;;  %v4951_v54 = vmax.f32 %v4813_v47, 0.0  ;;  %v11118_v17 = vpop.f32.mrf.mxu1  ;;  %v4640_v62 = vadd.f32 %v10946_v39, %v12102_v10 }
 0x3fe   : > { %v4816_v35 = vpop.f32.mrf.mxu0 }
 0x3ff   : > { %v4817_v50 = vadd.f32 %v4816_v35, %v4624_v52  ;;  %5774 = vmatprep.mubr.bf16.mxu0 %v5032_v30  ;;  %v4952_v38 = vmax.f32 %v4815_v44, 0.0  ;;  %v12103_v30 = vld [vmem:[#allocation76_spill] sm:$0xff] }
 0x400   : > { %v4818_v27 = vpop.f32.mrf.mxu0  ;;  %5775 = vmatmul.mubr.bf16.gmra.mxu0 %v5031_v37  ;;  %v4453_v47 = vadd.f32 %v12103_v30, %v4260_v3 }
 0x401   : > { %v4955_v41 = vmax.f32 %v4817_v50, 0.0  ;;  %v4819_v33 = vadd.f32 %v4818_v27, %v4626_v22  ;;  %v12104_v22 = vld [vmem:[#allocation94_spill] sm:$0xff]  ;;  %v12105_v50 = vld [vmem:[#allocation77_spill] sm:$0xff] }
 0x402   : > { %v4822_v36 = vpop.f32.mrf.mxu0  ;;  %v4642_v44 = vadd.f32 %v10950_v61, %v12104_v22  ;;  %v4644_v27 = vadd.f32 %v10959_v59, %v12105_v50  ;;  %v4646_v57 = vadd.f32 %v10964_v63, %v4453_v47  ;;  %v12106_v61 = vld [vmem:[#allocation90_spill] sm:$0xff]  ;;  %v12113_v22 = vld [vmem:[#allocation100_spill] sm:$0xff] }
 0x403   : > { %v5035_v55 = vpack.c.bf16 %v4955_v41, %v4951_v54  ;;  %v4956_v6 = vmax.f32 %v4819_v33, 0.0  ;;  %v4823_v16 = vadd.f32 %v4822_v36, %v4630_v58  ;;  %v11127_v33 = vpop.f32.mrf.mxu1 }
 0x404   : > { %v4824_v29 = vpop.f32.mrf.mxu0 }
 0x405   : > { %v5036_v15 = vpack.c.bf16 %v4956_v6, %v4952_v38  ;;  %v4825_v34 = vadd.f32 %v4824_v29, %v4632_v12  ;;  %v4959_v37 = vmax.f32 %v4823_v16, 0.0  ;;  %v4270_v6 = vadd.f32 %v12106_v61, %v10430_v49  ;;  %v11132_v21 = vpop.f32.mrf.mxu1  ;;  %v12109_v16 = vld [vmem:[#allocation97_spill] sm:$0xff] }
 0x406   : > { %v4826_v23 = vpop.f32.mrf.mxu0  ;;  %v4650_v29 = vadd.f32 %v10973_v2, %v12107_v5 }
 0x407   : > { %v4827_v4 = vadd.f32 %v4826_v23, %v4634_v18  ;;  %5784 = vmatprep.mubr.bf16.mxu0 %v5036_v15  ;;  %v4960_v45 = vmax.f32 %v4825_v34, 0.0  ;;  %v4463_v18 = vadd.f32 %v12108_v40, %v4270_v6  ;;  %v4652_v23 = vadd.f32 %v10984_v51, %v12109_v16  ;;  %v12111_v51 = vld [vmem:[#allocation59_spill] sm:$0xff] }
 0x408   : > { %v4828_v53 = vpop.f32.mrf.mxu0  ;;  %5785 = vmatmul.mubr.bf16.gmra.mxu0 %v5035_v55 }
 0x409   : > { %v4963_v24 = vmax.f32 %v4827_v4, 0.0  ;;  %v4829_v31 = vadd.f32 %v4828_v53, %v4636_v14  ;;  %v12110_v14 = vld [vmem:[#allocation80_spill] sm:$0xff] }
 0x40a   : > { %v4832_v11 = vpop.f32.mrf.mxu0  ;;  %v4654_v34 = vadd.f32 %v10993_v32, %v12110_v14 }
 0x40b   : > { %v5039_v52 = vpack.c.bf16 %v4963_v24, %v4959_v37  ;;  %v4964_v25 = vmax.f32 %v4829_v31, 0.0  ;;  %v4833_v41 = vadd.f32 %v4832_v11, %v4640_v62  ;;  %v11141_v37 = vpop.f32.mrf.mxu1  ;;  %v4656_v31 = vadd.f32 %v11007_v60, %v4463_v18 }
 0x40c   : > { %v4834_v35 = vpop.f32.mrf.mxu0 }
 0x40d   : > { %v5040_v54 = vpack.c.bf16 %v4964_v25, %v4960_v45  ;;  %v4835_v39 = vadd.f32 %v4834_v35, %v4642_v44  ;;  %v4967_v58 = vmax.f32 %v4833_v41, 0.0  ;;  %v4280_v45 = vadd.f32 %v12111_v51, %v10430_v49  ;;  %v12112_v25 = vld [vmem:[#allocation38_spill] sm:$0xff]  ;;  %v12115_v41 = vld [vmem:[#allocation41_spill] sm:$0xff] }
 0x40e   : > { %v4836_v7 = vpop.f32.mrf.mxu0  ;;  %v4660_v30 = vadd.f32 %v11022_v9, %v12112_v25 }
 0x40f   : > { %v4837_v36 = vadd.f32 %v4836_v7, %v4644_v27  ;;  %5794 = vmatprep.mubr.bf16.mxu0 %v5040_v54  ;;  %v4968_v42 = vmax.f32 %v4835_v39, 0.0  ;;  %v4473_v44 = vadd.f32 %v12113_v22, %v4280_v45  ;;  %v12114_v27 = vld [vmem:[#allocation98_spill] sm:$0xff]  ;;  %v4664_v7 = vadd.f32 %v11039_v46, %v12115_v41  ;;  %v12117_v45 = vld [vmem:[#allocation11_spill] sm:$0xff] }
 0x410   : > { %v4838_v26 = vpop.f32.mrf.mxu0  ;;  %5795 = vmatmul.mubr.bf16.gmra.mxu0 %v5039_v52  ;;  %v11146_v52 = vpop.f32.mrf.mxu1  ;;  %v4662_v54 = vadd.f32 %v11030_v43, %v12114_v27 }
 0x411   : > { %v4971_v38 = vmax.f32 %v4837_v36, 0.0  ;;  %v4839_v55 = vadd.f32 %v4838_v26, %v4646_v57  ;;  %v4666_v26 = vadd.f32 %v11044_v19, %v4473_v44 }
 0x412   : > { %v4842_v59 = vpop.f32.mrf.mxu0  ;;  %v11155_v39 = vpop.f32.mrf.mxu1 }
 0x413   : > { %v5043_v12 = vpack.c.bf16 %v4971_v38, %v4967_v58  ;;  %v4972_v63 = vmax.f32 %v4839_v55, 0.0  ;;  %v4843_v53 = vadd.f32 %v4842_v59, %v4650_v29 }
 0x414   : > { %v4844_v15 = vpop.f32.mrf.mxu0  ;;  %v11158_v59 = vpop.f32.mrf.mxu1 }
 0x415   : > { %v5044_v4 = vpack.c.bf16 %v4972_v63, %v4968_v42  ;;  %v4845_v2 = vadd.f32 %v4844_v15, %v4652_v23  ;;  %v4975_v11 = vmax.f32 %v4843_v53, 0.0 }
 0x416   : > { %v4846_v24 = vpop.f32.mrf.mxu0  ;;  %v11160_v42 = vpop.f32.mrf.mxu1 }
 0x417   : > { %v4847_v0 = vadd.f32 %v4846_v24, %v4654_v34  ;;  %5804 = vmatprep.mubr.bf16.mxu0 %v5044_v4  ;;  %v4976_v47 = vmax.f32 %v4845_v2, 0.0 }
 0x418   : > { %v4848_v3 = vpop.f32.mrf.mxu0  ;;  %5805 = vmatmul.mubr.bf16.gmra.mxu0 %v5043_v12  ;;  %v11162_v12 = vpop.f32.mrf.mxu1 }
 0x419   : > { %v4979_v10 = vmax.f32 %v4847_v0, 0.0  ;;  %v4849_v62 = vadd.f32 %v4848_v3, %v4656_v31 }
 0x41a   : > { %v4852_v32 = vpop.f32.mrf.mxu0  ;;  %v11164_v19 = vpop.f32.mrf.mxu1 }
 0x41b   : > { %v5047_v35 = vpack.c.bf16 %v4979_v10, %v4975_v11  ;;  %v4980_v60 = vmax.f32 %v4849_v62, 0.0  ;;  %v4853_v49 = vadd.f32 %v4852_v32, %v4660_v30  ;;  %v5117_v11 = vld [vmem:[%s11505_s6] sm:$0x3]  ;;  %v12116_v62 = vld [vmem:[#allocation10_spill] sm:$0xff] }
 0x41c   : > { %v4854_v50 = vpop.f32.mrf.mxu0  ;;  %v11166_v63 = vpop.f32.mrf.mxu1  ;;  %v11202_v51 = vrot.slane %v5117_v11, %v12116_v62  ;;  %v11205_v32 = vrot.slane %v5117_v11, %v12117_v45 }
 0x41d   : > { %v5048_v57 = vpack.c.bf16 %v4980_v60, %v4976_v47  ;;  %v4855_v9 = vadd.f32 %v4854_v50, %v4662_v54  ;;  %v4983_v55 = vmax.f32 %v4853_v49, 0.0 }
 0x41e   : > { %v4856_v36 = vpop.f32.mrf.mxu0  ;;  %v11168_v40 = vpop.f32.mrf.mxu1  ;;  %v5488_v60 = vadd.f32 %v11079_v8, %v11205_v32  ;;  %v5484_v22 = vadd.f32 %v11053_v48, %v11205_v32  ;;  %v5490_v50 = vadd.f32 %v11090_v20, %v11202_v51  ;;  %v5496_v48 = vadd.f32 %v11104_v1, %v11202_v51 }
 0x41f   : > { %v4857_v58 = vadd.f32 %v4856_v36, %v4664_v7  ;;  %5814 = vmatprep.mubr.bf16.mxu0 %v5048_v57  ;;  %v4984_v43 = vmax.f32 %v4855_v9, 0.0  ;;  %v5498_v20 = vadd.f32 %v11113_v56, %v11205_v32 }
 0x420   : > { %v4858_v38 = vpop.f32.mrf.mxu0  ;;  %5815 = vmatmul.mubr.bf16.gmra.mxu0 %v5047_v35  ;;  %v11170_v18 = vpop.f32.mrf.mxu1  ;;  %v5486_v35 = vadd.f32 %v11064_v13, %v11202_v51 }
 0x421   : > { %v4987_v61 = vmax.f32 %v4857_v58, 0.0  ;;  %v4859_v6 = vadd.f32 %v4858_v38, %v4666_v26 }
 0x422   : > { %v11172_v15 = vpop.f32.mrf.mxu1 }
 0x423   : > { %v5051_v5 = vpack.c.bf16 %v4987_v61, %v4983_v55  ;;  %v4988_v46 = vmax.f32 %v4859_v6, 0.0  ;;  %v5494_v61 = vadd.f32 %v11099_v28, %v11205_v32 }
 0x424   : > { %v11174_v16 = vpop.f32.mrf.mxu1 }
 0x425   : > { %v5052_v29 = vpack.c.bf16 %v4988_v46, %v4984_v43 }
 0x426   : > { %v11176_v23 = vpop.f32.mrf.mxu1 }
 0x427   : > { %5824 = vmatprep.mubr.bf16.mxu0 %v5052_v29 }
 0x428   : > { %5825 = vmatmul.mubr.bf16.gmra.mxu0 %v5051_v5  ;;  %v11178_v14 = vpop.f32.mrf.mxu1  ;;  %v5500_v5 = vadd.f32 %v11118_v17, %v11202_v51  ;;  %v5506_v17 = vadd.f32 %v11132_v21, %v11202_v51 }
 0x42a   : > { %v11180_v34 = vpop.f32.mrf.mxu1 }
 0x42c   : > { %v11182_v4 = vpop.f32.mrf.mxu1 }
 0x42e   : > { %v11184_v53 = vpop.f32.mrf.mxu1 }
 0x430   : > { %v11186_v24 = vpop.f32.mrf.mxu1 }
 0x432   : > { %v11188_v31 = vpop.f32.mrf.mxu1 }
 0x434   : > { %v11190_v2 = vpop.f32.mrf.mxu1 }
 0x436   : > { %v11192_v0 = vpop.f32.mrf.mxu1 }
 0x438   : > { %v11194_v3 = vpop.f32.mrf.mxu1 }
 0x43a   : > { %v11199_v10 = vpop.f32.mrf.mxu1 }
 0x43c   : > { %v11207_v30 = vpop.f32.mrf.mxu1 }
 0x43e   : > { %v11217_v41 = vpop.f32.mrf.mxu1 }
 0x440   : > { %v11219_v58 = vpop.f32.mrf.mxu1 }
 0x442   : > { %v11229_v11 = vpop.f32.mrf.mxu1 }
 0x470   : > { %v5676_v25 = vpop.f32.mrf.mxu0 }
 0x471   : > { %v5677_v7 = vadd.f32 %v5676_v25, %v5484_v22  ;;  %v11231_v22 = vpop.f32.mrf.mxu1 }
 0x472   : > { %v5678_v47 = vpop.f32.mrf.mxu0 }
 0x473   : > { %v5679_v27 = vadd.f32 %v5678_v47, %v5486_v35  ;;  %v5835_v8 = vmax.f32 %v5677_v7, 0.0 }
 0x474   : > { %v5680_v44 = vpop.f32.mrf.mxu0 }
 0x475   : > { %v5681_v54 = vadd.f32 %v5680_v44, %v5488_v60  ;;  %v5836_v13 = vmax.f32 %v5679_v27, 0.0 }
 0x476   : > { %v5682_v57 = vpop.f32.mrf.mxu0 }
 0x477   : > { %v5683_v49 = vadd.f32 %v5682_v57, %v5490_v50  ;;  %v5837_v36 = vmax.f32 %v5681_v54, 0.0  ;;  %v5508_v50 = vadd.f32 %v11141_v37, %v11205_v32  ;;  %v5504_v54 = vadd.f32 %v11127_v33, %v11205_v32 }
 0x478   : > { %v5686_v26 = vpop.f32.mrf.mxu0 }
 0x479   : > { %v5838_v9 = vmax.f32 %v5683_v49, 0.0  ;;  %v5899_v6 = vpack.c.bf16 %v5837_v36, %v5835_v8  ;;  %v5687_v62 = vadd.f32 %v5686_v26, %v5494_v61  ;;  %v5510_v49 = vadd.f32 %v11146_v52, %v11202_v51 }
 0x47a   : > { %v5688_v38 = vpop.f32.mrf.mxu0  ;;  %v5516_v52 = vadd.f32 %v11158_v59, %v11202_v51 }
 0x47b   : > { %v5900_v55 = vpack.c.bf16 %v5838_v9, %v5836_v13  ;;  %v5689_v46 = vadd.f32 %v5688_v38, %v5496_v48  ;;  %v5839_v28 = vmax.f32 %v5687_v62, 0.0  ;;  %v11241_v13 = vpop.f32.mrf.mxu1  ;;  %v5520_v62 = vadd.f32 %v11162_v12, %v11202_v51 }
 0x47c   : > { %v5690_v43 = vpop.f32.mrf.mxu0  ;;  %v5526_v12 = vadd.f32 %v11166_v63, %v11202_v51 }
 0x47d   : > { %v5691_v29 = vadd.f32 %v5690_v43, %v5498_v20  ;;  %6098 = vmatprep.mubr.bf16.mxu1 %v5900_v55  ;;  %v5840_v35 = vmax.f32 %v5689_v46, 0.0  ;;  %v11243_v55 = vpop.f32.mrf.mxu1 }
 0x47e   : > { %v5692_v25 = vpop.f32.mrf.mxu0  ;;  %6099 = vmatmul.mubr.bf16.vlgmr.msra.gmra.mxu1 %v5899_v6  ;;  %v5518_v6 = vadd.f32 %v11160_v42, %v11205_v32 }
 0x47f   : > { %v5693_v1 = vadd.f32 %v5692_v25, %v5500_v5  ;;  %v5841_v47 = vmax.f32 %v5691_v29, 0.0  ;;  %v5514_v5 = vadd.f32 %v11155_v39, %v11205_v32 }
 0x480   : > { %v5696_v56 = vpop.f32.mrf.mxu0 }
 0x481   : > { %v5842_v60 = vmax.f32 %v5693_v1, 0.0  ;;  %v5901_v7 = vpack.c.bf16 %v5841_v47, %v5839_v28  ;;  %v5697_v9 = vadd.f32 %v5696_v56, %v5504_v54  ;;  %v11253_v47 = vpop.f32.mrf.mxu1 }
 0x482   : > { %v5698_v44 = vpop.f32.mrf.mxu0 }
 0x483   : > { %v5902_v27 = vpack.c.bf16 %v5842_v60, %v5840_v35  ;;  %v5699_v36 = vadd.f32 %v5698_v44, %v5506_v17  ;;  %v5843_v33 = vmax.f32 %v5697_v9, 0.0  ;;  %v11255_v17 = vpop.f32.mrf.mxu1 }
 0x484   : > { %v5700_v57 = vpop.f32.mrf.mxu0 }
 0x485   : > { %v5701_v26 = vadd.f32 %v5700_v57, %v5508_v50  ;;  %6106 = vmatprep.mubr.bf16.mxu1 %v5902_v27  ;;  %v5844_v48 = vmax.f32 %v5699_v36, 0.0  ;;  %v5528_v27 = vadd.f32 %v11168_v40, %v11205_v32  ;;  %v5530_v36 = vadd.f32 %v11170_v18, %v11202_v51 }
 0x486   : > { %v5702_v8 = vpop.f32.mrf.mxu0  ;;  %6107 = vmatmul.mubr.bf16.gmra.mxu1 %v5901_v7  ;;  %v5524_v7 = vadd.f32 %v11164_v19, %v11205_v32  ;;  %v5536_v18 = vadd.f32 %v11174_v16, %v11202_v51 }
 0x487   : > { %v5703_v21 = vadd.f32 %v5702_v8, %v5510_v49  ;;  %v5845_v38 = vmax.f32 %v5701_v26, 0.0  ;;  %v11265_v8 = vpop.f32.mrf.mxu1 }
 0x488   : > { %v5706_v37 = vpop.f32.mrf.mxu0 }
 0x489   : > { %v5846_v20 = vmax.f32 %v5703_v21, 0.0  ;;  %v5903_v46 = vpack.c.bf16 %v5845_v38, %v5843_v33  ;;  %v5707_v56 = vadd.f32 %v5706_v37, %v5514_v5  ;;  %v11267_v33 = vpop.f32.mrf.mxu1 }
 0x48a   : > { %v5708_v61 = vpop.f32.mrf.mxu0 }
 0x48b   : > { %v5904_v43 = vpack.c.bf16 %v5846_v20, %v5844_v48  ;;  %v5709_v25 = vadd.f32 %v5708_v61, %v5516_v52  ;;  %v5847_v39 = vmax.f32 %v5707_v56, 0.0  ;;  %v5538_v52 = vadd.f32 %v11176_v23, %v11205_v32 }
 0x48c   : > { %v5710_v29 = vpop.f32.mrf.mxu0 }
 0x48d   : > { %v5711_v1 = vadd.f32 %v5710_v29, %v5518_v6  ;;  %6114 = vmatprep.mubr.bf16.mxu1 %v5904_v43  ;;  %v5848_v28 = vmax.f32 %v5709_v25, 0.0  ;;  %v5534_v43 = vadd.f32 %v11172_v15, %v11205_v32  ;;  %v5540_v29 = vadd.f32 %v11178_v14, %v11202_v51 }
 0x48e   : > { %v5712_v35 = vpop.f32.mrf.mxu0  ;;  %6115 = vmatmul.mubr.bf16.gmra.mxu1 %v5903_v46  ;;  %v5546_v14 = vadd.f32 %v11182_v4, %v11202_v51 }
 0x48f   : > { %v5713_v59 = vadd.f32 %v5712_v35, %v5520_v62  ;;  %v5849_v60 = vmax.f32 %v5711_v1, 0.0  ;;  %v11277_v1 = vpop.f32.mrf.mxu1 }
 0x490   : > { %v5716_v42 = vpop.f32.mrf.mxu0 }
 0x491   : > { %v5850_v44 = vmax.f32 %v5713_v59, 0.0  ;;  %v5905_v57 = vpack.c.bf16 %v5849_v60, %v5847_v39  ;;  %v5717_v21 = vadd.f32 %v5716_v42, %v5524_v7  ;;  %v5548_v39 = vadd.f32 %v11184_v53, %v11205_v32 }
 0x492   : > { %v5718_v50 = vpop.f32.mrf.mxu0  ;;  %v5550_v7 = vadd.f32 %v11186_v24, %v11202_v51  ;;  %v5556_v24 = vadd.f32 %v11190_v2, %v11202_v51 }
 0x493   : > { %v5906_v54 = vpack.c.bf16 %v5850_v44, %v5848_v28  ;;  %v5719_v26 = vadd.f32 %v5718_v50, %v5526_v12  ;;  %v5851_v19 = vmax.f32 %v5717_v21, 0.0  ;;  %v11279_v28 = vpop.f32.mrf.mxu1  ;;  %v5544_v12 = vadd.f32 %v11180_v34, %v11205_v32 }
 0x494   : > { %v5720_v49 = vpop.f32.mrf.mxu0 }
 0x495   : > { %v5721_v9 = vadd.f32 %v5720_v49, %v5528_v27  ;;  %6122 = vmatprep.mubr.bf16.mxu1 %v5906_v54  ;;  %v5852_v48 = vmax.f32 %v5719_v26, 0.0 }
 0x496   : > { %v5722_v38 = vpop.f32.mrf.mxu0  ;;  %6123 = vmatmul.mubr.bf16.gmra.mxu1 %v5905_v57 }
 0x497   : > { %v5723_v63 = vadd.f32 %v5722_v38, %v5530_v36  ;;  %v5853_v37 = vmax.f32 %v5721_v9, 0.0  ;;  %v11289_v36 = vpop.f32.mrf.mxu1 }
 0x498   : > { %v5726_v40 = vpop.f32.mrf.mxu0 }
 0x499   : > { %v5854_v20 = vmax.f32 %v5723_v63, 0.0  ;;  %v5907_v5 = vpack.c.bf16 %v5853_v37, %v5851_v19  ;;  %v5727_v56 = vadd.f32 %v5726_v40, %v5534_v43  ;;  %v11291_v37 = vpop.f32.mrf.mxu1  ;;  %v5554_v19 = vadd.f32 %v11188_v31, %v11205_v32 }
 0x49a   : > { %v5728_v61 = vpop.f32.mrf.mxu0 }
 0x49b   : > { %v5908_v6 = vpack.c.bf16 %v5854_v20, %v5852_v48  ;;  %v5729_v62 = vadd.f32 %v5728_v61, %v5536_v18  ;;  %v5855_v15 = vmax.f32 %v5727_v56, 0.0  ;;  %v5558_v48 = vadd.f32 %v11192_v0, %v11205_v32 }
 0x49c   : > { %v5730_v46 = vpop.f32.mrf.mxu0 }
 0x49d   : > { %v5731_v25 = vadd.f32 %v5730_v46, %v5538_v52  ;;  %6130 = vmatprep.mubr.bf16.mxu1 %v5908_v6  ;;  %v5856_v60 = vmax.f32 %v5729_v62, 0.0  ;;  %v5560_v52 = vadd.f32 %v11194_v3, %v11202_v51  ;;  %v5566_v3 = vadd.f32 %v11207_v30, %v11202_v51 }
 0x49e   : > { %v5732_v35 = vpop.f32.mrf.mxu0  ;;  %6131 = vmatmul.mubr.bf16.gmra.mxu1 %v5907_v5  ;;  %v11301_v5 = vpop.f32.mrf.mxu1 }
 0x49f   : > { %v5733_v16 = vadd.f32 %v5732_v35, %v5540_v29  ;;  %v5857_v59 = vmax.f32 %v5731_v25, 0.0 }
 0x4a0   : > { %v5736_v23 = vpop.f32.mrf.mxu0  ;;  %v11303_v35 = vpop.f32.mrf.mxu1 }
 0x4a1   : > { %v5858_v42 = vmax.f32 %v5733_v16, 0.0  ;;  %v5909_v27 = vpack.c.bf16 %v5857_v59, %v5855_v15  ;;  %v5737_v26 = vadd.f32 %v5736_v23, %v5544_v12  ;;  %v5568_v59 = vadd.f32 %v11217_v41, %v11205_v32 }
 0x4a2   : > { %v5738_v44 = vpop.f32.mrf.mxu0 }
 0x4a3   : > { %v5910_v50 = vpack.c.bf16 %v5858_v42, %v5856_v60  ;;  %v5739_v57 = vadd.f32 %v5738_v44, %v5546_v14  ;;  %v5859_v34 = vmax.f32 %v5737_v26, 0.0  ;;  %v5564_v60 = vadd.f32 %v11199_v10, %v11205_v32 }
 0x4a4   : > { %v5740_v54 = vpop.f32.mrf.mxu0  ;;  %v5570_v44 = vadd.f32 %v11219_v58, %v11202_v51  ;;  %v5576_v58 = vadd.f32 %v11231_v22, %v11202_v51 }
 0x4a5   : > { %v5741_v49 = vadd.f32 %v5740_v54, %v5548_v39  ;;  %6138 = vmatprep.mubr.bf16.mxu1 %v5910_v50  ;;  %v5860_v38 = vmax.f32 %v5739_v57, 0.0  ;;  %v11313_v50 = vpop.f32.mrf.mxu1 }
 0x4a6   : > { %v5742_v9 = vpop.f32.mrf.mxu0  ;;  %6139 = vmatmul.mubr.bf16.gmra.mxu1 %v5909_v27 }
 0x4a7   : > { %v5743_v4 = vadd.f32 %v5742_v9, %v5550_v7  ;;  %v5861_v21 = vmax.f32 %v5741_v49, 0.0  ;;  %v11315_v49 = vpop.f32.mrf.mxu1  ;;  %v5578_v9 = vadd.f32 %v11241_v13, %v11205_v32 }
 0x4a8   : > { %v5746_v53 = vpop.f32.mrf.mxu0 }
 0x4a9   : > { %v5862_v63 = vmax.f32 %v5743_v4, 0.0  ;;  %v5911_v61 = vpack.c.bf16 %v5861_v21, %v5859_v34  ;;  %v5747_v46 = vadd.f32 %v5746_v53, %v5554_v19  ;;  %v5574_v21 = vadd.f32 %v11229_v11, %v11205_v32 }
 0x4aa   : > { %v5748_v40 = vpop.f32.mrf.mxu0 }
 0x4ab   : > { %v5912_v20 = vpack.c.bf16 %v5862_v63, %v5860_v38  ;;  %v5749_v6 = vadd.f32 %v5748_v40, %v5556_v24  ;;  %v5863_v31 = vmax.f32 %v5747_v46, 0.0  ;;  %v5580_v63 = vadd.f32 %v11243_v55, %v11202_v51  ;;  %v11325_v24 = vpop.f32.mrf.mxu1 }
 0x4ac   : > { %v5750_v18 = vpop.f32.mrf.mxu0  ;;  %v5586_v55 = vadd.f32 %v11255_v17, %v11202_v51 }
 0x4ad   : > { %v5751_v43 = vadd.f32 %v5750_v18, %v5558_v48  ;;  %6146 = vmatprep.mubr.bf16.mxu1 %v5912_v20  ;;  %v5864_v25 = vmax.f32 %v5749_v6, 0.0 }
 0x4ae   : > { %v5752_v29 = vpop.f32.mrf.mxu0  ;;  %6147 = vmatmul.mubr.bf16.gmra.mxu1 %v5911_v61 }
 0x4af   : > { %v5753_v2 = vadd.f32 %v5752_v29, %v5560_v52  ;;  %v5865_v62 = vmax.f32 %v5751_v43, 0.0  ;;  %v11327_v52 = vpop.f32.mrf.mxu1  ;;  %v5588_v43 = vadd.f32 %v11265_v8, %v11205_v32  ;;  %v5584_v29 = vadd.f32 %v11253_v47, %v11205_v32 }
 0x4b0   : > { %v5756_v0 = vpop.f32.mrf.mxu0 }
 0x4b1   : > { %v5866_v56 = vmax.f32 %v5753_v2, 0.0  ;;  %v5913_v42 = vpack.c.bf16 %v5865_v62, %v5863_v31  ;;  %v5757_v12 = vadd.f32 %v5756_v0, %v5564_v60  ;;  %v5590_v0 = vadd.f32 %v11267_v33, %v11202_v51  ;;  %v5617_v31 = vpop.f32.mrf.mxu1 }
 0x4b2   : > { %v5758_v16 = vpop.f32.mrf.mxu0  ;;  %v5598_v33 = vadd.f32 %v11289_v36, %v11205_v32 }
 0x4b3   : > { %v5914_v23 = vpack.c.bf16 %v5866_v56, %v5864_v25  ;;  %v5759_v14 = vadd.f32 %v5758_v16, %v5566_v3  ;;  %v5867_v10 = vmax.f32 %v5757_v12, 0.0 }
 0x4b4   : > { %v5760_v15 = vpop.f32.mrf.mxu0 }
 0x4b5   : > { %v5761_v39 = vadd.f32 %v5760_v15, %v5568_v59  ;;  %6154 = vmatprep.mubr.bf16.mxu1 %v5914_v23  ;;  %v5868_v7 = vmax.f32 %v5759_v14, 0.0 }
 0x4b6   : > { %v5762_v27 = vpop.f32.mrf.mxu0  ;;  %6155 = vmatmul.mubr.bf16.gmra.mxu1 %v5913_v42  ;;  %v5619_v42 = vpop.f32.mrf.mxu1 }
 0x4b7   : > { %v5763_v30 = vadd.f32 %v5762_v27, %v5570_v44  ;;  %v5869_v54 = vmax.f32 %v5761_v39, 0.0  ;;  %v5596_v44 = vadd.f32 %v11279_v28, %v11202_v51  ;;  %v5594_v39 = vadd.f32 %v11277_v1, %v11205_v32 }
 0x4b8   : > { %v5766_v41 = vpop.f32.mrf.mxu0 }
 0x4b9   : > { %v5870_v57 = vmax.f32 %v5763_v30, 0.0  ;;  %v5915_v53 = vpack.c.bf16 %v5869_v54, %v5867_v10  ;;  %v5767_v48 = vadd.f32 %v5766_v41, %v5574_v21  ;;  %v5600_v30 = vadd.f32 %v11291_v37, %v11202_v51 }
 0x4ba   : > { %v5768_v26 = vpop.f32.mrf.mxu0  ;;  %v5608_v37 = vadd.f32 %v11313_v50, %v11205_v32 }
 0x4bb   : > { %v5916_v4 = vpack.c.bf16 %v5870_v57, %v5868_v7  ;;  %v5769_v34 = vadd.f32 %v5768_v26, %v5576_v58  ;;  %v5871_v11 = vmax.f32 %v5767_v48, 0.0  ;;  %v5623_v7 = vpop.f32.mrf.mxu1  ;;  %v5610_v48 = vadd.f32 %v11315_v49, %v11202_v51 }
 0x4bc   : > { %v5770_v38 = vpop.f32.mrf.mxu0  ;;  %v5618_v49 = vadd.f32 %v5617_v31, %v11205_v32 }
 0x4bd   : > { %v5771_v40 = vadd.f32 %v5770_v38, %v5578_v9  ;;  %6162 = vmatprep.mubr.bf16.mxu1 %v5916_v4  ;;  %v5872_v61 = vmax.f32 %v5769_v34, 0.0  ;;  %v5625_v4 = vpop.f32.mrf.mxu1 }
 0x4be   : > { %v5772_v20 = vpop.f32.mrf.mxu0  ;;  %6163 = vmatmul.mubr.bf16.gmra.mxu1 %v5915_v53  ;;  %v5606_v53 = vadd.f32 %v11303_v35, %v11202_v51 }
 0x4bf   : > { %v5773_v22 = vadd.f32 %v5772_v20, %v5580_v63  ;;  %v5873_v19 = vmax.f32 %v5771_v40, 0.0  ;;  %v5604_v63 = vadd.f32 %v11301_v5, %v11205_v32 }
 0x4c0   : > { %v5776_v13 = vpop.f32.mrf.mxu0 }
 0x4c1   : > { %v5874_v18 = vmax.f32 %v5773_v22, 0.0  ;;  %v5917_v2 = vpack.c.bf16 %v5873_v19, %v5871_v11  ;;  %v5777_v16 = vadd.f32 %v5776_v13, %v5584_v29  ;;  %v5627_v19 = vpop.f32.mrf.mxu1 }
 0x4c2   : > { %v5778_v6 = vpop.f32.mrf.mxu0 }
 0x4c3   : > { %v5918_v46 = vpack.c.bf16 %v5874_v18, %v5872_v61  ;;  %v5779_v25 = vadd.f32 %v5778_v6, %v5586_v55  ;;  %v5875_v15 = vmax.f32 %v5777_v16, 0.0  ;;  %v5629_v55 = vpop.f32.mrf.mxu1 }
 0x4c4   : > { %v5780_v62 = vpop.f32.mrf.mxu0 }
 0x4c5   : > { %v5781_v56 = vadd.f32 %v5780_v62, %v5588_v43  ;;  %6170 = vmatprep.mubr.bf16.mxu1 %v5918_v46  ;;  %v5876_v8 = vmax.f32 %v5779_v25, 0.0  ;;  %v5616_v46 = vadd.f32 %v11327_v52, %v11202_v51  ;;  %v5620_v25 = vadd.f32 %v5619_v42, %v11202_v51 }
 0x4c6   : > { %v5782_v3 = vpop.f32.mrf.mxu0  ;;  %6171 = vmatmul.mubr.bf16.gmra.mxu1 %v5917_v2  ;;  %v5614_v2 = vadd.f32 %v11325_v24, %v11205_v32  ;;  %v5626_v24 = vadd.f32 %v5625_v4, %v11202_v51 }
 0x4c7   : > { %v5783_v17 = vadd.f32 %v5782_v3, %v5590_v0  ;;  %v5877_v59 = vmax.f32 %v5781_v56, 0.0  ;;  %v5633_v3 = vpop.f32.mrf.mxu1 }
 0x4c8   : > { %v5786_v23 = vpop.f32.mrf.mxu0 }
 0x4c9   : > { %v5878_v60 = vmax.f32 %v5783_v17, 0.0  ;;  %v5919_v12 = vpack.c.bf16 %v5877_v59, %v5875_v15  ;;  %v5787_v57 = vadd.f32 %v5786_v23, %v5594_v39  ;;  %v5635_v15 = vpop.f32.mrf.mxu1 }
 0x4ca   : > { %v5788_v47 = vpop.f32.mrf.mxu0 }
 0x4cb   : > { %v5920_v14 = vpack.c.bf16 %v5878_v60, %v5876_v8  ;;  %v5789_v54 = vadd.f32 %v5788_v47, %v5596_v44  ;;  %v5879_v21 = vmax.f32 %v5787_v57, 0.0 }
 0x4cc   : > { %v5790_v27 = vpop.f32.mrf.mxu0 }
 0x4cd   : > { %v5791_v41 = vadd.f32 %v5790_v27, %v5598_v33  ;;  %6178 = vmatprep.mubr.bf16.mxu1 %v5920_v14  ;;  %v5880_v36 = vmax.f32 %v5789_v54, 0.0  ;;  %v5628_v33 = vadd.f32 %v5627_v19, %v11205_v32  ;;  %v5624_v14 = vadd.f32 %v5623_v7, %v11205_v32 }
 0x4ce   : > { %v5792_v10 = vpop.f32.mrf.mxu0  ;;  %6179 = vmatmul.mubr.bf16.gmra.mxu1 %v5919_v12  ;;  %v5630_v27 = vadd.f32 %v5629_v55, %v11202_v51  ;;  %v5636_v7 = vadd.f32 %v5635_v15, %v11202_v51 }
 0x4cf   : > { %v5793_v28 = vadd.f32 %v5792_v10, %v5600_v30  ;;  %v5881_v26 = vmax.f32 %v5791_v41, 0.0  ;;  %v5637_v41 = vpop.f32.mrf.mxu1 }
 0x4d0   : > { %v5796_v58 = vpop.f32.mrf.mxu0 }
 0x4d1   : > { %v5882_v9 = vmax.f32 %v5793_v28, 0.0  ;;  %v5921_v34 = vpack.c.bf16 %v5881_v26, %v5879_v21  ;;  %v5797_v13 = vadd.f32 %v5796_v58, %v5604_v63  ;;  %v5639_v4 = vpop.f32.mrf.mxu1 }
 0x4d2   : > { %v5798_v1 = vpop.f32.mrf.mxu0 }
 0x4d3   : > { %v5922_v38 = vpack.c.bf16 %v5882_v9, %v5880_v36  ;;  %v5799_v20 = vadd.f32 %v5798_v1, %v5606_v53  ;;  %v5883_v43 = vmax.f32 %v5797_v13, 0.0  ;;  %v5638_v53 = vadd.f32 %v5637_v41, %v11205_v32 }
 0x4d4   : > { %v5800_v40 = vpop.f32.mrf.mxu0 }
 0x4d5   : > { %v5801_v22 = vadd.f32 %v5800_v40, %v5608_v37  ;;  %6186 = vmatprep.mubr.bf16.mxu1 %v5922_v38  ;;  %v5884_v50 = vmax.f32 %v5799_v20, 0.0  ;;  %v5634_v38 = vadd.f32 %v5633_v3, %v11205_v32  ;;  %v5640_v40 = vadd.f32 %v5639_v4, %v11202_v51  ;;  %v11370_v51 = vld [vmem:[%s11507_s8] ss:$0 sm:$0xff] }
 0x4d6   : > { %v5802_v61 = vpop.f32.mrf.mxu0  ;;  %6187 = vmatmul.mubr.bf16.gmra.mxu1 %v5921_v34 }
 0x4d7   : > { %v5803_v35 = vadd.f32 %v5802_v61, %v5610_v48  ;;  %v5885_v18 = vmax.f32 %v5801_v22, 0.0 }
 0x4d8   : > { %v5806_v11 = vpop.f32.mrf.mxu0 }
 0x4d9   : > { %v5886_v6 = vmax.f32 %v5803_v35, 0.0  ;;  %v5923_v62 = vpack.c.bf16 %v5885_v18, %v5883_v43  ;;  %v5807_v17 = vadd.f32 %v5806_v11, %v5614_v2 }
 0x4da   : > { %v5808_v5 = vpop.f32.mrf.mxu0 }
 0x4db   : > { %v5924_v29 = vpack.c.bf16 %v5886_v6, %v5884_v50  ;;  %v5809_v56 = vadd.f32 %v5808_v5, %v5616_v46  ;;  %v5887_v47 = vmax.f32 %v5807_v17, 0.0 }
 0x4dc   : > { %v5810_v0 = vpop.f32.mrf.mxu0 }
 0x4dd   : > { %v5811_v16 = vadd.f32 %v5810_v0, %v5618_v49  ;;  %6194 = vmatprep.mubr.bf16.mxu1 %v5924_v29  ;;  %v5888_v60 = vmax.f32 %v5809_v56, 0.0 }
 0x4de   : > { %v5812_v59 = vpop.f32.mrf.mxu0  ;;  %6195 = vmatmul.mubr.bf16.gmra.mxu1 %v5923_v62 }
 0x4df   : > { %v5813_v23 = vadd.f32 %v5812_v59, %v5620_v25  ;;  %v5889_v8 = vmax.f32 %v5811_v16, 0.0 }
 0x4e0   : > { %v5816_v52 = vpop.f32.mrf.mxu0 }
 0x4e1   : > { %v5890_v31 = vmax.f32 %v5813_v23, 0.0  ;;  %v5925_v39 = vpack.c.bf16 %v5889_v8, %v5887_v47  ;;  %v5817_v57 = vadd.f32 %v5816_v52, %v5624_v14 }
 0x4e2   : > { %v5818_v44 = vpop.f32.mrf.mxu0 }
 0x4e3   : > { %v5926_v42 = vpack.c.bf16 %v5890_v31, %v5888_v60  ;;  %v5819_v30 = vadd.f32 %v5818_v44, %v5626_v24  ;;  %v5891_v21 = vmax.f32 %v5817_v57, 0.0 }
 0x4e4   : > { %v5820_v12 = vpop.f32.mrf.mxu0 }
 0x4e5   : > { %v5821_v54 = vadd.f32 %v5820_v12, %v5628_v33  ;;  %6202 = vmatprep.mubr.bf16.mxu1 %v5926_v42  ;;  %v5892_v36 = vmax.f32 %v5819_v30, 0.0 }
 0x4e6   : > { %v5822_v10 = vpop.f32.mrf.mxu0  ;;  %6203 = vmatmul.mubr.bf16.gmra.mxu1 %v5925_v39 }
 0x4e7   : > { %v5823_v28 = vadd.f32 %v5822_v10, %v5630_v27  ;;  %v5893_v26 = vmax.f32 %v5821_v54, 0.0 }
 0x4e8   : > { %v5826_v58 = vpop.f32.mrf.mxu0 }
 0x4e9   : > { %v5894_v9 = vmax.f32 %v5823_v28, 0.0  ;;  %v5927_v63 = vpack.c.bf16 %v5893_v26, %v5891_v21  ;;  %v5827_v22 = vadd.f32 %v5826_v58, %v5634_v38 }
 0x4ea   : > { %v5828_v1 = vpop.f32.mrf.mxu0 }
 0x4eb   : > { %v5928_v37 = vpack.c.bf16 %v5894_v9, %v5892_v36  ;;  %v5829_v48 = vadd.f32 %v5828_v1, %v5636_v7  ;;  %v5895_v11 = vmax.f32 %v5827_v22, 0.0 }
 0x4ec   : > { %v5830_v34 = vpop.f32.mrf.mxu0 }
 0x4ed   : > { %v5831_v20 = vadd.f32 %v5830_v34, %v5638_v53  ;;  %6210 = vmatprep.mubr.bf16.mxu1 %v5928_v37  ;;  %v5896_v35 = vmax.f32 %v5829_v48, 0.0 }
 0x4ee   : > { %v5832_v19 = vpop.f32.mrf.mxu0  ;;  %6211 = vmatmul.mubr.bf16.gmra.mxu1 %v5927_v63 }
 0x4ef   : > { %v5833_v13 = vadd.f32 %v5832_v19, %v5640_v40  ;;  %v5897_v61 = vmax.f32 %v5831_v20, 0.0 }
 0x4f1   : > { %v5898_v18 = vmax.f32 %v5833_v13, 0.0  ;;  %v5929_v6 = vpack.c.bf16 %v5897_v61, %v5895_v11 }
 0x4f3   : > { %v5930_v50 = vpack.c.bf16 %v5898_v18, %v5896_v35 }
 0x4f5   : > { %6218 = vmatprep.mubr.bf16.mxu1 %v5930_v50 }
 0x4f6   : > { %6219 = vmatmul.mubr.bf16.gmra.mxu1 %v5929_v6 }
 0x53e   : > { %v6940_v32 = vpop.f32.mrf.mxu1 }
 0x540   : > { %v6941_v55 = vpop.f32.mrf.mxu1 }
 0x541   : > { %v6942_v43 = vadd.f32 %v6941_v55, %v6940_v32 }
 0x542   : > { %v6943_v5 = vpop.f32.mrf.mxu1 }
 0x543   : > { %v6101_v49 = vadd.f32 %v6942_v43, %v11370_v51 }
 0x544   : > { %v6944_v46 = vpop.f32.mrf.mxu1 }
 0x545   : > { %v6945_v29 = vadd.f32 %v6944_v46, %v6943_v5  ;;  %v6227_v25 = vmax.f32 %v6101_v49, 0.0 }
 0x546   : > { %v6946_v2 = vpop.f32.mrf.mxu1 }
 0x547   : > { %v6104_v62 = vadd.f32 %v6945_v29, %v11370_v51 }
 0x548   : > { %v6947_v0 = vpop.f32.mrf.mxu1 }
 0x549   : > { %v6228_v56 = vmax.f32 %v6104_v62, 0.0  ;;  %v6948_v16 = vadd.f32 %v6947_v0, %v6946_v2 }
 0x54a   : > { %v6949_v3 = vpop.f32.mrf.mxu1 }
 0x54b   : > { %v11374_v17 = vpack.c.bf16 %v6228_v56, %v6227_v25  ;;  %v6109_v23 = vadd.f32 %v6948_v16, %v11370_v51 }
 0x54c   : > { %v6950_v59 = vpop.f32.mrf.mxu1 }
 0x54d   : > { %v6951_v8 = vadd.f32 %v6950_v59, %v6949_v3  ;;  %v6229_v15 = vmax.f32 %v6109_v23, 0.0 }
 0x54e   : > { %v6952_v52 = vpop.f32.mrf.mxu1 }
 0x54f   : > { %v6112_v60 = vadd.f32 %v6951_v8, %v11370_v51 }
 0x550   : > { %v6953_v31 = vpop.f32.mrf.mxu1 }
 0x551   : > { %v6230_v47 = vmax.f32 %v6112_v60, 0.0  ;;  %v6954_v44 = vadd.f32 %v6953_v31, %v6952_v52 }
 0x552   : > { %v6955_v24 = vpop.f32.mrf.mxu1 }
 0x553   : > { %v11378_v33 = vpack.c.bf16 %v6230_v47, %v6229_v15  ;;  %v6117_v14 = vadd.f32 %v6954_v44, %v11370_v51 }
 0x554   : > { %v6956_v42 = vpop.f32.mrf.mxu1 }
 0x555   : > { %v6957_v39 = vadd.f32 %v6956_v42, %v6955_v24  ;;  %v6231_v54 = vmax.f32 %v6117_v14, 0.0  ;;  %v11404_v24 = vld [vmem:[%s11508_s9] sm:$0xf] }
 0x556   : > { %v6958_v12 = vpop.f32.mrf.mxu1  ;;  %7052 = vmatprep.mubr.msk.bf16.mxu0 %vm3268_vm0, %v11404_v24 }
 0x557   : > { %v6120_v27 = vadd.f32 %v6957_v39, %v11370_v51 }
 0x558   : > { %v6959_v30 = vpop.f32.mrf.mxu1 }
 0x559   : > { %v6232_v41 = vmax.f32 %v6120_v27, 0.0  ;;  %v6960_v57 = vadd.f32 %v6959_v30, %v6958_v12 }
 0x55a   : > { %v6961_v10 = vpop.f32.mrf.mxu1 }
 0x55b   : > { %v11382_v28 = vpack.c.bf16 %v6232_v41, %v6231_v54  ;;  %v6125_v58 = vadd.f32 %v6960_v57, %v11370_v51 }
 0x55c   : > { %v6962_v26 = vpop.f32.mrf.mxu1 }
 0x55d   : > { %v6963_v36 = vadd.f32 %v6962_v26, %v6961_v10  ;;  %v6233_v1 = vmax.f32 %v6125_v58, 0.0  ;;  %v6368_v26 = vld [vmem:[#allocation2] sm:$0x1] }
 0x55e   : > { %v6964_v9 = vpop.f32.mrf.mxu1  ;;  %6371 = vperm.xlu0 %7196, %v6368_v26  }
 0x55f   : > { %v6128_v4 = vadd.f32 %v6963_v36, %v11370_v51 }
 0x560   : > { %v6965_v21 = vpop.f32.mrf.mxu1 }
 0x561   : > { %v6234_v7 = vmax.f32 %v6128_v4, 0.0  ;;  %v6966_v53 = vadd.f32 %v6965_v21, %v6964_v9 }
 0x562   : > { %v6967_v37 = vpop.f32.mrf.mxu1 }
 0x563   : > { %v11386_v38 = vpack.c.bf16 %v6234_v7, %v6233_v1  ;;  %v6133_v34 = vadd.f32 %v6966_v53, %v11370_v51 }
 0x564   : > { %v6968_v63 = vpop.f32.mrf.mxu1 }
 0x565   : > { %v6969_v40 = vadd.f32 %v6968_v63, %v6967_v37  ;;  %v6235_v19 = vmax.f32 %v6133_v34, 0.0 }
 0x566   : > { %v6970_v48 = vpop.f32.mrf.mxu1 }
 0x567   : > { %v6136_v20 = vadd.f32 %v6969_v40, %v11370_v51 }
 0x568   : > { %v6971_v22 = vpop.f32.mrf.mxu1 }
 0x569   : > { %v6236_v13 = vmax.f32 %v6136_v20, 0.0  ;;  %v6972_v61 = vadd.f32 %v6971_v22, %v6970_v48 }
 0x56a   : > { %v6973_v35 = vpop.f32.mrf.mxu1 }
 0x56b   : > { %v11390_v18 = vpack.c.bf16 %v6236_v13, %v6235_v19  ;;  %v6141_v50 = vadd.f32 %v6972_v61, %v11370_v51 }
 0x56c   : > { %v6974_v11 = vpop.f32.mrf.mxu1 }
 0x56d   : > { %v6975_v6 = vadd.f32 %v6974_v11, %v6973_v35  ;;  %v6237_v5 = vmax.f32 %v6141_v50, 0.0 }
 0x56e   : > { %v6976_v32 = vpop.f32.mrf.mxu1 }
 0x56f   : > { %v6144_v55 = vadd.f32 %v6975_v6, %v11370_v51 }
 0x570   : > { %v6977_v43 = vpop.f32.mrf.mxu1 }
 0x571   : > { %v6238_v46 = vmax.f32 %v6144_v55, 0.0  ;;  %v6978_v49 = vadd.f32 %v6977_v43, %v6976_v32 }
 0x572   : > { %v6979_v29 = vpop.f32.mrf.mxu1 }
 0x573   : > { %v11394_v2 = vpack.c.bf16 %v6238_v46, %v6237_v5  ;;  %v6149_v0 = vadd.f32 %v6978_v49, %v11370_v51 }
 0x574   : > { %v6980_v62 = vpop.f32.mrf.mxu1 }
 0x575   : > { %v6981_v25 = vadd.f32 %v6980_v62, %v6979_v29  ;;  %v6239_v59 = vmax.f32 %v6149_v0, 0.0 }
 0x576   : > { %v6982_v56 = vpop.f32.mrf.mxu1 }
 0x577   : > { %v6152_v16 = vadd.f32 %v6981_v25, %v11370_v51 }
 0x578   : > { %v6983_v3 = vpop.f32.mrf.mxu1 }
 0x579   : > { %v6240_v23 = vmax.f32 %v6152_v16, 0.0  ;;  %v6984_v8 = vadd.f32 %v6983_v3, %v6982_v56 }
 0x57a   : > { %v6985_v52 = vpop.f32.mrf.mxu1 }
 0x57b   : > { %v11398_v60 = vpack.c.bf16 %v6240_v23, %v6239_v59  ;;  %v6157_v15 = vadd.f32 %v6984_v8, %v11370_v51 }
 0x57c   : > { %v6986_v31 = vpop.f32.mrf.mxu1 }
 0x57d   : > { %v6987_v47 = vadd.f32 %v6986_v31, %v6985_v52  ;;  %v6241_v39 = vmax.f32 %v6157_v15, 0.0 }
 0x57e   : > { %v6988_v44 = vpop.f32.mrf.mxu1 }
 0x57f   : > { %v6160_v42 = vadd.f32 %v6987_v47, %v11370_v51 }
 0x580   : > { %v6989_v14 = vpop.f32.mrf.mxu1 }
 0x581   : > { %v6242_v12 = vmax.f32 %v6160_v42, 0.0  ;;  %v6990_v27 = vadd.f32 %v6989_v14, %v6988_v44 }
 0x582   : > { %v6991_v30 = vpop.f32.mrf.mxu1 }
 0x583   : > { %v11409_v54 = vpack.c.bf16 %v6242_v12, %v6241_v39  ;;  %v6165_v57 = vadd.f32 %v6990_v27, %v11370_v51 }
 0x584   : > { %v6992_v41 = vpop.f32.mrf.mxu1 }
 0x585   : > { %v6993_v10 = vadd.f32 %v6992_v41, %v6991_v30  ;;  %v6243_v4 = vmax.f32 %v6165_v57, 0.0 }
 0x586   : > { %v6994_v58 = vpop.f32.mrf.mxu1 }
 0x587   : > { %v6168_v36 = vadd.f32 %v6993_v10, %v11370_v51 }
 0x588   : > { %v6995_v9 = vpop.f32.mrf.mxu1 }
 0x589   : > { %v6244_v21 = vmax.f32 %v6168_v36, 0.0  ;;  %v6996_v1 = vadd.f32 %v6995_v9, %v6994_v58 }
 0x58a   : > { %v6997_v7 = vpop.f32.mrf.mxu1 }
 0x58b   : > { %v11413_v53 = vpack.c.bf16 %v6244_v21, %v6243_v4  ;;  %v6173_v63 = vadd.f32 %v6996_v1, %v11370_v51 }
 0x58c   : > { %v6998_v37 = vpop.f32.mrf.mxu1 }
 0x58d   : > { %v6999_v34 = vadd.f32 %v6998_v37, %v6997_v7  ;;  %v6245_v22 = vmax.f32 %v6173_v63, 0.0 }
 0x58e   : > { %v7000_v40 = vpop.f32.mrf.mxu1 }
 0x58f   : > { %v6176_v48 = vadd.f32 %v6999_v34, %v11370_v51 }
 0x590   : > { %v7001_v20 = vpop.f32.mrf.mxu1 }
 0x591   : > { %v6246_v19 = vmax.f32 %v6176_v48, 0.0  ;;  %v7002_v13 = vadd.f32 %v7001_v20, %v7000_v40  ;;  %v6301_v40 = vsel %vm3268_vm0, %v11409_v54, 0 }
 0x592   : > { %v7003_v61 = vpop.f32.mrf.mxu1 }
 0x593   : > { %v11417_v35 = vpack.c.bf16 %v6246_v19, %v6245_v22  ;;  %v6181_v50 = vadd.f32 %v7002_v13, %v11370_v51 }
 0x594   : > { %v7004_v11 = vpop.f32.mrf.mxu1 }
 0x595   : > { %v7005_v6 = vadd.f32 %v7004_v11, %v7003_v61  ;;  %v6247_v5 = vmax.f32 %v6181_v50, 0.0  ;;  %v6298_v50 = vsel %vm3268_vm0, %v11398_v60, 0 }
 0x596   : > { %v7006_v32 = vpop.f32.mrf.mxu1 }
 0x597   : > { %v6184_v55 = vadd.f32 %v7005_v6, %v11370_v51 }
 0x598   : > { %v7007_v43 = vpop.f32.mrf.mxu1 }
 0x599   : > { %v6248_v46 = vmax.f32 %v6184_v55, 0.0 }
 0x59a   : > { %v7009_v49 = vpop.f32.mrf.mxu1 }
 0x59b   : > { %v11421_v29 = vpack.c.bf16 %v6248_v46, %v6247_v5  ;;  %v7008_v5 = vadd.f32 %v7007_v43, %v7006_v32  ;;  %v6289_v32 = vsel %vm3268_vm0, %v11386_v38, 0  ;;  %v6280_v38 = vsel %vm3268_vm0, %v11374_v17, 0 }
 0x59c   : > { %v7010_v62 = vpop.f32.mrf.mxu1 }
 0x59d   : > { %v7011_v54 = vadd.f32 %v7010_v62, %v7009_v49  ;;  %v6292_v49 = vsel %vm3268_vm0, %v11390_v18, 0  ;;  %v6283_v18 = vsel %vm3268_vm0, %v11378_v33, 0 }
 0x59e   : > { %v7012_v0 = vpop.f32.mrf.mxu1 }
 0x5a0   : > { %v7013_v25 = vpop.f32.mrf.mxu1 }
 0x5a1   : > { %v7014_v19 = vadd.f32 %v7013_v25, %v7012_v0  ;;  %v6295_v0 = vsel %vm3268_vm0, %v11394_v2, 0  ;;  %v6189_v25 = vadd.f32 %v7008_v5, %v11370_v51 }
 0x5a2   : > { %v7015_v56 = vpop.f32.mrf.mxu1 }
 0x5a3   : > { %v6197_v6 = vadd.f32 %v7014_v19, %v11370_v51 }
 0x5a4   : > { %v7016_v16 = vpop.f32.mrf.mxu1 }
 0x5a5   : > { %v7017_v20 = vadd.f32 %v7016_v16, %v7015_v56  ;;  %v6251_v46 = vmax.f32 %v6197_v6, 0.0  ;;  %v6192_v56 = vadd.f32 %v7011_v54, %v11370_v51 }
 0x5a6   : > { %v7018_v3 = vpop.f32.mrf.mxu1 }
 0x5a7   : > { %v6200_v61 = vadd.f32 %v7017_v20, %v11370_v51  ;;  %v6250_v60 = vmax.f32 %v6192_v56, 0.0 }
 0x5a8   : > { %v7019_v59 = vpop.f32.mrf.mxu1 }
 0x5a9   : > { %v7020_v1 = vadd.f32 %v7019_v59, %v7018_v3  ;;  %v6252_v55 = vmax.f32 %v6200_v61, 0.0  ;;  %v6249_v3 = vmax.f32 %v6189_v25, 0.0 }
 0x5aa   : > { %v7021_v23 = vpop.f32.mrf.mxu1 }
 0x5ab   : > { %v6205_v48 = vadd.f32 %v7020_v1, %v11370_v51  ;;  %v6271_v16 = vpack.c.bf16 %v6252_v55, %v6251_v46  ;;  %v6270_v59 = vpack.c.bf16 %v6250_v60, %v6249_v3 }
 0x5ac   : > { %v7022_v8 = vpop.f32.mrf.mxu1 }
 0x5ad   : > { %v7023_v36 = vadd.f32 %v7022_v8, %v7021_v23  ;;  %v6253_v13 = vmax.f32 %v6205_v48, 0.0 }
 0x5ae   : > { %v7024_v52 = vpop.f32.mrf.mxu1 }
 0x5af   : > { %v6208_v63 = vadd.f32 %v7023_v36, %v11370_v51 }
 0x5b0   : > { %v7025_v31 = vpop.f32.mrf.mxu1 }
 0x5b1   : > { %v7026_v27 = vadd.f32 %v7025_v31, %v7024_v52  ;;  %v6254_v22 = vmax.f32 %v6208_v63, 0.0  ;;  %v12118_v52 = vld [vmem:[#allocation9_spill] sm:$0xff] }
 0x5b2   : > { %v7027_v15 = vpop.f32.mrf.mxu1 }
 0x5b3   : > { %v6213_v26 = vadd.f32 %v7026_v27, %v11370_v51  ;;  %v6272_v11 = vpack.c.bf16 %v6254_v22, %v6253_v13 }
 0x5b4   : > { %v7028_v47 = vpop.f32.mrf.mxu1 }
 0x5b5   : > { %v7029_v14 = vadd.f32 %v7028_v47, %v7027_v15  ;;  %v6255_v7 = vmax.f32 %v6213_v26, 0.0 }
 0x5b6   : > { %v7030_v44 = vpop.f32.mrf.mxu1 }
 0x5b7   : > { %v6216_v41 = vadd.f32 %v7029_v14, %v11370_v51 }
 0x5b8   : > { %v7031_v42 = vpop.f32.mrf.mxu1 }
 0x5b9   : > { %v7032_v39 = vadd.f32 %v7031_v42, %v7030_v44  ;;  %v6256_v9 = vmax.f32 %v6216_v41, 0.0 }
 0x5ba   : > { %v7033_v12 = vpop.f32.mrf.mxu1 }
 0x5bb   : > { %v6221_v57 = vadd.f32 %v7032_v39, %v11370_v51  ;;  %v6273_v34 = vpack.c.bf16 %v6256_v9, %v6255_v7 }
 0x5bc   : > { %v7034_v30 = vpop.f32.mrf.mxu1 }
 0x5bd   : > { %v7035_v10 = vadd.f32 %v7034_v30, %v7033_v12  ;;  %v6257_v4 = vmax.f32 %v6221_v57, 0.0 }
 0x5bf   : > { %v6224_v58 = vadd.f32 %v7035_v10, %v11370_v51  ;;  %v6286_v51 = vsel %vm3268_vm0, %v11382_v28, 0  ;;  %v7815_v28 = vmov 1966171168  }
 0x5c0   : > { %v6386_v43 = vunpack.c.l.s4 %v7815_v28 }
 0x5c1   : > { %v6258_v21 = vmax.f32 %v6224_v58, 0.0 }
 0x5c2   : > { %v6387_v62 = vunpack.c.0.s8 %v6386_v43 }
 0x5c3   : > { %v6274_v37 = vpack.c.bf16 %v6258_v21, %v6257_v4 }
 0x5c4   : > { %v6390_v17 = vsub.s32 %v6387_v62, %v12118_v52 }
 0x5c5   : > { %7134 = vmatprep.subr.msk.bf16.mxu0 %vm3268_vm0, %v6274_v37 }
 0x5c6   : > { %7037 = vmatpush3.bf16.xpose.msra.mxu0 %v6301_v40 }
 0x5c7   : > { %7135 = vmatprep.subr.msk.bf16.mxu0 %vm3268_vm0, %v6273_v34 }
 0x5ce   : > { %7039 = vmatpush3.bf16.xpose.msra.mxu0 %v6298_v50 }
 0x5cf   : > { %7136 = vmatprep.subr.msk.bf16.mxu0 %vm3268_vm0, %v6272_v11 }
 0x5d6   : > { %7041 = vmatpush3.bf16.xpose.msra.mxu0 %v6295_v0 }
 0x5d7   : > { %7137 = vmatprep.subr.msk.bf16.mxu0 %vm3268_vm0, %v6271_v16 }
 0x5d9   : > { %v6372_v2 = vpop.permute.xlu0 %6371 }
 0x5de   : > { %7043 = vmatpush3.bf16.xpose.msra.mxu0 %v6292_v49 }
 0x5df   : > { %7138 = vmatprep.subr.msk.bf16.mxu0 %vm3268_vm0, %v6270_v59 }
 0x5e6   : > { %7045 = vmatpush3.bf16.xpose.msra.mxu0 %v6289_v32 }
 0x5e7   : > { %7139 = vmatprep.subr.msk.bf16.mxu0 %vm3268_vm0, %v11421_v29  ;;  %v6377_v29 = vrot.slane %v6372_v2, %v12117_v45  ;;  %v12119_v45 = vlaneseq }
 0x5e9   : > { %vm6402_vm1 = vcmp.lt.s32.totalorder %v12119_v45, 256 }
 0x5ee   : > { %7047 = vmatpush3.bf16.xpose.msra.mxu0 %v6286_v51 }
 0x5ef   : > { %7140 = vmatprep.subr.msk.bf16.mxu0 %vm3268_vm0, %v11417_v35 }
 0x5f6   : > { %7049 = vmatpush3.bf16.xpose.msra.mxu0 %v6283_v18 }
 0x5f7   : > { %7141 = vmatprep.subr.msk.bf16.mxu0 %vm3268_vm0, %v11413_v53 }
 0x5fe   : > { %7051 = vmatpush3.bf16.xpose.msra.mxu0 %v6280_v38 }
 0x605   : > { %7053 = vmatmul.mubr.msk.bf16.vlgmr.msra.gmra.mxu0 %vm3268_vm0, %v11404_v24 }
 0x6c5   : > { %v6361_v35 = vpop.f32.mrf.mxu0 }
 0x6c6   : > { %v6378_v33 = vadd.f32 %v6377_v29, %v6361_v35 }
 0x6c7   : > { %v6363_v23 = vpop.f32.mrf.mxu0 }
 0x6c8   : > { %v6379_v53 = vadd.f32 %v6377_v29, %v6363_v23  ;;  %v6380_v31 = vmax.f32 %v6378_v33, 0.0 }
 0x6c9   : > { %v6365_v8 = vpop.f32.mrf.mxu0 }
 0x6ca   : > { %v6381_v15 = vmax.f32 %v6379_v53, 0.0 }
 0x6cb   : > { %v6366_v24 = vpop.f32.mrf.mxu0 }
 0x6cc   : > { %v6384_v47 = vcombine.low %v6380_v31, %v6381_v15 }
 0x6ce   : > { %v6391_v44 = vrot.slane %v6384_v47, %v6390_v17 }
 0x6d0   : > { %v6398_v42 = vrot.slane %v6391_v44, %v6390_v17 }
 0x6d2   : > { %6404 = vst.msk [vmem:[%s397_s30] sm:$0x3] %vm6402_vm1, %v6398_v42 }
 0x6d3   : > { %7758 = shalt.err (!%p7755_p0)
}
 0x6d4   : > { %s7759_s10 = scalar_lea.hbm %s6418_s16, 32  ;;  %s7763_s30 = scalar_lea.hbm %s11510_s11, 64 }
 0x6d5   : > { %p7760_p1 = scmp.ne.s32.totalorder %s6418_s16, %s7759_s10  ;;  %p7764_p4 = scmp.lt.s32.totalorder %s6418_s16, %s11510_s11 }
 0x6d6   : > { %p7765_p7 = scmp.lt.s32.totalorder %s7763_s30, %s7759_s10 }
 0x6d7   : > { %p7761_p2 = pnand %p7760_p1, %p7918_p5 }
 0x6d8   : > { %p7766_p6 = por %p7765_p7, %p7764_p4 }
 0x6d9   : > { %p7762_p3 = pneg %p7761_p2 }
 0x6db   : > { %p7767_p8 = pnand %p7766_p6, %p7762_p3 }
 0x6dd   : > { %7770 = shalt.err (!%p7767_p8)
}
 0x6de   : > { %7146 = dma.vmem_to_hbm [thread:$0]  (%p7918_p5), %s6421_s12, 32, %s6418_s16, %s6406_s15  }
 0x6df PF: > { %p7158_p9 = scmp.ge.s32.totalorder %s7809_s22, 2  ;;  %s6432_s25 = sand.u32 1, %s7797_s19  }
 0x6e0   : > { %p12120_p10 = scmp.ne.s32.totalorder %s11644_s29, 0  ;;  %s6433_s17 = scalar_lea.sflag [#allocation5], %s6432_s25 }
 0x6e2   : > { %p7153_p11 = pnand %p7158_p9, %p12120_p10 }
 0x6e4   : > { %p7154_p12 = pneg %p7153_p11 }
 0x6e6   : > { %7792 = dma.done.wait (%p7154_p12), %s6433_s17, 32  }
 0x6e7   : > { %7794 = vsyncadd (%p7154_p12), %s6433_s17, 4294967264  ;;  %p24_p13 = scmp.ge.s32.totalorder %s7905_s24, 4   ;;  %s12121_s19 = smov %s7801_s20 }
 0x6e8   : > { %s12122_s20 = smov %s7805_s21  ;;  %s12123_s21 = smov %s7916_s27 }
 0x6e9   : > { %s12124_s22 = smov %s7905_s24  ;;  %26 = sbr.rel (!%p24_p13) target bundleno = 7 (0x7), region = 104 }
 0x6ee   :  { %6438 = vsyncpa [#allocation4], 1 }
 0x6ef   :  { %6440 = vsyncpa [#allocation4 + $0x1], 1 }
 0x6f0   :  { %6441 = vsyncpa [#allocation5], 1 }
 0x6f1   :  { %6443 = vsyncpa [#allocation5 + $0x1], 1 }

</bundles_post_ra>
